<compile_context>
chip_gen: v7x
topology: tpu7x:2x2x1
jax: 0.10.0
libtpu: 0.0.40
codegen_flags: <defaults>
</compile_context>

<pallas_src>
import jax
import jax.numpy as jnp
from jax import lax
from jax.experimental import pallas as pl
from jax.experimental.pallas import tpu as pltpu

# ------------------------- small ViT-like config ----------------------------
B = 2                  # batch
C = 3                  # input channels
IMG = 32               # image size
PATCH = 4              # patch size
N = (IMG // PATCH) ** 2            # 64 tokens per image
BN = B * N                         # 128 total rows
D = 128                # hidden dim
HEADS = 4
HEAD_DIM = D // HEADS              # 32
MLP = 4 * D                        # 512
DEPTH = 2              # number of transformer blocks
NUM_CLASSES = 10
EPS = 1e-6             # timm ViT LayerNorm eps
K_RAW = C * PATCH * PATCH          # 48
K_PAD = 128            # lane-dense patch feature dim
OUT_PAD = 128          # lane-dense head output width


def _layernorm(x, gamma, beta):
    # x: (M, F) f32 ; gamma/beta: (1, F) f32
    mean = jnp.mean(x, axis=-1, keepdims=True)
    xc = x - mean
    var = jnp.mean(xc * xc, axis=-1, keepdims=True)
    inv = lax.rsqrt(var + EPS)
    return xc * inv * gamma + beta


def _mm(a, b):
    # bf16 MXU inputs, f32 accumulation
    return jnp.dot(a.astype(jnp.bfloat16), b.astype(jnp.bfloat16),
                   preferred_element_type=jnp.float32)


# --------------------------- fused forward kernel ----------------------------
def fused_vit_kernel(patches_ref, patch_w_ref, patch_b_ref,
                     ln1_g_ref, ln1_b_ref, qkv_w_ref, qkv_b_ref,
                     proj_w_ref, proj_b_ref, ln2_g_ref, ln2_b_ref,
                     fc1_w_ref, fc1_b_ref, fc2_w_ref, fc2_b_ref,
                     norm_g_ref, norm_b_ref, head_w_ref, head_b_ref,
                     o_ref, pv_scratch):
    # ---- patch embedding: (N, K_PAD) @ (K_PAD, D) ----
    x = _mm(patches_ref[...], patch_w_ref[...]) + patch_b_ref[...]      # (N, D) f32

    scale = HEAD_DIM ** -0.5

    for d in range(DEPTH):                                   # static unroll (DEPTH=2)
        # -------- attention branch --------
        h = _layernorm(x, ln1_g_ref[d], ln1_b_ref[d])
        qkv_f = _mm(h, qkv_w_ref[d]) + qkv_b_ref[d]          # (N, 3D) f32

        # Single bf16 cast per block; softmax scale folded into q; K transposed once.
        q_all = (qkv_f[:, :D] * scale).astype(jnp.bfloat16)          # (N, D)
        k_t = qkv_f[:, D:2 * D].T.astype(jnp.bfloat16)               # (D, N)
        v_all = qkv_f[:, 2 * D:].astype(jnp.bfloat16)                # (N, D)

        for hi in range(HEADS):                              # static unroll (HEADS=4)
            lo = hi * HEAD_DIM
            s = _mm(q_all[:, lo:lo + HEAD_DIM], k_t[lo:lo + HEAD_DIM, :])   # (N, N) f32
            s = s - jnp.max(s, axis=-1, keepdims=True)
            p = jnp.exp(s)
            p = p * pl.reciprocal(jnp.sum(p, axis=-1, keepdims=True), approx=True)
            pv = _mm(p, v_all[:, lo:lo + HEAD_DIM])                         # (N, HEAD_DIM) f32
            # scatter this head's output at its lane offset (bf16 scratch)
            pv_scratch[:, lo:lo + HEAD_DIM] = pv.astype(jnp.bfloat16)

        # single K=128 projection matmul after the head loop
        attn = _mm(pv_scratch[...], proj_w_ref[d])           # (N, D) f32
        x = x + attn + proj_b_ref[d]

        # -------- MLP branch --------
        h2 = _layernorm(x, ln2_g_ref[d], ln2_b_ref[d])
        m = _mm(h2, fc1_w_ref[d]) + fc1_b_ref[d]
        # tanh GELU (EUP); ~1e-3 deviation from nn.GELU's exact erf.
        m = jax.nn.gelu(m, approximate=True)
        m = _mm(m, fc2_w_ref[d]) + fc2_b_ref[d]
        x = x + m

    # ---- final LayerNorm + per-token head (padded to 128 lanes) ----
    h = _layernorm(x, norm_g_ref[...], norm_b_ref[...])
    logits = _mm(h, head_w_ref[...]) + head_b_ref[...]       # (N, OUT_PAD)
    o_ref[...] = logits.astype(o_ref.dtype)


# ------------------------------ wrapper ---------------------------------------
def _weight_spec(shape):
    # whole-array block, same block index every grid step (stays VMEM-resident)
    zeros = (0,) * len(shape)
    return pl.BlockSpec(shape, lambda i, _z=zeros: _z)


@jax.jit
def split_model_forward(x_nchw, params):
    # patch_embed: stride==kernel conv rewritten as patchify (glue) + fused matmul
    Hp = IMG // PATCH
    patches = x_nchw.reshape(B, C, Hp, PATCH, Hp, PATCH)
    patches = patches.transpose(0, 2, 4, 1, 3, 5).reshape(BN, K_RAW)
    patches = jnp.pad(patches, ((0, 0), (0, K_PAD - K_RAW)))            # K 48 -> 128

    patch_w = jnp.pad(params["patch_w"],
                      ((0, K_PAD - K_RAW), (0, 0))).astype(jnp.bfloat16)
    head_w = jnp.pad(params["head_w"],
                     ((0, 0), (0, OUT_PAD - NUM_CLASSES))).astype(jnp.bfloat16)
    head_b = jnp.pad(params["head_b"], ((0, 0), (0, OUT_PAD - NUM_CLASSES)))

    blocks = params["blocks"]

    def stack(name, dtype=None):
        a = jnp.stack([blk[name] for blk in blocks], axis=0)
        return a.astype(dtype) if dtype is not None else a

    args = (
        patches, patch_w, params["patch_b"],
        stack("ln1_g"), stack("ln1_b"),
        stack("qkv_w", jnp.bfloat16), stack("qkv_b"),
        stack("proj_w", jnp.bfloat16), stack("proj_b"),
        stack("ln2_g"), stack("ln2_b"),
        stack("fc1_w", jnp.bfloat16), stack("fc1_b"),
        stack("fc2_w", jnp.bfloat16), stack("fc2_b"),
        params["norm_g"], params["norm_b"], head_w, head_b,
    )

    in_specs = [pl.BlockSpec((N, K_PAD), lambda i: (i, 0))]       # patches: per-batch row block
    in_specs += [_weight_spec(a.shape) for a in args[1:]]         # weights: resident

    logits_pad = pl.pallas_call(
        fused_vit_kernel,
        out_shape=jax.ShapeDtypeStruct((BN, OUT_PAD), jnp.float32),
        grid_spec=pltpu.PrefetchScalarGridSpec(
            num_scalar_prefetch=0,
            grid=(B,),
            in_specs=in_specs,
            out_specs=pl.BlockSpec((N, OUT_PAD), lambda i: (i, 0)),
            scratch_shapes=[pltpu.VMEM((N, D), jnp.bfloat16)]),   # per-head pv scatter buffer
        compiler_params=pltpu.CompilerParams(
            dimension_semantics=("parallel",)),
    )(*args)

    # pos_drop / patch_drop / norm_pre / fc_norm / head_drop: Identity at inference
    return logits_pad.reshape(B, N, OUT_PAD)[:, :, :NUM_CLASSES]


# --------------------------- deterministic init ------------------------------
def init_params(key):
    def nrm(k, shape, scale=0.02):
        return scale * jax.random.normal(k, shape, dtype=jnp.float32)

    keys = iter(jax.random.split(key, 64))
    params = {
        "patch_w": nrm(next(keys), (K_RAW, D)),
        "patch_b": jnp.zeros((1, D), jnp.float32),
        "norm_g": jnp.ones((1, D), jnp.float32),
        "norm_b": jnp.zeros((1, D), jnp.float32),
        "head_w": nrm(next(keys), (D, NUM_CLASSES)),
        "head_b": jnp.zeros((1, NUM_CLASSES), jnp.float32),
        "blocks": [],
    }
    for _ in range(DEPTH):
        params["blocks"].append({
            "ln1_g": jnp.ones((1, D), jnp.float32),
            "ln1_b": jnp.zeros((1, D), jnp.float32),
            "qkv_w": nrm(next(keys), (D, 3 * D)),
            "qkv_b": jnp.zeros((1, 3 * D), jnp.float32),
            "proj_w": nrm(next(keys), (D, D)),
            "proj_b": jnp.zeros((1, D), jnp.float32),
            "ln2_g": jnp.ones((1, D), jnp.float32),
            "ln2_b": jnp.zeros((1, D), jnp.float32),
            "fc1_w": nrm(next(keys), (D, MLP)),
            "fc1_b": jnp.zeros((1, MLP), jnp.float32),
            "fc2_w": nrm(next(keys), (MLP, D)),
            "fc2_b": jnp.zeros((1, D), jnp.float32),
        })
    return params


if __name__ == "__main__":
    key = jax.random.PRNGKey(0)
    k_x, k_p = jax.random.split(key)
    x = jax.random.normal(k_x, (B, C, IMG, IMG), dtype=jnp.float32)  # NCHW like PyTorch
    params = init_params(k_p)

    out = split_model_forward(x, params)
    out = jax.block_until_ready(out)
    assert out.shape == (B, N, NUM_CLASSES), out.shape
    assert jnp.all(jnp.isfinite(out))
    print("KERNEL_OK")
</pallas_src>

<mosaic_0001>
module attributes {stable_mosaic.version = 11 : i64} {
  func.func @fused_vit_kernel(%arg0: i32, %arg1: memref<64x128xf32, #tpu.memory_space<vmem>>, %arg2: memref<128x128xbf16, #tpu.memory_space<vmem>>, %arg3: memref<1x128xf32, #tpu.memory_space<vmem>>, %arg4: memref<2x1x128xf32, #tpu.memory_space<vmem>>, %arg5: memref<2x1x128xf32, #tpu.memory_space<vmem>>, %arg6: memref<2x128x384xbf16, #tpu.memory_space<vmem>>, %arg7: memref<2x1x384xf32, #tpu.memory_space<vmem>>, %arg8: memref<2x128x128xbf16, #tpu.memory_space<vmem>>, %arg9: memref<2x1x128xf32, #tpu.memory_space<vmem>>, %arg10: memref<2x1x128xf32, #tpu.memory_space<vmem>>, %arg11: memref<2x1x128xf32, #tpu.memory_space<vmem>>, %arg12: memref<2x128x512xbf16, #tpu.memory_space<vmem>>, %arg13: memref<2x1x512xf32, #tpu.memory_space<vmem>>, %arg14: memref<2x512x128xbf16, #tpu.memory_space<vmem>>, %arg15: memref<2x1x128xf32, #tpu.memory_space<vmem>>, %arg16: memref<1x128xf32, #tpu.memory_space<vmem>>, %arg17: memref<1x128xf32, #tpu.memory_space<vmem>>, %arg18: memref<128x128xbf16, #tpu.memory_space<vmem>>, %arg19: memref<1x128xf32, #tpu.memory_space<vmem>>, %arg20: memref<64x128xf32, #tpu.memory_space<vmem>>, %arg21: memref<64x128xbf16, #tpu.memory_space<vmem>>) attributes {dimension_semantics = [#tpu.dimension_semantics<parallel>], iteration_bounds = array<i64: 2>, scalar_prefetch = 0 : i64, scratch_operands = 1 : i64, tpu.core_type = #tpu.core_type<tc>, window_params = [{transform_indices = @transform_0, window_bounds = array<i64: 64, 128>}, {pipeline_mode = #tpu.pipeline_mode<synchronous>, transform_indices = @transform_1, window_bounds = array<i64: 128, 128>}, {pipeline_mode = #tpu.pipeline_mode<synchronous>, transform_indices = @transform_2, window_bounds = array<i64: 1, 128>}, {pipeline_mode = #tpu.pipeline_mode<synchronous>, transform_indices = @transform_3, window_bounds = array<i64: 2, 1, 128>}, {pipeline_mode = #tpu.pipeline_mode<synchronous>, transform_indices = @transform_4, window_bounds = array<i64: 2, 1, 128>}, {pipeline_mode = #tpu.pipeline_mode<synchronous>, transform_indices = @transform_5, window_bounds = array<i64: 2, 128, 384>}, {pipeline_mode = #tpu.pipeline_mode<synchronous>, transform_indices = @transform_6, window_bounds = array<i64: 2, 1, 384>}, {pipeline_mode = #tpu.pipeline_mode<synchronous>, transform_indices = @transform_7, window_bounds = array<i64: 2, 128, 128>}, {pipeline_mode = #tpu.pipeline_mode<synchronous>, transform_indices = @transform_8, window_bounds = array<i64: 2, 1, 128>}, {pipeline_mode = #tpu.pipeline_mode<synchronous>, transform_indices = @transform_9, window_bounds = array<i64: 2, 1, 128>}, {pipeline_mode = #tpu.pipeline_mode<synchronous>, transform_indices = @transform_10, window_bounds = array<i64: 2, 1, 128>}, {pipeline_mode = #tpu.pipeline_mode<synchronous>, transform_indices = @transform_11, window_bounds = array<i64: 2, 128, 512>}, {pipeline_mode = #tpu.pipeline_mode<synchronous>, transform_indices = @transform_12, window_bounds = array<i64: 2, 1, 512>}, {pipeline_mode = #tpu.pipeline_mode<synchronous>, transform_indices = @transform_13, window_bounds = array<i64: 2, 512, 128>}, {pipeline_mode = #tpu.pipeline_mode<synchronous>, transform_indices = @transform_14, window_bounds = array<i64: 2, 1, 128>}, {pipeline_mode = #tpu.pipeline_mode<synchronous>, transform_indices = @transform_15, window_bounds = array<i64: 1, 128>}, {pipeline_mode = #tpu.pipeline_mode<synchronous>, transform_indices = @transform_16, window_bounds = array<i64: 1, 128>}, {pipeline_mode = #tpu.pipeline_mode<synchronous>, transform_indices = @transform_17, window_bounds = array<i64: 128, 128>}, {pipeline_mode = #tpu.pipeline_mode<synchronous>, transform_indices = @transform_18, window_bounds = array<i64: 1, 128>}, {transform_indices = @transform_19, window_bounds = array<i64: 64, 128>}]} {
    %c0 = arith.constant 0 : index
    %c0_0 = arith.constant 0 : index
    %0 = vector.load %arg1[%c0, %c0_0] : memref<64x128xf32, #tpu.memory_space<vmem>>, vector<64x128xf32>
    %c0_1 = arith.constant 0 : index
    %c0_2 = arith.constant 0 : index
    %1 = vector.load %arg2[%c0_1, %c0_2] : memref<128x128xbf16, #tpu.memory_space<vmem>>, vector<128x128xbf16>
    %2 = arith.truncf %0 : vector<64x128xf32> to vector<64x128xbf16>
    %cst = arith.constant dense<0.000000e+00> : vector<64x128xf32>
    %3 = tpu.matmul %2, %1, %cst {dimension_numbers = #tpu.dot_dimension_numbers<[1], [0], [0], [1], [0, 0, 1, 1], [], []>} : vector<64x128xbf16>, vector<128x128xbf16>, vector<64x128xf32> -> vector<64x128xf32>
    %c0_3 = arith.constant 0 : index
    %c0_4 = arith.constant 0 : index
    %4 = vector.load %arg3[%c0_3, %c0_4] : memref<1x128xf32, #tpu.memory_space<vmem>>, vector<1x128xf32>
    %5 = vector.broadcast %4 : vector<1x128xf32> to vector<64x128xf32>
    %6 = arith.addf %3, %5 : vector<64x128xf32>
    %c0_5 = arith.constant 0 : index
    %c0_6 = arith.constant 0 : index
    %c0_7 = arith.constant 0 : index
    %7 = vector.load %arg4[%c0_5, %c0_6, %c0_7] : memref<2x1x128xf32, #tpu.memory_space<vmem>>, vector<1x1x128xf32>
    %8 = vector.shape_cast %7 : vector<1x1x128xf32> to vector<1x128xf32>
    %c0_8 = arith.constant 0 : index
    %c0_9 = arith.constant 0 : index
    %c0_10 = arith.constant 0 : index
    %9 = vector.load %arg5[%c0_8, %c0_9, %c0_10] : memref<2x1x128xf32, #tpu.memory_space<vmem>>, vector<1x1x128xf32>
    %10 = vector.shape_cast %9 : vector<1x1x128xf32> to vector<1x128xf32>
    %cst_11 = arith.constant dense<0.000000e+00> : vector<64xf32>
    %11 = vector.multi_reduction <add>, %6, %cst_11 [1] : vector<64x128xf32> to vector<64xf32>
    %12 = vector.shape_cast %11 : vector<64xf32> to vector<64x1xf32>
    %cst_12 = arith.constant 1.280000e+02 : f32
    %13 = vector.broadcast %cst_12 : f32 to vector<64x1xf32>
    %14 = arith.divf %12, %13 : vector<64x1xf32>
    %15 = vector.broadcast %14 : vector<64x1xf32> to vector<64x128xf32>
    %16 = arith.subf %6, %15 : vector<64x128xf32>
    %17 = arith.mulf %16, %16 : vector<64x128xf32>
    %cst_13 = arith.constant dense<0.000000e+00> : vector<64xf32>
    %18 = vector.multi_reduction <add>, %17, %cst_13 [1] : vector<64x128xf32> to vector<64xf32>
    %19 = vector.shape_cast %18 : vector<64xf32> to vector<64x1xf32>
    %cst_14 = arith.constant 1.280000e+02 : f32
    %20 = vector.broadcast %cst_14 : f32 to vector<64x1xf32>
    %21 = arith.divf %19, %20 : vector<64x1xf32>
    %cst_15 = arith.constant 9.99999997E-7 : f32
    %22 = vector.broadcast %cst_15 : f32 to vector<64x1xf32>
    %23 = arith.addf %21, %22 : vector<64x1xf32>
    %24 = math.rsqrt %23 : vector<64x1xf32>
    %25 = vector.broadcast %24 : vector<64x1xf32> to vector<64x128xf32>
    %26 = arith.mulf %16, %25 : vector<64x128xf32>
    %27 = vector.broadcast %8 : vector<1x128xf32> to vector<64x128xf32>
    %28 = arith.mulf %26, %27 : vector<64x128xf32>
    %29 = vector.broadcast %10 : vector<1x128xf32> to vector<64x128xf32>
    %30 = arith.addf %28, %29 : vector<64x128xf32>
    %c0_16 = arith.constant 0 : index
    %c0_17 = arith.constant 0 : index
    %c0_18 = arith.constant 0 : index
    %31 = vector.load %arg6[%c0_16, %c0_17, %c0_18] : memref<2x128x384xbf16, #tpu.memory_space<vmem>>, vector<1x128x384xbf16>
    %32 = vector.shape_cast %31 : vector<1x128x384xbf16> to vector<128x384xbf16>
    %33 = arith.truncf %30 : vector<64x128xf32> to vector<64x128xbf16>
    %cst_19 = arith.constant dense<0.000000e+00> : vector<64x384xf32>
    %34 = tpu.matmul %33, %32, %cst_19 {dimension_numbers = #tpu.dot_dimension_numbers<[1], [0], [0], [1], [0, 0, 1, 1], [], []>} : vector<64x128xbf16>, vector<128x384xbf16>, vector<64x384xf32> -> vector<64x384xf32>
    %c0_20 = arith.constant 0 : index
    %c0_21 = arith.constant 0 : index
    %c0_22 = arith.constant 0 : index
    %35 = vector.load %arg7[%c0_20, %c0_21, %c0_22] : memref<2x1x384xf32, #tpu.memory_space<vmem>>, vector<1x1x384xf32>
    %36 = vector.shape_cast %35 : vector<1x1x384xf32> to vector<1x384xf32>
    %37 = vector.broadcast %36 : vector<1x384xf32> to vector<64x384xf32>
    %38 = arith.addf %34, %37 : vector<64x384xf32>
    %39 = vector.extract_strided_slice %38 {offsets = [0, 0], sizes = [64, 128], strides = [1, 1]} : vector<64x384xf32> to vector<64x128xf32>
    %cst_23 = arith.constant 0.176776692 : f32
    %40 = vector.broadcast %cst_23 : f32 to vector<64x128xf32>
    %41 = arith.mulf %39, %40 : vector<64x128xf32>
    %42 = arith.truncf %41 : vector<64x128xf32> to vector<64x128xbf16>
    %43 = vector.extract_strided_slice %38 {offsets = [0, 128], sizes = [64, 128], strides = [1, 1]} : vector<64x384xf32> to vector<64x128xf32>
    %44 = tpu.transpose %43, [1, 0] : vector<64x128xf32> -> vector<128x64xf32>
    %45 = arith.truncf %44 : vector<128x64xf32> to vector<128x64xbf16>
    %46 = vector.extract_strided_slice %38 {offsets = [0, 256], sizes = [64, 128], strides = [1, 1]} : vector<64x384xf32> to vector<64x128xf32>
    %47 = arith.truncf %46 : vector<64x128xf32> to vector<64x128xbf16>
    %48 = vector.extract_strided_slice %42 {offsets = [0, 0], sizes = [64, 32], strides = [1, 1]} : vector<64x128xbf16> to vector<64x32xbf16>
    %49 = vector.extract_strided_slice %45 {offsets = [0, 0], sizes = [32, 64], strides = [1, 1]} : vector<128x64xbf16> to vector<32x64xbf16>
    %cst_24 = arith.constant dense<0.000000e+00> : vector<64x64xf32>
    %50 = tpu.matmul %48, %49, %cst_24 {dimension_numbers = #tpu.dot_dimension_numbers<[1], [0], [0], [1], [0, 0, 1, 1], [], []>} : vector<64x32xbf16>, vector<32x64xbf16>, vector<64x64xf32> -> vector<64x64xf32>
    %cst_25 = arith.constant dense<0xFF800000> : vector<64xf32>
    %51 = vector.multi_reduction <maximumf>, %50, %cst_25 [1] : vector<64x64xf32> to vector<64xf32>
    %52 = vector.shape_cast %51 : vector<64xf32> to vector<64x1xf32>
    %53 = vector.broadcast %52 : vector<64x1xf32> to vector<64x64xf32>
    %54 = arith.subf %50, %53 : vector<64x64xf32>
    %55 = math.exp %54 : vector<64x64xf32>
    %cst_26 = arith.constant dense<0.000000e+00> : vector<64xf32>
    %56 = vector.multi_reduction <add>, %55, %cst_26 [1] : vector<64x64xf32> to vector<64xf32>
    %57 = vector.shape_cast %56 : vector<64xf32> to vector<64x1xf32>
    %58 = tpu.reciprocal %57 {approx = true} : vector<64x1xf32> -> vector<64x1xf32>
    %59 = vector.broadcast %58 : vector<64x1xf32> to vector<64x64xf32>
    %60 = arith.mulf %55, %59 : vector<64x64xf32>
    %61 = vector.extract_strided_slice %47 {offsets = [0, 0], sizes = [64, 32], strides = [1, 1]} : vector<64x128xbf16> to vector<64x32xbf16>
    %62 = arith.truncf %60 : vector<64x64xf32> to vector<64x64xbf16>
    %cst_27 = arith.constant dense<0.000000e+00> : vector<64x32xf32>
    %63 = tpu.matmul %62, %61, %cst_27 {dimension_numbers = #tpu.dot_dimension_numbers<[1], [0], [0], [1], [0, 0, 1, 1], [], []>} : vector<64x64xbf16>, vector<64x32xbf16>, vector<64x32xf32> -> vector<64x32xf32>
    %64 = arith.truncf %63 : vector<64x32xf32> to vector<64x32xbf16>
    %c0_28 = arith.constant 0 : index
    %c0_29 = arith.constant 0 : index
    %65 = vector.load %arg21[%c0_28, %c0_29] : memref<64x128xbf16, #tpu.memory_space<vmem>>, vector<64x32xbf16>
    tpu.vector_store %arg21[%c0_28, %c0_29], %64 {strides = array<i32>} : memref<64x128xbf16, #tpu.memory_space<vmem>>, vector<64x32xbf16>,
    %66 = vector.extract_strided_slice %42 {offsets = [0, 32], sizes = [64, 32], strides = [1, 1]} : vector<64x128xbf16> to vector<64x32xbf16>
    %67 = vector.extract_strided_slice %45 {offsets = [32, 0], sizes = [32, 64], strides = [1, 1]} : vector<128x64xbf16> to vector<32x64xbf16>
    %cst_30 = arith.constant dense<0.000000e+00> : vector<64x64xf32>
    %68 = tpu.matmul %66, %67, %cst_30 {dimension_numbers = #tpu.dot_dimension_numbers<[1], [0], [0], [1], [0, 0, 1, 1], [], []>} : vector<64x32xbf16>, vector<32x64xbf16>, vector<64x64xf32> -> vector<64x64xf32>
    %cst_31 = arith.constant dense<0xFF800000> : vector<64xf32>
    %69 = vector.multi_reduction <maximumf>, %68, %cst_31 [1] : vector<64x64xf32> to vector<64xf32>
    %70 = vector.shape_cast %69 : vector<64xf32> to vector<64x1xf32>
    %71 = vector.broadcast %70 : vector<64x1xf32> to vector<64x64xf32>
    %72 = arith.subf %68, %71 : vector<64x64xf32>
    %73 = math.exp %72 : vector<64x64xf32>
    %cst_32 = arith.constant dense<0.000000e+00> : vector<64xf32>
    %74 = vector.multi_reduction <add>, %73, %cst_32 [1] : vector<64x64xf32> to vector<64xf32>
    %75 = vector.shape_cast %74 : vector<64xf32> to vector<64x1xf32>
    %76 = tpu.reciprocal %75 {approx = true} : vector<64x1xf32> -> vector<64x1xf32>
    %77 = vector.broadcast %76 : vector<64x1xf32> to vector<64x64xf32>
    %78 = arith.mulf %73, %77 : vector<64x64xf32>
    %79 = vector.extract_strided_slice %47 {offsets = [0, 32], sizes = [64, 32], strides = [1, 1]} : vector<64x128xbf16> to vector<64x32xbf16>
    %80 = arith.truncf %78 : vector<64x64xf32> to vector<64x64xbf16>
    %cst_33 = arith.constant dense<0.000000e+00> : vector<64x32xf32>
    %81 = tpu.matmul %80, %79, %cst_33 {dimension_numbers = #tpu.dot_dimension_numbers<[1], [0], [0], [1], [0, 0, 1, 1], [], []>} : vector<64x64xbf16>, vector<64x32xbf16>, vector<64x32xf32> -> vector<64x32xf32>
    %82 = arith.truncf %81 : vector<64x32xf32> to vector<64x32xbf16>
    %c0_34 = arith.constant 0 : index
    %c32 = arith.constant 32 : index
    %83 = vector.load %arg21[%c0_34, %c32] : memref<64x128xbf16, #tpu.memory_space<vmem>>, vector<64x32xbf16>
    tpu.vector_store %arg21[%c0_34, %c32], %82 {strides = array<i32>} : memref<64x128xbf16, #tpu.memory_space<vmem>>, vector<64x32xbf16>,
    %84 = vector.extract_strided_slice %42 {offsets = [0, 64], sizes = [64, 32], strides = [1, 1]} : vector<64x128xbf16> to vector<64x32xbf16>
    %85 = vector.extract_strided_slice %45 {offsets = [64, 0], sizes = [32, 64], strides = [1, 1]} : vector<128x64xbf16> to vector<32x64xbf16>
    %cst_35 = arith.constant dense<0.000000e+00> : vector<64x64xf32>
    %86 = tpu.matmul %84, %85, %cst_35 {dimension_numbers = #tpu.dot_dimension_numbers<[1], [0], [0], [1], [0, 0, 1, 1], [], []>} : vector<64x32xbf16>, vector<32x64xbf16>, vector<64x64xf32> -> vector<64x64xf32>
    %cst_36 = arith.constant dense<0xFF800000> : vector<64xf32>
    %87 = vector.multi_reduction <maximumf>, %86, %cst_36 [1] : vector<64x64xf32> to vector<64xf32>
    %88 = vector.shape_cast %87 : vector<64xf32> to vector<64x1xf32>
    %89 = vector.broadcast %88 : vector<64x1xf32> to vector<64x64xf32>
    %90 = arith.subf %86, %89 : vector<64x64xf32>
    %91 = math.exp %90 : vector<64x64xf32>
    %cst_37 = arith.constant dense<0.000000e+00> : vector<64xf32>
    %92 = vector.multi_reduction <add>, %91, %cst_37 [1] : vector<64x64xf32> to vector<64xf32>
    %93 = vector.shape_cast %92 : vector<64xf32> to vector<64x1xf32>
    %94 = tpu.reciprocal %93 {approx = true} : vector<64x1xf32> -> vector<64x1xf32>
    %95 = vector.broadcast %94 : vector<64x1xf32> to vector<64x64xf32>
    %96 = arith.mulf %91, %95 : vector<64x64xf32>
    %97 = vector.extract_strided_slice %47 {offsets = [0, 64], sizes = [64, 32], strides = [1, 1]} : vector<64x128xbf16> to vector<64x32xbf16>
    %98 = arith.truncf %96 : vector<64x64xf32> to vector<64x64xbf16>
    %cst_38 = arith.constant dense<0.000000e+00> : vector<64x32xf32>
    %99 = tpu.matmul %98, %97, %cst_38 {dimension_numbers = #tpu.dot_dimension_numbers<[1], [0], [0], [1], [0, 0, 1, 1], [], []>} : vector<64x64xbf16>, vector<64x32xbf16>, vector<64x32xf32> -> vector<64x32xf32>
    %100 = arith.truncf %99 : vector<64x32xf32> to vector<64x32xbf16>
    %c0_39 = arith.constant 0 : index
    %c64 = arith.constant 64 : index
    %101 = vector.load %arg21[%c0_39, %c64] : memref<64x128xbf16, #tpu.memory_space<vmem>>, vector<64x32xbf16>
    tpu.vector_store %arg21[%c0_39, %c64], %100 {strides = array<i32>} : memref<64x128xbf16, #tpu.memory_space<vmem>>, vector<64x32xbf16>,
    %102 = vector.extract_strided_slice %42 {offsets = [0, 96], sizes = [64, 32], strides = [1, 1]} : vector<64x128xbf16> to vector<64x32xbf16>
    %103 = vector.extract_strided_slice %45 {offsets = [96, 0], sizes = [32, 64], strides = [1, 1]} : vector<128x64xbf16> to vector<32x64xbf16>
    %cst_40 = arith.constant dense<0.000000e+00> : vector<64x64xf32>
    %104 = tpu.matmul %102, %103, %cst_40 {dimension_numbers = #tpu.dot_dimension_numbers<[1], [0], [0], [1], [0, 0, 1, 1], [], []>} : vector<64x32xbf16>, vector<32x64xbf16>, vector<64x64xf32> -> vector<64x64xf32>
    %cst_41 = arith.constant dense<0xFF800000> : vector<64xf32>
    %105 = vector.multi_reduction <maximumf>, %104, %cst_41 [1] : vector<64x64xf32> to vector<64xf32>
    %106 = vector.shape_cast %105 : vector<64xf32> to vector<64x1xf32>
    %107 = vector.broadcast %106 : vector<64x1xf32> to vector<64x64xf32>
    %108 = arith.subf %104, %107 : vector<64x64xf32>
    %109 = math.exp %108 : vector<64x64xf32>
    %cst_42 = arith.constant dense<0.000000e+00> : vector<64xf32>
    %110 = vector.multi_reduction <add>, %109, %cst_42 [1] : vector<64x64xf32> to vector<64xf32>
    %111 = vector.shape_cast %110 : vector<64xf32> to vector<64x1xf32>
    %112 = tpu.reciprocal %111 {approx = true} : vector<64x1xf32> -> vector<64x1xf32>
    %113 = vector.broadcast %112 : vector<64x1xf32> to vector<64x64xf32>
    %114 = arith.mulf %109, %113 : vector<64x64xf32>
    %115 = vector.extract_strided_slice %47 {offsets = [0, 96], sizes = [64, 32], strides = [1, 1]} : vector<64x128xbf16> to vector<64x32xbf16>
    %116 = arith.truncf %114 : vector<64x64xf32> to vector<64x64xbf16>
    %cst_43 = arith.constant dense<0.000000e+00> : vector<64x32xf32>
    %117 = tpu.matmul %116, %115, %cst_43 {dimension_numbers = #tpu.dot_dimension_numbers<[1], [0], [0], [1], [0, 0, 1, 1], [], []>} : vector<64x64xbf16>, vector<64x32xbf16>, vector<64x32xf32> -> vector<64x32xf32>
    %118 = arith.truncf %117 : vector<64x32xf32> to vector<64x32xbf16>
    %c0_44 = arith.constant 0 : index
    %c96 = arith.constant 96 : index
    %119 = vector.load %arg21[%c0_44, %c96] : memref<64x128xbf16, #tpu.memory_space<vmem>>, vector<64x32xbf16>
    tpu.vector_store %arg21[%c0_44, %c96], %118 {strides = array<i32>} : memref<64x128xbf16, #tpu.memory_space<vmem>>, vector<64x32xbf16>,
    %c0_45 = arith.constant 0 : index
    %c0_46 = arith.constant 0 : index
    %120 = vector.load %arg21[%c0_45, %c0_46] : memref<64x128xbf16, #tpu.memory_space<vmem>>, vector<64x128xbf16>
    %c0_47 = arith.constant 0 : index
    %c0_48 = arith.constant 0 : index
    %c0_49 = arith.constant 0 : index
    %121 = vector.load %arg8[%c0_47, %c0_48, %c0_49] : memref<2x128x128xbf16, #tpu.memory_space<vmem>>, vector<1x128x128xbf16>
    %122 = vector.shape_cast %121 : vector<1x128x128xbf16> to vector<128x128xbf16>
    %cst_50 = arith.constant dense<0.000000e+00> : vector<64x128xf32>
    %123 = tpu.matmul %120, %122, %cst_50 {dimension_numbers = #tpu.dot_dimension_numbers<[1], [0], [0], [1], [0, 0, 1, 1], [], []>} : vector<64x128xbf16>, vector<128x128xbf16>, vector<64x128xf32> -> vector<64x128xf32>
    %124 = arith.addf %6, %123 : vector<64x128xf32>
    %c0_51 = arith.constant 0 : index
    %c0_52 = arith.constant 0 : index
    %c0_53 = arith.constant 0 : index
    %125 = vector.load %arg9[%c0_51, %c0_52, %c0_53] : memref<2x1x128xf32, #tpu.memory_space<vmem>>, vector<1x1x128xf32>
    %126 = vector.shape_cast %125 : vector<1x1x128xf32> to vector<1x128xf32>
    %127 = vector.broadcast %126 : vector<1x128xf32> to vector<64x128xf32>
    %128 = arith.addf %124, %127 : vector<64x128xf32>
    %c0_54 = arith.constant 0 : index
    %c0_55 = arith.constant 0 : index
    %c0_56 = arith.constant 0 : index
    %129 = vector.load %arg10[%c0_54, %c0_55, %c0_56] : memref<2x1x128xf32, #tpu.memory_space<vmem>>, vector<1x1x128xf32>
    %130 = vector.shape_cast %129 : vector<1x1x128xf32> to vector<1x128xf32>
    %c0_57 = arith.constant 0 : index
    %c0_58 = arith.constant 0 : index
    %c0_59 = arith.constant 0 : index
    %131 = vector.load %arg11[%c0_57, %c0_58, %c0_59] : memref<2x1x128xf32, #tpu.memory_space<vmem>>, vector<1x1x128xf32>
    %132 = vector.shape_cast %131 : vector<1x1x128xf32> to vector<1x128xf32>
    %cst_60 = arith.constant dense<0.000000e+00> : vector<64xf32>
    %133 = vector.multi_reduction <add>, %128, %cst_60 [1] : vector<64x128xf32> to vector<64xf32>
    %134 = vector.shape_cast %133 : vector<64xf32> to vector<64x1xf32>
    %cst_61 = arith.constant 1.280000e+02 : f32
    %135 = vector.broadcast %cst_61 : f32 to vector<64x1xf32>
    %136 = arith.divf %134, %135 : vector<64x1xf32>
    %137 = vector.broadcast %136 : vector<64x1xf32> to vector<64x128xf32>
    %138 = arith.subf %128, %137 : vector<64x128xf32>
    %139 = arith.mulf %138, %138 : vector<64x128xf32>
    %cst_62 = arith.constant dense<0.000000e+00> : vector<64xf32>
    %140 = vector.multi_reduction <add>, %139, %cst_62 [1] : vector<64x128xf32> to vector<64xf32>
    %141 = vector.shape_cast %140 : vector<64xf32> to vector<64x1xf32>
    %cst_63 = arith.constant 1.280000e+02 : f32
    %142 = vector.broadcast %cst_63 : f32 to vector<64x1xf32>
    %143 = arith.divf %141, %142 : vector<64x1xf32>
    %cst_64 = arith.constant 9.99999997E-7 : f32
    %144 = vector.broadcast %cst_64 : f32 to vector<64x1xf32>
    %145 = arith.addf %143, %144 : vector<64x1xf32>
    %146 = math.rsqrt %145 : vector<64x1xf32>
    %147 = vector.broadcast %146 : vector<64x1xf32> to vector<64x128xf32>
    %148 = arith.mulf %138, %147 : vector<64x128xf32>
    %149 = vector.broadcast %130 : vector<1x128xf32> to vector<64x128xf32>
    %150 = arith.mulf %148, %149 : vector<64x128xf32>
    %151 = vector.broadcast %132 : vector<1x128xf32> to vector<64x128xf32>
    %152 = arith.addf %150, %151 : vector<64x128xf32>
    %c0_65 = arith.constant 0 : index
    %c0_66 = arith.constant 0 : index
    %c0_67 = arith.constant 0 : index
    %153 = vector.load %arg12[%c0_65, %c0_66, %c0_67] : memref<2x128x512xbf16, #tpu.memory_space<vmem>>, vector<1x128x512xbf16>
    %154 = vector.shape_cast %153 : vector<1x128x512xbf16> to vector<128x512xbf16>
    %155 = arith.truncf %152 : vector<64x128xf32> to vector<64x128xbf16>
    %cst_68 = arith.constant dense<0.000000e+00> : vector<64x512xf32>
    %156 = tpu.matmul %155, %154, %cst_68 {dimension_numbers = #tpu.dot_dimension_numbers<[1], [0], [0], [1], [0, 0, 1, 1], [], []>} : vector<64x128xbf16>, vector<128x512xbf16>, vector<64x512xf32> -> vector<64x512xf32>
    %c0_69 = arith.constant 0 : index
    %c0_70 = arith.constant 0 : index
    %c0_71 = arith.constant 0 : index
    %157 = vector.load %arg13[%c0_69, %c0_70, %c0_71] : memref<2x1x512xf32, #tpu.memory_space<vmem>>, vector<1x1x512xf32>
    %158 = vector.shape_cast %157 : vector<1x1x512xf32> to vector<1x512xf32>
    %159 = vector.broadcast %158 : vector<1x512xf32> to vector<64x512xf32>
    %160 = arith.addf %156, %159 : vector<64x512xf32>
    %161 = arith.mulf %160, %160 : vector<64x512xf32>
    %162 = arith.mulf %160, %161 : vector<64x512xf32>
    %cst_72 = arith.constant 4.471500e-02 : f32
    %163 = vector.broadcast %cst_72 : f32 to vector<64x512xf32>
    %164 = arith.mulf %163, %162 : vector<64x512xf32>
    %165 = arith.addf %160, %164 : vector<64x512xf32>
    %cst_73 = arith.constant 0.797884583 : f32
    %166 = vector.broadcast %cst_73 : f32 to vector<64x512xf32>
    %167 = arith.mulf %166, %165 : vector<64x512xf32>
    %168 = math.tanh %167 : vector<64x512xf32>
    %cst_74 = arith.constant 1.000000e+00 : f32
    %169 = vector.broadcast %cst_74 : f32 to vector<64x512xf32>
    %170 = arith.addf %169, %168 : vector<64x512xf32>
    %cst_75 = arith.constant 5.000000e-01 : f32
    %171 = vector.broadcast %cst_75 : f32 to vector<64x512xf32>
    %172 = arith.mulf %171, %170 : vector<64x512xf32>
    %173 = arith.mulf %160, %172 : vector<64x512xf32>
    %c0_76 = arith.constant 0 : index
    %c0_77 = arith.constant 0 : index
    %c0_78 = arith.constant 0 : index
    %174 = vector.load %arg14[%c0_76, %c0_77, %c0_78] : memref<2x512x128xbf16, #tpu.memory_space<vmem>>, vector<1x512x128xbf16>
    %175 = vector.shape_cast %174 : vector<1x512x128xbf16> to vector<512x128xbf16>
    %176 = arith.truncf %173 : vector<64x512xf32> to vector<64x512xbf16>
    %cst_79 = arith.constant dense<0.000000e+00> : vector<64x128xf32>
    %177 = tpu.matmul %176, %175, %cst_79 {dimension_numbers = #tpu.dot_dimension_numbers<[1], [0], [0], [1], [0, 0, 1, 1], [], []>} : vector<64x512xbf16>, vector<512x128xbf16>, vector<64x128xf32> -> vector<64x128xf32>
    %c0_80 = arith.constant 0 : index
    %c0_81 = arith.constant 0 : index
    %c0_82 = arith.constant 0 : index
    %178 = vector.load %arg15[%c0_80, %c0_81, %c0_82] : memref<2x1x128xf32, #tpu.memory_space<vmem>>, vector<1x1x128xf32>
    %179 = vector.shape_cast %178 : vector<1x1x128xf32> to vector<1x128xf32>
    %180 = vector.broadcast %179 : vector<1x128xf32> to vector<64x128xf32>
    %181 = arith.addf %177, %180 : vector<64x128xf32>
    %182 = arith.addf %128, %181 : vector<64x128xf32>
    %c1 = arith.constant 1 : index
    %c0_83 = arith.constant 0 : index
    %c0_84 = arith.constant 0 : index
    %183 = vector.load %arg4[%c1, %c0_83, %c0_84] : memref<2x1x128xf32, #tpu.memory_space<vmem>>, vector<1x1x128xf32>
    %184 = vector.shape_cast %183 : vector<1x1x128xf32> to vector<1x128xf32>
    %c1_85 = arith.constant 1 : index
    %c0_86 = arith.constant 0 : index
    %c0_87 = arith.constant 0 : index
    %185 = vector.load %arg5[%c1_85, %c0_86, %c0_87] : memref<2x1x128xf32, #tpu.memory_space<vmem>>, vector<1x1x128xf32>
    %186 = vector.shape_cast %185 : vector<1x1x128xf32> to vector<1x128xf32>
    %cst_88 = arith.constant dense<0.000000e+00> : vector<64xf32>
    %187 = vector.multi_reduction <add>, %182, %cst_88 [1] : vector<64x128xf32> to vector<64xf32>
    %188 = vector.shape_cast %187 : vector<64xf32> to vector<64x1xf32>
    %cst_89 = arith.constant 1.280000e+02 : f32
    %189 = vector.broadcast %cst_89 : f32 to vector<64x1xf32>
    %190 = arith.divf %188, %189 : vector<64x1xf32>
    %191 = vector.broadcast %190 : vector<64x1xf32> to vector<64x128xf32>
    %192 = arith.subf %182, %191 : vector<64x128xf32>
    %193 = arith.mulf %192, %192 : vector<64x128xf32>
    %cst_90 = arith.constant dense<0.000000e+00> : vector<64xf32>
    %194 = vector.multi_reduction <add>, %193, %cst_90 [1] : vector<64x128xf32> to vector<64xf32>
    %195 = vector.shape_cast %194 : vector<64xf32> to vector<64x1xf32>
    %cst_91 = arith.constant 1.280000e+02 : f32
    %196 = vector.broadcast %cst_91 : f32 to vector<64x1xf32>
    %197 = arith.divf %195, %196 : vector<64x1xf32>
    %cst_92 = arith.constant 9.99999997E-7 : f32
    %198 = vector.broadcast %cst_92 : f32 to vector<64x1xf32>
    %199 = arith.addf %197, %198 : vector<64x1xf32>
    %200 = math.rsqrt %199 : vector<64x1xf32>
    %201 = vector.broadcast %200 : vector<64x1xf32> to vector<64x128xf32>
    %202 = arith.mulf %192, %201 : vector<64x128xf32>
    %203 = vector.broadcast %184 : vector<1x128xf32> to vector<64x128xf32>
    %204 = arith.mulf %202, %203 : vector<64x128xf32>
    %205 = vector.broadcast %186 : vector<1x128xf32> to vector<64x128xf32>
    %206 = arith.addf %204, %205 : vector<64x128xf32>
    %c1_93 = arith.constant 1 : index
    %c0_94 = arith.constant 0 : index
    %c0_95 = arith.constant 0 : index
    %207 = vector.load %arg6[%c1_93, %c0_94, %c0_95] : memref<2x128x384xbf16, #tpu.memory_space<vmem>>, vector<1x128x384xbf16>
    %208 = vector.shape_cast %207 : vector<1x128x384xbf16> to vector<128x384xbf16>
    %209 = arith.truncf %206 : vector<64x128xf32> to vector<64x128xbf16>
    %cst_96 = arith.constant dense<0.000000e+00> : vector<64x384xf32>
    %210 = tpu.matmul %209, %208, %cst_96 {dimension_numbers = #tpu.dot_dimension_numbers<[1], [0], [0], [1], [0, 0, 1, 1], [], []>} : vector<64x128xbf16>, vector<128x384xbf16>, vector<64x384xf32> -> vector<64x384xf32>
    %c1_97 = arith.constant 1 : index
    %c0_98 = arith.constant 0 : index
    %c0_99 = arith.constant 0 : index
    %211 = vector.load %arg7[%c1_97, %c0_98, %c0_99] : memref<2x1x384xf32, #tpu.memory_space<vmem>>, vector<1x1x384xf32>
    %212 = vector.shape_cast %211 : vector<1x1x384xf32> to vector<1x384xf32>
    %213 = vector.broadcast %212 : vector<1x384xf32> to vector<64x384xf32>
    %214 = arith.addf %210, %213 : vector<64x384xf32>
    %215 = vector.extract_strided_slice %214 {offsets = [0, 0], sizes = [64, 128], strides = [1, 1]} : vector<64x384xf32> to vector<64x128xf32>
    %cst_100 = arith.constant 0.176776692 : f32
    %216 = vector.broadcast %cst_100 : f32 to vector<64x128xf32>
    %217 = arith.mulf %215, %216 : vector<64x128xf32>
    %218 = arith.truncf %217 : vector<64x128xf32> to vector<64x128xbf16>
    %219 = vector.extract_strided_slice %214 {offsets = [0, 128], sizes = [64, 128], strides = [1, 1]} : vector<64x384xf32> to vector<64x128xf32>
    %220 = tpu.transpose %219, [1, 0] : vector<64x128xf32> -> vector<128x64xf32>
    %221 = arith.truncf %220 : vector<128x64xf32> to vector<128x64xbf16>
    %222 = vector.extract_strided_slice %214 {offsets = [0, 256], sizes = [64, 128], strides = [1, 1]} : vector<64x384xf32> to vector<64x128xf32>
    %223 = arith.truncf %222 : vector<64x128xf32> to vector<64x128xbf16>
    %224 = vector.extract_strided_slice %218 {offsets = [0, 0], sizes = [64, 32], strides = [1, 1]} : vector<64x128xbf16> to vector<64x32xbf16>
    %225 = vector.extract_strided_slice %221 {offsets = [0, 0], sizes = [32, 64], strides = [1, 1]} : vector<128x64xbf16> to vector<32x64xbf16>
    %cst_101 = arith.constant dense<0.000000e+00> : vector<64x64xf32>
    %226 = tpu.matmul %224, %225, %cst_101 {dimension_numbers = #tpu.dot_dimension_numbers<[1], [0], [0], [1], [0, 0, 1, 1], [], []>} : vector<64x32xbf16>, vector<32x64xbf16>, vector<64x64xf32> -> vector<64x64xf32>
    %cst_102 = arith.constant dense<0xFF800000> : vector<64xf32>
    %227 = vector.multi_reduction <maximumf>, %226, %cst_102 [1] : vector<64x64xf32> to vector<64xf32>
    %228 = vector.shape_cast %227 : vector<64xf32> to vector<64x1xf32>
    %229 = vector.broadcast %228 : vector<64x1xf32> to vector<64x64xf32>
    %230 = arith.subf %226, %229 : vector<64x64xf32>
    %231 = math.exp %230 : vector<64x64xf32>
    %cst_103 = arith.constant dense<0.000000e+00> : vector<64xf32>
    %232 = vector.multi_reduction <add>, %231, %cst_103 [1] : vector<64x64xf32> to vector<64xf32>
    %233 = vector.shape_cast %232 : vector<64xf32> to vector<64x1xf32>
    %234 = tpu.reciprocal %233 {approx = true} : vector<64x1xf32> -> vector<64x1xf32>
    %235 = vector.broadcast %234 : vector<64x1xf32> to vector<64x64xf32>
    %236 = arith.mulf %231, %235 : vector<64x64xf32>
    %237 = vector.extract_strided_slice %223 {offsets = [0, 0], sizes = [64, 32], strides = [1, 1]} : vector<64x128xbf16> to vector<64x32xbf16>
    %238 = arith.truncf %236 : vector<64x64xf32> to vector<64x64xbf16>
    %cst_104 = arith.constant dense<0.000000e+00> : vector<64x32xf32>
    %239 = tpu.matmul %238, %237, %cst_104 {dimension_numbers = #tpu.dot_dimension_numbers<[1], [0], [0], [1], [0, 0, 1, 1], [], []>} : vector<64x64xbf16>, vector<64x32xbf16>, vector<64x32xf32> -> vector<64x32xf32>
    %240 = arith.truncf %239 : vector<64x32xf32> to vector<64x32xbf16>
    %c0_105 = arith.constant 0 : index
    %c0_106 = arith.constant 0 : index
    %241 = vector.load %arg21[%c0_105, %c0_106] : memref<64x128xbf16, #tpu.memory_space<vmem>>, vector<64x32xbf16>
    tpu.vector_store %arg21[%c0_105, %c0_106], %240 {strides = array<i32>} : memref<64x128xbf16, #tpu.memory_space<vmem>>, vector<64x32xbf16>,
    %242 = vector.extract_strided_slice %218 {offsets = [0, 32], sizes = [64, 32], strides = [1, 1]} : vector<64x128xbf16> to vector<64x32xbf16>
    %243 = vector.extract_strided_slice %221 {offsets = [32, 0], sizes = [32, 64], strides = [1, 1]} : vector<128x64xbf16> to vector<32x64xbf16>
    %cst_107 = arith.constant dense<0.000000e+00> : vector<64x64xf32>
    %244 = tpu.matmul %242, %243, %cst_107 {dimension_numbers = #tpu.dot_dimension_numbers<[1], [0], [0], [1], [0, 0, 1, 1], [], []>} : vector<64x32xbf16>, vector<32x64xbf16>, vector<64x64xf32> -> vector<64x64xf32>
    %cst_108 = arith.constant dense<0xFF800000> : vector<64xf32>
    %245 = vector.multi_reduction <maximumf>, %244, %cst_108 [1] : vector<64x64xf32> to vector<64xf32>
    %246 = vector.shape_cast %245 : vector<64xf32> to vector<64x1xf32>
    %247 = vector.broadcast %246 : vector<64x1xf32> to vector<64x64xf32>
    %248 = arith.subf %244, %247 : vector<64x64xf32>
    %249 = math.exp %248 : vector<64x64xf32>
    %cst_109 = arith.constant dense<0.000000e+00> : vector<64xf32>
    %250 = vector.multi_reduction <add>, %249, %cst_109 [1] : vector<64x64xf32> to vector<64xf32>
    %251 = vector.shape_cast %250 : vector<64xf32> to vector<64x1xf32>
    %252 = tpu.reciprocal %251 {approx = true} : vector<64x1xf32> -> vector<64x1xf32>
    %253 = vector.broadcast %252 : vector<64x1xf32> to vector<64x64xf32>
    %254 = arith.mulf %249, %253 : vector<64x64xf32>
    %255 = vector.extract_strided_slice %223 {offsets = [0, 32], sizes = [64, 32], strides = [1, 1]} : vector<64x128xbf16> to vector<64x32xbf16>
    %256 = arith.truncf %254 : vector<64x64xf32> to vector<64x64xbf16>
    %cst_110 = arith.constant dense<0.000000e+00> : vector<64x32xf32>
    %257 = tpu.matmul %256, %255, %cst_110 {dimension_numbers = #tpu.dot_dimension_numbers<[1], [0], [0], [1], [0, 0, 1, 1], [], []>} : vector<64x64xbf16>, vector<64x32xbf16>, vector<64x32xf32> -> vector<64x32xf32>
    %258 = arith.truncf %257 : vector<64x32xf32> to vector<64x32xbf16>
    %c0_111 = arith.constant 0 : index
    %c32_112 = arith.constant 32 : index
    %259 = vector.load %arg21[%c0_111, %c32_112] : memref<64x128xbf16, #tpu.memory_space<vmem>>, vector<64x32xbf16>
    tpu.vector_store %arg21[%c0_111, %c32_112], %258 {strides = array<i32>} : memref<64x128xbf16, #tpu.memory_space<vmem>>, vector<64x32xbf16>,
    %260 = vector.extract_strided_slice %218 {offsets = [0, 64], sizes = [64, 32], strides = [1, 1]} : vector<64x128xbf16> to vector<64x32xbf16>
    %261 = vector.extract_strided_slice %221 {offsets = [64, 0], sizes = [32, 64], strides = [1, 1]} : vector<128x64xbf16> to vector<32x64xbf16>
    %cst_113 = arith.constant dense<0.000000e+00> : vector<64x64xf32>
    %262 = tpu.matmul %260, %261, %cst_113 {dimension_numbers = #tpu.dot_dimension_numbers<[1], [0], [0], [1], [0, 0, 1, 1], [], []>} : vector<64x32xbf16>, vector<32x64xbf16>, vector<64x64xf32> -> vector<64x64xf32>
    %cst_114 = arith.constant dense<0xFF800000> : vector<64xf32>
    %263 = vector.multi_reduction <maximumf>, %262, %cst_114 [1] : vector<64x64xf32> to vector<64xf32>
    %264 = vector.shape_cast %263 : vector<64xf32> to vector<64x1xf32>
    %265 = vector.broadcast %264 : vector<64x1xf32> to vector<64x64xf32>
    %266 = arith.subf %262, %265 : vector<64x64xf32>
    %267 = math.exp %266 : vector<64x64xf32>
    %cst_115 = arith.constant dense<0.000000e+00> : vector<64xf32>
    %268 = vector.multi_reduction <add>, %267, %cst_115 [1] : vector<64x64xf32> to vector<64xf32>
    %269 = vector.shape_cast %268 : vector<64xf32> to vector<64x1xf32>
    %270 = tpu.reciprocal %269 {approx = true} : vector<64x1xf32> -> vector<64x1xf32>
    %271 = vector.broadcast %270 : vector<64x1xf32> to vector<64x64xf32>
    %272 = arith.mulf %267, %271 : vector<64x64xf32>
    %273 = vector.extract_strided_slice %223 {offsets = [0, 64], sizes = [64, 32], strides = [1, 1]} : vector<64x128xbf16> to vector<64x32xbf16>
    %274 = arith.truncf %272 : vector<64x64xf32> to vector<64x64xbf16>
    %cst_116 = arith.constant dense<0.000000e+00> : vector<64x32xf32>
    %275 = tpu.matmul %274, %273, %cst_116 {dimension_numbers = #tpu.dot_dimension_numbers<[1], [0], [0], [1], [0, 0, 1, 1], [], []>} : vector<64x64xbf16>, vector<64x32xbf16>, vector<64x32xf32> -> vector<64x32xf32>
    %276 = arith.truncf %275 : vector<64x32xf32> to vector<64x32xbf16>
    %c0_117 = arith.constant 0 : index
    %c64_118 = arith.constant 64 : index
    %277 = vector.load %arg21[%c0_117, %c64_118] : memref<64x128xbf16, #tpu.memory_space<vmem>>, vector<64x32xbf16>
    tpu.vector_store %arg21[%c0_117, %c64_118], %276 {strides = array<i32>} : memref<64x128xbf16, #tpu.memory_space<vmem>>, vector<64x32xbf16>,
    %278 = vector.extract_strided_slice %218 {offsets = [0, 96], sizes = [64, 32], strides = [1, 1]} : vector<64x128xbf16> to vector<64x32xbf16>
    %279 = vector.extract_strided_slice %221 {offsets = [96, 0], sizes = [32, 64], strides = [1, 1]} : vector<128x64xbf16> to vector<32x64xbf16>
    %cst_119 = arith.constant dense<0.000000e+00> : vector<64x64xf32>
    %280 = tpu.matmul %278, %279, %cst_119 {dimension_numbers = #tpu.dot_dimension_numbers<[1], [0], [0], [1], [0, 0, 1, 1], [], []>} : vector<64x32xbf16>, vector<32x64xbf16>, vector<64x64xf32> -> vector<64x64xf32>
    %cst_120 = arith.constant dense<0xFF800000> : vector<64xf32>
    %281 = vector.multi_reduction <maximumf>, %280, %cst_120 [1] : vector<64x64xf32> to vector<64xf32>
    %282 = vector.shape_cast %281 : vector<64xf32> to vector<64x1xf32>
    %283 = vector.broadcast %282 : vector<64x1xf32> to vector<64x64xf32>
    %284 = arith.subf %280, %283 : vector<64x64xf32>
    %285 = math.exp %284 : vector<64x64xf32>
    %cst_121 = arith.constant dense<0.000000e+00> : vector<64xf32>
    %286 = vector.multi_reduction <add>, %285, %cst_121 [1] : vector<64x64xf32> to vector<64xf32>
    %287 = vector.shape_cast %286 : vector<64xf32> to vector<64x1xf32>
    %288 = tpu.reciprocal %287 {approx = true} : vector<64x1xf32> -> vector<64x1xf32>
    %289 = vector.broadcast %288 : vector<64x1xf32> to vector<64x64xf32>
    %290 = arith.mulf %285, %289 : vector<64x64xf32>
    %291 = vector.extract_strided_slice %223 {offsets = [0, 96], sizes = [64, 32], strides = [1, 1]} : vector<64x128xbf16> to vector<64x32xbf16>
    %292 = arith.truncf %290 : vector<64x64xf32> to vector<64x64xbf16>
    %cst_122 = arith.constant dense<0.000000e+00> : vector<64x32xf32>
    %293 = tpu.matmul %292, %291, %cst_122 {dimension_numbers = #tpu.dot_dimension_numbers<[1], [0], [0], [1], [0, 0, 1, 1], [], []>} : vector<64x64xbf16>, vector<64x32xbf16>, vector<64x32xf32> -> vector<64x32xf32>
    %294 = arith.truncf %293 : vector<64x32xf32> to vector<64x32xbf16>
    %c0_123 = arith.constant 0 : index
    %c96_124 = arith.constant 96 : index
    %295 = vector.load %arg21[%c0_123, %c96_124] : memref<64x128xbf16, #tpu.memory_space<vmem>>, vector<64x32xbf16>
    tpu.vector_store %arg21[%c0_123, %c96_124], %294 {strides = array<i32>} : memref<64x128xbf16, #tpu.memory_space<vmem>>, vector<64x32xbf16>,
    %c0_125 = arith.constant 0 : index
    %c0_126 = arith.constant 0 : index
    %296 = vector.load %arg21[%c0_125, %c0_126] : memref<64x128xbf16, #tpu.memory_space<vmem>>, vector<64x128xbf16>
    %c1_127 = arith.constant 1 : index
    %c0_128 = arith.constant 0 : index
    %c0_129 = arith.constant 0 : index
    %297 = vector.load %arg8[%c1_127, %c0_128, %c0_129] : memref<2x128x128xbf16, #tpu.memory_space<vmem>>, vector<1x128x128xbf16>
    %298 = vector.shape_cast %297 : vector<1x128x128xbf16> to vector<128x128xbf16>
    %cst_130 = arith.constant dense<0.000000e+00> : vector<64x128xf32>
    %299 = tpu.matmul %296, %298, %cst_130 {dimension_numbers = #tpu.dot_dimension_numbers<[1], [0], [0], [1], [0, 0, 1, 1], [], []>} : vector<64x128xbf16>, vector<128x128xbf16>, vector<64x128xf32> -> vector<64x128xf32>
    %300 = arith.addf %182, %299 : vector<64x128xf32>
    %c1_131 = arith.constant 1 : index
    %c0_132 = arith.constant 0 : index
    %c0_133 = arith.constant 0 : index
    %301 = vector.load %arg9[%c1_131, %c0_132, %c0_133] : memref<2x1x128xf32, #tpu.memory_space<vmem>>, vector<1x1x128xf32>
    %302 = vector.shape_cast %301 : vector<1x1x128xf32> to vector<1x128xf32>
    %303 = vector.broadcast %302 : vector<1x128xf32> to vector<64x128xf32>
    %304 = arith.addf %300, %303 : vector<64x128xf32>
    %c1_134 = arith.constant 1 : index
    %c0_135 = arith.constant 0 : index
    %c0_136 = arith.constant 0 : index
    %305 = vector.load %arg10[%c1_134, %c0_135, %c0_136] : memref<2x1x128xf32, #tpu.memory_space<vmem>>, vector<1x1x128xf32>
    %306 = vector.shape_cast %305 : vector<1x1x128xf32> to vector<1x128xf32>
    %c1_137 = arith.constant 1 : index
    %c0_138 = arith.constant 0 : index
    %c0_139 = arith.constant 0 : index
    %307 = vector.load %arg11[%c1_137, %c0_138, %c0_139] : memref<2x1x128xf32, #tpu.memory_space<vmem>>, vector<1x1x128xf32>
    %308 = vector.shape_cast %307 : vector<1x1x128xf32> to vector<1x128xf32>
    %cst_140 = arith.constant dense<0.000000e+00> : vector<64xf32>
    %309 = vector.multi_reduction <add>, %304, %cst_140 [1] : vector<64x128xf32> to vector<64xf32>
    %310 = vector.shape_cast %309 : vector<64xf32> to vector<64x1xf32>
    %cst_141 = arith.constant 1.280000e+02 : f32
    %311 = vector.broadcast %cst_141 : f32 to vector<64x1xf32>
    %312 = arith.divf %310, %311 : vector<64x1xf32>
    %313 = vector.broadcast %312 : vector<64x1xf32> to vector<64x128xf32>
    %314 = arith.subf %304, %313 : vector<64x128xf32>
    %315 = arith.mulf %314, %314 : vector<64x128xf32>
    %cst_142 = arith.constant dense<0.000000e+00> : vector<64xf32>
    %316 = vector.multi_reduction <add>, %315, %cst_142 [1] : vector<64x128xf32> to vector<64xf32>
    %317 = vector.shape_cast %316 : vector<64xf32> to vector<64x1xf32>
    %cst_143 = arith.constant 1.280000e+02 : f32
    %318 = vector.broadcast %cst_143 : f32 to vector<64x1xf32>
    %319 = arith.divf %317, %318 : vector<64x1xf32>
    %cst_144 = arith.constant 9.99999997E-7 : f32
    %320 = vector.broadcast %cst_144 : f32 to vector<64x1xf32>
    %321 = arith.addf %319, %320 : vector<64x1xf32>
    %322 = math.rsqrt %321 : vector<64x1xf32>
    %323 = vector.broadcast %322 : vector<64x1xf32> to vector<64x128xf32>
    %324 = arith.mulf %314, %323 : vector<64x128xf32>
    %325 = vector.broadcast %306 : vector<1x128xf32> to vector<64x128xf32>
    %326 = arith.mulf %324, %325 : vector<64x128xf32>
    %327 = vector.broadcast %308 : vector<1x128xf32> to vector<64x128xf32>
    %328 = arith.addf %326, %327 : vector<64x128xf32>
    %c1_145 = arith.constant 1 : index
    %c0_146 = arith.constant 0 : index
    %c0_147 = arith.constant 0 : index
    %329 = vector.load %arg12[%c1_145, %c0_146, %c0_147] : memref<2x128x512xbf16, #tpu.memory_space<vmem>>, vector<1x128x512xbf16>
    %330 = vector.shape_cast %329 : vector<1x128x512xbf16> to vector<128x512xbf16>
    %331 = arith.truncf %328 : vector<64x128xf32> to vector<64x128xbf16>
    %cst_148 = arith.constant dense<0.000000e+00> : vector<64x512xf32>
    %332 = tpu.matmul %331, %330, %cst_148 {dimension_numbers = #tpu.dot_dimension_numbers<[1], [0], [0], [1], [0, 0, 1, 1], [], []>} : vector<64x128xbf16>, vector<128x512xbf16>, vector<64x512xf32> -> vector<64x512xf32>
    %c1_149 = arith.constant 1 : index
    %c0_150 = arith.constant 0 : index
    %c0_151 = arith.constant 0 : index
    %333 = vector.load %arg13[%c1_149, %c0_150, %c0_151] : memref<2x1x512xf32, #tpu.memory_space<vmem>>, vector<1x1x512xf32>
    %334 = vector.shape_cast %333 : vector<1x1x512xf32> to vector<1x512xf32>
    %335 = vector.broadcast %334 : vector<1x512xf32> to vector<64x512xf32>
    %336 = arith.addf %332, %335 : vector<64x512xf32>
    %337 = arith.mulf %336, %336 : vector<64x512xf32>
    %338 = arith.mulf %336, %337 : vector<64x512xf32>
    %cst_152 = arith.constant 4.471500e-02 : f32
    %339 = vector.broadcast %cst_152 : f32 to vector<64x512xf32>
    %340 = arith.mulf %339, %338 : vector<64x512xf32>
    %341 = arith.addf %336, %340 : vector<64x512xf32>
    %cst_153 = arith.constant 0.797884583 : f32
    %342 = vector.broadcast %cst_153 : f32 to vector<64x512xf32>
    %343 = arith.mulf %342, %341 : vector<64x512xf32>
    %344 = math.tanh %343 : vector<64x512xf32>
    %cst_154 = arith.constant 1.000000e+00 : f32
    %345 = vector.broadcast %cst_154 : f32 to vector<64x512xf32>
    %346 = arith.addf %345, %344 : vector<64x512xf32>
    %cst_155 = arith.constant 5.000000e-01 : f32
    %347 = vector.broadcast %cst_155 : f32 to vector<64x512xf32>
    %348 = arith.mulf %347, %346 : vector<64x512xf32>
    %349 = arith.mulf %336, %348 : vector<64x512xf32>
    %c1_156 = arith.constant 1 : index
    %c0_157 = arith.constant 0 : index
    %c0_158 = arith.constant 0 : index
    %350 = vector.load %arg14[%c1_156, %c0_157, %c0_158] : memref<2x512x128xbf16, #tpu.memory_space<vmem>>, vector<1x512x128xbf16>
    %351 = vector.shape_cast %350 : vector<1x512x128xbf16> to vector<512x128xbf16>
    %352 = arith.truncf %349 : vector<64x512xf32> to vector<64x512xbf16>
    %cst_159 = arith.constant dense<0.000000e+00> : vector<64x128xf32>
    %353 = tpu.matmul %352, %351, %cst_159 {dimension_numbers = #tpu.dot_dimension_numbers<[1], [0], [0], [1], [0, 0, 1, 1], [], []>} : vector<64x512xbf16>, vector<512x128xbf16>, vector<64x128xf32> -> vector<64x128xf32>
    %c1_160 = arith.constant 1 : index
    %c0_161 = arith.constant 0 : index
    %c0_162 = arith.constant 0 : index
    %354 = vector.load %arg15[%c1_160, %c0_161, %c0_162] : memref<2x1x128xf32, #tpu.memory_space<vmem>>, vector<1x1x128xf32>
    %355 = vector.shape_cast %354 : vector<1x1x128xf32> to vector<1x128xf32>
    %356 = vector.broadcast %355 : vector<1x128xf32> to vector<64x128xf32>
    %357 = arith.addf %353, %356 : vector<64x128xf32>
    %358 = arith.addf %304, %357 : vector<64x128xf32>
    %c0_163 = arith.constant 0 : index
    %c0_164 = arith.constant 0 : index
    %359 = vector.load %arg16[%c0_163, %c0_164] : memref<1x128xf32, #tpu.memory_space<vmem>>, vector<1x128xf32>
    %c0_165 = arith.constant 0 : index
    %c0_166 = arith.constant 0 : index
    %360 = vector.load %arg17[%c0_165, %c0_166] : memref<1x128xf32, #tpu.memory_space<vmem>>, vector<1x128xf32>
    %cst_167 = arith.constant dense<0.000000e+00> : vector<64xf32>
    %361 = vector.multi_reduction <add>, %358, %cst_167 [1] : vector<64x128xf32> to vector<64xf32>
    %362 = vector.shape_cast %361 : vector<64xf32> to vector<64x1xf32>
    %cst_168 = arith.constant 1.280000e+02 : f32
    %363 = vector.broadcast %cst_168 : f32 to vector<64x1xf32>
    %364 = arith.divf %362, %363 : vector<64x1xf32>
    %365 = vector.broadcast %364 : vector<64x1xf32> to vector<64x128xf32>
    %366 = arith.subf %358, %365 : vector<64x128xf32>
    %367 = arith.mulf %366, %366 : vector<64x128xf32>
    %cst_169 = arith.constant dense<0.000000e+00> : vector<64xf32>
    %368 = vector.multi_reduction <add>, %367, %cst_169 [1] : vector<64x128xf32> to vector<64xf32>
    %369 = vector.shape_cast %368 : vector<64xf32> to vector<64x1xf32>
    %cst_170 = arith.constant 1.280000e+02 : f32
    %370 = vector.broadcast %cst_170 : f32 to vector<64x1xf32>
    %371 = arith.divf %369, %370 : vector<64x1xf32>
    %cst_171 = arith.constant 9.99999997E-7 : f32
    %372 = vector.broadcast %cst_171 : f32 to vector<64x1xf32>
    %373 = arith.addf %371, %372 : vector<64x1xf32>
    %374 = math.rsqrt %373 : vector<64x1xf32>
    %375 = vector.broadcast %374 : vector<64x1xf32> to vector<64x128xf32>
    %376 = arith.mulf %366, %375 : vector<64x128xf32>
    %377 = vector.broadcast %359 : vector<1x128xf32> to vector<64x128xf32>
    %378 = arith.mulf %376, %377 : vector<64x128xf32>
    %379 = vector.broadcast %360 : vector<1x128xf32> to vector<64x128xf32>
    %380 = arith.addf %378, %379 : vector<64x128xf32>
    %c0_172 = arith.constant 0 : index
    %c0_173 = arith.constant 0 : index
    %381 = vector.load %arg18[%c0_172, %c0_173] : memref<128x128xbf16, #tpu.memory_space<vmem>>, vector<128x128xbf16>
    %382 = arith.truncf %380 : vector<64x128xf32> to vector<64x128xbf16>
    %cst_174 = arith.constant dense<0.000000e+00> : vector<64x128xf32>
    %383 = tpu.matmul %382, %381, %cst_174 {dimension_numbers = #tpu.dot_dimension_numbers<[1], [0], [0], [1], [0, 0, 1, 1], [], []>} : vector<64x128xbf16>, vector<128x128xbf16>, vector<64x128xf32> -> vector<64x128xf32>
    %c0_175 = arith.constant 0 : index
    %c0_176 = arith.constant 0 : index
    %384 = vector.load %arg19[%c0_175, %c0_176] : memref<1x128xf32, #tpu.memory_space<vmem>>, vector<1x128xf32>
    %385 = vector.broadcast %384 : vector<1x128xf32> to vector<64x128xf32>
    %386 = arith.addf %383, %385 : vector<64x128xf32>
    %c0_177 = arith.constant 0 : index
    %c0_178 = arith.constant 0 : index
    %387 = vector.load %arg20[%c0_177, %c0_178] : memref<64x128xf32, #tpu.memory_space<vmem>>, vector<64x128xf32>
    tpu.vector_store %arg20[%c0_177, %c0_178], %386 {strides = array<i32>} : memref<64x128xf32, #tpu.memory_space<vmem>>, vector<64x128xf32>,
    return
  }
  func.func @transform_0(%arg0: i32) -> (i32, i32) {
    %c0_i32 = arith.constant 0 : i32
    %c0_i32_0 = arith.constant 0 : i32
    return %arg0, %c0_i32 : i32, i32
  }
  func.func @transform_1(%arg0: i32) -> (i32, i32) {
    %c0_i32 = arith.constant 0 : i32
    %c0_i32_0 = arith.constant 0 : i32
    %c0_i32_1 = arith.constant 0 : i32
    return %c0_i32, %c0_i32_0 : i32, i32
  }
  func.func @transform_2(%arg0: i32) -> (i32, i32) {
    %c0_i32 = arith.constant 0 : i32
    %c0_i32_0 = arith.constant 0 : i32
    %c0_i32_1 = arith.constant 0 : i32
    return %c0_i32, %c0_i32_0 : i32, i32
  }
  func.func @transform_3(%arg0: i32) -> (i32, i32, i32) {
    %c0_i32 = arith.constant 0 : i32
    %c0_i32_0 = arith.constant 0 : i32
    %c0_i32_1 = arith.constant 0 : i32
    %c0_i32_2 = arith.constant 0 : i32
    return %c0_i32, %c0_i32_0, %c0_i32_1 : i32, i32, i32
  }
  func.func @transform_4(%arg0: i32) -> (i32, i32, i32) {
    %c0_i32 = arith.constant 0 : i32
    %c0_i32_0 = arith.constant 0 : i32
    %c0_i32_1 = arith.constant 0 : i32
    %c0_i32_2 = arith.constant 0 : i32
    return %c0_i32, %c0_i32_0, %c0_i32_1 : i32, i32, i32
  }
  func.func @transform_5(%arg0: i32) -> (i32, i32, i32) {
    %c0_i32 = arith.constant 0 : i32
    %c0_i32_0 = arith.constant 0 : i32
    %c0_i32_1 = arith.constant 0 : i32
    %c0_i32_2 = arith.constant 0 : i32
    return %c0_i32, %c0_i32_0, %c0_i32_1 : i32, i32, i32
  }
  func.func @transform_6(%arg0: i32) -> (i32, i32, i32) {
    %c0_i32 = arith.constant 0 : i32
    %c0_i32_0 = arith.constant 0 : i32
    %c0_i32_1 = arith.constant 0 : i32
    %c0_i32_2 = arith.constant 0 : i32
    return %c0_i32, %c0_i32_0, %c0_i32_1 : i32, i32, i32
  }
  func.func @transform_7(%arg0: i32) -> (i32, i32, i32) {
    %c0_i32 = arith.constant 0 : i32
    %c0_i32_0 = arith.constant 0 : i32
    %c0_i32_1 = arith.constant 0 : i32
    %c0_i32_2 = arith.constant 0 : i32
    return %c0_i32, %c0_i32_0, %c0_i32_1 : i32, i32, i32
  }
  func.func @transform_8(%arg0: i32) -> (i32, i32, i32) {
    %c0_i32 = arith.constant 0 : i32
    %c0_i32_0 = arith.constant 0 : i32
    %c0_i32_1 = arith.constant 0 : i32
    %c0_i32_2 = arith.constant 0 : i32
    return %c0_i32, %c0_i32_0, %c0_i32_1 : i32, i32, i32
  }
  func.func @transform_9(%arg0: i32) -> (i32, i32, i32) {
    %c0_i32 = arith.constant 0 : i32
    %c0_i32_0 = arith.constant 0 : i32
    %c0_i32_1 = arith.constant 0 : i32
    %c0_i32_2 = arith.constant 0 : i32
    return %c0_i32, %c0_i32_0, %c0_i32_1 : i32, i32, i32
  }
  func.func @transform_10(%arg0: i32) -> (i32, i32, i32) {
    %c0_i32 = arith.constant 0 : i32
    %c0_i32_0 = arith.constant 0 : i32
    %c0_i32_1 = arith.constant 0 : i32
    %c0_i32_2 = arith.constant 0 : i32
    return %c0_i32, %c0_i32_0, %c0_i32_1 : i32, i32, i32
  }
  func.func @transform_11(%arg0: i32) -> (i32, i32, i32) {
    %c0_i32 = arith.constant 0 : i32
    %c0_i32_0 = arith.constant 0 : i32
    %c0_i32_1 = arith.constant 0 : i32
    %c0_i32_2 = arith.constant 0 : i32
    return %c0_i32, %c0_i32_0, %c0_i32_1 : i32, i32, i32
  }
  func.func @transform_12(%arg0: i32) -> (i32, i32, i32) {
    %c0_i32 = arith.constant 0 : i32
    %c0_i32_0 = arith.constant 0 : i32
    %c0_i32_1 = arith.constant 0 : i32
    %c0_i32_2 = arith.constant 0 : i32
    return %c0_i32, %c0_i32_0, %c0_i32_1 : i32, i32, i32
  }
  func.func @transform_13(%arg0: i32) -> (i32, i32, i32) {
    %c0_i32 = arith.constant 0 : i32
    %c0_i32_0 = arith.constant 0 : i32
    %c0_i32_1 = arith.constant 0 : i32
    %c0_i32_2 = arith.constant 0 : i32
    return %c0_i32, %c0_i32_0, %c0_i32_1 : i32, i32, i32
  }
  func.func @transform_14(%arg0: i32) -> (i32, i32, i32) {
    %c0_i32 = arith.constant 0 : i32
    %c0_i32_0 = arith.constant 0 : i32
    %c0_i32_1 = arith.constant 0 : i32
    %c0_i32_2 = arith.constant 0 : i32
    return %c0_i32, %c0_i32_0, %c0_i32_1 : i32, i32, i32
  }
  func.func @transform_15(%arg0: i32) -> (i32, i32) {
    %c0_i32 = arith.constant 0 : i32
    %c0_i32_0 = arith.constant 0 : i32
    %c0_i32_1 = arith.constant 0 : i32
    return %c0_i32, %c0_i32_0 : i32, i32
  }
  func.func @transform_16(%arg0: i32) -> (i32, i32) {
    %c0_i32 = arith.constant 0 : i32
    %c0_i32_0 = arith.constant 0 : i32
    %c0_i32_1 = arith.constant 0 : i32
    return %c0_i32, %c0_i32_0 : i32, i32
  }
  func.func @transform_17(%arg0: i32) -> (i32, i32) {
    %c0_i32 = arith.constant 0 : i32
    %c0_i32_0 = arith.constant 0 : i32
    %c0_i32_1 = arith.constant 0 : i32
    return %c0_i32, %c0_i32_0 : i32, i32
  }
  func.func @transform_18(%arg0: i32) -> (i32, i32) {
    %c0_i32 = arith.constant 0 : i32
    %c0_i32_0 = arith.constant 0 : i32
    %c0_i32_1 = arith.constant 0 : i32
    return %c0_i32, %c0_i32_0 : i32, i32
  }
  func.func @transform_19(%arg0: i32) -> (i32, i32) {
    %c0_i32 = arith.constant 0 : i32
    %c0_i32_0 = arith.constant 0 : i32
    return %arg0, %c0_i32 : i32, i32
  }
}

</mosaic_0001>

<bundles_post_ra>
// kernel: split_model_forward.1
= control target key start
LH: loop header
LB: loop body
LE: loop exit
PB: predicated region body
PF: predicated region fallthrough
CT: control target
= control target key end

     0   :  { %s11979_s0 = inlined_call_operand.vmem [shape: f32[128,128], index: 0, kind: input, shape index: {}]   ;;  %s11980_s1 = inlined_call_operand.vmem [shape: bf16[128,128], index: 1, kind: input, shape index: {}]   ;;  %s11981_s2 = inlined_call_operand.vmem [shape: f32[1,128], index: 2, kind: input, shape index: {}]   ;;  %s11982_s3 = inlined_call_operand.vmem [shape: f32[2,1,128], index: 3, kind: input, shape index: {}]   ;;  %s11983_s4 = inlined_call_operand.vmem [shape: f32[2,1,128], index: 4, kind: input, shape index: {}]   ;;  %s11984_s5 = inlined_call_operand.vmem [shape: bf16[2,128,384], index: 5, kind: input, shape index: {}]   ;;  %s11985_s6 = inlined_call_operand.vmem [shape: f32[2,1,384], index: 6, kind: input, shape index: {}]   ;;  %s11986_s7 = inlined_call_operand.vmem [shape: bf16[2,128,128], index: 7, kind: input, shape index: {}]   ;;  %s11987_s8 = inlined_call_operand.vmem [shape: f32[2,1,128], index: 8, kind: input, shape index: {}]   ;;  %s11988_s9 = inlined_call_operand.vmem [shape: f32[2,1,128], index: 9, kind: input, shape index: {}]   ;;  %s11989_s10 = inlined_call_operand.vmem [shape: f32[2,1,128], index: 10, kind: input, shape index: {}]   ;;  %s11990_s11 = inlined_call_operand.vmem [shape: bf16[2,128,512], index: 11, kind: input, shape index: {}]   ;;  %s11991_s12 = inlined_call_operand.vmem [shape: f32[2,1,512], index: 12, kind: input, shape index: {}]   ;;  %s11992_s13 = inlined_call_operand.vmem [shape: bf16[2,512,128], index: 13, kind: input, shape index: {}]   ;;  %s11993_s14 = inlined_call_operand.vmem [shape: f32[2,1,128], index: 14, kind: input, shape index: {}]   ;;  %s11994_s15 = inlined_call_operand.vmem [shape: f32[1,128], index: 15, kind: input, shape index: {}]   ;;  %s11995_s16 = inlined_call_operand.vmem [shape: f32[1,128], index: 16, kind: input, shape index: {}]   ;;  %s11996_s17 = inlined_call_operand.vmem [shape: bf16[128,128], index: 17, kind: input, shape index: {}]   ;;  %s11997_s18 = inlined_call_operand.vmem [shape: f32[1,128], index: 18, kind: input, shape index: {}]   ;;  %s11998_s19 = inlined_call_operand.vmem [shape: f32[128,128], index: 19, kind: output, shape index: {}]  }
   0x1   :  { %12048 = sst [smem:[#allocation18_spill]] %s11979_s0  ;;  %s9039_s0 = smov 0  }
   0x2   :  { %12049 = sst [smem:[#allocation19_spill]] %s11980_s1 }
   0x3   :  { %12050 = sst [smem:[#allocation20_spill]] %s11981_s2 }
   0x4   :  { %12051 = sst [smem:[#allocation21_spill]] %s11982_s3 }
   0x5 LB: > { %s7031_s30 = sadd.s32 4294967295, %s8933_s0   ;;  %p7035_p0 = scmp.ge.s32.totalorder %s8933_s0, 1  ;;  %s8933_s0 = sphi %s9039_s0, %s29_s0  }
   0x6   : > { %p538_p1 = scmp.lt.s32.totalorder %s8933_s0, 3 }
   0x8   : > { %p539_p2 = pnand %p7035_p0, %p538_p1 }
   0xa   : > { %542 = sbr.rel (%p539_p2) target bundleno = 6260 (0x1874), region = 96 }
  0x11   : > { %s12052_s1 = sld [smem:[#allocation19_spill]]  ;;  %s7036_s22 = sshll.u32 %s7031_s30, 3  ;;  %v8215_v37 = vld [vmem:[%s11984_s5 + $0x4] ss:$12 sps:$4 sm:$0xff]   ;;  %v8217_v38 = vld [vmem:[%s11984_s5] ss:$12 sps:$4 sm:$0xff]  }
  0x12   : > { %p595_p3 = scmp.lt.s32.totalorder %s7036_s22, 15  ;;  %s12053_s28 = sld [smem:[#allocation18_spill]]  ;;  %v8218_v39 = vld [vmem:[%s11984_s5 + $0x1c] ss:$12 sps:$4 sm:$0xff]   ;;  %1055 = vmatprep.subr.bf16.mxu1 %v8215_v37  ;;  %vm1249_vm0 = vcmask 261120   ;;  %vm1327_vm1 = vcmask 523264  }
  0x13   : > { %s12054_s21 = sld [smem:[#allocation20_spill]]  ;;  %v8220_v40 = vld [vmem:[%s11984_s5 + $0x8] ss:$12 sps:$4 sm:$0xff]   ;;  %1056 = vmatpush1.bf16.msra.mxu1 %v8217_v38  ;;  %v8246_v37 = vld [vmem:[%s11984_s5 + $0xb0] ss:$12 sps:$4 sm:$0xff]   ;;  %s12058_s27 = sld [smem:[#allocation21_spill]] }
  0x14   : > { %s12137_s22 = smov (!%p595_p3, %s7036_s22), 15  ;;  %1057 = vmatprep.subr.bf16.mxu1 %v8218_v39  ;;  %s12017_s2 = smov 64   ;;  %vm1799_vm2 = vcmask 523520   ;;  %vm2090_vm3 = vcmask 785920   ;;  %vm2381_vm4 = vcmask 1048320  }
  0x15   : > { %s12014_s3 = sshll.u32 %s12137_s22, 3  ;;  %s12015_s23 = smov 32  }
  0x16   : > { %s12101_s30 = smov 96   ;;  %s12102_s20 = smov 64  }
  0x17   : > { %v8207_v0 = vld [vmem:[%s12052_s1] sm:$0xff]   ;;  %v8208_v1 = vld [vmem:[%s12052_s1 + $0x8] sm:$0xff]   ;;  %v8209_v2 = vld [vmem:[%s12052_s1 + $0x10] sm:$0xff]   ;;  %s12135_s24 = sshll.u32 %s12137_s22, 3 }
  0x18   : > { %7826 = vmatprep.subr.bf16.mxu0 %v8207_v0  ;;  %s598_s29 = scalar_lea.vmem %s12053_s28, %s12014_s3  ;;  %v8210_v3 = vld [vmem:[%s12052_s1 + $0x18] sm:$0xff]   ;;  %v8211_v7 = vld [vmem:[%s12052_s1 + $0x20] sm:$0xff]   ;;  %v8212_v8 = vld [vmem:[%s12052_s1 + $0x28] sm:$0xff]   ;;  %s604_s26 = scalar_lea.vmem %s11998_s19, %s12135_s24 }
  0x19   : > { %7827 = vmatpush3.bf16.msra.mxu0 %v8207_v0  ;;  %v607_v4 = vld [vmem:[%s598_s29] sm:$0xff]  ;;  %v608_v5 = vld [vmem:[%s598_s29 + $0x8] sm:$0xff]  ;;  %v8213_v9 = vld [vmem:[%s12052_s1 + $0x30] sm:$0xff]  }
  0x1a   : > { %7828 = vmatprep.subr.bf16.mxu0 %v8208_v1  ;;  %v631_v6 = vpack.c.bf16 %v608_v5, %v607_v4  ;;  %v8214_v10 = vld [vmem:[%s12052_s1 + $0x38] sm:$0xff]   ;;  %v609_v11 = vld [vmem:[%s598_s29 + $0x10] sm:$0xff]  ;;  %v611_v13 = vld [vmem:[%s598_s29 + $0x20] sm:$0xff] }
  0x1b   : > { %v610_v12 = vld [vmem:[%s598_s29 + $0x18] sm:$0xff]  ;;  %v612_v14 = vld [vmem:[%s598_s29 + $0x28] sm:$0xff]  ;;  %v613_v17 = vld [vmem:[%s598_s29 + $0x30] sm:$0xff] }
  0x1c   : > { %7842 = vmatprep.mubr.bf16.mxu0 %v631_v6  ;;  %v632_v15 = vpack.c.bf16 %v610_v12, %v609_v11  ;;  %v633_v16 = vpack.c.bf16 %v612_v14, %v611_v13  ;;  %v614_v18 = vld [vmem:[%s598_s29 + $0x38] sm:$0xff]  ;;  %v7040_v20 = vld [vmem:[%s12054_s21] ss:$0 sm:$0xff]  ;;  %s12019_s29 = smov 96  }
  0x1d   : > { %7829 = vmatpush3.bf16.msra.mxu0 %v8208_v1  ;;  %v634_v19 = vpack.c.bf16 %v614_v18, %v613_v17  ;;  %v8224_v11 = vld [vmem:[%s11984_s5 + $0x20] ss:$12 sps:$4 sm:$0xff]   ;;  %v8225_v12 = vld [vmem:[%s11984_s5 + $0x30] ss:$12 sps:$4 sm:$0xff]   ;;  %v8228_v14 = vld [vmem:[%s11984_s5 + $0x38] ss:$12 sps:$4 sm:$0xff]  }
  0x1e   : > { %7830 = vmatprep.subr.bf16.mxu0 %v8209_v2  ;;  %v8226_v13 = vld [vmem:[%s11984_s5 + $0x4c] ss:$12 sps:$4 sm:$0xff]   ;;  %v8232_v17 = vld [vmem:[%s11984_s5 + $0x50] ss:$12 sps:$4 sm:$0xff]  }
  0x1f   : > { %v8233_v18 = vld [vmem:[%s11984_s5 + $0x60] ss:$12 sps:$4 sm:$0xff]  }
  0x21   : > { %7831 = vmatpush3.bf16.msra.mxu0 %v8209_v2 }
  0x22   : > { %7832 = vmatprep.subr.bf16.mxu0 %v8210_v3 }
  0x25   : > { %7833 = vmatpush3.bf16.msra.mxu0 %v8210_v3 }
  0x26   : > { %7834 = vmatprep.subr.bf16.mxu0 %v8211_v7 }
  0x29   : > { %7835 = vmatpush3.bf16.msra.mxu0 %v8211_v7 }
  0x2a   : > { %7836 = vmatprep.subr.bf16.mxu0 %v8212_v8 }
  0x2d   : > { %7837 = vmatpush3.bf16.msra.mxu0 %v8212_v8  ;;  %v8221_v8 = vld [vmem:[%s11984_s5 + $0x18] ss:$12 sps:$4 sm:$0xff]  }
  0x2e   : > { %7838 = vmatprep.subr.bf16.mxu0 %v8213_v9  ;;  %1058 = vmatpush1.bf16.msra.mxu1 %v8221_v8 }
  0x31   : > { %7839 = vmatpush3.bf16.msra.mxu0 %v8213_v9 }
  0x32   : > { %7840 = vmatprep.subr.bf16.mxu0 %v8214_v10 }
  0x35   : > { %7841 = vmatpush3.bf16.msra.mxu0 %v8214_v10  ;;  %v8222_v10 = vld [vmem:[%s11984_s5 + $0x34] ss:$12 sps:$4 sm:$0xff]  }
  0x36   : > { %7850 = vmatprep.subr.bf16.mxu0 %v8220_v40  ;;  %1059 = vmatprep.subr.bf16.mxu1 %v8222_v10 }
  0x37   : > { %1060 = vmatpush1.bf16.msra.mxu1 %v8225_v12 }
  0x38   : > { %7843 = vmatmul.mubr.bf16.vlgmr.msra.gmra.mrb[0].mxu0 %v632_v15  ;;  %v8229_v15 = vld [vmem:[%s11984_s5 + $0x48] ss:$12 sps:$4 sm:$0xff]   ;;  %1061 = vmatprep.subr.bf16.mxu1 %v8226_v13 }
  0x39   : > { %7846 = vmatprep.mubr.bf16.mxu0 %v633_v16  ;;  %7851 = vmatpush3.bf16.msra.mxu0 %v8220_v40  ;;  %v8230_v16 = vld [vmem:[%s11984_s5 + $0x64] ss:$12 sps:$4 sm:$0xff]  }
  0x3a   : > { %7852 = vmatprep.subr.bf16.mxu0 %v8224_v11 }
  0x3b   : > { %1062 = vmatpush1.bf16.msra.mxu1 %v8229_v15 }
  0x3c   : > { %1063 = vmatprep.subr.bf16.mxu1 %v8230_v16 }
  0x3d   : > { %7853 = vmatpush3.bf16.msra.mxu0 %v8224_v11 }
  0x3e   : > { %7854 = vmatprep.subr.bf16.mxu0 %v8228_v14 }
  0x3f   : > { %1064 = vmatpush1.bf16.msra.mxu1 %v8233_v18 }
  0x40   : > { %7847 = vmatmul.mubr.bf16.gmra.mrb[4].mxu0 %v634_v19  ;;  %v8234_v19 = vld [vmem:[%s11984_s5 + $0x7c] ss:$12 sps:$4 sm:$0xff]  }
  0x41   : > { %7855 = vmatpush3.bf16.msra.mxu0 %v8228_v14  ;;  %1065 = vmatprep.subr.bf16.mxu1 %v8234_v19 }
  0x42   : > { %7856 = vmatprep.subr.bf16.mxu0 %v8232_v17 }
  0x45   : > { %7857 = vmatpush3.bf16.msra.mxu0 %v8232_v17 }
 0x10b   : > { %v7844_v21 = vpop.f32.mrb[0].mxu0 }
 0x10c   : > { %v9082_v22 = vadd.f32 %v7844_v21, %v7040_v20  ;;  %v724_v23 = vpop.f32.mrb[1].mxu0  ;;  %v8237_v21 = vld [vmem:[%s11984_s5 + $0x78] ss:$12 sps:$4 sm:$0xff]  }
 0x10d   : > { %v9084_v24 = vadd.f32 %v7040_v20, %v724_v23  ;;  %v7845_v25 = vpop.f32.mrb[2].mxu0  ;;  %1066 = vmatpush1.bf16.msra.mxu1 %v8237_v21  ;;  %v8238_v23 = vld [vmem:[%s11984_s5 + $0x94] ss:$12 sps:$4 sm:$0xff]  }
 0x10e   : > { %761 = vadd.xlane.f32.xlu1 %v9082_v22  ;;  %v727_v26 = vpop.f32.mrb[3].mxu0  ;;  %v9088_v27 = vadd.f32 %v7845_v25, %v7040_v20  ;;  %v8240_v25 = vld [vmem:[%s11984_s5 + $0x80] ss:$12 sps:$4 sm:$0xff]   ;;  %1067 = vmatprep.subr.bf16.mxu1 %v8238_v23 }
 0x10f   : > { %757 = vadd.xlane.f32.xlu0 %v9084_v24  ;;  %v9090_v28 = vadd.f32 %v7040_v20, %v727_v26  ;;  %v8241_v26 = vld [vmem:[%s11984_s5 + $0x90] ss:$12 sps:$4 sm:$0xff]  }
 0x111   : > { %1068 = vmatpush1.bf16.msra.mxu1 %v8241_v26 }
 0x112   : > { %763 = vadd.xlane.f32.xlu1 %v9088_v27 }
 0x113   : > { %v7848_v29 = vpop.f32.mrb[4].mxu0  ;;  %759 = vadd.xlane.f32.xlu0 %v9090_v28 }
 0x114   : > { %v740_v30 = vpop.f32.mrb[5].mxu0  ;;  %v9096_v34 = vadd.f32 %v7848_v29, %v7040_v20  ;;  %v8242_v29 = vld [vmem:[%s11984_s5 + $0xac] ss:$12 sps:$4 sm:$0xff]  }
 0x115   : > { %v9094_v31 = vadd.f32 %v7040_v20, %v740_v30  ;;  %v7849_v32 = vpop.f32.mrb[6].mxu0  ;;  %v8244_v30 = vld [vmem:[%s11984_s5 + $0x98] ss:$12 sps:$4 sm:$0xff]   ;;  %1069 = vmatprep.subr.bf16.mxu1 %v8242_v29 }
 0x116   : > { %v743_v33 = vpop.f32.mrb[7].mxu0  ;;  %12055 = vst [vmem:[#allocation3_spill] sm:$0xff] %v9096_v34  ;;  %v9101_v36 = vadd.f32 %v7849_v32, %v7040_v20  ;;  %v8245_v32 = vld [vmem:[%s11984_s5 + $0xa8] ss:$12 sps:$4 sm:$0xff]  }
 0x117   : > { %v9098_v35 = vadd.f32 %v7040_v20, %v743_v33  ;;  %765 = vadd.xlane.f32.xlu0 %v9094_v31  ;;  %v8236_v20 = vld [vmem:[%s11984_s5 + $0x68] ss:$12 sps:$4 sm:$0xff]   ;;  %1070 = vmatpush1.bf16.msra.mxu1 %v8245_v32  ;;  %v12001_v33 = vmov 0  }
 0x118   : > { %12057 = vst [vmem:[#allocation5_spill] sm:$0xff] %v9101_v36  ;;  %7858 = vmatprep.subr.bf16.mxu0 %v8236_v20  ;;  %1087 = vmatprep.mubr.bf16.mxu1 %v12001_v33 }
 0x119   : > { %12056 = vst [vmem:[#allocation4_spill] sm:$0xff] %v9098_v35  ;;  %767 = vadd.xlane.f32.xlu1 %v9098_v35  ;;  %7859 = vmatpush3.bf16.msra.mxu0 %v8236_v20 }
 0x11a   : > { %7860 = vmatprep.subr.bf16.mxu0 %v8240_v25 }
 0x11b   : > { %769 = vadd.xlane.f32.xlu0 %v9096_v34 }
 0x11d   : > { %771 = vadd.xlane.f32.xlu1 %v9101_v36  ;;  %7861 = vmatpush3.bf16.msra.mxu0 %v8240_v25 }
 0x11e   : > { %7862 = vmatprep.subr.bf16.mxu0 %v8244_v30 }
 0x121   : > { %7863 = vmatpush3.bf16.msra.mxu0 %v8244_v30 }
 0x122   : > { %7864 = vmatprep.subr.bf16.mxu0 %v8246_v37 }
 0x125   : > { %7865 = vmatpush3.bf16.msra.mxu0 %v8246_v37 }
 0x19b   : > { %v762_v41 = vpop.xlane.xlu1 %761 }
 0x19c   : > { %v758_v42 = vpop.xlane.xlu0 %757  ;;  %v776_v43 = vmul.f32 0.0078125, %v762_v41 }
 0x19d   : > { %v774_v44 = vmul.f32 0.0078125, %v758_v42 }
 0x19e   : > { %v9124_v51 = vsub.f32 %v9082_v22, %v776_v43 }
 0x19f   : > { %v764_v45 = vpop.xlane.xlu1 %763  ;;  %v9119_v46 = vsub.f32 %v9084_v24, %v774_v44 }
 0x1a0   : > { %v760_v47 = vpop.xlane.xlu0 %759  ;;  %v777_v48 = vmul.f32 0.0078125, %v764_v45  ;;  %v792_v55 = vmul.f32 %v9124_v51, %v9124_v51 }
 0x1a1   : > { %v775_v49 = vmul.f32 0.0078125, %v760_v47  ;;  %v790_v50 = vmul.f32 %v9119_v46, %v9119_v46 }
 0x1a2   : > { %v9134_v57 = vsub.f32 %v9088_v27, %v777_v48 }
 0x1a3   : > { %798 = vadd.xlane.f32.xlu0 %v790_v50  ;;  %v9127_v52 = vsub.f32 %v9090_v28, %v775_v49 }
 0x1a4   : > { %v766_v53 = vpop.xlane.xlu0 %765  ;;  %v793_v63 = vmul.f32 %v9134_v57, %v9134_v57 }
 0x1a5   : > { %v778_v54 = vmul.f32 0.0078125, %v766_v53  ;;  %v791_v56 = vmul.f32 %v9127_v52, %v9127_v52 }
 0x1a6   : > { %v768_v58 = vpop.xlane.xlu1 %767 }
 0x1a7   : > { %v779_v59 = vmul.f32 0.0078125, %v768_v58  ;;  %802 = vadd.xlane.f32.xlu0 %v792_v55  ;;  %800 = vadd.xlane.f32.xlu1 %v791_v56  ;;  %v9137_v60 = vsub.f32 %v9094_v31, %v778_v54 }
 0x1a8   : > { %v770_v61 = vpop.xlane.xlu0 %769 }
 0x1a9   : > { %v780_v62 = vmul.f32 0.0078125, %v770_v61  ;;  %v794_v0 = vmul.f32 %v9137_v60, %v9137_v60  ;;  %v9144_v1 = vsub.f32 %v9098_v35, %v779_v59 }
 0x1aa   : > { %v772_v2 = vpop.xlane.xlu1 %771 }
 0x1ab   : > { %v781_v3 = vmul.f32 0.0078125, %v772_v2  ;;  %804 = vadd.xlane.f32.xlu1 %v793_v63  ;;  %806 = vadd.xlane.f32.xlu0 %v794_v0  ;;  %v9147_v4 = vsub.f32 %v9096_v34, %v780_v62  ;;  %v795_v5 = vmul.f32 %v9144_v1, %v9144_v1 }
 0x1ad   : > { %v796_v6 = vmul.f32 %v9147_v4, %v9147_v4  ;;  %v9154_v7 = vsub.f32 %v9101_v36, %v781_v3 }
 0x1af   : > { %808 = vadd.xlane.f32.xlu1 %v795_v5  ;;  %810 = vadd.xlane.f32.xlu0 %v796_v6  ;;  %v797_v9 = vmul.f32 %v9154_v7, %v9154_v7  ;;  %v7049_v5 = vld [vmem:[%s12058_s27] ss:$0 sm:$0xff] }
 0x1b3   : > { %812 = vadd.xlane.f32.xlu1 %v797_v9 }
 0x230   : > { %v799_v38 = vpop.xlane.xlu0 %798 }
 0x231   : > { %v814_v39 = vmul.f32 0.0078125, %v799_v38 }
 0x233   : > { %v822_v40 = vadd.f32 1e-06, %v814_v39 }
 0x234   : > { %v801_v41 = vpop.xlane.xlu1 %800  ;;  %v803_v42 = vpop.xlane.xlu0 %802 }
 0x235   : > { %8463 = vrsqrt.f32 %v822_v40  ;;  %v815_v43 = vmul.f32 0.0078125, %v801_v41  ;;  %v816_v44 = vmul.f32 0.0078125, %v803_v42 }
 0x237   : > { %v823_v45 = vadd.f32 1e-06, %v815_v43  ;;  %v824_v47 = vadd.f32 1e-06, %v816_v44 }
 0x238   : > { %v805_v48 = vpop.xlane.xlu1 %804  ;;  %v807_v49 = vpop.xlane.xlu0 %806 }
 0x239   : > { %8465 = vrsqrt.f32 %v823_v45  ;;  %v817_v50 = vmul.f32 0.0078125, %v805_v48  ;;  %v818_v53 = vmul.f32 0.0078125, %v807_v49  ;;  %v910_v49 = vld [vmem:[%s11985_s6] sm:$0x7] }
 0x23a   : > { %8467 = vrsqrt.f32 %v824_v47 }
 0x23b   : > { %v825_v54 = vadd.f32 1e-06, %v817_v50  ;;  %v826_v55 = vadd.f32 1e-06, %v818_v53 }
 0x23c   : > { %v809_v56 = vpop.xlane.xlu1 %808  ;;  %v811_v58 = vpop.xlane.xlu0 %810 }
 0x23d   : > { %8469 = vrsqrt.f32 %v825_v54  ;;  %v819_v59 = vmul.f32 0.0078125, %v809_v56  ;;  %v820_v61 = vmul.f32 0.0078125, %v811_v58 }
 0x23e   : > { %8471 = vrsqrt.f32 %v826_v55 }
 0x23f   : > { %v8464_v62 = vpop.eup %8463  ;;  %v827_v63 = vadd.f32 1e-06, %v819_v59  ;;  %v828_v0 = vadd.f32 1e-06, %v820_v61 }
 0x240   : > { %v813_v2 = vpop.xlane.xlu1 %812  ;;  %v838_v3 = vmul.f32 %v8464_v62, %v9119_v46  ;;  %v7050_v46 = vld [vmem:[%s11983_s4] ss:$0 sm:$0xff] }
 0x241   : > { %8473 = vrsqrt.f32 %v827_v63  ;;  %v821_v6 = vmul.f32 0.0078125, %v813_v2 }
 0x242   : > { %8475 = vrsqrt.f32 %v828_v0  ;;  %v852_v12 = vmul.f32 %v7049_v5, %v838_v3 }
 0x243   : > { %v8466_v8 = vpop.eup %8465  ;;  %v829_v9 = vadd.f32 1e-06, %v821_v6 }
 0x244   : > { %v8468_v10 = vpop.eup %8467  ;;  %v839_v11 = vmul.f32 %v8466_v8, %v9127_v52  ;;  %v866_v19 = vadd.f32 %v7050_v46, %v852_v12 }
 0x245   : > { %v840_v13 = vmul.f32 %v8468_v10, %v9124_v51  ;;  %8477 = vrsqrt.f32 %v829_v9 }
 0x246   : > { %v853_v14 = vmul.f32 %v7049_v5, %v839_v11 }
 0x247   : > { %v8470_v15 = vpop.eup %8469  ;;  %v854_v16 = vmul.f32 %v7049_v5, %v840_v13 }
 0x248   : > { %v8472_v17 = vpop.eup %8471  ;;  %v841_v18 = vmul.f32 %v8470_v15, %v9134_v57  ;;  %v867_v20 = vadd.f32 %v7050_v46, %v853_v14 }
 0x249   : > { %v842_v21 = vmul.f32 %v8472_v17, %v9137_v60  ;;  %v868_v26 = vadd.f32 %v7050_v46, %v854_v16 }
 0x24a   : > { %v855_v23 = vmul.f32 %v7049_v5, %v841_v18  ;;  %v906_v52 = vpack.c.bf16 %v867_v20, %v866_v19 }
 0x24b   : > { %v8474_v25 = vpop.eup %8473  ;;  %v856_v32 = vmul.f32 %v7049_v5, %v842_v21 }
 0x24c   : > { %v8476_v51 = vpop.eup %8475  ;;  %1088 = vmatmul.mubr.bf16.vlgmr.msra.gmra.mrb[0].mxu1 %v906_v52  ;;  %7866 = vmatprep.mubr.bf16.mxu0 %v906_v52  ;;  %v869_v29 = vadd.f32 %v7050_v46, %v855_v23  ;;  %v843_v30 = vmul.f32 %v8474_v25, %v9144_v1 }
 0x24d   : > { %1097 = vmatprep.mubr.bf16.mxu1 %v12001_v33  ;;  %v844_v37 = vmul.f32 %v8476_v51, %v9147_v4  ;;  %v870_v60 = vadd.f32 %v7050_v46, %v856_v32  ;;  %v912_v4 = vlaneseq }
 0x24e   : > { %v907_v57 = vpack.c.bf16 %v869_v29, %v868_v26  ;;  %v857_v38 = vmul.f32 %v7049_v5, %v843_v30 }
 0x24f   : > { %v8478_v39 = vpop.eup %8477  ;;  %v858_v42 = vmul.f32 %v7049_v5, %v844_v37  ;;  %v9236_v48 = vshrl.u32 %v912_v4, 7 }
 0x250   : > { %7867 = vmatmul.mubr.bf16.vlgmr.msra.gmra.mrb[8].mxu0 %v907_v57  ;;  %v871_v40 = vadd.f32 %v7050_v46, %v857_v38  ;;  %v845_v41 = vmul.f32 %v8478_v39, %v9154_v7 }
 0x251   : > { %v872_v45 = vadd.f32 %v7050_v46, %v858_v42  ;;  %12059 = vst [vmem:[#allocation6_spill] sm:$0xff] %v9236_v48  ;;  %v9239_v7 = vsub.s32 0, %v9236_v48  ;;  %v9245_v50 = vsub.s32 1, %v9236_v48  ;;  %v9254_v55 = vsub.s32 2, %v9236_v48 }
 0x252   : > { %v908_v43 = vpack.c.bf16 %v871_v40, %v870_v60  ;;  %v859_v44 = vmul.f32 %v7049_v5, %v845_v41 }
 0x253   : > { %12060 = vst [vmem:[#allocation7_spill] sm:$0xff] %v9239_v7  ;;  %12061 = vst [vmem:[#allocation8_spill] sm:$0xff] %v9245_v50  ;;  %v9248_v53 = vrot.slane %v910_v49, %v9239_v7  ;;  %v9251_v54 = vrot.slane %v910_v49, %v9245_v50  ;;  %v923_v2 = vrot.slane %v910_v49, %v9254_v55 }
 0x254   : > { %1098 = vmatmul.mubr.bf16.gmra.mrb[4].mxu1 %v907_v57  ;;  %7870 = vmatprep.mubr.bf16.mxu0 %v908_v43  ;;  %v873_v1 = vadd.f32 %v7050_v46, %v859_v44  ;;  %12062 = vst [vmem:[#allocation9_spill] sm:$0xff] %v9254_v55 }
 0x255   : > { %1107 = vmatprep.mubr.bf16.mxu1 %v12001_v33 }
 0x256   : > { %v909_v47 = vpack.c.bf16 %v873_v1, %v872_v45 }
 0x258   : > { %7871 = vmatmul.mubr.bf16.gmra.mrb[12].mxu0 %v909_v47 }
 0x25c   : > { %1108 = vmatmul.mubr.bf16.gmra.mrb[8].mxu1 %v908_v43 }
 0x25d   : > { %1117 = vmatprep.mubr.bf16.mxu1 %v12001_v33 }
 0x264   : > { %1118 = vmatmul.mubr.bf16.gmra.mrb[12].mxu1 %v909_v47 }
 0x31f   : > { %v1089_v56 = vpop.f32.mrb[0].mxu1 }
 0x320   : > { %v1090_v58 = vadd.f32 %v1089_v56, %v9248_v53  ;;  %v1091_v59 = vpop.f32.mrb[1].mxu1 }
 0x321   : > { %v1092_v61 = vadd.f32 %v1091_v59, %v9251_v54  ;;  %v1093_v62 = vpop.f32.mrb[2].mxu1 }
 0x322   : > { %v1094_v63 = vadd.f32 %v1093_v62, %v9248_v53  ;;  %v1095_v0 = vpop.f32.mrb[3].mxu1  ;;  %v1193_v5 = vmul.f32 0.17677669, %v1090_v58 }
 0x323   : > { %1205 = vxpose.xlu0.b32.start [1/8] (short) %v1092_v61, 128  ;;  %v7868_v3 = vpop.f32.mrb[8].mxu0  ;;  %v1096_v9 = vadd.f32 %v1095_v0, %v9251_v54 }
 0x324   : > { %v1194_v6 = vmul.f32 0.17677669, %v1094_v63  ;;  %v1162_v8 = vpop.f32.mrb[9].mxu0  ;;  %v1171_v12 = vadd.f32 %v7868_v3, %v923_v2 }
 0x325   : > { %v7869_v10 = vpop.f32.mrb[10].mxu0  ;;  %v1163_v14 = vadd.f32 %v1162_v8, %v923_v2 }
 0x326   : > { %v9261_v11 = vpack.c.bf16 %v1194_v6, %v1193_v5  ;;  %v1174_v13 = vadd.f32 %v7869_v10, %v923_v2  ;;  %v1165_v46 = vpop.f32.mrb[11].mxu0 }
 0x327   : > { %v1166_v15 = vadd.f32 %v1165_v46, %v923_v2  ;;  %1206 = vxpose.xlu0.b32.cont [2/8] (short) %v1096_v9, 128  ;;  %v1099_v16 = vpop.f32.mrb[4].mxu1 }
 0x328   : > { %v9263_v17 = vpack.c.bf16 %v1174_v13, %v1171_v12  ;;  %v1100_v18 = vadd.f32 %v1099_v16, %v9248_v53  ;;  %1509 = vrot.lane.b32.xlu1 %v9261_v11, %s12019_s29  ;;  %v1101_v19 = vpop.f32.mrb[5].mxu1  ;;  %7878 = vmatprep.mubr.msk.bf16.mxu1 %vm1249_vm0, %v9261_v11 }
 0x329   : > { %v9270_v20 = vpack.c.bf16 %v1166_v15, %v1163_v14  ;;  %v1102_v21 = vadd.f32 %v1101_v19, %v9251_v54  ;;  %v1103_v23 = vpop.f32.mrb[6].mxu1 }
 0x32a   : > { %v1104_v52 = vadd.f32 %v1103_v23, %v9248_v53  ;;  %v1105_v25 = vpop.f32.mrb[7].mxu1  ;;  %v1195_v51 = vmul.f32 0.17677669, %v1100_v18 }
 0x32b   : > { %7886 = vmatprep.subr.bf16.mxu0 %v9270_v20  ;;  %1207 = vxpose.xlu0.b32.cont [3/8] (short) %v1102_v21, 128  ;;  %v7872_v26 = vpop.f32.mrb[12].mxu0  ;;  %v1106_v32 = vadd.f32 %v1105_v25, %v9251_v54 }
 0x32c   : > { %v1196_v29 = vmul.f32 0.17677669, %v1104_v52  ;;  %v1178_v30 = vpop.f32.mrb[13].mxu0  ;;  %7887 = vmatpush3.bf16.msra.mxu0 %v9270_v20  ;;  %v1187_v38 = vadd.f32 %v7872_v26, %v923_v2 }
 0x32d   : > { %v7873_v37 = vpop.f32.mrb[14].mxu0  ;;  %7888 = vmatprep.subr.bf16.mxu0 %v9263_v17  ;;  %v1179_v40 = vadd.f32 %v1178_v30, %v923_v2 }
 0x32e   : > { %v9278_v57 = vpack.c.bf16 %v1196_v29, %v1195_v51  ;;  %v1190_v39 = vadd.f32 %v7873_v37, %v923_v2  ;;  %v1181_v60 = vpop.f32.mrb[15].mxu0 }
 0x32f   : > { %v1182_v41 = vadd.f32 %v1181_v60, %v923_v2  ;;  %1208 = vxpose.xlu0.b32.cont [4/8] (short) %v1106_v32, 128  ;;  %v1109_v42 = vpop.f32.mrb[8].mxu1 }
 0x330   : > { %v9280_v43 = vpack.c.bf16 %v1190_v39, %v1187_v38  ;;  %v1110_v44 = vadd.f32 %v1109_v42, %v9248_v53  ;;  %7889 = vmatpush3.bf16.msra.mxu0 %v9263_v17  ;;  %1511 = vrot.lane.b32.xlu1 %v9278_v57, %s12019_s29  ;;  %v1111_v45 = vpop.f32.mrb[9].mxu1 }
 0x331   : > { %v9286_v1 = vpack.c.bf16 %v1182_v41, %v1179_v40  ;;  %v1112_v47 = vadd.f32 %v1111_v45, %v9251_v54  ;;  %v1113_v4 = vpop.f32.mrb[10].mxu1 }
 0x332   : > { %v1114_v49 = vadd.f32 %v1113_v4, %v9248_v53  ;;  %v1115_v56 = vpop.f32.mrb[11].mxu1  ;;  %v1197_v58 = vmul.f32 0.17677669, %v1110_v44 }
 0x333   : > { %1209 = vxpose.xlu0.b32.cont [5/8] (short) %v1112_v47, 128  ;;  %7890 = vmatprep.subr.bf16.mxu0 %v9286_v1  ;;  %v1116_v61 = vadd.f32 %v1115_v56, %v9251_v54 }
 0x334   : > { %v1198_v59 = vmul.f32 0.17677669, %v1114_v49  ;;  %7891 = vmatpush3.bf16.msra.mxu0 %v9286_v1 }
 0x335   : > { %7892 = vmatprep.subr.bf16.mxu0 %v9280_v43 }
 0x336   : > { %v1203_v62 = vpack.c.bf16 %v1198_v59, %v1197_v58 }
 0x337   : > { %1210 = vxpose.xlu0.b32.cont [6/8] (short) %v1116_v61, 128  ;;  %v1119_v63 = vpop.f32.mrb[12].mxu1 }
 0x338   : > { %v1120_v0 = vadd.f32 %v1119_v63, %v9248_v53  ;;  %1513 = vrot.lane.b32.xlu1 %v1203_v62, %s12019_s29  ;;  %v1121_v2 = vpop.f32.mrb[13].mxu1  ;;  %7893 = vmatpush3.bf16.msra.mxu0 %v9280_v43 }
 0x339   : > { %v1122_v3 = vadd.f32 %v1121_v2, %v9251_v54  ;;  %v1123_v5 = vpop.f32.mrb[14].mxu1 }
 0x33a   : > { %v1124_v6 = vadd.f32 %v1123_v5, %v9248_v53  ;;  %v1125_v8 = vpop.f32.mrb[15].mxu1  ;;  %v1199_v9 = vmul.f32 0.17677669, %v1120_v0 }
 0x33b   : > { %1211 = vxpose.xlu0.b32.cont [7/8] (short) %v1122_v3, 128  ;;  %v1126_v12 = vadd.f32 %v1125_v8, %v9251_v54 }
 0x33c   : > { %v1200_v10 = vmul.f32 0.17677669, %v1124_v6 }
 0x33e   : > { %v1204_v13 = vpack.c.bf16 %v1200_v10, %v1199_v9 }
 0x33f   : > { %1212 = vxpose.xlu0.b32.end [8/8] (short) %v1126_v12, 128 }
 0x340   : > { %1515 = vrot.lane.b32.xlu1 %v1204_v13, %s12019_s29 }
 0x344   : > { %1804 = vrot.lane.b32.xlu1 %v9261_v11, %s12017_s2 }
 0x348   : > { %1806 = vrot.lane.b32.xlu1 %v9278_v57, %s12017_s2 }
 0x34c   : > { %1808 = vrot.lane.b32.xlu1 %v1203_v62, %s12017_s2 }
 0x350   : > { %1810 = vrot.lane.b32.xlu1 %v1204_v13, %s12017_s2 }
 0x354   : > { %2095 = vrot.lane.b32.xlu1 %v9261_v11, %s12015_s23 }
 0x358   : > { %2097 = vrot.lane.b32.xlu1 %v9278_v57, %s12015_s23 }
 0x35c   : > { %2099 = vrot.lane.b32.xlu1 %v1203_v62, %s12015_s23 }
 0x360   : > { %2101 = vrot.lane.b32.xlu1 %v1204_v13, %s12015_s23 }
 0x364   : > { %1692 = vrot.lane.b32.xlu1 %v9263_v17, %s12019_s29 }
 0x368   : > { %1981 = vrot.lane.b32.xlu1 %v9270_v20, %s12017_s2 }
 0x36c   : > { %1983 = vrot.lane.b32.xlu1 %v9263_v17, %s12017_s2 }
 0x388   : > { %1690 = vrot.lane.b32.xlu0 %v9270_v20, %s12019_s29 }
 0x38c   : > { %1694 = vrot.lane.b32.xlu0 %v9286_v1, %s12019_s29 }
 0x390   : > { %1696 = vrot.lane.b32.xlu0 %v9280_v43, %s12019_s29 }
 0x39a   : > { %v1510_v15 = vpop.permute.xlu1 %1509 }
 0x3a2   : > { %v1512_v19 = vpop.permute.xlu1 %1511 }
 0x3a3   : > { %v1221_v53 = vpop.trf.xlu0 }
 0x3a7   : > { %v1222_v54 = vpop.trf.xlu0 }
 0x3a8   : > { %v1237_v11 = vpack.c.bf16 %v1222_v54, %v1221_v53 }
 0x3aa   : > { %7874 = vmatprep.subr.bf16.mxu1 %v1237_v11  ;;  %v1514_v23 = vpop.permute.xlu1 %1513 }
 0x3ab   : > { %7875 = vmatpush3.bf16.msra.mxu1 %v1237_v11  ;;  %v1223_v46 = vpop.trf.xlu0 }
 0x3af   : > { %v1224_v14 = vpop.trf.xlu0 }
 0x3b0   : > { %v1238_v16 = vpack.c.bf16 %v1224_v14, %v1223_v46 }
 0x3b2   : > { %7876 = vmatprep.subr.bf16.mxu1 %v1238_v16  ;;  %v1516_v26 = vpop.permute.xlu1 %1515 }
 0x3b3   : > { %7877 = vmatpush3.bf16.msra.mxu1 %v1238_v16  ;;  %v1225_v18 = vpop.trf.xlu0 }
 0x3b6   : > { %7879 = vmatmul.mubr.msk.bf16.vlgmr.msra.gmra.mrb[16].mxu1 %vm1249_vm0, %v9278_v57  ;;  %v1805_v30 = vpop.permute.xlu1 %1804 }
 0x3b7   : > { %7882 = vmatprep.mubr.msk.bf16.mxu1 %vm1249_vm0, %v1203_v62  ;;  %v1226_v21 = vpop.trf.xlu0 }
 0x3b8   : > { %v1239_v52 = vpack.c.bf16 %v1226_v21, %v1225_v18 }
 0x3ba   : > { %7902 = vmatprep.subr.bf16.mxu1 %v1239_v52  ;;  %v1807_v57 = vpop.permute.xlu1 %1806 }
 0x3bb   : > { %v1227_v25 = vpop.trf.xlu0  ;;  %7903 = vmatpush3.bf16.msra.mxu1 %v1239_v52 }
 0x3be   : > { %7883 = vmatmul.mubr.msk.bf16.gmra.mrb[20].mxu1 %vm1249_vm0, %v1204_v13  ;;  %v1809_v60 = vpop.permute.xlu1 %1808 }
 0x3bf   : > { %v1228_v51 = vpop.trf.xlu0  ;;  %7906 = vmatprep.mubr.msk.bf16.mxu1 %vm1249_vm0, %v1510_v15 }
 0x3c0   : > { %v1240_v29 = vpack.c.bf16 %v1228_v51, %v1227_v25 }
 0x3c2   : > { %7904 = vmatprep.subr.bf16.mxu1 %v1240_v29  ;;  %v1811_v44 = vpop.permute.xlu1 %1810 }
 0x3c3   : > { %7905 = vmatpush3.bf16.msra.mxu1 %v1240_v29  ;;  %v1229_v32 = vpop.trf.xlu0 }
 0x3c6   : > { %7907 = vmatmul.mubr.msk.bf16.vlgmr.msra.gmra.mrb[24].mxu1 %vm1249_vm0, %v1512_v19  ;;  %v2096_v4 = vpop.permute.xlu1 %2095 }
 0x3c7   : > { %v1230_v37 = vpop.trf.xlu0  ;;  %7910 = vmatprep.mubr.msk.bf16.mxu1 %vm1249_vm0, %v1514_v23 }
 0x3c8   : > { %v1241_v38 = vpack.c.bf16 %v1230_v37, %v1229_v32 }
 0x3ca   : > { %7930 = vmatprep.subr.bf16.mxu1 %v1241_v38  ;;  %v2098_v58 = vpop.permute.xlu1 %2097 }
 0x3cb   : > { %v1231_v39 = vpop.trf.xlu0  ;;  %7931 = vmatpush3.bf16.msra.mxu1 %v1241_v38 }
 0x3ce   : > { %7911 = vmatmul.mubr.msk.bf16.gmra.mrb[28].mxu1 %vm1249_vm0, %v1516_v26  ;;  %v2100_v61 = vpop.permute.xlu1 %2099 }
 0x3cf   : > { %v1232_v40 = vpop.trf.xlu0  ;;  %7934 = vmatprep.mubr.msk.bf16.mxu1 %vm1249_vm0, %v1805_v30 }
 0x3d0   : > { %v1242_v41 = vpack.c.bf16 %v1232_v40, %v1231_v39 }
 0x3d2   : > { %7932 = vmatprep.subr.bf16.mxu1 %v1242_v41  ;;  %v2102_v62 = vpop.permute.xlu1 %2101 }
 0x3d3   : > { %v1233_v42 = vpop.trf.xlu0  ;;  %7933 = vmatpush3.bf16.msra.mxu1 %v1242_v41 }
 0x3d6   : > { %7935 = vmatmul.mubr.msk.bf16.vlgmr.msra.gmra.mrb[32].mxu1 %vm1249_vm0, %v1807_v57 }
 0x3d7   : > { %v1234_v45 = vpop.trf.xlu0  ;;  %7938 = vmatprep.mubr.msk.bf16.mxu1 %vm1249_vm0, %v1809_v60 }
 0x3d8   : > { %v1243_v47 = vpack.c.bf16 %v1234_v45, %v1233_v42 }
 0x3da   : > { %7958 = vmatprep.subr.bf16.mxu1 %v1243_v47 }
 0x3db   : > { %v1235_v49 = vpop.trf.xlu0  ;;  %7959 = vmatpush3.bf16.msra.mxu1 %v1243_v47 }
 0x3de   : > { %7939 = vmatmul.mubr.msk.bf16.gmra.mrb[36].mxu1 %vm1249_vm0, %v1811_v44 }
 0x3df   : > { %v1236_v56 = vpop.trf.xlu0  ;;  %7962 = vmatprep.mubr.msk.bf16.mxu1 %vm1249_vm0, %v2096_v4 }
 0x3e0   : > { %v1244_v59 = vpack.c.bf16 %v1236_v56, %v1235_v49 }
 0x3e2   : > { %7960 = vmatprep.subr.bf16.mxu1 %v1244_v59 }
 0x3e3   : > { %7961 = vmatpush3.bf16.msra.mxu1 %v1244_v59 }
 0x3e6   : > { %7963 = vmatmul.mubr.msk.bf16.vlgmr.msra.gmra.mrb[40].mxu1 %vm1249_vm0, %v2098_v58 }
 0x3e7   : > { %7966 = vmatprep.mubr.msk.bf16.mxu1 %vm1249_vm0, %v2100_v61 }
 0x3ee   : > { %7967 = vmatmul.mubr.msk.bf16.gmra.mrb[44].mxu1 %vm1249_vm0, %v2102_v62 }
 0x3fa   : > { %v9341_v63 = vpop.permute.xlu0 %1690 }
 0x3fb   : > { %7914 = vmatprep.subr.bf16.mxu0 %v9341_v63 }
 0x489   : > { %v9344_v0 = vpop.f32.mrb[16].mxu1 }
 0x48a   : > { %v9346_v2 = vpop.f32.mrb[17].mxu1  ;;  %v1334_v3 = vsel %vm1327_vm1, %v9344_v0, -inf }
 0x48b   : > { %v9350_v5 = vpop.f32.mrb[18].mxu1  ;;  %1335 = vmax.xlane.f32.xlu1 %v1334_v3  ;;  %v1328_v9 = vsel %vm1327_vm1, %v9346_v2, -inf }
 0x48c   : > { %v9352_v6 = vpop.f32.mrb[19].mxu1  ;;  %v1337_v13 = vsel %vm1327_vm1, %v9350_v5, -inf }
 0x48d   : > { %v1331_v8 = vsel %vm1327_vm1, %v9352_v6, -inf }
 0x48e   : > { %1332 = vmax.xlane.f32.xlu0 %v1331_v8 }
 0x48f   : > { %1329 = vmax.xlane.f32.xlu1 %v1328_v9 }
 0x491   : > { %v9358_v10 = vpop.f32.mrb[20].mxu1 }
 0x492   : > { %v9360_v12 = vpop.f32.mrb[21].mxu1  ;;  %v1346_v11 = vsel %vm1327_vm1, %v9358_v10, -inf }
 0x493   : > { %1338 = vmax.xlane.f32.xlu1 %v1337_v13  ;;  %v9364_v53 = vpop.f32.mrb[22].mxu1  ;;  %v1340_v15 = vsel %vm1327_vm1, %v9360_v12, -inf }
 0x494   : > { %v9366_v54 = vpop.f32.mrb[23].mxu1  ;;  %v1349_v19 = vsel %vm1327_vm1, %v9364_v53, -inf }
 0x495   : > { %v1343_v52 = vsel %vm1327_vm1, %v9366_v54, -inf }
 0x497   : > { %1347 = vmax.xlane.f32.xlu1 %v1346_v11 }
 0x499   : > { %v9370_v46 = vpop.f32.mrb[24].mxu1 }
 0x49a   : > { %v9372_v14 = vpop.f32.mrb[25].mxu1  ;;  %v1600_v51 = vsel %vm1327_vm1, %v9370_v46, -inf }
 0x49b   : > { %1341 = vmax.xlane.f32.xlu1 %v1340_v15  ;;  %v9376_v16 = vpop.f32.mrb[26].mxu1  ;;  %v1594_v37 = vsel %vm1327_vm1, %v9372_v14, -inf }
 0x49c   : > { %v9378_v18 = vpop.f32.mrb[27].mxu1  ;;  %v1603_v60 = vsel %vm1327_vm1, %v9376_v16, -inf }
 0x49d   : > { %v1597_v44 = vsel %vm1327_vm1, %v9378_v18, -inf }
 0x49f   : > { %1350 = vmax.xlane.f32.xlu1 %v1349_v19 }
 0x4a1   : > { %v9382_v21 = vpop.f32.mrb[28].mxu1 }
 0x4a2   : > { %v9384_v23 = vpop.f32.mrb[29].mxu1  ;;  %v1612_v49 = vsel %vm1327_vm1, %v9382_v21, -inf }
 0x4a3   : > { %v9388_v25 = vpop.f32.mrb[30].mxu1  ;;  %1344 = vmax.xlane.f32.xlu1 %v1343_v52  ;;  %v1606_v61 = vsel %vm1327_vm1, %v9384_v23, -inf }
 0x4a4   : > { %v9390_v26 = vpop.f32.mrb[31].mxu1  ;;  %v1615_v9 = vsel %vm1327_vm1, %v9388_v25, -inf }
 0x4a5   : > { %v1609_v15 = vsel %vm1327_vm1, %v9390_v26, -inf }
 0x4a7   : > { %1601 = vmax.xlane.f32.xlu1 %v1600_v51 }
 0x4a9   : > { %v9394_v29 = vpop.f32.mrb[32].mxu1 }
 0x4aa   : > { %v9396_v30 = vpop.f32.mrb[33].mxu1  ;;  %v1895_v32 = vsel %vm1327_vm1, %v9394_v29, -inf }
 0x4ab   : > { %1896 = vmax.xlane.f32.xlu0 %v1895_v32  ;;  %v9402_v57 = vpop.f32.mrb[34].mxu1  ;;  %1595 = vmax.xlane.f32.xlu1 %v1594_v37  ;;  %v1889_v39 = vsel %vm1327_vm1, %v9396_v30, -inf }
 0x4ac   : > { %v9404_v38 = vpop.f32.mrb[35].mxu1  ;;  %v1898_v51 = vsel %vm1327_vm1, %v9402_v57, -inf }
 0x4ad   : > { %v1892_v32 = vsel %vm1327_vm1, %v9404_v38, -inf }
 0x4af   : > { %1890 = vmax.xlane.f32.xlu0 %v1889_v39  ;;  %1604 = vmax.xlane.f32.xlu1 %v1603_v60 }
 0x4b1   : > { %v9410_v40 = vpop.f32.mrb[36].mxu1 }
 0x4b2   : > { %v9412_v41 = vpop.f32.mrb[37].mxu1  ;;  %v1907_v42 = vsel %vm1327_vm1, %v9410_v40, -inf }
 0x4b3   : > { %1908 = vmax.xlane.f32.xlu0 %v1907_v42  ;;  %v9418_v45 = vpop.f32.mrb[38].mxu1  ;;  %1598 = vmax.xlane.f32.xlu1 %v1597_v44  ;;  %v1901_v4 = vsel %vm1327_vm1, %v9412_v41, -inf  ;;  %v9470_v44 = vpop.permute.xlu1 %1692 }
 0x4b4   : > { %v9420_v47 = vpop.f32.mrb[39].mxu1  ;;  %v1910_v37 = vsel %vm1327_vm1, %v9418_v45, -inf }
 0x4b5   : > { %v1904_v39 = vsel %vm1327_vm1, %v9420_v47, -inf }
 0x4b7   : > { %1902 = vmax.xlane.f32.xlu0 %v1901_v4  ;;  %1613 = vmax.xlane.f32.xlu1 %v1612_v49  ;;  %v9474_v49 = vpop.permute.xlu1 %1981 }
 0x4b9   : > { %v9426_v56 = vpop.f32.mrb[40].mxu1 }
 0x4ba   : > { %v9428_v58 = vpop.f32.mrb[41].mxu1  ;;  %v2186_v59 = vsel %vm1327_vm1, %v9426_v56, -inf }
 0x4bb   : > { %2187 = vmax.xlane.f32.xlu0 %v2186_v59  ;;  %v9434_v62 = vpop.f32.mrb[42].mxu1  ;;  %1607 = vmax.xlane.f32.xlu1 %v1606_v61  ;;  %v2180_v8 = vsel %vm1327_vm1, %v9428_v58, -inf  ;;  %v9480_v61 = vpop.permute.xlu1 %1983 }
 0x4bc   : > { %v9436_v3 = vpop.f32.mrb[43].mxu1  ;;  %v2189_v4 = vsel %vm1327_vm1, %v9434_v62, -inf }
 0x4bd   : > { %v2183_v59 = vsel %vm1327_vm1, %v9436_v3, -inf }
 0x4bf   : > { %2181 = vmax.xlane.f32.xlu0 %v2180_v8  ;;  %1616 = vmax.xlane.f32.xlu1 %v1615_v9 }
 0x4c1   : > { %v9442_v13 = vpop.f32.mrb[44].mxu1 }
 0x4c2   : > { %v9444_v11 = vpop.f32.mrb[45].mxu1  ;;  %v2198_v60 = vsel %vm1327_vm1, %v9442_v13, -inf }
 0x4c3   : > { %v9448_v19 = vpop.f32.mrb[46].mxu1  ;;  %1610 = vmax.xlane.f32.xlu1 %v1609_v15  ;;  %v2192_v42 = vsel %vm1327_vm1, %v9444_v11, -inf }
 0x4c4   : > { %v9450_v52 = vpop.f32.mrb[47].mxu1 }
 0x4c5   : > { %v2195_v8 = vsel %vm1327_vm1, %v9450_v52, -inf }
 0x4c7   : > { %1899 = vmax.xlane.f32.xlu1 %v1898_v51 }
 0x4cb   : > { %1893 = vmax.xlane.f32.xlu1 %v1892_v32 }
 0x4cf   : > { %1911 = vmax.xlane.f32.xlu1 %v1910_v37 }
 0x4d3   : > { %1905 = vmax.xlane.f32.xlu1 %v1904_v39 }
 0x4d5   : > { %1985 = vrot.lane.b32.xlu0 %v9286_v1, %s12017_s2 }
 0x4e4   : > { %1987 = vrot.lane.b32.xlu1 %v9280_v43, %s12017_s2 }
 0x4e8   : > { %2272 = vrot.lane.b32.xlu1 %v9270_v20, %s12015_s23  ;;  %v2201_v20 = vsel %vm1327_vm1, %v9448_v19, -inf }
 0x4f4   : > { %2199 = vmax.xlane.f32.xlu0 %v2198_v60 }
 0x4f8   : > { %2193 = vmax.xlane.f32.xlu0 %v2192_v42 }
 0x50c   : > { %2190 = vmax.xlane.f32.xlu1 %v2189_v4 }
 0x510   : > { %2184 = vmax.xlane.f32.xlu1 %v2183_v59 }
 0x514   : > { %2202 = vmax.xlane.f32.xlu1 %v2201_v20 }
 0x518   : > { %v1336_v9 = vpop.xlane.xlu1 %1335  ;;  %2196 = vmax.xlane.f32.xlu1 %v2195_v8 }
 0x519   : > { %v1354_v15 = vsub.f32 %v9344_v0, %v1336_v9 }
 0x51b   : > { %v1364_v51 = vmul.f32 1.442695, %v1354_v15 }
 0x51c   : > { %v1330_v32 = vpop.xlane.xlu1 %1329 }
 0x51d   : > { %8479 = vpow2.f32 %v1364_v51  ;;  %v1352_v37 = vsub.f32 %v9346_v2, %v1330_v32  ;;  %v9494_v2 = vpop.permute.xlu0 %1694 }
 0x51f   : > { %v1360_v39 = vmul.f32 1.442695, %v1352_v37 }
 0x520   : > { %v1339_v60 = vpop.xlane.xlu1 %1338 }
 0x521   : > { %8481 = vpow2.f32 %v1360_v39  ;;  %v9500_v32 = vpop.permute.xlu0 %1696 }
 0x524   : > { %v1348_v42 = vpop.xlane.xlu1 %1347 }
 0x525   : > { %v1358_v4 = vsub.f32 %v9358_v10, %v1348_v42 }
 0x527   : > { %v9487_v59 = vpop.eup %8479  ;;  %v1372_v20 = vmul.f32 1.442695, %v1358_v4 }
 0x528   : > { %v1342_v33 = vpop.xlane.xlu1 %1341  ;;  %v1382_v8 = vsel %vm1327_vm1, %v9487_v59, 0.0 }
 0x529   : > { %8483 = vpow2.f32 %v1372_v20  ;;  %v1356_v0 = vsub.f32 %v9360_v12, %v1342_v33  ;;  %1383 = vadd.xlane.f32.xlu0 %v1382_v8  ;;  %2274 = vrot.lane.b32.xlu1 %v9263_v17, %s12015_s23  ;;  %v1333_v33 = vpop.xlane.xlu0 %1332  ;;  %v1355_v20 = vsub.f32 %v9350_v5, %v1339_v60 }
 0x52a   : > { %v1353_v55 = vsub.f32 %v9352_v6, %v1333_v33 }
 0x52b   : > { %v9496_v9 = vpop.eup %8481  ;;  %v1368_v15 = vmul.f32 1.442695, %v1356_v0  ;;  %v1366_v7 = vmul.f32 1.442695, %v1355_v20 }
 0x52c   : > { %v1351_v10 = vpop.xlane.xlu1 %1350  ;;  %v1376_v51 = vsel %vm1327_vm1, %v9496_v9, 0.0  ;;  %v1362_v5 = vmul.f32 1.442695, %v1353_v55 }
 0x52d   : > { %8485 = vpow2.f32 %v1368_v15  ;;  %1377 = vadd.xlane.f32.xlu0 %v1376_v51  ;;  %v1359_v60 = vsub.f32 %v9364_v53, %v1351_v10 }
 0x530   : > { %v1345_v37 = vpop.xlane.xlu1 %1344 }
 0x533   : > { %v9502_v39 = vpop.eup %8483 }
 0x534   : > { %v1602_v12 = vpop.xlane.xlu1 %1601  ;;  %v1394_v17 = vsel %vm1327_vm1, %v9502_v39, 0.0 }
 0x535   : > { %v1620_v42 = vsub.f32 %v9370_v46, %v1602_v12  ;;  %1395 = vadd.xlane.f32.xlu0 %v1394_v17 }
 0x537   : > { %v9507_v4 = vpop.eup %8485  ;;  %v1630_v8 = vmul.f32 1.442695, %v1620_v42 }
 0x538   : > { %v9510_v0 = vpop.xlane.xlu0 %1896  ;;  %v1596_v15 = vpop.xlane.xlu1 %1595  ;;  %v1388_v51 = vsel %vm1327_vm1, %v9507_v4, 0.0 }
 0x539   : > { %8487 = vpow2.f32 %v1630_v8  ;;  %v1618_v50 = vsub.f32 %v9372_v14, %v1596_v15  ;;  %1389 = vadd.xlane.f32.xlu0 %v1388_v51  ;;  %v1374_v8 = vmul.f32 1.442695, %v1359_v60  ;;  %v1357_v14 = vsub.f32 %v9366_v54, %v1345_v37 }
 0x53b   : > { %v1626_v46 = vmul.f32 1.442695, %v1618_v50  ;;  %v1370_v55 = vmul.f32 1.442695, %v1357_v14 }
 0x53c   : > { %v1605_v12 = vpop.xlane.xlu1 %1604  ;;  %v9516_v17 = vpop.xlane.xlu0 %1890 }
 0x53d   : > { %8489 = vpow2.f32 %v1626_v46 }
 0x53e   : > { %8491 = vpow2.f32 %v1366_v7  ;;  %v1621_v7 = vsub.f32 %v9376_v16, %v1605_v12 }
 0x53f   : > { %8493 = vpow2.f32 %v1362_v5 }
 0x540   : > { %v1599_v42 = vpop.xlane.xlu1 %1598  ;;  %v1909_v15 = vpop.xlane.xlu0 %1908  ;;  %8495 = vpow2.f32 %v1374_v8 }
 0x541   : > { %v1919_v33 = vsub.f32 %v9410_v40, %v1909_v15  ;;  %v1619_v16 = vsub.f32 %v9378_v18, %v1599_v42 }
 0x543   : > { %v9519_v48 = vpop.eup %8487  ;;  %v1933_v60 = vmul.f32 1.442695, %v1919_v33 }
 0x544   : > { %v1614_v51 = vpop.xlane.xlu1 %1613  ;;  %v1648_v50 = vsel %vm1327_vm1, %v9519_v48, 0.0  ;;  %v1903_v54 = vpop.xlane.xlu0 %1902 }
 0x545   : > { %v1624_v6 = vsub.f32 %v9382_v21, %v1614_v51  ;;  %1649 = vadd.xlane.f32.xlu0 %v1648_v50  ;;  %v1632_v21 = vmul.f32 1.442695, %v1621_v7  ;;  %v1917_v8 = vsub.f32 %v9412_v41, %v1903_v54 }
 0x547   : > { %v1638_v53 = vmul.f32 1.442695, %v1624_v6  ;;  %v9526_v10 = vpop.eup %8489  ;;  %v1929_v50 = vmul.f32 1.442695, %v1917_v8 }
 0x548   : > { %v1608_v20 = vpop.xlane.xlu1 %1607  ;;  %v9529_v46 = vpop.eup %8491  ;;  %v1642_v5 = vsel %vm1327_vm1, %v9526_v10, 0.0 }
 0x549   : > { %v1622_v37 = vsub.f32 %v9384_v23, %v1608_v20  ;;  %8497 = vpow2.f32 %v1638_v53  ;;  %1643 = vadd.xlane.f32.xlu0 %v1642_v5  ;;  %v1385_v14 = vsel %vm1327_vm1, %v9529_v46, 0.0  ;;  %v9538_v15 = vpop.eup %8493  ;;  %v1628_v23 = vmul.f32 1.442695, %v1619_v16  ;;  %v2188_v20 = vpop.xlane.xlu0 %2187 }
 0x54a   : > { %8499 = vpow2.f32 %v1370_v55  ;;  %v1379_v18 = vsel %vm1327_vm1, %v9538_v15, 0.0  ;;  %v9543_v42 = vpop.eup %8495 }
 0x54b   : > { %v1634_v12 = vmul.f32 1.442695, %v1622_v37  ;;  %v1915_v37 = vsub.f32 %v9394_v29, %v9510_v0  ;;  %v2206_v0 = vsub.f32 %v9426_v56, %v2188_v20 }
 0x54c   : > { %v1617_v40 = vpop.xlane.xlu1 %1616 }
 0x54d   : > { %1386 = vadd.xlane.f32.xlu1 %v1385_v14  ;;  %8501 = vpow2.f32 %v1634_v12  ;;  %v1625_v51 = vsub.f32 %v9388_v25, %v1617_v40  ;;  %v1397_v25 = vsel %vm1327_vm1, %v9543_v42, 0.0  ;;  %v1913_v40 = vsub.f32 %v9396_v30, %v9516_v17  ;;  %v2182_v14 = vpop.xlane.xlu0 %2181 }
 0x54e   : > { %8503 = vpow2.f32 %v1632_v21  ;;  %v1925_v29 = vmul.f32 1.442695, %v1915_v37  ;;  %v2204_v17 = vsub.f32 %v9428_v58, %v2182_v14  ;;  %v2216_v56 = vmul.f32 1.442695, %v2206_v0 }
 0x54f   : > { %8505 = vpow2.f32 %v1933_v60  ;;  %v1640_v41 = vmul.f32 1.442695, %v1625_v51  ;;  %v1921_v30 = vmul.f32 1.442695, %v1913_v40 }
 0x550   : > { %v1611_v6 = vpop.xlane.xlu1 %1610  ;;  %8507 = vpow2.f32 %v1628_v23  ;;  %v2212_v37 = vmul.f32 1.442695, %v2204_v17 }
 0x551   : > { %1380 = vadd.xlane.f32.xlu1 %v1379_v18  ;;  %v1623_v55 = vsub.f32 %v9390_v26, %v1611_v6  ;;  %8509 = vpow2.f32 %v1929_v50 }
 0x552   : > { %8511 = vpow2.f32 %v1640_v41 }
 0x553   : > { %v9546_v7 = vpop.eup %8497  ;;  %v1636_v26 = vmul.f32 1.442695, %v1623_v55 }
 0x554   : > { %v1900_v53 = vpop.xlane.xlu1 %1899  ;;  %v9550_v33 = vpop.eup %8499  ;;  %v1660_v54 = vsel %vm1327_vm1, %v9546_v7, 0.0 }
 0x555   : > { %1398 = vadd.xlane.f32.xlu1 %v1397_v25  ;;  %1661 = vadd.xlane.f32.xlu0 %v1660_v54  ;;  %v1391_v16 = vsel %vm1327_vm1, %v9550_v33, 0.0  ;;  %8513 = vpow2.f32 %v1636_v26  ;;  %v1916_v55 = vsub.f32 %v9402_v57, %v1900_v53 }
 0x556   : > { %8515 = vpow2.f32 %v1925_v29 }
 0x557   : > { %v9556_v5 = vpop.eup %8501  ;;  %v1927_v58 = vmul.f32 1.442695, %v1916_v55 }
 0x558   : > { %v1894_v21 = vpop.xlane.xlu1 %1893  ;;  %v9560_v12 = vpop.eup %8503  ;;  %v1654_v60 = vsel %vm1327_vm1, %v9556_v5, 0.0 }
 0x559   : > { %1392 = vadd.xlane.f32.xlu1 %v1391_v16  ;;  %v9564_v8 = vpop.eup %8505  ;;  %1655 = vadd.xlane.f32.xlu0 %v1654_v60  ;;  %v1651_v51 = vsel %vm1327_vm1, %v9560_v12, 0.0  ;;  %v1914_v26 = vsub.f32 %v9404_v38, %v1894_v21 }
 0x55a   : > { %v9571_v50 = vpop.eup %8507  ;;  %v1955_v18 = vsel %vm1327_vm1, %v9564_v8, 0.0 }
 0x55b   : > { %v9576_v41 = vpop.eup %8509  ;;  %v1645_v20 = vsel %vm1327_vm1, %v9571_v50, 0.0  ;;  %v1923_v60 = vmul.f32 1.442695, %v1914_v26 }
 0x55c   : > { %v1912_v23 = vpop.xlane.xlu1 %1911  ;;  %v9582_v54 = vpop.eup %8511 }
 0x55d   : > { %v1920_v6 = vsub.f32 %v9418_v45, %v1912_v23  ;;  %1652 = vadd.xlane.f32.xlu1 %v1651_v51  ;;  %1956 = vadd.xlane.f32.xlu0 %v1955_v18  ;;  %v1949_v45 = vsel %vm1327_vm1, %v9576_v41, 0.0  ;;  %v1663_v57 = vsel %vm1327_vm1, %v9582_v54, 0.0 }
 0x55f   : > { %v1935_v25 = vmul.f32 1.442695, %v1920_v6  ;;  %v9589_v53 = vpop.eup %8513 }
 0x560   : > { %v1906_v16 = vpop.xlane.xlu1 %1905  ;;  %v1657_v29 = vsel %vm1327_vm1, %v9589_v53, 0.0  ;;  %v9594_v0 = vpop.eup %8515 }
 0x561   : > { %8517 = vpow2.f32 %v1935_v25  ;;  %1646 = vadd.xlane.f32.xlu1 %v1645_v20  ;;  %1950 = vadd.xlane.f32.xlu0 %v1949_v45  ;;  %v1918_v40 = vsub.f32 %v9420_v47, %v1906_v16  ;;  %v1943_v23 = vsel %vm1327_vm1, %v9594_v0, 0.0 }
 0x562   : > { %8519 = vpow2.f32 %v1921_v30 }
 0x563   : > { %8521 = vpow2.f32 %v2216_v56  ;;  %v1931_v38 = vmul.f32 1.442695, %v1918_v40 }
 0x564   : > { %8523 = vpow2.f32 %v2212_v37  ;;  %v9628_v26 = vpop.permute.xlu1 %1987 }
 0x565   : > { %1664 = vadd.xlane.f32.xlu1 %v1663_v57  ;;  %8525 = vpow2.f32 %v1927_v58  ;;  %v9626_v58 = vpop.permute.xlu0 %1985 }
 0x566   : > { %8527 = vpow2.f32 %v1923_v60 }
 0x567   : > { %8529 = vpow2.f32 %v1931_v38 }
 0x568   : > { %v9630_v57 = vpop.permute.xlu1 %2272 }
 0x569   : > { %1658 = vadd.xlane.f32.xlu1 %v1657_v29 }
 0x56b   : > { %v9596_v14 = vpop.eup %8517 }
 0x56c   : > { %v9598_v21 = vpop.eup %8519  ;;  %v1958_v51 = vsel %vm1327_vm1, %v9596_v14, 0.0 }
 0x56d   : > { %v9604_v6 = vpop.eup %8521  ;;  %1944 = vadd.xlane.f32.xlu1 %v1943_v23  ;;  %1959 = vadd.xlane.f32.xlu0 %v1958_v51  ;;  %v1937_v18 = vsel %vm1327_vm1, %v9598_v21, 0.0 }
 0x56e   : > { %v9606_v47 = vpop.eup %8523  ;;  %v2234_v30 = vsel %vm1327_vm1, %v9604_v6, 0.0 }
 0x56f   : > { %v9612_v17 = vpop.eup %8525  ;;  %v2228_v55 = vsel %vm1327_vm1, %v9606_v47, 0.0 }
 0x570   : > { %v1946_v56 = vsel %vm1327_vm1, %v9612_v17, 0.0  ;;  %v9618_v25 = vpop.eup %8527 }
 0x571   : > { %1938 = vadd.xlane.f32.xlu1 %v1937_v18  ;;  %2235 = vadd.xlane.f32.xlu0 %v2234_v30  ;;  %v1940_v20 = vsel %vm1327_vm1, %v9618_v25, 0.0  ;;  %v9622_v45 = vpop.eup %8529 }
 0x572   : > { %v1952_v37 = vsel %vm1327_vm1, %v9622_v45, 0.0 }
 0x575   : > { %1947 = vadd.xlane.f32.xlu1 %v1946_v56  ;;  %2229 = vadd.xlane.f32.xlu0 %v2228_v55 }
 0x579   : > { %1941 = vadd.xlane.f32.xlu1 %v1940_v20 }
 0x57d   : > { %1953 = vadd.xlane.f32.xlu1 %v1952_v37 }
 0x581   : > { %v2200_v16 = vpop.xlane.xlu0 %2199 }
 0x582   : > { %v2210_v60 = vsub.f32 %v9442_v13, %v2200_v16 }
 0x584   : > { %v2224_v23 = vmul.f32 1.442695, %v2210_v60 }
 0x585   : > { %v2194_v40 = vpop.xlane.xlu0 %2193 }
 0x586   : > { %v2208_v51 = vsub.f32 %v9444_v11, %v2194_v40 }
 0x588   : > { %v2220_v55 = vmul.f32 1.442695, %v2208_v51 }
 0x599   : > { %v2191_v29 = vpop.xlane.xlu1 %2190 }
 0x59a   : > { %v2207_v38 = vsub.f32 %v9434_v62, %v2191_v29 }
 0x59c   : > { %v2218_v18 = vmul.f32 1.442695, %v2207_v38 }
 0x59d   : > { %v2185_v30 = vpop.xlane.xlu1 %2184 }
 0x59e   : > { %8531 = vpow2.f32 %v2218_v18  ;;  %v2205_v56 = vsub.f32 %v9436_v3, %v2185_v30 }
 0x59f   : > { %8533 = vpow2.f32 %v2224_v23 }
 0x5a0   : > { %v2214_v20 = vmul.f32 1.442695, %v2205_v56 }
 0x5a1   : > { %v2203_v37 = vpop.xlane.xlu1 %2202 }
 0x5a2   : > { %8535 = vpow2.f32 %v2214_v20  ;;  %v2211_v36 = vsub.f32 %v9448_v19, %v2203_v37 }
 0x5a3   : > { %8537 = vpow2.f32 %v2220_v55 }
 0x5a4   : > { %v2226_v13 = vmul.f32 1.442695, %v2211_v36 }
 0x5a5   : > { %v2197_v16 = vpop.xlane.xlu1 %2196 }
 0x5a6   : > { %v2209_v62 = vsub.f32 %v9450_v52, %v2197_v16  ;;  %8539 = vpow2.f32 %v2226_v13 }
 0x5a8   : > { %v9638_v60 = vpop.eup %8531  ;;  %v2222_v11 = vmul.f32 1.442695, %v2209_v62 }
 0x5a9   : > { %v2237_v40 = vsel %vm1327_vm1, %v9638_v60, 0.0  ;;  %v9642_v3 = vpop.eup %8533  ;;  %v9666_v20 = vpop.permute.xlu1 %2274 }
 0x5aa   : > { %8541 = vpow2.f32 %v2222_v11  ;;  %2238 = vadd.xlane.f32.xlu0 %v2237_v40  ;;  %v2246_v19 = vsel %vm1327_vm1, %v9642_v3, 0.0 }
 0x5ac   : > { %v9644_v29 = vpop.eup %8535 }
 0x5ad   : > { %v2231_v36 = vsel %vm1327_vm1, %v9644_v29, 0.0  ;;  %v9650_v52 = vpop.eup %8537 }
 0x5ae   : > { %2247 = vadd.xlane.f32.xlu0 %v2246_v19  ;;  %2232 = vadd.xlane.f32.xlu1 %v2231_v36  ;;  %v2240_v38 = vsel %vm1327_vm1, %v9650_v52, 0.0 }
 0x5b0   : > { %v9654_v23 = vpop.eup %8539 }
 0x5b1   : > { %v2249_v18 = vsel %vm1327_vm1, %v9654_v23, 0.0 }
 0x5b2   : > { %2241 = vadd.xlane.f32.xlu0 %v2240_v38 }
 0x5b4   : > { %v9656_v51 = vpop.eup %8541 }
 0x5b5   : > { %v2243_v30 = vsel %vm1327_vm1, %v9656_v51, 0.0 }
 0x5b6   : > { %2250 = vadd.xlane.f32.xlu0 %v2249_v18  ;;  %2244 = vadd.xlane.f32.xlu1 %v2243_v30  ;;  %v1384_v56 = vpop.xlane.xlu0 %1383 }
 0x5ba   : > { %v1378_v55 = vpop.xlane.xlu0 %1377 }
 0x5c2   : > { %v1396_v37 = vpop.xlane.xlu0 %1395 }
 0x5c6   : > { %v1390_v16 = vpop.xlane.xlu0 %1389 }
 0x5c7   : > { %2278 = vrot.lane.b32.xlu1 %v9280_v43, %s12015_s23 }
 0x5cc   : > { %2276 = vrot.lane.b32.xlu0 %v9286_v1, %s12015_s23 }
 0x5d2   : > { %v1650_v11 = vpop.xlane.xlu0 %1649 }
 0x5d6   : > { %v1644_v38 = vpop.xlane.xlu0 %1643 }
 0x5da   : > { %v1387_v13 = vpop.xlane.xlu1 %1386 }
 0x5db   : > { %8543 = vrcp.f32 %v1387_v13 }
 0x5dc   : > { %8545 = vrcp.f32 %v1378_v55 }
 0x5dd   : > { %8547 = vrcp.f32 %v1384_v56 }
 0x5de   : > { %v1381_v62 = vpop.xlane.xlu1 %1380 }
 0x5df   : > { %8549 = vrcp.f32 %v1381_v62 }
 0x5e2   : > { %v1399_v40 = vpop.xlane.xlu1 %1398  ;;  %v1662_v35 = vpop.xlane.xlu0 %1661 }
 0x5e3   : > { %8551 = vrcp.f32 %v1399_v40 }
 0x5e4   : > { %8553 = vrcp.f32 %v1390_v16 }
 0x5e5   : > { %v8544_v43 = vpop.eup %8543  ;;  %8555 = vrcp.f32 %v1396_v37 }
 0x5e6   : > { %v1393_v19 = vpop.xlane.xlu1 %1392  ;;  %v8546_v1 = vpop.eup %8545  ;;  %v1411_v30 = vmul.f32 %v8544_v43, %v9529_v46 }
 0x5e7   : > { %8557 = vrcp.f32 %v1393_v19  ;;  %v8548_v36 = vpop.eup %8547  ;;  %v1408_v56 = vmul.f32 %v8546_v1, %v9496_v9 }
 0x5e8   : > { %v1410_v62 = vmul.f32 %v8548_v36, %v9487_v59 }
 0x5e9   : > { %v8550_v18 = vpop.eup %8549 }
 0x5ea   : > { %v1653_v13 = vpop.xlane.xlu1 %1652  ;;  %v1409_v55 = vmul.f32 %v8550_v18, %v9538_v15  ;;  %v1417_v37 = vpack.c.bf16 %v1411_v30, %v1410_v62  ;;  %v1656_v15 = vpop.xlane.xlu0 %1655 }
 0x5eb   : > { %8559 = vrcp.f32 %v1653_v13 }
 0x5ec   : > { %v1416_v16 = vpack.c.bf16 %v1409_v55, %v1408_v56  ;;  %8561 = vrcp.f32 %v1644_v38 }
 0x5ed   : > { %v8552_v40 = vpop.eup %8551  ;;  %8563 = vrcp.f32 %v1650_v11 }
 0x5ee   : > { %7894 = vmatprep.mubr.msk.bf16.mxu0 %vm1327_vm1, %v1416_v16  ;;  %v1647_v19 = vpop.xlane.xlu1 %1646  ;;  %v8554_v34 = vpop.eup %8553  ;;  %v1415_v59 = vmul.f32 %v8552_v40, %v9543_v42 }
 0x5ef   : > { %8565 = vrcp.f32 %v1647_v19  ;;  %7895 = vmatmul.mubr.msk.bf16.vlgmr.msra.gmra.mrb[16].mxu0 %vm1327_vm1, %v1417_v37  ;;  %v8556_v46 = vpop.eup %8555  ;;  %v1412_v1 = vmul.f32 %v8554_v34, %v9507_v4  ;;  %v1957_v16 = vpop.xlane.xlu0 %1956 }
 0x5f0   : > { %7915 = vmatpush3.bf16.msra.mxu0 %v9341_v63  ;;  %v1414_v36 = vmul.f32 %v8556_v46, %v9502_v39 }
 0x5f1   : > { %v8558_v9 = vpop.eup %8557  ;;  %7916 = vmatprep.subr.bf16.mxu0 %v9470_v44 }
 0x5f2   : > { %v1665_v43 = vpop.xlane.xlu1 %1664  ;;  %v1413_v11 = vmul.f32 %v8558_v9, %v9550_v33  ;;  %v1419_v63 = vpack.c.bf16 %v1415_v59, %v1414_v36 }
 0x5f3   : > { %8567 = vrcp.f32 %v1665_v43  ;;  %v1951_v9 = vpop.xlane.xlu0 %1950 }
 0x5f4   : > { %7917 = vmatpush3.bf16.msra.mxu0 %v9470_v44  ;;  %v1418_v38 = vpack.c.bf16 %v1413_v11, %v1412_v1  ;;  %8569 = vrcp.f32 %v1656_v15 }
 0x5f5   : > { %7918 = vmatprep.subr.bf16.mxu0 %v9494_v2  ;;  %v8560_v18 = vpop.eup %8559  ;;  %8571 = vrcp.f32 %v1662_v35 }
 0x5f6   : > { %7898 = vmatprep.mubr.msk.bf16.mxu0 %vm1327_vm1, %v1418_v38  ;;  %v1659_v42 = vpop.xlane.xlu1 %1658  ;;  %v8562_v30 = vpop.eup %8561  ;;  %v1677_v44 = vmul.f32 %v8560_v18, %v9560_v12 }
 0x5f7   : > { %8573 = vrcp.f32 %v1659_v42  ;;  %7899 = vmatmul.mubr.msk.bf16.gmra.mrb[20].mxu0 %vm1327_vm1, %v1419_v63  ;;  %v8564_v34 = vpop.eup %8563  ;;  %v1674_v33 = vmul.f32 %v8562_v30, %v9526_v10 }
 0x5f8   : > { %7919 = vmatpush3.bf16.msra.mxu0 %v9494_v2  ;;  %v1676_v13 = vmul.f32 %v8564_v34, %v9519_v48 }
 0x5f9   : > { %v8566_v39 = vpop.eup %8565  ;;  %7920 = vmatprep.subr.bf16.mxu0 %v9500_v32 }
 0x5fa   : > { %v1945_v4 = vpop.xlane.xlu1 %1944  ;;  %v1675_v35 = vmul.f32 %v8566_v39, %v9571_v50  ;;  %v1683_v55 = vpack.c.bf16 %v1677_v44, %v1676_v13 }
 0x5fc   : > { %7921 = vmatpush3.bf16.msra.mxu0 %v9500_v32  ;;  %v1682_v56 = vpack.c.bf16 %v1675_v35, %v1674_v33 }
 0x5fd   : > { %7942 = vmatprep.subr.bf16.mxu0 %v9474_v49  ;;  %v8568_v62 = vpop.eup %8567 }
 0x5fe   : > { %7922 = vmatprep.mubr.msk.bf16.mxu0 %vm1327_vm1, %v1682_v56  ;;  %v1939_v2 = vpop.xlane.xlu1 %1938  ;;  %v8570_v12 = vpop.eup %8569  ;;  %v1681_v48 = vmul.f32 %v8568_v62, %v9582_v54 }
 0x5ff   : > { %7923 = vmatmul.mubr.msk.bf16.vlgmr.msra.gmra.mrb[24].mxu0 %vm1327_vm1, %v1683_v55  ;;  %v8572_v37 = vpop.eup %8571  ;;  %v1678_v50 = vmul.f32 %v8570_v12, %v9556_v5 }
 0x600   : > { %7943 = vmatpush3.bf16.msra.mxu0 %v9474_v49  ;;  %v1680_v19 = vmul.f32 %v8572_v37, %v9546_v7  ;;  %v1960_v7 = vpop.xlane.xlu0 %1959 }
 0x601   : > { %v8574_v10 = vpop.eup %8573  ;;  %7944 = vmatprep.subr.bf16.mxu0 %v9480_v61 }
 0x602   : > { %v1948_v32 = vpop.xlane.xlu1 %1947  ;;  %v1679_v40 = vmul.f32 %v8574_v10, %v9589_v53  ;;  %v1685_v49 = vpack.c.bf16 %v1681_v48, %v1680_v19 }
 0x603   : > { %8575 = vrcp.f32 %v1948_v32 }
 0x604   : > { %7945 = vmatpush3.bf16.msra.mxu0 %v9480_v61  ;;  %v1684_v46 = vpack.c.bf16 %v1679_v40, %v1678_v50  ;;  %8577 = vrcp.f32 %v1939_v2 }
 0x605   : > { %7946 = vmatprep.subr.bf16.mxu0 %v9626_v58  ;;  %8579 = vrcp.f32 %v1945_v4 }
 0x606   : > { %7926 = vmatprep.mubr.msk.bf16.mxu0 %vm1327_vm1, %v1684_v46  ;;  %v1942_v54 = vpop.xlane.xlu1 %1941 }
 0x607   : > { %8581 = vrcp.f32 %v1942_v54  ;;  %7927 = vmatmul.mubr.msk.bf16.gmra.mrb[28].mxu0 %vm1327_vm1, %v1685_v49 }
 0x608   : > { %7947 = vmatpush3.bf16.msra.mxu0 %v9626_v58  ;;  %8583 = vrcp.f32 %v1951_v9  ;;  %v12063_v9 = vmov 0  }
 0x609   : > { %7948 = vmatprep.subr.bf16.mxu0 %v9628_v26 }
 0x60a   : > { %v1954_v61 = vpop.xlane.xlu1 %1953 }
 0x60b   : > { %8585 = vrcp.f32 %v1954_v61 }
 0x60c   : > { %8587 = vrcp.f32 %v1960_v7  ;;  %7949 = vmatpush3.bf16.msra.mxu0 %v9628_v26 }
 0x60d   : > { %7970 = vmatprep.subr.bf16.mxu0 %v9630_v57  ;;  %v8576_v5 = vpop.eup %8575  ;;  %8589 = vrcp.f32 %v1957_v16 }
 0x60e   : > { %v8578_v53 = vpop.eup %8577  ;;  %v1972_v43 = vmul.f32 %v8576_v5, %v9612_v17 }
 0x60f   : > { %v8580_v59 = vpop.eup %8579  ;;  %v1969_v58 = vmul.f32 %v8578_v53, %v9598_v21 }
 0x610   : > { %v1971_v36 = vmul.f32 %v8580_v59, %v9594_v0 }
 0x611   : > { %v8582_v15 = vpop.eup %8581 }
 0x612   : > { %v1970_v1 = vmul.f32 %v8582_v15, %v9618_v25  ;;  %v8584_v11 = vpop.eup %8583  ;;  %v1978_v18 = vpack.c.bf16 %v1972_v43, %v1971_v36 }
 0x613   : > { %v1973_v42 = vmul.f32 %v8584_v11, %v9576_v41  ;;  %v2236_v41 = vpop.xlane.xlu0 %2235 }
 0x614   : > { %v1977_v38 = vpack.c.bf16 %v1970_v1, %v1969_v58 }
 0x615   : > { %v8586_v63 = vpop.eup %8585 }
 0x616   : > { %v8588_v26 = vpop.eup %8587  ;;  %7950 = vmatprep.mubr.msk.bf16.mxu0 %vm1327_vm1, %v1977_v38  ;;  %v1974_v30 = vmul.f32 %v8586_v63, %v9622_v45 }
 0x617   : > { %7951 = vmatmul.mubr.msk.bf16.vlgmr.msra.gmra.mrb[32].mxu0 %vm1327_vm1, %v1978_v18  ;;  %v8590_v17 = vpop.eup %8589  ;;  %v1976_v0 = vmul.f32 %v8588_v26, %v9596_v14  ;;  %v2230_v45 = vpop.xlane.xlu0 %2229 }
 0x618   : > { %7971 = vmatpush3.bf16.msra.mxu0 %v9630_v57  ;;  %v1979_v21 = vpack.c.bf16 %v1974_v30, %v1973_v42  ;;  %v1975_v25 = vmul.f32 %v8590_v17, %v9564_v8  ;;  %8591 = vrcp.f32 %v2230_v45  ;;  %v8250_v45 = vld [vmem:[%s11986_s7 + $0x18] sm:$0xff]  }
 0x619   : > { %7972 = vmatprep.subr.bf16.mxu0 %v9666_v20 }
 0x61a   : > { %7954 = vmatprep.mubr.msk.bf16.mxu0 %vm1327_vm1, %v1979_v21  ;;  %v1980_v34 = vpack.c.bf16 %v1976_v0, %v1975_v25  ;;  %v8247_v21 = vld [vmem:[%s11986_s7] sm:$0xff]   ;;  %v8248_v0 = vld [vmem:[%s11986_s7 + $0x8] sm:$0xff]   ;;  %v8249_v25 = vld [vmem:[%s11986_s7 + $0x10] sm:$0xff]  }
 0x61b   : > { %7986 = vmatprep.subr.bf16.mxu1 %v8247_v21 }
 0x61c   : > { %7973 = vmatpush3.bf16.msra.mxu0 %v9666_v20  ;;  %7987 = vmatpush3.bf16.msra.mxu1 %v8247_v21 }
 0x61d   : > { %7988 = vmatprep.subr.bf16.mxu1 %v8248_v0 }
 0x61f   : > { %7955 = vmatmul.mubr.msk.bf16.gmra.mrb[36].mxu0 %vm1327_vm1, %v1980_v34 }
 0x620   : > { %7989 = vmatpush3.bf16.msra.mxu1 %v8248_v0 }
 0x621   : > { %7990 = vmatprep.subr.bf16.mxu1 %v8249_v25 }
 0x622   : > { %v8592_v8 = vpop.eup %8591 }
 0x623   : > { %v2260_v56 = vmul.f32 %v8592_v8, %v9606_v47 }
 0x624   : > { %7991 = vmatpush3.bf16.msra.mxu1 %v8249_v25 }
 0x625   : > { %7992 = vmatprep.subr.bf16.mxu1 %v8250_v45 }
 0x628   : > { %7993 = vmatpush3.bf16.msra.mxu1 %v8250_v45 }
 0x637   : > { %v2239_v39 = vpop.xlane.xlu0 %2238 }
 0x638   : > { %8593 = vrcp.f32 %v2239_v39 }
 0x63b   : > { %v2248_v44 = vpop.xlane.xlu0 %2247  ;;  %v2233_v57 = vpop.xlane.xlu1 %2232 }
 0x63c   : > { %8595 = vrcp.f32 %v2233_v57 }
 0x63d   : > { %8597 = vrcp.f32 %v2236_v41 }
 0x63f   : > { %v2242_v4 = vpop.xlane.xlu0 %2241 }
 0x640   : > { %8599 = vrcp.f32 %v2242_v4 }
 0x642   : > { %v8594_v20 = vpop.eup %8593 }
 0x643   : > { %v2251_v14 = vpop.xlane.xlu0 %2250  ;;  %v2245_v33 = vpop.xlane.xlu1 %2244  ;;  %v2263_v12 = vmul.f32 %v8594_v20, %v9638_v60  ;;  %v8252_v20 = vld [vmem:[%s11986_s7 + $0x28] sm:$0xff]  }
 0x644   : > { %8601 = vrcp.f32 %v2251_v14  ;;  %v8251_v14 = vld [vmem:[%s11986_s7 + $0x20] sm:$0xff]  }
 0x645   : > { %8603 = vrcp.f32 %v2245_v33  ;;  %7994 = vmatprep.subr.bf16.mxu1 %v8251_v14 }
 0x646   : > { %v8596_v35 = vpop.eup %8595  ;;  %8605 = vrcp.f32 %v2248_v44  ;;  %7995 = vmatpush3.bf16.msra.mxu1 %v8251_v14 }
 0x647   : > { %v2277_v13 = vpop.permute.xlu0 %2276  ;;  %v2261_v55 = vmul.f32 %v8596_v35, %v9644_v29  ;;  %v8598_v62 = vpop.eup %8597  ;;  %7996 = vmatprep.subr.bf16.mxu1 %v8252_v20 }
 0x648   : > { %7974 = vmatprep.subr.bf16.mxu0 %v2277_v13  ;;  %v2279_v2 = vpop.permute.xlu1 %2278  ;;  %v2262_v37 = vmul.f32 %v8598_v62, %v9604_v6  ;;  %v8253_v62 = vld [vmem:[%s11986_s7 + $0x30] sm:$0xff]  }
 0x649   : > { %7975 = vmatpush3.bf16.msra.mxu0 %v2277_v13  ;;  %v2268_v16 = vpack.c.bf16 %v2261_v55, %v2260_v56 }
 0x64a   : > { %7976 = vmatprep.subr.bf16.mxu0 %v2279_v2  ;;  %v8600_v10 = vpop.eup %8599  ;;  %v2269_v32 = vpack.c.bf16 %v2263_v12, %v2262_v37  ;;  %7997 = vmatpush3.bf16.msra.mxu1 %v8252_v20 }
 0x64b   : > { %7978 = vmatprep.mubr.msk.bf16.mxu0 %vm1327_vm1, %v2268_v16  ;;  %v2264_v47 = vmul.f32 %v8600_v10, %v9650_v52  ;;  %7998 = vmatprep.subr.bf16.mxu1 %v8253_v62 }
 0x64d   : > { %7977 = vmatpush3.bf16.msra.mxu0 %v2279_v2  ;;  %v8254_v2 = vld [vmem:[%s11986_s7 + $0x38] sm:$0xff]  }
 0x64e   : > { %v8602_v48 = vpop.eup %8601  ;;  %7999 = vmatpush3.bf16.msra.mxu1 %v8253_v62  ;;  %v8266_v62 = vld [vmem:[%s11990_s11 + $0x2c] ss:$16 sps:$4 sm:$0xff]  }
 0x64f   : > { %v8604_v50 = vpop.eup %8603  ;;  %v2267_v60 = vmul.f32 %v8602_v48, %v9654_v23  ;;  %8000 = vmatprep.subr.bf16.mxu1 %v8254_v2 }
 0x650   : > { %7979 = vmatmul.mubr.msk.bf16.vlgmr.msra.gmra.mrb[40].mxu0 %vm1327_vm1, %v2269_v32  ;;  %v2265_v29 = vmul.f32 %v8604_v50, %v9656_v51  ;;  %v8606_v40 = vpop.eup %8605 }
 0x651   : > { %v2266_v6 = vmul.f32 %v8606_v40, %v9642_v3 }
 0x652   : > { %v2270_v19 = vpack.c.bf16 %v2265_v29, %v2264_v47  ;;  %8001 = vmatpush3.bf16.msra.mxu1 %v8254_v2  ;;  %v8261_v2 = vld [vmem:[%s11990_s11 + $0x20] ss:$16 sps:$4 sm:$0xff]  }
 0x653   : > { %v2271_v46 = vpack.c.bf16 %v2267_v60, %v2266_v6 }
 0x654   : > { %7982 = vmatprep.mubr.msk.bf16.mxu0 %vm1327_vm1, %v2270_v19 }
 0x658   : > { %7983 = vmatmul.mubr.msk.bf16.gmra.mrb[44].mxu0 %vm1327_vm1, %v2271_v46 }
 0x659   : > { %2910 = vmatprep.mubr.bf16.mxu0 %v12063_v9 }
 0x6c2   : > { %v7896_v49 = vpop.f32.mrb[16].mxu0 }
 0x6c3   : > { %v1466_v54 = vpop.f32.mrb[17].mxu0 }
 0x6c4   : > { %v7897_v7 = vpop.f32.mrb[18].mxu0 }
 0x6c5   : > { %v1498_v61 = vpack.c.bf16 %v7897_v7, %v7896_v49  ;;  %v1469_v52 = vpop.f32.mrb[19].mxu0 }
 0x6c6   : > { %v1497_v5 = vpack.c.bf16 %v1469_v52, %v1466_v54 }
 0x6c7   : > { %1502 = vst.msk [vmem:[#allocation2 + $0x8] sm:$0xff] %vm1249_vm0, %v1498_v61 }
 0x6c8   : > { %1501 = vst.msk [vmem:[#allocation2] sm:$0xff] %vm1249_vm0, %v1497_v5 }
 0x6ca   : > { %v7900_v23 = vpop.f32.mrb[20].mxu0 }
 0x6cb   : > { %v1482_v51 = vpop.f32.mrb[21].mxu0 }
 0x6cc   : > { %v7901_v53 = vpop.f32.mrb[22].mxu0 }
 0x6cd   : > { %v1500_v59 = vpack.c.bf16 %v7901_v53, %v7900_v23  ;;  %v1485_v3 = vpop.f32.mrb[23].mxu0 }
 0x6ce   : > { %v1499_v15 = vpack.c.bf16 %v1485_v3, %v1482_v51 }
 0x6cf   : > { %1504 = vst.msk [vmem:[#allocation2 + $0x18] sm:$0xff] %vm1249_vm0, %v1500_v59 }
 0x6d0   : > { %1503 = vst.msk [vmem:[#allocation2 + $0x10] sm:$0xff] %vm1249_vm0, %v1499_v15 }
 0x6d2   : > { %v7924_v43 = vpop.f32.mrb[24].mxu0 }
 0x6d3   : > { %v1748_v58 = vpop.f32.mrb[25].mxu0 }
 0x6d4   : > { %v7925_v1 = vpop.f32.mrb[26].mxu0 }
 0x6d5   : > { %v1780_v11 = vpack.c.bf16 %v7925_v1, %v7924_v43  ;;  %v1751_v36 = vpop.f32.mrb[27].mxu0 }
 0x6d6   : > { %v1779_v38 = vpack.c.bf16 %v1751_v36, %v1748_v58 }
 0x6d7   : > { %1789 = vrot.lane.b32.xlu0 %v1780_v11, %s12015_s23  ;;  %v7115_v11 = vld [vmem:[%s11987_s8] ss:$0 sm:$0xff] }
 0x6d8   : > { %1787 = vrot.lane.b32.xlu1 %v1779_v38, %s12015_s23 }
 0x6da   : > { %v7928_v63 = vpop.f32.mrb[28].mxu0 }
 0x6db   : > { %v1764_v18 = vpop.f32.mrb[29].mxu0 }
 0x6dc   : > { %v7929_v26 = vpop.f32.mrb[30].mxu0 }
 0x6dd   : > { %v1782_v42 = vpack.c.bf16 %v7929_v26, %v7928_v63  ;;  %v1767_v30 = vpop.f32.mrb[31].mxu0 }
 0x6de   : > { %v1781_v17 = vpack.c.bf16 %v1767_v30, %v1764_v18 }
 0x6ea   : > { %v7952_v34 = vpop.f32.mrb[32].mxu0 }
 0x6eb   : > { %v2039_v41 = vpop.f32.mrb[33].mxu0 }
 0x6ec   : > { %v7953_v39 = vpop.f32.mrb[34].mxu0 }
 0x6ed   : > { %v2071_v44 = vpack.c.bf16 %v7953_v39, %v7952_v34  ;;  %v2042_v57 = vpop.f32.mrb[35].mxu0 }
 0x6ee   : > { %v2070_v4 = vpack.c.bf16 %v2042_v57, %v2039_v41  ;;  %v12068_v41 = vld [vmem:[#allocation3_spill] sm:$0xff] }
 0x6ef   : > { %2080 = vrot.lane.b32.xlu0 %v2071_v44, %s12017_s2  ;;  %v12070_v44 = vld [vmem:[#allocation4_spill] sm:$0xff] }
 0x6f0   : > { %2078 = vrot.lane.b32.xlu1 %v2070_v4, %s12017_s2  ;;  %v12071_v4 = vld [vmem:[#allocation5_spill] sm:$0xff] }
 0x6f2   : > { %v7956_v33 = vpop.f32.mrb[36].mxu0 }
 0x6f3   : > { %v2055_v8 = vpop.f32.mrb[37].mxu0 }
 0x6f4   : > { %v7957_v35 = vpop.f32.mrb[38].mxu0 }
 0x6f5   : > { %v2073_v13 = vpack.c.bf16 %v7957_v35, %v7956_v33  ;;  %v2058_v56 = vpop.f32.mrb[39].mxu0  ;;  %v8257_v35 = vld [vmem:[%s11990_s11 + $0x4] ss:$16 sps:$4 sm:$0xff]  }
 0x6f6   : > { %v2072_v55 = vpack.c.bf16 %v2058_v56, %v2055_v8  ;;  %v8260_v56 = vld [vmem:[%s11990_s11 + $0xc] ss:$16 sps:$4 sm:$0xff]   ;;  %2878 = vmatprep.subr.bf16.mxu0 %v8257_v35  ;;  %v8293_v35 = vld [vmem:[%s11990_s11 + $0xc4] ss:$16 sps:$4 sm:$0xff]  }
 0x6f7   : > { %2951 = vmatprep.subr.bf16.mxu1 %v8260_v56  ;;  %v8291_v56 = vld [vmem:[%s11990_s11 + $0xc0] ss:$16 sps:$4 sm:$0xff]  }
 0x723   : > { %v7980_v12 = vpop.f32.mrb[40].mxu0 }
 0x724   : > { %v2330_v16 = vpop.f32.mrb[41].mxu0 }
 0x725   : > { %v7981_v37 = vpop.f32.mrb[42].mxu0 }
 0x726   : > { %v2362_v10 = vpack.c.bf16 %v7981_v37, %v7980_v12  ;;  %v2333_v48 = vpop.f32.mrb[43].mxu0  ;;  %v8264_v12 = vld [vmem:[%s11990_s11 + $0x28] ss:$16 sps:$4 sm:$0xff]  }
 0x727   : > { %v2361_v32 = vpack.c.bf16 %v2333_v48, %v2330_v16 }
 0x728   : > { %2371 = vrot.lane.b32.xlu0 %v2362_v10, %s12019_s29 }
 0x729   : > { %2369 = vrot.lane.b32.xlu1 %v2361_v32, %s12019_s29 }
 0x72b   : > { %v7984_v50 = vpop.f32.mrb[44].mxu0 }
 0x72c   : > { %1793 = vrot.lane.b32.xlu0 %v1782_v42, %s12015_s23  ;;  %v2346_v47 = vpop.f32.mrb[45].mxu0 }
 0x72d   : > { %1791 = vrot.lane.b32.xlu1 %v1781_v17, %s12015_s23  ;;  %v7985_v29 = vpop.f32.mrb[46].mxu0 }
 0x72e   : > { %v2364_v40 = vpack.c.bf16 %v7985_v29, %v7984_v50  ;;  %v2349_v19 = vpop.f32.mrb[47].mxu0 }
 0x72f   : > { %v2363_v60 = vpack.c.bf16 %v2349_v19, %v2346_v47 }
 0x730   : > { %2084 = vrot.lane.b32.xlu0 %v2073_v13, %s12017_s2  ;;  %v8258_v13 = vld [vmem:[%s11990_s11 + $0x8] ss:$16 sps:$4 sm:$0xff]  }
 0x731   : > { %2082 = vrot.lane.b32.xlu1 %v2072_v55, %s12017_s2  ;;  %v8263_v55 = vld [vmem:[%s11990_s11 + $0x24] ss:$16 sps:$4 sm:$0xff]  }
 0x734   : > { %2375 = vrot.lane.b32.xlu0 %v2364_v40, %s12019_s29 }
 0x735   : > { %2373 = vrot.lane.b32.xlu1 %v2363_v60, %s12019_s29  ;;  %s12103_s29 = smov 32  }
 0x749   : > { %v1790_v6 = vpop.permute.xlu0 %1789 }
 0x74a   : > { %1801 = vst.msk [vmem:[#allocation2 + $0x8] sm:$0xff] %vm1799_vm2, %v1790_v6  ;;  %v1788_v46 = vpop.permute.xlu1 %1787 }
 0x74b   : > { %1800 = vst.msk [vmem:[#allocation2] sm:$0xff] %vm1799_vm2, %v1788_v46 }
 0x761   : > { %v2081_v49 = vpop.permute.xlu0 %2080 }
 0x762   : > { %2092 = vst.msk [vmem:[#allocation2 + $0x8] sm:$0xff] %vm2090_vm3, %v2081_v49  ;;  %v2079_v54 = vpop.permute.xlu1 %2078 }
 0x763   : > { %2091 = vst.msk [vmem:[#allocation2] sm:$0xff] %vm2090_vm3, %v2079_v54 }
 0x79a   : > { %v2372_v7 = vpop.permute.xlu0 %2371 }
 0x79b   : > { %2383 = vst.msk [vmem:[#allocation2 + $0x8] sm:$0xff] %vm2381_vm4, %v2372_v7  ;;  %v2370_v61 = vpop.permute.xlu1 %2369 }
 0x79c   : > { %2382 = vst.msk [vmem:[#allocation2] sm:$0xff] %vm2381_vm4, %v2370_v61 }
 0x79e   : > { %v1794_v52 = vpop.permute.xlu0 %1793 }
 0x79f   : > { %1803 = vst.msk [vmem:[#allocation2 + $0x18] sm:$0xff] %vm1799_vm2, %v1794_v52  ;;  %v1792_v5 = vpop.permute.xlu1 %1791 }
 0x7a0   : > { %1802 = vst.msk [vmem:[#allocation2 + $0x10] sm:$0xff] %vm1799_vm2, %v1792_v5 }
 0x7a2   : > { %v2085_v23 = vpop.permute.xlu0 %2084  ;;  %v2387_v59 = vld [vmem:[#allocation2 + $0x8] sm:$0xff] }
 0x7a3   : > { %2094 = vst.msk [vmem:[#allocation2 + $0x18] sm:$0xff] %vm2090_vm3, %v2085_v23  ;;  %v2083_v51 = vpop.permute.xlu1 %2082  ;;  %v2386_v53 = vld [vmem:[#allocation2] sm:$0xff] }
 0x7a4   : > { %2093 = vst.msk [vmem:[#allocation2 + $0x10] sm:$0xff] %vm2090_vm3, %v2083_v51  ;;  %8002 = vmatprep.mubr.bf16.mxu1 %v2386_v53 }
 0x7a5   : > { %8003 = vmatmul.mubr.bf16.vlgmr.msra.gmra.mrb[48].mxu1 %v2387_v59 }
 0x7a6   : > { %v2376_v3 = vpop.permute.xlu0 %2375  ;;  %2952 = vmatpush1.bf16.msra.mxu1 %v8258_v13  ;;  %v8296_v13 = vld [vmem:[%s11990_s11 + $0xcc] ss:$16 sps:$4 sm:$0xff]  }
 0x7a7   : > { %2385 = vst.msk [vmem:[#allocation2 + $0x18] sm:$0xff] %vm2381_vm4, %v2376_v3  ;;  %v2374_v15 = vpop.permute.xlu1 %2373  ;;  %2953 = vmatprep.subr.bf16.mxu1 %v8266_v62  ;;  %v8299_v62 = vld [vmem:[%s11990_s11 + $0xe4] ss:$16 sps:$4 sm:$0xff]  }
 0x7a8   : > { %2384 = vst.msk [vmem:[#allocation2 + $0x10] sm:$0xff] %vm2381_vm4, %v2374_v15 }
 0x7aa   : > { %2954 = vmatpush1.bf16.msra.mxu1 %v8264_v12  ;;  %v8297_v12 = vld [vmem:[%s11990_s11 + $0xe0] ss:$16 sps:$4 sm:$0xff]  }
 0x7ae   : > { %v2389_v58 = vld [vmem:[#allocation2 + $0x18] sm:$0xff] }
 0x7af   : > { %v2388_v43 = vld [vmem:[#allocation2 + $0x10] sm:$0xff] }
 0x7b0   : > { %8006 = vmatprep.mubr.bf16.mxu1 %v2388_v43 }
 0x7b1   : > { %8007 = vmatmul.mubr.bf16.gmra.mrb[52].mxu1 %v2389_v58 }
 0x7b2   : > { %2983 = vmatprep.mubr.bf16.mxu1 %v12063_v9 }
 0x878   : > { %v8004_v1 = vpop.f32.mrb[48].mxu1 }
 0x879   : > { %v2488_v36 = vpop.f32.mrb[49].mxu1  ;;  %v2521_v17 = vadd.f32 %v8004_v1, %v9082_v22 }
 0x87a   : > { %v2519_v38 = vadd.f32 %v2488_v36, %v9084_v24  ;;  %v8005_v63 = vpop.f32.mrb[50].mxu1 }
 0x87b   : > { %v2491_v18 = vpop.f32.mrb[51].mxu1  ;;  %v2522_v42 = vadd.f32 %v8005_v63, %v9088_v27  ;;  %v9804_v25 = vadd.f32 %v7115_v11, %v2521_v17  ;;  %v8269_v63 = vld [vmem:[%s11990_s11 + $0x44] ss:$16 sps:$4 sm:$0xff]  }
 0x87c   : > { %v9793_v26 = vadd.f32 %v7115_v11, %v2519_v38  ;;  %v2520_v30 = vadd.f32 %v2491_v18, %v9090_v28  ;;  %v8272_v18 = vld [vmem:[%s11990_s11 + $0x4c] ss:$16 sps:$4 sm:$0xff]  }
 0x87d   : > { %v9801_v0 = vadd.f32 %v7115_v11, %v2522_v42  ;;  %12067 = vst [vmem:[#allocation13_spill] sm:$0xff] %v9804_v25  ;;  %v8267_v42 = vld [vmem:[%s11990_s11 + $0x40] ss:$16 sps:$4 sm:$0xff]   ;;  %2955 = vmatprep.subr.bf16.mxu1 %v8272_v18 }
 0x87e   : > { %12064 = vst [vmem:[#allocation10_spill] sm:$0xff] %v9793_v26  ;;  %v9798_v21 = vadd.f32 %v7115_v11, %v2520_v30  ;;  %2544 = vadd.xlane.f32.xlu1 %v9793_v26  ;;  %v8270_v30 = vld [vmem:[%s11990_s11 + $0x48] ss:$16 sps:$4 sm:$0xff]  }
 0x87f   : > { %12066 = vst [vmem:[#allocation12_spill] sm:$0xff] %v9801_v0  ;;  %2956 = vmatpush1.bf16.msra.mxu1 %v8270_v30 }
 0x880   : > { %12065 = vst [vmem:[#allocation11_spill] sm:$0xff] %v9798_v21  ;;  %2546 = vadd.xlane.f32.xlu0 %v9798_v21 }
 0x882   : > { %2550 = vadd.xlane.f32.xlu1 %v9801_v0 }
 0x884   : > { %2548 = vadd.xlane.f32.xlu0 %v9804_v25  ;;  %v8008_v24 = vpop.f32.mrb[52].mxu1 }
 0x885   : > { %v2504_v27 = vpop.f32.mrb[53].mxu1  ;;  %v2525_v45 = vadd.f32 %v8008_v24, %v12068_v41  ;;  %v8275_v24 = vld [vmem:[%s11990_s11 + $0x64] ss:$16 sps:$4 sm:$0xff]   ;;  %v8284_v41 = vld [vmem:[%s11990_s11 + $0x8c] ss:$16 sps:$4 sm:$0xff]  }
 0x886   : > { %v2523_v28 = vadd.f32 %v2504_v27, %v9094_v31  ;;  %v8009_v34 = vpop.f32.mrb[54].mxu1  ;;  %v8255_v31 = vld [vmem:[%s11990_s11] ss:$16 sps:$4 sm:$0xff]   ;;  %v8278_v27 = vld [vmem:[%s11990_s11 + $0x6c] ss:$16 sps:$4 sm:$0xff]  }
 0x887   : > { %v2507_v22 = vpop.f32.mrb[55].mxu1  ;;  %v2526_v14 = vadd.f32 %v8009_v34, %v12071_v4  ;;  %v9817_v8 = vadd.f32 %v7115_v11, %v2525_v45  ;;  %2879 = vmatpush1.bf16.msra.mxu0 %v8255_v31  ;;  %v8276_v34 = vld [vmem:[%s11990_s11 + $0x68] ss:$16 sps:$4 sm:$0xff]   ;;  %2957 = vmatprep.subr.bf16.mxu1 %v8278_v27  ;;  %v8279_v45 = vld [vmem:[%s11990_s11 + $0x80] ss:$16 sps:$4 sm:$0xff]  }
 0x888   : > { %v9810_v39 = vadd.f32 %v7115_v11, %v2523_v28  ;;  %v2524_v57 = vadd.f32 %v2507_v22, %v12070_v44  ;;  %2880 = vmatprep.subr.bf16.mxu0 %v8263_v55  ;;  %v8273_v28 = vld [vmem:[%s11990_s11 + $0x60] ss:$16 sps:$4 sm:$0xff]   ;;  %2958 = vmatpush1.bf16.msra.mxu1 %v8276_v34  ;;  %v8281_v22 = vld [vmem:[%s11990_s11 + $0x84] ss:$16 sps:$4 sm:$0xff]   ;;  %v8282_v44 = vld [vmem:[%s11990_s11 + $0x88] ss:$16 sps:$4 sm:$0xff]  }
 0x889   : > { %12073 = vst [vmem:[#allocation5_spill] sm:$0xff] %v9817_v8  ;;  %v9820_v20 = vadd.f32 %v7115_v11, %v2526_v14  ;;  %2959 = vmatprep.subr.bf16.mxu1 %v8284_v41  ;;  %v8290_v4 = vld [vmem:[%s11990_s11 + $0xac] ss:$16 sps:$4 sm:$0xff]   ;;  %v8285_v14 = vld [vmem:[%s11990_s11 + $0xa0] ss:$16 sps:$4 sm:$0xff]  }
 0x88a   : > { %12069 = vst [vmem:[#allocation3_spill] sm:$0xff] %v9810_v39  ;;  %v9814_v33 = vadd.f32 %v7115_v11, %v2524_v57  ;;  %2552 = vadd.xlane.f32.xlu0 %v9810_v39  ;;  %v8287_v57 = vld [vmem:[%s11990_s11 + $0xa4] ss:$16 sps:$4 sm:$0xff]   ;;  %v8288_v31 = vld [vmem:[%s11990_s11 + $0xa8] ss:$16 sps:$4 sm:$0xff]  }
 0x88b   : > { %12074 = vst [vmem:[#allocation14_spill] sm:$0xff] %v9820_v20  ;;  %2881 = vmatpush1.bf16.msra.mxu0 %v8261_v2  ;;  %v8294_v55 = vld [vmem:[%s11990_s11 + $0xc8] ss:$16 sps:$4 sm:$0xff]   ;;  %v8302_v2 = vld [vmem:[%s11990_s11 + $0xec] ss:$16 sps:$4 sm:$0xff]  }
 0x88c   : > { %12072 = vst [vmem:[#allocation4_spill] sm:$0xff] %v9814_v33  ;;  %2554 = vadd.xlane.f32.xlu1 %v9814_v33  ;;  %2882 = vmatprep.subr.bf16.mxu0 %v8269_v63  ;;  %v7117_v27 = vld [vmem:[%s11989_s10] ss:$0 sm:$0xff] }
 0x88d   : > { %2960 = vmatpush1.bf16.msra.mxu1 %v8282_v44 }
 0x88e   : > { %2556 = vadd.xlane.f32.xlu0 %v9817_v8  ;;  %2961 = vmatprep.subr.bf16.mxu1 %v8290_v4 }
 0x88f   : > { %2883 = vmatpush1.bf16.msra.mxu0 %v8267_v42 }
 0x890   : > { %2558 = vadd.xlane.f32.xlu1 %v9820_v20  ;;  %2884 = vmatprep.subr.bf16.mxu0 %v8275_v24 }
 0x891   : > { %2962 = vmatpush1.bf16.msra.mxu1 %v8288_v31 }
 0x892   : > { %2963 = vmatprep.subr.bf16.mxu1 %v8296_v13 }
 0x893   : > { %2885 = vmatpush1.bf16.msra.mxu0 %v8273_v28 }
 0x894   : > { %2886 = vmatprep.subr.bf16.mxu0 %v8281_v22 }
 0x895   : > { %2964 = vmatpush1.bf16.msra.mxu1 %v8294_v55 }
 0x896   : > { %2965 = vmatprep.subr.bf16.mxu1 %v8302_v2 }
 0x897   : > { %2887 = vmatpush1.bf16.msra.mxu0 %v8279_v45 }
 0x898   : > { %2888 = vmatprep.subr.bf16.mxu0 %v8287_v57 }
 0x89b   : > { %2889 = vmatpush1.bf16.msra.mxu0 %v8285_v14 }
 0x89c   : > { %2890 = vmatprep.subr.bf16.mxu0 %v8293_v35 }
 0x89f   : > { %2891 = vmatpush1.bf16.msra.mxu0 %v8291_v56 }
 0x8a0   : > { %2892 = vmatprep.subr.bf16.mxu0 %v8299_v62 }
 0x8a3   : > { %2893 = vmatpush1.bf16.msra.mxu0 %v8297_v12 }
 0x90b   : > { %v2545_v16 = vpop.xlane.xlu1 %2544 }
 0x90c   : > { %v2560_v37 = vmul.f32 0.0078125, %v2545_v16  ;;  %v8300_v16 = vld [vmem:[%s11990_s11 + $0xe8] ss:$16 sps:$4 sm:$0xff]  }
 0x90d   : > { %v2547_v10 = vpop.xlane.xlu0 %2546  ;;  %2966 = vmatpush1.bf16.msra.mxu1 %v8300_v16 }
 0x90e   : > { %v9849_v48 = vsub.f32 %v9793_v26, %v2560_v37  ;;  %v2561_v32 = vmul.f32 0.0078125, %v2547_v10 }
 0x90f   : > { %v2551_v50 = vpop.xlane.xlu1 %2550 }
 0x910   : > { %v9852_v47 = vsub.f32 %v9798_v21, %v2561_v32  ;;  %v2563_v29 = vmul.f32 0.0078125, %v2551_v50  ;;  %v2576_v40 = vmul.f32 %v9849_v48, %v9849_v48 }
 0x911   : > { %v2549_v19 = vpop.xlane.xlu0 %2548 }
 0x912   : > { %v9857_v60 = vsub.f32 %v9801_v0, %v2563_v29  ;;  %v2562_v6 = vmul.f32 0.0078125, %v2549_v19  ;;  %2584 = vadd.xlane.f32.xlu0 %v2576_v40  ;;  %v2577_v46 = vmul.f32 %v9852_v47, %v9852_v47 }
 0x914   : > { %v9862_v49 = vsub.f32 %v9804_v25, %v2562_v6  ;;  %2586 = vadd.xlane.f32.xlu1 %v2577_v46  ;;  %v2579_v7 = vmul.f32 %v9857_v60, %v9857_v60 }
 0x916   : > { %v2578_v54 = vmul.f32 %v9862_v49, %v9862_v49 }
 0x917   : > { %v2553_v61 = vpop.xlane.xlu0 %2552 }
 0x918   : > { %v2564_v52 = vmul.f32 0.0078125, %v2553_v61  ;;  %2588 = vadd.xlane.f32.xlu0 %v2578_v54  ;;  %2590 = vadd.xlane.f32.xlu1 %v2579_v7 }
 0x919   : > { %v2555_v5 = vpop.xlane.xlu1 %2554 }
 0x91a   : > { %v9869_v23 = vsub.f32 %v9810_v39, %v2564_v52  ;;  %v2565_v51 = vmul.f32 0.0078125, %v2555_v5 }
 0x91b   : > { %v2557_v53 = vpop.xlane.xlu0 %2556 }
 0x91c   : > { %v9872_v59 = vsub.f32 %v9814_v33, %v2565_v51  ;;  %v2566_v3 = vmul.f32 0.0078125, %v2557_v53  ;;  %v2580_v15 = vmul.f32 %v9869_v23, %v9869_v23 }
 0x91d   : > { %v2559_v43 = vpop.xlane.xlu1 %2558 }
 0x91e   : > { %v9877_v58 = vsub.f32 %v9817_v8, %v2566_v3  ;;  %v2567_v1 = vmul.f32 0.0078125, %v2559_v43  ;;  %2592 = vadd.xlane.f32.xlu0 %v2580_v15  ;;  %v2581_v11 = vmul.f32 %v9872_v59, %v9872_v59  ;;  %v7116_v3 = vld [vmem:[%s11988_s9] ss:$0 sm:$0xff] }
 0x920   : > { %v9882_v36 = vsub.f32 %v9820_v20, %v2567_v1  ;;  %2594 = vadd.xlane.f32.xlu1 %v2581_v11  ;;  %v2582_v38 = vmul.f32 %v9877_v58, %v9877_v58 }
 0x922   : > { %2596 = vadd.xlane.f32.xlu0 %v2582_v38  ;;  %v2583_v17 = vmul.f32 %v9882_v36, %v9882_v36 }
 0x924   : > { %2598 = vadd.xlane.f32.xlu1 %v2583_v17 }
 0x99f   : > { %v2585_v37 = vpop.xlane.xlu0 %2584 }
 0x9a0   : > { %v2600_v10 = vmul.f32 0.0078125, %v2585_v37 }
 0x9a1   : > { %v2587_v32 = vpop.xlane.xlu1 %2586 }
 0x9a2   : > { %v2608_v50 = vadd.f32 1e-06, %v2600_v10  ;;  %v2601_v29 = vmul.f32 0.0078125, %v2587_v32 }
 0x9a4   : > { %8607 = vrsqrt.f32 %v2608_v50  ;;  %v2609_v40 = vadd.f32 1e-06, %v2601_v29 }
 0x9a5   : > { %v2589_v19 = vpop.xlane.xlu0 %2588  ;;  %v2591_v6 = vpop.xlane.xlu1 %2590 }
 0x9a6   : > { %8609 = vrsqrt.f32 %v2609_v40  ;;  %v2602_v46 = vmul.f32 0.0078125, %v2589_v19  ;;  %v2603_v54 = vmul.f32 0.0078125, %v2591_v6 }
 0x9a8   : > { %v2610_v7 = vadd.f32 1e-06, %v2602_v46  ;;  %v2611_v61 = vadd.f32 1e-06, %v2603_v54  ;;  %v8305_v54 = vld [vmem:[%s11992_s13] sm:$0xff]  }
 0x9aa   : > { %8611 = vrsqrt.f32 %v2610_v7  ;;  %v8306_v7 = vld [vmem:[%s11992_s13 + $0x80] sm:$0xff]  }
 0x9ab   : > { %8613 = vrsqrt.f32 %v2611_v61  ;;  %v2593_v52 = vpop.xlane.xlu0 %2592  ;;  %v8307_v61 = vld [vmem:[%s11992_s13 + $0x48] sm:$0xff]  }
 0x9ac   : > { %v2604_v5 = vmul.f32 0.0078125, %v2593_v52  ;;  %v8308_v52 = vld [vmem:[%s11992_s13 + $0xc8] sm:$0xff]  }
 0x9ad   : > { %v2595_v51 = vpop.xlane.xlu1 %2594 }
 0x9ae   : > { %v8608_v53 = vpop.eup %8607  ;;  %v2612_v15 = vadd.f32 1e-06, %v2604_v5  ;;  %v2605_v43 = vmul.f32 0.0078125, %v2595_v51  ;;  %v8309_v5 = vld [vmem:[%s11992_s13 + $0x8] sm:$0xff]  }
 0x9af   : > { %v2624_v1 = vmul.f32 %v8608_v53, %v9849_v48  ;;  %v2597_v11 = vpop.xlane.xlu0 %2596  ;;  %v8310_v51 = vld [vmem:[%s11992_s13 + $0x88] sm:$0xff]   ;;  %v8311_v53 = vld [vmem:[%s11992_s13 + $0x50] sm:$0xff]  }
 0x9b0   : > { %v8610_v38 = vpop.eup %8609  ;;  %8615 = vrsqrt.f32 %v2612_v15  ;;  %v2613_v63 = vadd.f32 1e-06, %v2605_v43  ;;  %v2606_v18 = vmul.f32 0.0078125, %v2597_v11  ;;  %v8313_v15 = vld [vmem:[%s11992_s13 + $0x10] sm:$0xff]   ;;  %v8316_v11 = vld [vmem:[%s11992_s13 + $0xd8] sm:$0xff]  }
 0x9b1   : > { %v2638_v42 = vmul.f32 %v7116_v3, %v2624_v1  ;;  %v2625_v30 = vmul.f32 %v8610_v38, %v9852_v47  ;;  %v2599_v17 = vpop.xlane.xlu1 %2598  ;;  %v8314_v43 = vld [vmem:[%s11992_s13 + $0x90] sm:$0xff]   ;;  %v8315_v1 = vld [vmem:[%s11992_s13 + $0x58] sm:$0xff]  }
 0x9b2   : > { %8617 = vrsqrt.f32 %v2613_v63  ;;  %v2607_v24 = vmul.f32 0.0078125, %v2599_v17  ;;  %v2614_v22 = vadd.f32 1e-06, %v2606_v18  ;;  %v8317_v38 = vld [vmem:[%s11992_s13 + $0x18] sm:$0xff]   ;;  %v8319_v18 = vld [vmem:[%s11992_s13 + $0x60] sm:$0xff]  }
 0x9b3   : > { %v2639_v28 = vmul.f32 %v7116_v3, %v2625_v30  ;;  %v2652_v45 = vadd.f32 %v7117_v27, %v2638_v42  ;;  %v8318_v63 = vld [vmem:[%s11992_s13 + $0x98] sm:$0xff]   ;;  %v8320_v42 = vld [vmem:[%s11992_s13 + $0xe0] sm:$0xff]  }
 0x9b4   : > { %v8612_v34 = vpop.eup %8611  ;;  %v2615_v41 = vadd.f32 1e-06, %v2607_v24  ;;  %v8321_v30 = vld [vmem:[%s11992_s13 + $0x20] sm:$0xff]   ;;  %v8323_v24 = vld [vmem:[%s11992_s13 + $0x68] sm:$0xff]  }
 0x9b5   : > { %v8614_v48 = vpop.eup %8613  ;;  %v2653_v44 = vadd.f32 %v7117_v27, %v2639_v28  ;;  %v2626_v57 = vmul.f32 %v8612_v34, %v9862_v49  ;;  %v8322_v17 = vld [vmem:[%s11992_s13 + $0xa0] sm:$0xff]   ;;  %v8325_v28 = vld [vmem:[%s11992_s13 + $0x28] sm:$0xff]  }
 0x9b6   : > { %8619 = vrsqrt.f32 %v2615_v41  ;;  %v2627_v4 = vmul.f32 %v8614_v48, %v9857_v60  ;;  %v8326_v34 = vld [vmem:[%s11992_s13 + $0xa8] sm:$0xff]   ;;  %v8328_v41 = vld [vmem:[%s11992_s13 + $0xf0] sm:$0xff]  }
 0x9b7   : > { %v2692_v47 = vpack.c.bf16 %v2653_v44, %v2652_v45  ;;  %v2640_v14 = vmul.f32 %v7116_v3, %v2626_v57  ;;  %8621 = vrsqrt.f32 %v2614_v22  ;;  %v8327_v22 = vld [vmem:[%s11992_s13 + $0x70] sm:$0xff]   ;;  %v8331_v44 = vld [vmem:[%s11992_s13 + $0x78] sm:$0xff]  }
 0x9b8   : > { %v2641_v31 = vmul.f32 %v7116_v3, %v2627_v4  ;;  %v8329_v48 = vld [vmem:[%s11992_s13 + $0x30] sm:$0xff]   ;;  %v8332_v57 = vld [vmem:[%s11992_s13 + $0xf8] sm:$0xff]  }
 0x9b9   : > { %2911 = vmatmul.mubr.bf16.vlgmr.msra.gmra.mrb[48].mxu0 %v2692_v47  ;;  %2984 = vmatmul.mubr.bf16.vlgmr.msra.gmra.mrb[56].mxu1 %v2692_v47  ;;  %v2654_v13 = vadd.f32 %v7117_v27, %v2640_v14  ;;  %v8330_v45 = vld [vmem:[%s11992_s13 + $0xb0] sm:$0xff]   ;;  %v8333_v4 = vld [vmem:[%s11992_s13 + $0x38] sm:$0xff]   ;;  %v2696_v14 = vld [vmem:[%s11991_s12] sm:$0xf] }
 0x9ba   : > { %v8616_v35 = vpop.eup %8615  ;;  %2920 = vmatprep.mubr.bf16.mxu0 %v12063_v9  ;;  %2993 = vmatprep.mubr.bf16.mxu1 %v12063_v9  ;;  %v2655_v56 = vadd.f32 %v7117_v27, %v2641_v31  ;;  %v8334_v47 = vld [vmem:[%s11992_s13 + $0xb8] sm:$0xff]  }
 0x9bb   : > { %v2628_v62 = vmul.f32 %v8616_v35, %v9869_v23  ;;  %v12075_v31 = vld [vmem:[#allocation6_spill] sm:$0xff] }
 0x9bc   : > { %v8618_v55 = vpop.eup %8617  ;;  %v2693_v2 = vpack.c.bf16 %v2655_v56, %v2654_v13  ;;  %v12021_v35 = vsub.s32 3, %v12075_v31  ;;  %v12076_v13 = vld [vmem:[#allocation7_spill] sm:$0xff] }
 0x9bd   : > { %v2629_v49 = vmul.f32 %v8618_v55, %v9872_v59  ;;  %v2642_v16 = vmul.f32 %v7116_v3, %v2628_v62  ;;  %v10081_v56 = vrot.slane %v2696_v14, %v12076_v13  ;;  %v12077_v55 = vld [vmem:[#allocation9_spill] sm:$0xff] }
 0x9be   : > { %v10084_v62 = vrot.slane %v2696_v14, %v12077_v55 }
 0x9bf   : > { %v2643_v60 = vmul.f32 %v7116_v3, %v2629_v49  ;;  %v2656_v50 = vadd.f32 %v7117_v27, %v2642_v16  ;;  %v12078_v49 = vld [vmem:[#allocation8_spill] sm:$0xff] }
 0x9c0   : > { %v8620_v12 = vpop.eup %8619 }
 0x9c1   : > { %2921 = vmatmul.mubr.bf16.gmra.mrb[52].mxu0 %v2693_v2  ;;  %2994 = vmatmul.mubr.bf16.gmra.mrb[60].mxu1 %v2693_v2  ;;  %v8622_v37 = vpop.eup %8621  ;;  %v2657_v10 = vadd.f32 %v7117_v27, %v2643_v60  ;;  %v2631_v32 = vmul.f32 %v8620_v12, %v9882_v36  ;;  %v8303_v36 = vld [vmem:[%s11992_s13 + $0x40] sm:$0xff]   ;;  %v10087_v2 = vrot.slane %v2696_v14, %v12078_v49 }
 0x9c2   : > { %2930 = vmatprep.mubr.bf16.mxu0 %v12063_v9  ;;  %3003 = vmatprep.mubr.bf16.mxu1 %v12063_v9  ;;  %v2630_v29 = vmul.f32 %v8622_v37, %v9877_v58  ;;  %v8304_v58 = vld [vmem:[%s11992_s13 + $0xc0] sm:$0xff]   ;;  %v10091_v60 = vrot.slane %v2696_v14, %v12021_v35 }
 0x9c3   : > { %v2694_v23 = vpack.c.bf16 %v2657_v10, %v2656_v50  ;;  %v2645_v40 = vmul.f32 %v7116_v3, %v2631_v32  ;;  %7574 = vmatprep.subr.bf16.mxu0 %v8303_v36  ;;  %7614 = vmatprep.subr.bf16.mxu1 %v8304_v58 }
 0x9c4   : > { %v2644_v59 = vmul.f32 %v7116_v3, %v2630_v29  ;;  %7575 = vmatpush3.bf16.msra.mxu0 %v8305_v54  ;;  %7615 = vmatpush3.bf16.msra.mxu1 %v8306_v7  ;;  %v8312_v3 = vld [vmem:[%s11992_s13 + $0xd0] sm:$0xff]  }
 0x9c5   : > { %v2659_v19 = vadd.f32 %v7117_v27, %v2645_v40  ;;  %7576 = vmatprep.subr.bf16.mxu0 %v8307_v61  ;;  %7616 = vmatprep.subr.bf16.mxu1 %v8308_v52 }
 0x9c6   : > { %v2658_v6 = vadd.f32 %v7117_v27, %v2644_v59  ;;  %v8324_v27 = vld [vmem:[%s11992_s13 + $0xe8] sm:$0xff]  }
 0x9c8   : > { %v2695_v46 = vpack.c.bf16 %v2659_v19, %v2658_v6  ;;  %7577 = vmatpush3.bf16.msra.mxu0 %v8309_v5  ;;  %7617 = vmatpush3.bf16.msra.mxu1 %v8310_v51 }
 0x9c9   : > { %2931 = vmatmul.mubr.bf16.gmra.mrb[56].mxu0 %v2694_v23  ;;  %3004 = vmatmul.mubr.bf16.gmra.mrb[64].mxu1 %v2694_v23 }
 0x9ca   : > { %2940 = vmatprep.mubr.bf16.mxu0 %v12063_v9  ;;  %3013 = vmatprep.mubr.bf16.mxu1 %v12063_v9 }
 0x9cb   : > { %7578 = vmatprep.subr.bf16.mxu0 %v8311_v53  ;;  %7618 = vmatprep.subr.bf16.mxu1 %v8312_v3 }
 0x9cc   : > { %7579 = vmatpush3.bf16.msra.mxu0 %v8313_v15  ;;  %7619 = vmatpush3.bf16.msra.mxu1 %v8314_v43 }
 0x9cd   : > { %7580 = vmatprep.subr.bf16.mxu0 %v8315_v1  ;;  %7620 = vmatprep.subr.bf16.mxu1 %v8316_v11 }
 0x9d0   : > { %7581 = vmatpush3.bf16.msra.mxu0 %v8317_v38  ;;  %7621 = vmatpush3.bf16.msra.mxu1 %v8318_v63 }
 0x9d1   : > { %2941 = vmatmul.mubr.bf16.gmra.mrb[60].mxu0 %v2695_v46  ;;  %3014 = vmatmul.mubr.bf16.gmra.mrb[68].mxu1 %v2695_v46 }
 0x9d2   : > { %7582 = vmatprep.subr.bf16.mxu0 %v8319_v18  ;;  %7622 = vmatprep.subr.bf16.mxu1 %v8320_v42 }
 0x9d4   : > { %7583 = vmatpush3.bf16.msra.mxu0 %v8321_v30  ;;  %7623 = vmatpush3.bf16.msra.mxu1 %v8322_v17 }
 0x9d5   : > { %7584 = vmatprep.subr.bf16.mxu0 %v8323_v24  ;;  %7624 = vmatprep.subr.bf16.mxu1 %v8324_v27 }
 0x9d8   : > { %7585 = vmatpush3.bf16.msra.mxu0 %v8325_v28  ;;  %7625 = vmatpush3.bf16.msra.mxu1 %v8326_v34 }
 0x9d9   : > { %7586 = vmatprep.subr.bf16.mxu0 %v8327_v22  ;;  %7626 = vmatprep.subr.bf16.mxu1 %v8328_v41 }
 0x9dc   : > { %7587 = vmatpush3.bf16.msra.mxu0 %v8329_v48  ;;  %7627 = vmatpush3.bf16.msra.mxu1 %v8330_v45 }
 0x9dd   : > { %7588 = vmatprep.subr.bf16.mxu0 %v8331_v44  ;;  %7628 = vmatprep.subr.bf16.mxu1 %v8332_v57 }
 0x9e0   : > { %7589 = vmatpush3.bf16.msra.mxu0 %v8333_v4  ;;  %7629 = vmatpush3.bf16.msra.mxu1 %v8334_v47 }
 0xa8c   : > { %v2912_v12 = vpop.f32.mrb[48].mxu0  ;;  %v2985_v16 = vpop.f32.mrb[56].mxu1 }
 0xa8d   : > { %v10094_v37 = vadd.f32 %v2912_v12, %v10081_v56  ;;  %v10097_v10 = vadd.f32 %v2985_v16, %v10084_v62  ;;  %v2914_v32 = vpop.f32.mrb[49].mxu0  ;;  %v2987_v50 = vpop.f32.mrb[57].mxu1 }
 0xa8e   : > { %v10100_v29 = vadd.f32 %v2914_v32, %v10087_v2  ;;  %v10103_v23 = vadd.f32 %v2987_v50, %v10091_v60  ;;  %v2916_v40 = vpop.f32.mrb[50].mxu0  ;;  %v2989_v59 = vpop.f32.mrb[58].mxu1 }
 0xa8f   : > { %v3024_v19 = vmul.f32 %v10094_v37, %v10094_v37  ;;  %v3026_v6 = vmul.f32 %v10097_v10, %v10097_v10  ;;  %v10110_v46 = vadd.f32 %v2916_v40, %v10081_v56  ;;  %v10113_v36 = vadd.f32 %v2989_v59, %v10084_v62  ;;  %v2918_v58 = vpop.f32.mrb[51].mxu0  ;;  %v2991_v54 = vpop.f32.mrb[59].mxu1 }
 0xa90   : > { %v3025_v7 = vmul.f32 %v10100_v29, %v10100_v29  ;;  %v3027_v61 = vmul.f32 %v10103_v23, %v10103_v23  ;;  %v10120_v52 = vadd.f32 %v2918_v58, %v10087_v2  ;;  %v10123_v5 = vadd.f32 %v2991_v54, %v10091_v60 }
 0xa91   : > { %v3056_v51 = vmul.f32 %v3024_v19, %v10094_v37  ;;  %v3058_v53 = vmul.f32 %v3026_v6, %v10097_v10  ;;  %v3028_v3 = vmul.f32 %v10110_v46, %v10110_v46  ;;  %v3030_v15 = vmul.f32 %v10113_v36, %v10113_v36 }
 0xa92   : > { %v3057_v43 = vmul.f32 %v3025_v7, %v10100_v29  ;;  %v3059_v1 = vmul.f32 %v3027_v61, %v10103_v23  ;;  %v3029_v11 = vmul.f32 %v10120_v52, %v10120_v52  ;;  %v3031_v38 = vmul.f32 %v10123_v5, %v10123_v5 }
 0xa93   : > { %v3088_v63 = vmul.f32 0.044715, %v3056_v51  ;;  %v3090_v18 = vmul.f32 0.044715, %v3058_v53  ;;  %v3060_v42 = vmul.f32 %v3028_v3, %v10110_v46  ;;  %v3062_v30 = vmul.f32 %v3030_v15, %v10113_v36 }
 0xa94   : > { %v3089_v17 = vmul.f32 0.044715, %v3057_v43  ;;  %v3091_v24 = vmul.f32 0.044715, %v3059_v1  ;;  %v3061_v27 = vmul.f32 %v3029_v11, %v10120_v52  ;;  %v3063_v28 = vmul.f32 %v3031_v38, %v10123_v5  ;;  %v2922_v34 = vpop.f32.mrb[52].mxu0  ;;  %v2995_v22 = vpop.f32.mrb[60].mxu1 }
 0xa95   : > { %v3120_v41 = vadd.f32 %v3088_v63, %v10094_v37  ;;  %v3122_v48 = vadd.f32 %v3090_v18, %v10097_v10  ;;  %v3092_v45 = vmul.f32 0.044715, %v3060_v42  ;;  %v3094_v44 = vmul.f32 0.044715, %v3062_v30  ;;  %v2924_v57 = vpop.f32.mrb[53].mxu0  ;;  %v2997_v4 = vpop.f32.mrb[61].mxu1 }
 0xa96   : > { %v3121_v47 = vadd.f32 %v3089_v17, %v10100_v29  ;;  %v3123_v14 = vadd.f32 %v3091_v24, %v10103_v23  ;;  %v3093_v12 = vmul.f32 0.044715, %v3061_v27  ;;  %v3095_v16 = vmul.f32 0.044715, %v3063_v28  ;;  %v2926_v32 = vpop.f32.mrb[54].mxu0  ;;  %v2999_v50 = vpop.f32.mrb[62].mxu1 }
 0xa97   : > { %v3152_v40 = vmul.f32 0.7978846, %v3120_v41  ;;  %v3154_v59 = vmul.f32 0.7978846, %v3122_v48  ;;  %v3124_v19 = vadd.f32 %v3092_v45, %v10110_v46  ;;  %v3126_v6 = vadd.f32 %v3094_v44, %v10113_v36  ;;  %v2928_v58 = vpop.f32.mrb[55].mxu0  ;;  %v3001_v54 = vpop.f32.mrb[63].mxu1 }
 0xa98   : > { %v3153_v7 = vmul.f32 0.7978846, %v3121_v47  ;;  %v3155_v61 = vmul.f32 0.7978846, %v3123_v14  ;;  %v3125_v51 = vadd.f32 %v3093_v12, %v10120_v52  ;;  %v3127_v53 = vadd.f32 %v3095_v16, %v10123_v5 }
 0xa99   : > { %8623 = vtanh.f32 %v3152_v40  ;;  %v3156_v3 = vmul.f32 0.7978846, %v3124_v19  ;;  %v3158_v15 = vmul.f32 0.7978846, %v3126_v6  ;;  %v10150_v43 = vadd.f32 %v2922_v34, %v10081_v56 }
 0xa9a   : > { %8625 = vtanh.f32 %v3154_v59  ;;  %v3157_v1 = vmul.f32 0.7978846, %v3125_v51  ;;  %v3159_v11 = vmul.f32 0.7978846, %v3127_v53  ;;  %v10153_v38 = vadd.f32 %v2995_v22, %v10084_v62 }
 0xa9b   : > { %8627 = vtanh.f32 %v3153_v7  ;;  %v3032_v63 = vmul.f32 %v10150_v43, %v10150_v43  ;;  %v10158_v18 = vadd.f32 %v2924_v57, %v10087_v2  ;;  %v10161_v42 = vadd.f32 %v2997_v4, %v10091_v60 }
 0xa9c   : > { %8629 = vtanh.f32 %v3155_v61  ;;  %v3034_v30 = vmul.f32 %v10153_v38, %v10153_v38  ;;  %v10166_v17 = vadd.f32 %v2926_v32, %v10081_v56  ;;  %v10169_v24 = vadd.f32 %v2999_v50, %v10084_v62  ;;  %v10171_v27 = vpop.f32.mrb[56].mxu0  ;;  %v10173_v28 = vpop.f32.mrb[64].mxu1 }
 0xa9d   : > { %8631 = vtanh.f32 %v3156_v3  ;;  %v3064_v34 = vmul.f32 %v3032_v63, %v10150_v43  ;;  %v3033_v22 = vmul.f32 %v10158_v18, %v10158_v18  ;;  %v3035_v41 = vmul.f32 %v10161_v42, %v10161_v42  ;;  %v10180_v48 = vpop.f32.mrb[57].mxu0  ;;  %v10182_v45 = vpop.f32.mrb[65].mxu1 }
 0xa9e   : > { %8633 = vtanh.f32 %v3158_v15  ;;  %v3066_v44 = vmul.f32 %v3034_v30, %v10153_v38  ;;  %v3036_v57 = vmul.f32 %v10166_v17, %v10166_v17  ;;  %v3038_v4 = vmul.f32 %v10169_v24, %v10169_v24  ;;  %v10189_v47 = vpop.f32.mrb[58].mxu0  ;;  %v10191_v14 = vpop.f32.mrb[66].mxu1 }
 0xa9f   : > { %8635 = vtanh.f32 %v3157_v1  ;;  %v3096_v12 = vmul.f32 0.044715, %v3064_v34  ;;  %v3065_v16 = vmul.f32 %v3033_v22, %v10158_v18  ;;  %v3067_v32 = vmul.f32 %v3035_v41, %v10161_v42  ;;  %v10195_v50 = vpop.f32.mrb[59].mxu0  ;;  %v10197_v40 = vpop.f32.mrb[67].mxu1 }
 0xaa0   : > { %8637 = vtanh.f32 %v3159_v11  ;;  %v3098_v59 = vmul.f32 0.044715, %v3066_v44  ;;  %v3068_v19 = vmul.f32 %v3036_v57, %v10166_v17  ;;  %v3070_v6 = vmul.f32 %v3038_v4, %v10169_v24 }
 0xaa1   : > { %v3128_v7 = vadd.f32 %v3096_v12, %v10150_v43  ;;  %v3097_v61 = vmul.f32 0.044715, %v3065_v16  ;;  %v3099_v51 = vmul.f32 0.044715, %v3067_v32  ;;  %v10203_v53 = vadd.f32 %v2928_v58, %v10087_v2 }
 0xaa2   : > { %v3130_v3 = vadd.f32 %v3098_v59, %v10153_v38  ;;  %v3100_v15 = vmul.f32 0.044715, %v3068_v19  ;;  %v3102_v1 = vmul.f32 0.044715, %v3070_v6  ;;  %v10207_v63 = vadd.f32 %v3001_v54, %v10091_v60 }
 0xaa3   : > { %v8624_v11 = vpop.eup %8623  ;;  %v3160_v30 = vmul.f32 0.7978846, %v3128_v7  ;;  %v3129_v34 = vadd.f32 %v3097_v61, %v10158_v18  ;;  %v3131_v22 = vadd.f32 %v3099_v51, %v10161_v42  ;;  %v3037_v41 = vmul.f32 %v10203_v53, %v10203_v53 }
 0xaa4   : > { %v8626_v44 = vpop.eup %8625  ;;  %v3216_v57 = vadd.f32 1.0, %v8624_v11  ;;  %v3162_v58 = vmul.f32 0.7978846, %v3130_v3  ;;  %v3132_v4 = vadd.f32 %v3100_v15, %v10166_v17  ;;  %v3134_v12 = vadd.f32 %v3102_v1, %v10169_v24  ;;  %v10215_v16 = vpop.f32.mrb[60].mxu0 }
 0xaa5   : > { %v10217_v54 = vpop.f32.mrb[68].mxu1  ;;  %v10219_v32 = vpop.eup %8627  ;;  %v3218_v59 = vadd.f32 1.0, %v8626_v44  ;;  %8639 = vtanh.f32 %v3160_v30  ;;  %v3161_v19 = vmul.f32 0.7978846, %v3129_v34  ;;  %v3163_v6 = vmul.f32 0.7978846, %v3131_v22 }
 0xaa6   : > { %v10221_v7 = vpop.f32.mrb[61].mxu0  ;;  %v10223_v61 = vpop.eup %8629  ;;  %v3248_v51 = vmul.f32 0.5, %v3216_v57  ;;  %8641 = vtanh.f32 %v3162_v58  ;;  %v3164_v3 = vmul.f32 0.7978846, %v3132_v4  ;;  %v3166_v15 = vmul.f32 0.7978846, %v3134_v12 }
 0xaa7   : > { %v10225_v11 = vpop.f32.mrb[69].mxu1  ;;  %v8632_v1 = vpop.eup %8631  ;;  %v3250_v35 = vmul.f32 0.5, %v3218_v59  ;;  %8643 = vtanh.f32 %v3161_v19  ;;  %v3069_v31 = vmul.f32 %v3037_v41, %v10203_v53  ;;  %v3039_v30 = vmul.f32 %v10207_v63, %v10207_v63 }
 0xaa8   : > { %v10230_v34 = vpop.f32.mrb[62].mxu0  ;;  %v10232_v22 = vpop.f32.mrb[70].mxu1  ;;  %v10235_v57 = vmul.f32 %v3248_v51, %v10094_v37  ;;  %v3220_v58 = vadd.f32 1.0, %v8632_v1  ;;  %8645 = vtanh.f32 %v3163_v6  ;;  %v10239_v4 = vadd.f32 %v10171_v27, %v10081_v56 }
 0xaa9   : > { %v8634_v44 = vpop.eup %8633  ;;  %v10241_v12 = vpop.f32.mrb[63].mxu0  ;;  %v10248_v19 = vmul.f32 %v3250_v35, %v10097_v10  ;;  %8647 = vtanh.f32 %v3164_v3  ;;  %v3101_v49 = vmul.f32 0.044715, %v3069_v31  ;;  %v3071_v6 = vmul.f32 %v3039_v30, %v10207_v63 }
 0xaaa   : > { %v10243_v41 = vpop.f32.mrb[71].mxu1  ;;  %v10245_v59 = vpop.eup %8635  ;;  %v3222_v55 = vadd.f32 1.0, %v8634_v44  ;;  %v3252_v51 = vmul.f32 0.5, %v3220_v58  ;;  %8649 = vtanh.f32 %v3166_v15  ;;  %v3040_v27 = vmul.f32 %v10239_v4, %v10239_v4 }
 0xaab   : > { %v10250_v37 = vpop.eup %8637  ;;  %v3133_v13 = vadd.f32 %v3101_v49, %v10203_v53  ;;  %v10258_v20 = vadd.f32 %v10173_v28, %v10084_v62  ;;  %v10262_v35 = vadd.f32 %v10180_v48, %v10087_v2  ;;  %v3103_v10 = vmul.f32 0.044715, %v3071_v6 }
 0xaac   : > { %v3254_v1 = vmul.f32 0.5, %v3222_v55  ;;  %v10265_v31 = vmul.f32 %v3252_v51, %v10110_v46  ;;  %v3072_v3 = vmul.f32 %v3040_v27, %v10239_v4  ;;  %v10270_v15 = vadd.f32 %v10182_v45, %v10091_v60 }
 0xaad   : > { %v3165_v49 = vmul.f32 0.7978846, %v3133_v13  ;;  %v3042_v28 = vmul.f32 %v10258_v20, %v10258_v20  ;;  %v3041_v48 = vmul.f32 %v10262_v35, %v10262_v35  ;;  %v3135_v30 = vadd.f32 %v3103_v10, %v10207_v63 }
 0xaae   : > { %v10273_v55 = vmul.f32 %v3254_v1, %v10113_v36  ;;  %v3104_v44 = vmul.f32 0.044715, %v3072_v3  ;;  %v3043_v45 = vmul.f32 %v10270_v15, %v10270_v15  ;;  %v10296_v3 = vadd.f32 %v10189_v47, %v10081_v56 }
 0xaaf   : > { %v10284_v58 = vpop.eup %8639  ;;  %8651 = vtanh.f32 %v3165_v49  ;;  %v3074_v36 = vmul.f32 %v3042_v28, %v10258_v20  ;;  %v3073_v51 = vmul.f32 %v3041_v48, %v10262_v35  ;;  %v3167_v27 = vmul.f32 0.7978846, %v3135_v30 }
 0xab0   : > { %v10290_v6 = vpop.eup %8641  ;;  %v3136_v1 = vadd.f32 %v3104_v44, %v10239_v4  ;;  %v3075_v10 = vmul.f32 %v3043_v45, %v10270_v15  ;;  %v10302_v49 = vadd.f32 %v10191_v14, %v10084_v62  ;;  %v10306_v28 = vadd.f32 %v10195_v50, %v10087_v2 }
 0xab1   : > { %v10298_v46 = vpop.eup %8643  ;;  %v3106_v8 = vmul.f32 0.044715, %v3074_v36  ;;  %v3105_v13 = vmul.f32 0.044715, %v3073_v51  ;;  %8653 = vtanh.f32 %v3167_v27  ;;  %v3044_v47 = vmul.f32 %v10296_v3, %v10296_v3 }
 0xab2   : > { %v10308_v48 = vpop.eup %8645  ;;  %v3168_v30 = vmul.f32 0.7978846, %v3136_v1  ;;  %v3107_v44 = vmul.f32 0.044715, %v3075_v10  ;;  %v3046_v14 = vmul.f32 %v10302_v49, %v10302_v49  ;;  %v3045_v50 = vmul.f32 %v10306_v28, %v10306_v28 }
 0xab3   : > { %v10312_v45 = vpop.eup %8647  ;;  %v3138_v36 = vadd.f32 %v3106_v8, %v10258_v20  ;;  %v3137_v51 = vadd.f32 %v3105_v13, %v10262_v35  ;;  %v3076_v1 = vmul.f32 %v3044_v47, %v10296_v3  ;;  %v10326_v10 = vadd.f32 %v10197_v40, %v10091_v60 }
 0xab4   : > { %v10320_v33 = vpop.eup %8649  ;;  %8655 = vtanh.f32 %v3168_v30  ;;  %v3139_v27 = vadd.f32 %v3107_v44, %v10270_v15  ;;  %v3078_v13 = vmul.f32 %v3046_v14, %v10302_v49  ;;  %v3077_v0 = vmul.f32 %v3045_v50, %v10306_v28 }
 0xab5   : > { %v3170_v8 = vmul.f32 0.7978846, %v3138_v36  ;;  %v3169_v39 = vmul.f32 0.7978846, %v3137_v51  ;;  %v3108_v21 = vmul.f32 0.044715, %v3076_v1  ;;  %v3047_v26 = vmul.f32 %v10326_v10, %v10326_v10 }
 0xab6   : > { %v3171_v25 = vmul.f32 0.7978846, %v3139_v27  ;;  %v10334_v30 = vadd.f32 %v10215_v16, %v10081_v56  ;;  %v3110_v44 = vmul.f32 0.044715, %v3078_v13  ;;  %v3109_v47 = vmul.f32 0.044715, %v3077_v0 }
 0xab7   : > { %8657 = vtanh.f32 %v3170_v8  ;;  %v10338_v40 = vadd.f32 %v10217_v54, %v10084_v62  ;;  %v3140_v36 = vadd.f32 %v3108_v21, %v10296_v3  ;;  %v3079_v51 = vmul.f32 %v3047_v26, %v10326_v10 }
 0xab8   : > { %12079 = vst [vmem:[#allocation15_spill] sm:$0xff] %v10334_v30  ;;  %8659 = vtanh.f32 %v3169_v39  ;;  %v3048_v14 = vmul.f32 %v10334_v30, %v10334_v30  ;;  %v3142_v16 = vadd.f32 %v3110_v44, %v10302_v49  ;;  %v3141_v27 = vadd.f32 %v3109_v47, %v10306_v28 }
 0xab9   : > { %12080 = vst [vmem:[#allocation16_spill] sm:$0xff] %v10338_v40  ;;  %v10344_v50 = vpop.eup %8651  ;;  %8661 = vtanh.f32 %v3171_v25  ;;  %v3050_v0 = vmul.f32 %v10338_v40, %v10338_v40  ;;  %v3172_v54 = vmul.f32 0.7978846, %v3140_v36  ;;  %v3111_v1 = vmul.f32 0.044715, %v3079_v51 }
 0xaba   : > { %v3080_v39 = vmul.f32 %v3048_v14, %v10334_v30  ;;  %v10353_v26 = vadd.f32 %v10221_v7, %v10087_v2  ;;  %v3174_v21 = vmul.f32 0.7978846, %v3142_v16  ;;  %v3173_v8 = vmul.f32 0.7978846, %v3141_v27 }
 0xabb   : > { %v3082_v13 = vmul.f32 %v3050_v0, %v10338_v40  ;;  %v10358_v25 = vadd.f32 %v10225_v11, %v10091_v60  ;;  %v10360_v44 = vpop.eup %8653  ;;  %8663 = vtanh.f32 %v3172_v54  ;;  %v3143_v47 = vadd.f32 %v3111_v1, %v10326_v10 }
 0xabc   : > { %v3112_v36 = vmul.f32 0.044715, %v3080_v39  ;;  %v3049_v51 = vmul.f32 %v10353_v26, %v10353_v26  ;;  %8665 = vtanh.f32 %v3174_v21  ;;  %v10369_v16 = vadd.f32 %v10230_v34, %v10081_v56 }
 0xabd   : > { %v3114_v7 = vmul.f32 0.044715, %v3082_v13  ;;  %v3051_v14 = vmul.f32 %v10358_v25, %v10358_v25  ;;  %8667 = vtanh.f32 %v3173_v8  ;;  %v3175_v27 = vmul.f32 0.7978846, %v3143_v47 }
 0xabe   : > { %12081 = vst [vmem:[#allocation17_spill] sm:$0xff] %v10369_v16  ;;  %v10371_v11 = vpop.eup %8655  ;;  %v3144_v0 = vadd.f32 %v3112_v36, %v10334_v30  ;;  %v3081_v54 = vmul.f32 %v3049_v51, %v10353_v26  ;;  %v3052_v21 = vmul.f32 %v10369_v16, %v10369_v16  ;;  %v10381_v13 = vadd.f32 %v10232_v22, %v10084_v62 }
 0xabf   : > { %v3146_v1 = vadd.f32 %v3114_v7, %v10338_v40  ;;  %v3083_v39 = vmul.f32 %v3051_v14, %v10358_v25  ;;  %8669 = vtanh.f32 %v3175_v27  ;;  %v10385_v8 = vadd.f32 %v10241_v12, %v10087_v2 }
 0xac0   : > { %v3176_v56 = vmul.f32 0.7978846, %v3144_v0  ;;  %v3113_v34 = vmul.f32 0.044715, %v3081_v54  ;;  %v3084_v7 = vmul.f32 %v3052_v21, %v10369_v16  ;;  %v3054_v14 = vmul.f32 %v10381_v13, %v10381_v13 }
 0xac1   : > { %v10387_v47 = vpop.eup %8657  ;;  %v3178_v36 = vmul.f32 0.7978846, %v3146_v1  ;;  %v3115_v51 = vmul.f32 0.044715, %v3083_v39  ;;  %v3053_v22 = vmul.f32 %v10385_v8, %v10385_v8  ;;  %v10399_v2 = vadd.f32 %v10243_v41, %v10091_v60 }
 0xac2   : > { %v10392_v9 = vpop.eup %8659  ;;  %8671 = vtanh.f32 %v3176_v56  ;;  %v3145_v62 = vadd.f32 %v3113_v34, %v10353_v26  ;;  %v3116_v0 = vmul.f32 0.044715, %v3084_v7  ;;  %v3086_v54 = vmul.f32 %v3054_v14, %v10381_v13 }
 0xac3   : > { %v10401_v12 = vpop.eup %8661  ;;  %8673 = vtanh.f32 %v3178_v36  ;;  %v3147_v27 = vadd.f32 %v3115_v51, %v10358_v25  ;;  %v3085_v39 = vmul.f32 %v3053_v22, %v10385_v8  ;;  %v3055_v21 = vmul.f32 %v10399_v2, %v10399_v2 }
 0xac4   : > { %v3177_v1 = vmul.f32 0.7978846, %v3145_v62  ;;  %v3217_v56 = vadd.f32 1.0, %v10219_v32  ;;  %v3148_v60 = vadd.f32 %v3116_v0, %v10369_v16  ;;  %v3118_v41 = vmul.f32 0.044715, %v3086_v54 }
 0xac5   : > { %v3179_v34 = vmul.f32 0.7978846, %v3147_v27  ;;  %v3221_v40 = vadd.f32 1.0, %v10245_v59  ;;  %v10411_v36 = vpop.eup %8663  ;;  %v3117_v51 = vmul.f32 0.044715, %v3085_v39  ;;  %v3087_v7 = vmul.f32 %v3055_v21, %v10399_v2 }
 0xac6   : > { %8675 = vtanh.f32 %v3177_v1  ;;  %v3249_v14 = vmul.f32 0.5, %v3217_v56  ;;  %v10414_v62 = vpop.eup %8665  ;;  %v3180_v22 = vmul.f32 0.7978846, %v3148_v60  ;;  %v3150_v30 = vadd.f32 %v3118_v41, %v10381_v13 }
 0xac7   : > { %8677 = vtanh.f32 %v3179_v34  ;;  %v3253_v32 = vmul.f32 0.5, %v3221_v40  ;;  %v8668_v27 = vpop.eup %8667  ;;  %v3149_v0 = vadd.f32 %v3117_v51, %v10385_v8  ;;  %v3119_v54 = vmul.f32 0.044715, %v3087_v7 }
 0xac8   : > { %v3281_v59 = vmul.f32 %v3249_v14, %v10100_v29  ;;  %v3219_v16 = vadd.f32 1.0, %v10223_v61  ;;  %8679 = vtanh.f32 %v3180_v22  ;;  %v3182_v1 = vmul.f32 0.7978846, %v3150_v30 }
 0xac9   : > { %v3285_v39 = vmul.f32 %v3253_v32, %v10120_v52  ;;  %v3223_v21 = vadd.f32 1.0, %v10250_v37  ;;  %v8670_v56 = vpop.eup %8669  ;;  %v3181_v34 = vmul.f32 0.7978846, %v3149_v0  ;;  %v3151_v60 = vadd.f32 %v3119_v54, %v10399_v2 }
 0xaca   : > { %v3251_v41 = vmul.f32 0.5, %v3219_v16  ;;  %v3225_v40 = vadd.f32 1.0, %v10298_v46  ;;  %8681 = vtanh.f32 %v3182_v1  ;;  %v3229_v29 = vadd.f32 1.0, %v10344_v50 }
 0xacb   : > { %v3377_v51 = vpack.c.bf16 %v3285_v39, %v3281_v59  ;;  %v3255_v7 = vmul.f32 0.5, %v3223_v21  ;;  %8683 = vtanh.f32 %v3181_v34  ;;  %v3183_v61 = vmul.f32 0.7978846, %v3151_v60 }
 0xacc   : > { %v10425_v14 = vpop.eup %8671  ;;  %v3283_v52 = vmul.f32 %v3251_v41, %v10103_v23  ;;  %v3257_v30 = vmul.f32 0.5, %v3225_v40  ;;  %v3261_v16 = vmul.f32 0.5, %v3229_v29  ;;  %v3227_v46 = vadd.f32 1.0, %v10308_v48 }
 0xacd   : > { %v10428_v37 = vpop.eup %8673  ;;  %3623 = vmatprep.mubr.bf16.mxu0 %v3377_v51  ;;  %v3287_v22 = vmul.f32 %v3255_v7, %v10123_v5  ;;  %v3231_v32 = vadd.f32 1.0, %v10360_v44  ;;  %8685 = vtanh.f32 %v3183_v61  ;;  %v12082_v50 = vpack.c.bf16 %v10265_v31, %v10235_v57 }
 0xace   : > { %v3289_v0 = vmul.f32 %v3257_v30, %v10158_v18  ;;  %v3224_v23 = vadd.f32 1.0, %v10284_v58  ;;  %v3228_v54 = vadd.f32 1.0, %v10312_v45  ;;  %v3293_v1 = vmul.f32 %v3261_v16, %v10203_v53 }
 0xacf   : > { %3624 = vmatmul.mubr.bf16.vlgmr.msra.gmra.mrb[64].mxu0 %v12082_v50  ;;  %v3379_v59 = vpack.c.bf16 %v3287_v22, %v3283_v52  ;;  %v3259_v5 = vmul.f32 0.5, %v3227_v46  ;;  %v3263_v39 = vmul.f32 0.5, %v3231_v32  ;;  %v3226_v44 = vadd.f32 1.0, %v10290_v6 }
 0xad0   : > { %v8676_v21 = vpop.eup %8675  ;;  %v3256_v48 = vmul.f32 0.5, %v3224_v23  ;;  %v3260_v34 = vmul.f32 0.5, %v3228_v54  ;;  %v3230_v60 = vadd.f32 1.0, %v10320_v33  ;;  %v3381_v31 = vpack.c.bf16 %v3293_v1, %v3289_v0 }
 0xad1   : > { %v8678_v57 = vpop.eup %8677  ;;  %3688 = vmatprep.mubr.bf16.mxu1 %v3379_v59  ;;  %v3291_v18 = vmul.f32 %v3259_v5, %v10161_v42  ;;  %v3295_v58 = vmul.f32 %v3263_v39, %v10207_v63  ;;  %v3233_v45 = vadd.f32 1.0, %v10392_v9  ;;  %v12083_v53 = vpack.c.bf16 %v10273_v55, %v10248_v19 }
 0xad2   : > { %v3288_v41 = vmul.f32 %v3256_v48, %v10150_v43  ;;  %v3292_v40 = vmul.f32 %v3260_v34, %v10166_v17  ;;  %v3258_v6 = vmul.f32 0.5, %v3226_v44  ;;  %v3262_v51 = vmul.f32 0.5, %v3230_v60  ;;  %v8680_v33 = vpop.eup %8679  ;;  %3631 = vmatprep.mubr.bf16.mxu0 %v3381_v31 }
 0xad3   : > { %3689 = vmatmul.mubr.bf16.vlgmr.msra.gmra.mrb[72].mxu1 %v12083_v53  ;;  %v3383_v7 = vpack.c.bf16 %v3295_v58, %v3291_v18  ;;  %v3237_v29 = vadd.f32 1.0, %v8668_v27  ;;  %v3265_v61 = vmul.f32 0.5, %v3233_v45  ;;  %v3235_v42 = vadd.f32 1.0, %v10401_v12 }
 0xad4   : > { %v3380_v63 = vpack.c.bf16 %v3292_v40, %v3288_v41  ;;  %v3290_v9 = vmul.f32 %v3258_v6, %v10153_v38  ;;  %v3294_v52 = vmul.f32 %v3262_v51, %v10169_v24  ;;  %v3239_v19 = vadd.f32 1.0, %v8670_v56  ;;  %v8682_v55 = vpop.eup %8681 }
 0xad5   : > { %3696 = vmatprep.mubr.bf16.mxu1 %v3383_v7  ;;  %v3269_v43 = vmul.f32 0.5, %v3237_v29  ;;  %v3297_v17 = vmul.f32 %v3265_v61, %v10262_v35  ;;  %v3267_v30 = vmul.f32 0.5, %v3235_v42  ;;  %v3232_v22 = vadd.f32 1.0, %v10371_v11  ;;  %v8684_v16 = vpop.eup %8683  ;;  %v12086_v61 = vld [vmem:[#allocation16_spill] sm:$0xff] }
 0xad6   : > { %v3382_v27 = vpack.c.bf16 %v3294_v52, %v3290_v9  ;;  %v3271_v46 = vmul.f32 0.5, %v3239_v19  ;;  %v3236_v12 = vadd.f32 1.0, %v10411_v36  ;;  %v3234_v32 = vadd.f32 1.0, %v10387_v47  ;;  %v10479_v9 = vld [vmem:[%s11993_s14] ss:$0 sm:$0xff] }
 0xad7   : > { %3632 = vmatmul.mubr.bf16.gmra.mrb[68].mxu0 %v3380_v63  ;;  %v3301_v38 = vmul.f32 %v3269_v43, %v10306_v28  ;;  %v3299_v24 = vmul.f32 %v3267_v30, %v10270_v15  ;;  %v3264_v56 = vmul.f32 0.5, %v3232_v22  ;;  %v3238_v50 = vadd.f32 1.0, %v10414_v62  ;;  %v8686_v0 = vpop.eup %8685 }
 0xad8   : > { %v3303_v35 = vmul.f32 %v3271_v46, %v10326_v10  ;;  %v3268_v23 = vmul.f32 0.5, %v3236_v12  ;;  %v3266_v11 = vmul.f32 0.5, %v3234_v32  ;;  %v3241_v54 = vadd.f32 1.0, %v8676_v21 }
 0xad9   : > { %v3385_v59 = vpack.c.bf16 %v3301_v38, %v3297_v17  ;;  %v3296_v1 = vmul.f32 %v3264_v56, %v10239_v4  ;;  %v3270_v5 = vmul.f32 0.5, %v3238_v50  ;;  %v3245_v36 = vadd.f32 1.0, %v8684_v16 }
 0xada   : > { %v3387_v47 = vpack.c.bf16 %v3303_v35, %v3299_v24  ;;  %v3300_v28 = vmul.f32 %v3268_v23, %v10296_v3  ;;  %v3298_v15 = vmul.f32 %v3266_v11, %v10258_v20  ;;  %v3273_v39 = vmul.f32 0.5, %v3241_v54  ;;  %v12088_v23 = vld [vmem:[#allocation10_spill] sm:$0xff] }
 0xadb   : > { %3697 = vmatmul.mubr.bf16.gmra.mrb[76].mxu1 %v3382_v27  ;;  %3639 = vmatprep.mubr.bf16.mxu0 %v3385_v59  ;;  %v3302_v62 = vmul.f32 %v3270_v5, %v10302_v49  ;;  %v3277_v48 = vmul.f32 0.5, %v3245_v36  ;;  %v3243_v10 = vadd.f32 1.0, %v8678_v57  ;;  %v3247_v34 = vadd.f32 1.0, %v8686_v0  ;;  %v12089_v36 = vld [vmem:[#allocation11_spill] sm:$0xff] }
 0xadc   : > { %3704 = vmatprep.mubr.bf16.mxu1 %v3387_v47  ;;  %v3384_v21 = vpack.c.bf16 %v3300_v28, %v3296_v1  ;;  %v3305_v44 = vmul.f32 %v3273_v39, %v10353_v26  ;;  %v3240_v4 = vadd.f32 1.0, %v10425_v14  ;;  %v3244_v60 = vadd.f32 1.0, %v8680_v33  ;;  %v12084_v26 = vld [vmem:[#allocation15_spill] sm:$0xff]  ;;  %v12085_v14 = vld [vmem:[#allocation17_spill] sm:$0xff] }
 0xadd   : > { %v3386_v31 = vpack.c.bf16 %v3302_v62, %v3298_v15  ;;  %v3309_v18 = vmul.f32 %v3277_v48, %v10385_v8  ;;  %v3275_v3 = vmul.f32 0.5, %v3243_v10  ;;  %v3279_v58 = vmul.f32 0.5, %v3247_v34 }
 0xade   : > { %v3272_v20 = vmul.f32 0.5, %v3240_v4  ;;  %v3276_v45 = vmul.f32 0.5, %v3244_v60  ;;  %v3242_v49 = vadd.f32 1.0, %v10428_v37  ;;  %v3246_v53 = vadd.f32 1.0, %v8682_v55 }
 0xadf   : > { %3640 = vmatmul.mubr.bf16.gmra.mrb[72].mxu0 %v3384_v21  ;;  %v3389_v57 = vpack.c.bf16 %v3309_v18, %v3305_v44  ;;  %v3307_v41 = vmul.f32 %v3275_v3, %v10358_v25  ;;  %v3311_v40 = vmul.f32 %v3279_v58, %v10399_v2  ;;  %v12087_v25 = vmov 0   ;;  %v12090_v18 = vld [vmem:[#allocation13_spill] sm:$0xff] }
 0xae0   : > { %v3304_v6 = vmul.f32 %v3272_v20, %v12084_v26  ;;  %v3308_v51 = vmul.f32 %v3276_v45, %v12085_v14  ;;  %v3274_v33 = vmul.f32 0.5, %v3242_v49  ;;  %v3278_v7 = vmul.f32 0.5, %v3246_v53  ;;  %v12091_v53 = vld [vmem:[#allocation12_spill] sm:$0xff] }
 0xae1   : > { %3647 = vmatprep.mubr.bf16.mxu0 %v3389_v57  ;;  %v3391_v8 = vpack.c.bf16 %v3311_v40, %v3307_v41 }
 0xae2   : > { %v3388_v29 = vpack.c.bf16 %v3308_v51, %v3304_v6  ;;  %v3306_v42 = vmul.f32 %v3274_v33, %v12086_v61  ;;  %v3310_v37 = vmul.f32 %v3278_v7, %v10381_v13 }
 0xae3   : > { %3705 = vmatmul.mubr.bf16.gmra.mrb[80].mxu1 %v3386_v31 }
 0xae4   : > { %3712 = vmatprep.mubr.bf16.mxu1 %v3391_v8  ;;  %v3390_v63 = vpack.c.bf16 %v3310_v37, %v3306_v42  ;;  %v12092_v42 = vld [vmem:[#allocation3_spill] sm:$0xff] }
 0xae7   : > { %3648 = vmatmul.mubr.bf16.gmra.mrb[76].mxu0 %v3388_v29 }
 0xae8   : > { %4064 = vmatprep.mubr.bf16.mxu0 %v12087_v25 }
 0xaeb   : > { %3713 = vmatmul.mubr.bf16.gmra.mrb[84].mxu1 %v3390_v63 }
 0xba2   : > { %v7590_v2 = vpop.f32.mrb[64].mxu0 }
 0xba3   : > { %v7591_v52 = vpop.f32.mrb[65].mxu0 }
 0xba4   : > { %v7592_v19 = vadd.f32 %v7591_v52, %v7590_v2  ;;  %v7593_v55 = vpop.f32.mrb[66].mxu0 }
 0xba5   : > { %v7594_v43 = vpop.f32.mrb[67].mxu0 }
 0xba6   : > { %v7630_v17 = vpop.f32.mrb[72].mxu1  ;;  %v3626_v30 = vadd.f32 %v7592_v19, %v10479_v9  ;;  %v7595_v13 = vadd.f32 %v7594_v43, %v7593_v55  ;;  %v12093_v43 = vld [vmem:[#allocation4_spill] sm:$0xff] }
 0xba7   : > { %v7631_v22 = vpop.f32.mrb[73].mxu1 }
 0xba8   : > { %v7632_v16 = vadd.f32 %v7631_v22, %v7630_v17  ;;  %v7633_v27 = vpop.f32.mrb[74].mxu1  ;;  %v3629_v46 = vadd.f32 %v7595_v13, %v10479_v9 }
 0xba9   : > { %v7634_v12 = vpop.f32.mrb[75].mxu1 }
 0xbaa   : > { %v3691_v32 = vadd.f32 %v7632_v16, %v3626_v30  ;;  %v7635_v38 = vadd.f32 %v7634_v12, %v7633_v27  ;;  %v7596_v24 = vpop.f32.mrb[68].mxu0 }
 0xbab   : > { %v7597_v56 = vpop.f32.mrb[69].mxu0 }
 0xbac   : > { %v3694_v50 = vadd.f32 %v7635_v38, %v3629_v46  ;;  %v7598_v0 = vadd.f32 %v7597_v56, %v7596_v24  ;;  %v7599_v35 = vpop.f32.mrb[70].mxu0  ;;  %v10484_v11 = vadd.f32 %v3691_v32, %v12088_v23  ;;  %v12095_v38 = vld [vmem:[#allocation5_spill] sm:$0xff]  ;;  %v12096_v56 = vld [vmem:[#allocation14_spill] sm:$0xff] }
 0xbad   : > { %v7600_v54 = vpop.f32.mrb[71].mxu0  ;;  %v8338_v23 = vld [vmem:[%s11984_s5 + $0xd8] ss:$12 sps:$4 sm:$0xff]  }
 0xbae   : > { %v7636_v59 = vpop.f32.mrb[76].mxu1  ;;  %v3634_v1 = vadd.f32 %v7598_v0, %v10479_v9  ;;  %3733 = vadd.xlane.f32.xlu0 %v10484_v11  ;;  %v7601_v5 = vadd.f32 %v7600_v54, %v7599_v35  ;;  %v10489_v47 = vadd.f32 %v3694_v50, %v12089_v36  ;;  %v8337_v0 = vld [vmem:[%s11984_s5 + $0xc4] ss:$12 sps:$4 sm:$0xff]   ;;  %v8340_v35 = vld [vmem:[%s11984_s5 + $0xdc] ss:$12 sps:$4 sm:$0xff]  }
 0xbaf   : > { %v7637_v28 = vpop.f32.mrb[77].mxu1  ;;  %4032 = vmatprep.subr.bf16.mxu0 %v8337_v0 }
 0xbb0   : > { %v7638_v15 = vadd.f32 %v7637_v28, %v7636_v59  ;;  %v7639_v39 = vpop.f32.mrb[78].mxu1  ;;  %v3637_v62 = vadd.f32 %v7601_v5, %v10479_v9  ;;  %3735 = vadd.xlane.f32.xlu1 %v10489_v47 }
 0xbb1   : > { %v7640_v48 = vpop.f32.mrb[79].mxu1 }
 0xbb2   : > { %v3699_v10 = vadd.f32 %v7638_v15, %v3634_v1  ;;  %v7641_v34 = vadd.f32 %v7640_v48, %v7639_v39  ;;  %v7602_v21 = vpop.f32.mrb[72].mxu0 }
 0xbb3   : > { %v7603_v44 = vpop.f32.mrb[73].mxu0 }
 0xbb4   : > { %v3702_v4 = vadd.f32 %v7641_v34, %v3637_v62  ;;  %v7604_v60 = vadd.f32 %v7603_v44, %v7602_v21  ;;  %v7605_v31 = vpop.f32.mrb[74].mxu0  ;;  %v10494_v3 = vadd.f32 %v3699_v10, %v12090_v18 }
 0xbb5   : > { %v7606_v58 = vpop.f32.mrb[75].mxu0 }
 0xbb6   : > { %v7642_v20 = vpop.f32.mrb[80].mxu1  ;;  %v3642_v45 = vadd.f32 %v7604_v60, %v10479_v9  ;;  %3737 = vadd.xlane.f32.xlu0 %v10494_v3  ;;  %v7607_v49 = vadd.f32 %v7606_v58, %v7605_v31  ;;  %v10499_v57 = vadd.f32 %v3702_v4, %v12091_v53 }
 0xbb7   : > { %v7643_v41 = vpop.f32.mrb[81].mxu1 }
 0xbb8   : > { %v7644_v40 = vadd.f32 %v7643_v41, %v7642_v20  ;;  %v7645_v26 = vpop.f32.mrb[82].mxu1  ;;  %v3645_v6 = vadd.f32 %v7607_v49, %v10479_v9  ;;  %3739 = vadd.xlane.f32.xlu1 %v10499_v57 }
 0xbb9   : > { %v7646_v14 = vpop.f32.mrb[83].mxu1 }
 0xbba   : > { %v3707_v51 = vadd.f32 %v7644_v40, %v3642_v45  ;;  %v7647_v33 = vadd.f32 %v7646_v14, %v7645_v26  ;;  %v7608_v7 = vpop.f32.mrb[76].mxu0  ;;  %v8343_v26 = vld [vmem:[%s11984_s5 + $0xf4] ss:$12 sps:$4 sm:$0xff]  }
 0xbbb   : > { %v7609_v8 = vpop.f32.mrb[77].mxu0 }
 0xbbc   : > { %v3710_v29 = vadd.f32 %v7647_v33, %v3645_v6  ;;  %v7610_v61 = vadd.f32 %v7609_v8, %v7608_v7  ;;  %v10504_v37 = vadd.f32 %v3707_v51, %v12092_v42  ;;  %v7611_v63 = vpop.f32.mrb[78].mxu0  ;;  %v8344_v6 = vld [vmem:[%s11984_s5 + $0xc8] ss:$12 sps:$4 sm:$0xff]   ;;  %v8341_v51 = vld [vmem:[%s11984_s5 + $0xf0] ss:$12 sps:$4 sm:$0xff]  }
 0xbbd   : > { %v7612_v2 = vpop.f32.mrb[79].mxu0  ;;  %8010 = vmatprep.subr.bf16.mxu1 %v8344_v6 }
 0xbbe   : > { %v7648_v52 = vpop.f32.mrb[84].mxu1  ;;  %v3650_v19 = vadd.f32 %v7610_v61, %v10479_v9  ;;  %3741 = vadd.xlane.f32.xlu0 %v10504_v37  ;;  %v7613_v55 = vadd.f32 %v7612_v2, %v7611_v63  ;;  %v10509_v17 = vadd.f32 %v3710_v29, %v12093_v43  ;;  %8011 = vmatpush3.bf16.msra.mxu1 %v8344_v6  ;;  %v8347_v29 = vld [vmem:[%s11984_s5 + $0x10c] ss:$12 sps:$4 sm:$0xff]   ;;  %v8345_v2 = vld [vmem:[%s11984_s5 + $0x108] ss:$12 sps:$4 sm:$0xff]  }
 0xbbf   : > { %v7649_v30 = vpop.f32.mrb[85].mxu1  ;;  %v8348_v61 = vld [vmem:[%s11984_s5 + $0xe0] ss:$12 sps:$4 sm:$0xff]  }
 0xbc0   : > { %12094 = vst [vmem:[#allocation15_spill] sm:$0xff] %v10509_v17  ;;  %v7650_v13 = vadd.f32 %v7649_v30, %v7648_v52  ;;  %v7651_v22 = vpop.f32.mrb[86].mxu1  ;;  %v3653_v16 = vadd.f32 %v7613_v55, %v10479_v9  ;;  %3743 = vadd.xlane.f32.xlu1 %v10509_v17  ;;  %v8335_v9 = vld [vmem:[%s11984_s5 + $0xc0] ss:$12 sps:$4 sm:$0xff]   ;;  %8012 = vmatprep.subr.bf16.mxu1 %v8348_v61  ;;  %v8352_v55 = vld [vmem:[%s11984_s5 + $0xf8] ss:$12 sps:$4 sm:$0xff]  }
 0xbc1   : > { %v7652_v27 = vpop.f32.mrb[87].mxu1  ;;  %4033 = vmatpush1.bf16.msra.mxu0 %v8335_v9  ;;  %v8349_v43 = vld [vmem:[%s11984_s5 + $0x120] ss:$12 sps:$4 sm:$0xff]   ;;  %v8355_v30 = vld [vmem:[%s11984_s5 + $0x13c] ss:$12 sps:$4 sm:$0xff]  }
 0xbc2   : > { %v3715_v46 = vadd.f32 %v7650_v13, %v3650_v19  ;;  %v7653_v12 = vadd.f32 %v7652_v27, %v7651_v22  ;;  %4034 = vmatprep.subr.bf16.mxu0 %v8340_v35  ;;  %8013 = vmatpush3.bf16.msra.mxu1 %v8348_v61  ;;  %v8351_v19 = vld [vmem:[%s11984_s5 + $0x124] ss:$12 sps:$4 sm:$0xff]   ;;  %v8360_v27 = vld [vmem:[%s11984_s5 + $0x128] ss:$12 sps:$4 sm:$0xff]   ;;  %v7186_v6 = vld [vmem:[%s11983_s4 + $0x1] ss:$0 sm:$0xff] }
 0xbc3   : > { %8014 = vmatprep.subr.bf16.mxu1 %v8352_v55  ;;  %v8356_v13 = vld [vmem:[%s11984_s5 + $0x110] ss:$12 sps:$4 sm:$0xff]   ;;  %v8353_v22 = vld [vmem:[%s11984_s5 + $0x138] ss:$12 sps:$4 sm:$0xff]  }
 0xbc4   : > { %v3718_v32 = vadd.f32 %v7653_v12, %v3653_v16  ;;  %v10514_v24 = vadd.f32 %v3715_v46, %v12095_v38  ;;  %v8359_v16 = vld [vmem:[%s11984_s5 + $0x154] ss:$12 sps:$4 sm:$0xff]   ;;  %v8357_v46 = vld [vmem:[%s11984_s5 + $0x150] ss:$12 sps:$4 sm:$0xff]  }
 0xbc5   : > { %4035 = vmatpush1.bf16.msra.mxu0 %v8338_v23  ;;  %v8361_v12 = vld [vmem:[%s11984_s5 + $0x168] ss:$12 sps:$4 sm:$0xff]   ;;  %v8364_v38 = vld [vmem:[%s11984_s5 + $0x140] ss:$12 sps:$4 sm:$0xff]   ;;  %v8366_v9 = vld [vmem:[%s11984_s5 + $0x170] ss:$12 sps:$4 sm:$0xff]  }
 0xbc6   : > { %3745 = vadd.xlane.f32.xlu0 %v10514_v24  ;;  %v10518_v50 = vadd.f32 %v3718_v32, %v12096_v56  ;;  %4036 = vmatprep.subr.bf16.mxu0 %v8343_v26  ;;  %v8363_v32 = vld [vmem:[%s11984_s5 + $0x16c] ss:$12 sps:$4 sm:$0xff]  }
 0xbc7   : > { %8015 = vmatpush3.bf16.msra.mxu1 %v8352_v55  ;;  %v8365_v56 = vld [vmem:[%s11984_s5 + $0x158] ss:$12 sps:$4 sm:$0xff]  }
 0xbc8   : > { %12097 = vst [vmem:[#allocation17_spill] sm:$0xff] %v10518_v50  ;;  %3747 = vadd.xlane.f32.xlu1 %v10518_v50  ;;  %8016 = vmatprep.subr.bf16.mxu1 %v8356_v13 }
 0xbc9   : > { %4037 = vmatpush1.bf16.msra.mxu0 %v8341_v51 }
 0xbca   : > { %4038 = vmatprep.subr.bf16.mxu0 %v8347_v29 }
 0xbcb   : > { %8017 = vmatpush3.bf16.msra.mxu1 %v8356_v13 }
 0xbcc   : > { %8018 = vmatprep.subr.bf16.mxu1 %v8360_v27 }
 0xbcd   : > { %4039 = vmatpush1.bf16.msra.mxu0 %v8345_v2 }
 0xbce   : > { %4040 = vmatprep.subr.bf16.mxu0 %v8351_v19 }
 0xbcf   : > { %8019 = vmatpush3.bf16.msra.mxu1 %v8360_v27 }
 0xbd0   : > { %8020 = vmatprep.subr.bf16.mxu1 %v8364_v38 }
 0xbd1   : > { %4041 = vmatpush1.bf16.msra.mxu0 %v8349_v43 }
 0xbd2   : > { %4042 = vmatprep.subr.bf16.mxu0 %v8355_v30 }
 0xbd3   : > { %8021 = vmatpush3.bf16.msra.mxu1 %v8364_v38 }
 0xbd4   : > { %8022 = vmatprep.subr.bf16.mxu1 %v8365_v56 }
 0xbd5   : > { %4043 = vmatpush1.bf16.msra.mxu0 %v8353_v22 }
 0xbd6   : > { %4044 = vmatprep.subr.bf16.mxu0 %v8359_v16 }
 0xbd7   : > { %8023 = vmatpush3.bf16.msra.mxu1 %v8365_v56 }
 0xbd8   : > { %8024 = vmatprep.subr.bf16.mxu1 %v8366_v9 }
 0xbd9   : > { %4045 = vmatpush1.bf16.msra.mxu0 %v8357_v46 }
 0xbda   : > { %4046 = vmatprep.subr.bf16.mxu0 %v8363_v32 }
 0xbdb   : > { %8025 = vmatpush3.bf16.msra.mxu1 %v8366_v9 }
 0xbdd   : > { %4047 = vmatpush1.bf16.msra.mxu0 %v8361_v12 }
 0xc3b   : > { %v3734_v54 = vpop.xlane.xlu0 %3733 }
 0xc3c   : > { %v3749_v59 = vmul.f32 0.0078125, %v3734_v54 }
 0xc3d   : > { %v3736_v1 = vpop.xlane.xlu1 %3735 }
 0xc3e   : > { %v10534_v5 = vsub.f32 %v10484_v11, %v3749_v59  ;;  %v3750_v36 = vmul.f32 0.0078125, %v3736_v1 }
 0xc40   : > { %v10537_v28 = vsub.f32 %v10489_v47, %v3750_v36  ;;  %v3765_v15 = vmul.f32 %v10534_v5, %v10534_v5 }
 0xc42   : > { %3773 = vadd.xlane.f32.xlu0 %v3765_v15  ;;  %v3766_v39 = vmul.f32 %v10537_v28, %v10537_v28 }
 0xc43   : > { %v3738_v62 = vpop.xlane.xlu0 %3737 }
 0xc44   : > { %v3751_v48 = vmul.f32 0.0078125, %v3738_v62  ;;  %3775 = vadd.xlane.f32.xlu1 %v3766_v39 }
 0xc45   : > { %v3740_v10 = vpop.xlane.xlu1 %3739 }
 0xc46   : > { %v10544_v34 = vsub.f32 %v10494_v3, %v3751_v48  ;;  %v3752_v21 = vmul.f32 0.0078125, %v3740_v10 }
 0xc48   : > { %v10547_v44 = vsub.f32 %v10499_v57, %v3752_v21  ;;  %v3767_v4 = vmul.f32 %v10544_v34, %v10544_v34 }
 0xc4a   : > { %3777 = vadd.xlane.f32.xlu0 %v3767_v4  ;;  %v3768_v60 = vmul.f32 %v10547_v44, %v10547_v44  ;;  %v7185_v4 = vld [vmem:[%s12058_s27 + $0x1] ss:$0 sm:$0xff] }
 0xc4b   : > { %v3742_v31 = vpop.xlane.xlu0 %3741 }
 0xc4c   : > { %v3753_v18 = vmul.f32 0.0078125, %v3742_v31  ;;  %3779 = vadd.xlane.f32.xlu1 %v3768_v60 }
 0xc4d   : > { %v3744_v58 = vpop.xlane.xlu1 %3743 }
 0xc4e   : > { %v10554_v20 = vsub.f32 %v10504_v37, %v3753_v18  ;;  %v3754_v45 = vmul.f32 0.0078125, %v3744_v58 }
 0xc50   : > { %v10557_v49 = vsub.f32 %v10509_v17, %v3754_v45  ;;  %v3769_v53 = vmul.f32 %v10554_v20, %v10554_v20 }
 0xc52   : > { %3781 = vadd.xlane.f32.xlu0 %v3769_v53  ;;  %v3770_v41 = vmul.f32 %v10557_v49, %v10557_v49 }
 0xc53   : > { %v3746_v40 = vpop.xlane.xlu0 %3745 }
 0xc54   : > { %v3755_v14 = vmul.f32 0.0078125, %v3746_v40  ;;  %3783 = vadd.xlane.f32.xlu1 %v3770_v41 }
 0xc55   : > { %v3748_v33 = vpop.xlane.xlu1 %3747 }
 0xc56   : > { %v10573_v7 = vsub.f32 %v10514_v24, %v3755_v14  ;;  %v3756_v8 = vmul.f32 0.0078125, %v3748_v33 }
 0xc58   : > { %v10582_v42 = vsub.f32 %v10518_v50, %v3756_v8  ;;  %v3771_v63 = vmul.f32 %v10573_v7, %v10573_v7 }
 0xc5a   : > { %3785 = vadd.xlane.f32.xlu0 %v3771_v63  ;;  %v3772_v52 = vmul.f32 %v10582_v42, %v10582_v42 }
 0xc5c   : > { %3787 = vadd.xlane.f32.xlu1 %v3772_v52 }
 0xccf   : > { %v3774_v0 = vpop.xlane.xlu0 %3773 }
 0xcd0   : > { %v3789_v35 = vmul.f32 0.0078125, %v3774_v0 }
 0xcd1   : > { %v3776_v23 = vpop.xlane.xlu1 %3775 }
 0xcd2   : > { %v3797_v54 = vadd.f32 1e-06, %v3789_v35  ;;  %v3790_v59 = vmul.f32 0.0078125, %v3776_v23 }
 0xcd4   : > { %8687 = vrsqrt.f32 %v3797_v54  ;;  %v3798_v1 = vadd.f32 1e-06, %v3790_v59 }
 0xcd6   : > { %8689 = vrsqrt.f32 %v3798_v1 }
 0xcd7   : > { %v3778_v36 = vpop.xlane.xlu0 %3777 }
 0xcd8   : > { %v3791_v15 = vmul.f32 0.0078125, %v3778_v36 }
 0xcd9   : > { %v3780_v39 = vpop.xlane.xlu1 %3779 }
 0xcda   : > { %v3799_v62 = vadd.f32 1e-06, %v3791_v15  ;;  %v3792_v48 = vmul.f32 0.0078125, %v3780_v39 }
 0xcdc   : > { %8691 = vrsqrt.f32 %v3799_v62  ;;  %v3800_v10 = vadd.f32 1e-06, %v3792_v48  ;;  %v7219_v62 = vld [vmem:[%s11985_s6 + $0x3] sm:$0x7] }
 0xcdd   : > { %v12098_v48 = vld [vmem:[#allocation7_spill] sm:$0xff] }
 0xcde   : > { %v8688_v21 = vpop.eup %8687  ;;  %8693 = vrsqrt.f32 %v3800_v10  ;;  %v12099_v10 = vld [vmem:[#allocation8_spill] sm:$0xff] }
 0xcdf   : > { %v3813_v60 = vmul.f32 %v8688_v21, %v10534_v5  ;;  %v3782_v31 = vpop.xlane.xlu0 %3781  ;;  %v10657_v21 = vrot.slane %v7219_v62, %v12099_v10 }
 0xce0   : > { %v8690_v18 = vpop.eup %8689  ;;  %v3793_v58 = vmul.f32 0.0078125, %v3782_v31 }
 0xce1   : > { %v3827_v45 = vmul.f32 %v7185_v4, %v3813_v60  ;;  %v3814_v53 = vmul.f32 %v8690_v18, %v10537_v28  ;;  %v3784_v41 = vpop.xlane.xlu1 %3783 }
 0xce2   : > { %v3801_v40 = vadd.f32 1e-06, %v3793_v58  ;;  %v3794_v26 = vmul.f32 0.0078125, %v3784_v41 }
 0xce3   : > { %v3828_v14 = vmul.f32 %v7185_v4, %v3814_v53  ;;  %v3841_v33 = vadd.f32 %v7186_v6, %v3827_v45 }
 0xce4   : > { %8695 = vrsqrt.f32 %v3801_v40  ;;  %v3802_v51 = vadd.f32 1e-06, %v3794_v26 }
 0xce5   : > { %v3842_v8 = vadd.f32 %v7186_v6, %v3828_v14 }
 0xce6   : > { %v8692_v29 = vpop.eup %8691  ;;  %8697 = vrsqrt.f32 %v3802_v51 }
 0xce7   : > { %v3786_v5 = vpop.xlane.xlu0 %3785  ;;  %v3882_v61 = vpack.c.bf16 %v3842_v8, %v3841_v33  ;;  %v3815_v63 = vmul.f32 %v8692_v29, %v10544_v34 }
 0xce8   : > { %v8694_v2 = vpop.eup %8693  ;;  %v3795_v28 = vmul.f32 0.0078125, %v3786_v5 }
 0xce9   : > { %v3788_v52 = vpop.xlane.xlu1 %3787  ;;  %4065 = vmatmul.mubr.bf16.vlgmr.msra.gmra.mrb[80].mxu0 %v3882_v61  ;;  %8026 = vmatprep.mubr.bf16.mxu1 %v3882_v61  ;;  %v3816_v19 = vmul.f32 %v8694_v2, %v10547_v44  ;;  %v3829_v55 = vmul.f32 %v7185_v4, %v3815_v63 }
 0xcea   : > { %v3803_v43 = vadd.f32 1e-06, %v3795_v28  ;;  %v3796_v30 = vmul.f32 0.0078125, %v3788_v52  ;;  %4074 = vmatprep.mubr.bf16.mxu0 %v12087_v25 }
 0xceb   : > { %v3830_v13 = vmul.f32 %v7185_v4, %v3816_v19  ;;  %v3843_v16 = vadd.f32 %v7186_v6, %v3829_v55 }
 0xcec   : > { %8699 = vrsqrt.f32 %v3803_v43  ;;  %v3804_v22 = vadd.f32 1e-06, %v3796_v30 }
 0xced   : > { %v3844_v27 = vadd.f32 %v7186_v6, %v3830_v13 }
 0xcee   : > { %v8696_v46 = vpop.eup %8695  ;;  %8701 = vrsqrt.f32 %v3804_v22 }
 0xcef   : > { %v3883_v34 = vpack.c.bf16 %v3844_v27, %v3843_v16  ;;  %v3817_v12 = vmul.f32 %v8696_v46, %v10554_v20 }
 0xcf0   : > { %v8698_v32 = vpop.eup %8697 }
 0xcf1   : > { %4075 = vmatmul.mubr.bf16.gmra.mrb[84].mxu0 %v3883_v34  ;;  %8027 = vmatmul.mubr.bf16.vlgmr.msra.gmra.mrb[88].mxu1 %v3883_v34  ;;  %v3818_v44 = vmul.f32 %v8698_v32, %v10557_v49  ;;  %v3831_v38 = vmul.f32 %v7185_v4, %v3817_v12 }
 0xcf2   : > { %4084 = vmatprep.mubr.bf16.mxu0 %v12087_v25 }
 0xcf3   : > { %v3832_v56 = vmul.f32 %v7185_v4, %v3818_v44  ;;  %v3845_v9 = vadd.f32 %v7186_v6, %v3831_v38 }
 0xcf5   : > { %v3846_v0 = vadd.f32 %v7186_v6, %v3832_v56 }
 0xcf6   : > { %v8700_v35 = vpop.eup %8699 }
 0xcf7   : > { %v3884_v23 = vpack.c.bf16 %v3846_v0, %v3845_v9  ;;  %v3819_v54 = vmul.f32 %v8700_v35, %v10573_v7  ;;  %v10654_v7 = vrot.slane %v7219_v62, %v12098_v48 }
 0xcf8   : > { %v8702_v59 = vpop.eup %8701 }
 0xcf9   : > { %4085 = vmatmul.mubr.bf16.gmra.mrb[88].mxu0 %v3884_v23  ;;  %8030 = vmatprep.mubr.bf16.mxu1 %v3884_v23  ;;  %v3820_v20 = vmul.f32 %v8702_v59, %v10582_v42  ;;  %v3833_v1 = vmul.f32 %v7185_v4, %v3819_v54 }
 0xcfa   : > { %4094 = vmatprep.mubr.bf16.mxu0 %v12087_v25 }
 0xcfb   : > { %v3834_v36 = vmul.f32 %v7185_v4, %v3820_v20  ;;  %v3847_v49 = vadd.f32 %v7186_v6, %v3833_v1 }
 0xcfd   : > { %v3848_v15 = vadd.f32 %v7186_v6, %v3834_v36  ;;  %v12100_v6 = vld [vmem:[#allocation9_spill] sm:$0xff] }
 0xcfe   : > { %v3900_v14 = vrot.slane %v7219_v62, %v12100_v6 }
 0xcff   : > { %v3885_v39 = vpack.c.bf16 %v3848_v15, %v3847_v49 }
 0xd01   : > { %4095 = vmatmul.mubr.bf16.gmra.mrb[92].mxu0 %v3885_v39  ;;  %8031 = vmatmul.mubr.bf16.gmra.mrb[92].mxu1 %v3885_v39 }
 0xdbc   : > { %v4066_v42 = vpop.f32.mrb[80].mxu0 }
 0xdbd   : > { %v4067_v60 = vadd.f32 %v4066_v42, %v10654_v7  ;;  %v4068_v31 = vpop.f32.mrb[81].mxu0 }
 0xdbe   : > { %v4069_v4 = vadd.f32 %v4068_v31, %v10657_v21  ;;  %v4070_v18 = vpop.f32.mrb[82].mxu0 }
 0xdbf   : > { %v4071_v58 = vadd.f32 %v4070_v18, %v10654_v7  ;;  %v4072_v45 = vpop.f32.mrb[83].mxu0  ;;  %v4170_v53 = vmul.f32 0.17677669, %v4067_v60 }
 0xdc0   : > { %4182 = vxpose.xlu0.b32.start [1/8] (short) %v4069_v4, 128  ;;  %v4073_v40 = vadd.f32 %v4072_v45, %v10657_v21 }
 0xdc1   : > { %v4171_v41 = vmul.f32 0.17677669, %v4071_v58 }
 0xdc3   : > { %v10663_v26 = vpack.c.bf16 %v4171_v41, %v4170_v53 }
 0xdc4   : > { %4183 = vxpose.xlu0.b32.cont [2/8] (short) %v4073_v40, 128  ;;  %v4076_v51 = vpop.f32.mrb[84].mxu0  ;;  %v8028_v33 = vpop.f32.mrb[88].mxu1 }
 0xdc5   : > { %v4077_v8 = vadd.f32 %v4076_v51, %v10654_v7  ;;  %4484 = vrot.lane.b32.xlu1 %v10663_v26, %s12101_s30  ;;  %v4078_v29 = vpop.f32.mrb[85].mxu0  ;;  %v4139_v5 = vpop.f32.mrb[89].mxu1  ;;  %8038 = vmatprep.mubr.msk.bf16.mxu0 %vm1249_vm0, %v10663_v26  ;;  %v4148_v28 = vadd.f32 %v8028_v33, %v3900_v14 }
 0xdc6   : > { %v4079_v61 = vadd.f32 %v4078_v29, %v10657_v21  ;;  %v4080_v63 = vpop.f32.mrb[86].mxu0  ;;  %v8029_v2 = vpop.f32.mrb[90].mxu1  ;;  %v4140_v30 = vadd.f32 %v4139_v5, %v3900_v14 }
 0xdc7   : > { %v4081_v52 = vadd.f32 %v4080_v63, %v10654_v7  ;;  %v4151_v19 = vadd.f32 %v8029_v2, %v3900_v14  ;;  %v4082_v55 = vpop.f32.mrb[87].mxu0  ;;  %v4142_v43 = vpop.f32.mrb[91].mxu1  ;;  %v4172_v22 = vmul.f32 0.17677669, %v4077_v8 }
 0xdc8   : > { %v4143_v13 = vadd.f32 %v4142_v43, %v3900_v14  ;;  %4184 = vxpose.xlu0.b32.cont [3/8] (short) %v4079_v61, 128  ;;  %v4083_v46 = vadd.f32 %v4082_v55, %v10657_v21 }
 0xdc9   : > { %v4173_v16 = vmul.f32 0.17677669, %v4081_v52  ;;  %v10673_v27 = vpack.c.bf16 %v4151_v19, %v4148_v28 }
 0xdca   : > { %v10676_v34 = vpack.c.bf16 %v4143_v13, %v4140_v30 }
 0xdcb   : > { %v10678_v12 = vpack.c.bf16 %v4173_v16, %v4172_v22 }
 0xdcc   : > { %8046 = vmatprep.subr.bf16.mxu1 %v10676_v34  ;;  %4185 = vxpose.xlu0.b32.cont [4/8] (short) %v4083_v46, 128  ;;  %v4086_v32 = vpop.f32.mrb[88].mxu0 }
 0xdcd   : > { %v4087_v44 = vadd.f32 %v4086_v32, %v10654_v7  ;;  %8047 = vmatpush3.bf16.msra.mxu1 %v10676_v34  ;;  %4486 = vrot.lane.b32.xlu1 %v10678_v12, %s12101_s30  ;;  %v4088_v38 = vpop.f32.mrb[89].mxu0 }
 0xdce   : > { %v4089_v56 = vadd.f32 %v4088_v38, %v10657_v21  ;;  %v4090_v9 = vpop.f32.mrb[90].mxu0  ;;  %8048 = vmatprep.subr.bf16.mxu1 %v10673_v27 }
 0xdcf   : > { %v4091_v0 = vadd.f32 %v4090_v9, %v10654_v7  ;;  %v4092_v35 = vpop.f32.mrb[91].mxu0  ;;  %v4174_v23 = vmul.f32 0.17677669, %v4087_v44 }
 0xdd0   : > { %4186 = vxpose.xlu0.b32.cont [5/8] (short) %v4089_v56, 128  ;;  %v4093_v59 = vadd.f32 %v4092_v35, %v10657_v21 }
 0xdd1   : > { %v4175_v54 = vmul.f32 0.17677669, %v4091_v0  ;;  %8049 = vmatpush3.bf16.msra.mxu1 %v10673_v27 }
 0xdd3   : > { %v10690_v20 = vpack.c.bf16 %v4175_v54, %v4174_v23 }
 0xdd4   : > { %4187 = vxpose.xlu0.b32.cont [6/8] (short) %v4093_v59, 128  ;;  %v4096_v1 = vpop.f32.mrb[92].mxu0  ;;  %v8032_v36 = vpop.f32.mrb[92].mxu1 }
 0xdd5   : > { %v4097_v49 = vadd.f32 %v4096_v1, %v10654_v7  ;;  %4488 = vrot.lane.b32.xlu1 %v10690_v20, %s12101_s30  ;;  %v4098_v15 = vpop.f32.mrb[93].mxu0  ;;  %v4155_v39 = vpop.f32.mrb[93].mxu1  ;;  %v4164_v31 = vadd.f32 %v8032_v36, %v3900_v14 }
 0xdd6   : > { %v4099_v62 = vadd.f32 %v4098_v15, %v10657_v21  ;;  %v4100_v42 = vpop.f32.mrb[94].mxu0  ;;  %v8033_v60 = vpop.f32.mrb[94].mxu1  ;;  %v4156_v53 = vadd.f32 %v4155_v39, %v3900_v14 }
 0xdd7   : > { %v4101_v4 = vadd.f32 %v4100_v42, %v10654_v7  ;;  %v4167_v18 = vadd.f32 %v8033_v60, %v3900_v14  ;;  %v4102_v58 = vpop.f32.mrb[95].mxu0  ;;  %v4158_v45 = vpop.f32.mrb[95].mxu1  ;;  %v4176_v40 = vmul.f32 0.17677669, %v4097_v49 }
 0xdd8   : > { %v4159_v41 = vadd.f32 %v4158_v45, %v3900_v14  ;;  %4188 = vxpose.xlu0.b32.cont [7/8] (short) %v4099_v62, 128  ;;  %v4103_v8 = vadd.f32 %v4102_v58, %v10657_v21 }
 0xdd9   : > { %v4177_v51 = vmul.f32 0.17677669, %v4101_v4  ;;  %v10697_v33 = vpack.c.bf16 %v4167_v18, %v4164_v31 }
 0xdda   : > { %v10700_v29 = vpack.c.bf16 %v4159_v41, %v4156_v53 }
 0xddb   : > { %v4181_v5 = vpack.c.bf16 %v4177_v51, %v4176_v40 }
 0xddc   : > { %8050 = vmatprep.subr.bf16.mxu1 %v10700_v29  ;;  %4189 = vxpose.xlu0.b32.end [8/8] (short) %v4103_v8, 128 }
 0xddd   : > { %8051 = vmatpush3.bf16.msra.mxu1 %v10700_v29  ;;  %4490 = vrot.lane.b32.xlu1 %v4181_v5, %s12101_s30 }
 0xdde   : > { %8052 = vmatprep.subr.bf16.mxu1 %v10697_v33 }
 0xde1   : > { %8053 = vmatpush3.bf16.msra.mxu1 %v10697_v33  ;;  %4778 = vrot.lane.b32.xlu1 %v10663_v26, %s12102_s20 }
 0xde5   : > { %4780 = vrot.lane.b32.xlu1 %v10678_v12, %s12102_s20 }
 0xde9   : > { %4782 = vrot.lane.b32.xlu1 %v10690_v20, %s12102_s20 }
 0xded   : > { %4784 = vrot.lane.b32.xlu1 %v4181_v5, %s12102_s20 }
 0xdf1   : > { %5068 = vrot.lane.b32.xlu1 %v10663_v26, %s12103_s29 }
 0xdf5   : > { %5070 = vrot.lane.b32.xlu1 %v10678_v12, %s12103_s29 }
 0xdf9   : > { %5072 = vrot.lane.b32.xlu1 %v10690_v20, %s12103_s29 }
 0xdfd   : > { %5074 = vrot.lane.b32.xlu1 %v4181_v5, %s12103_s29 }
 0xe01   : > { %4665 = vrot.lane.b32.xlu1 %v10676_v34, %s12101_s30 }
 0xe05   : > { %4667 = vrot.lane.b32.xlu1 %v10673_v27, %s12101_s30 }
 0xe09   : > { %4671 = vrot.lane.b32.xlu1 %v10697_v33, %s12101_s30 }
 0xe0d   : > { %4959 = vrot.lane.b32.xlu1 %v10700_v29, %s12102_s20 }
 0xe25   : > { %4669 = vrot.lane.b32.xlu0 %v10700_v29, %s12101_s30 }
 0xe29   : > { %4955 = vrot.lane.b32.xlu0 %v10676_v34, %s12102_s20 }
 0xe2d   : > { %4957 = vrot.lane.b32.xlu0 %v10673_v27, %s12102_s20 }
 0xe37   : > { %v4485_v21 = vpop.permute.xlu1 %4484 }
 0xe3f   : > { %v4487_v61 = vpop.permute.xlu1 %4486 }
 0xe40   : > { %v4198_v7 = vpop.trf.xlu0 }
 0xe44   : > { %v4199_v26 = vpop.trf.xlu0 }
 0xe45   : > { %v4214_v14 = vpack.c.bf16 %v4199_v26, %v4198_v7 }
 0xe47   : > { %8034 = vmatprep.subr.bf16.mxu0 %v4214_v14  ;;  %v4489_v2 = vpop.permute.xlu1 %4488 }
 0xe48   : > { %8035 = vmatpush3.bf16.msra.mxu0 %v4214_v14  ;;  %v4200_v63 = vpop.trf.xlu0 }
 0xe4c   : > { %v4201_v28 = vpop.trf.xlu0 }
 0xe4d   : > { %v4215_v52 = vpack.c.bf16 %v4201_v28, %v4200_v63 }
 0xe4f   : > { %8036 = vmatprep.subr.bf16.mxu0 %v4215_v52  ;;  %v4491_v19 = vpop.permute.xlu1 %4490 }
 0xe50   : > { %8037 = vmatpush3.bf16.msra.mxu0 %v4215_v52  ;;  %v4202_v55 = vpop.trf.xlu0 }
 0xe53   : > { %8039 = vmatmul.mubr.msk.bf16.vlgmr.msra.gmra.mrb[96].mxu0 %vm1249_vm0, %v10678_v12  ;;  %v4779_v43 = vpop.permute.xlu1 %4778 }
 0xe54   : > { %8042 = vmatprep.mubr.msk.bf16.mxu0 %vm1249_vm0, %v10690_v20  ;;  %v4203_v30 = vpop.trf.xlu0 }
 0xe55   : > { %v4216_v13 = vpack.c.bf16 %v4203_v30, %v4202_v55 }
 0xe57   : > { %v4781_v22 = vpop.permute.xlu1 %4780  ;;  %8062 = vmatprep.subr.bf16.mxu0 %v4216_v13 }
 0xe58   : > { %v4204_v16 = vpop.trf.xlu0  ;;  %8063 = vmatpush3.bf16.msra.mxu0 %v4216_v13 }
 0xe5b   : > { %v4783_v46 = vpop.permute.xlu1 %4782  ;;  %8043 = vmatmul.mubr.msk.bf16.gmra.mrb[100].mxu0 %vm1249_vm0, %v4181_v5 }
 0xe5c   : > { %v4205_v32 = vpop.trf.xlu0  ;;  %8066 = vmatprep.mubr.msk.bf16.mxu0 %vm1249_vm0, %v4485_v21 }
 0xe5d   : > { %v4217_v44 = vpack.c.bf16 %v4205_v32, %v4204_v16 }
 0xe5f   : > { %8064 = vmatprep.subr.bf16.mxu0 %v4217_v44  ;;  %v4785_v38 = vpop.permute.xlu1 %4784 }
 0xe60   : > { %8065 = vmatpush3.bf16.msra.mxu0 %v4217_v44  ;;  %v4206_v12 = vpop.trf.xlu0 }
 0xe63   : > { %v5069_v56 = vpop.permute.xlu1 %5068  ;;  %8067 = vmatmul.mubr.msk.bf16.vlgmr.msra.gmra.mrb[104].mxu0 %vm1249_vm0, %v4487_v61 }
 0xe64   : > { %v4207_v9 = vpop.trf.xlu0  ;;  %8070 = vmatprep.mubr.msk.bf16.mxu0 %vm1249_vm0, %v4489_v2 }
 0xe65   : > { %v4218_v0 = vpack.c.bf16 %v4207_v9, %v4206_v12 }
 0xe67   : > { %v5071_v35 = vpop.permute.xlu1 %5070  ;;  %8090 = vmatprep.subr.bf16.mxu0 %v4218_v0 }
 0xe68   : > { %v4208_v23 = vpop.trf.xlu0  ;;  %8091 = vmatpush3.bf16.msra.mxu0 %v4218_v0 }
 0xe6b   : > { %v5073_v54 = vpop.permute.xlu1 %5072  ;;  %8071 = vmatmul.mubr.msk.bf16.gmra.mrb[108].mxu0 %vm1249_vm0, %v4491_v19 }
 0xe6c   : > { %v4209_v59 = vpop.trf.xlu0  ;;  %8094 = vmatprep.mubr.msk.bf16.mxu0 %vm1249_vm0, %v4779_v43 }
 0xe6d   : > { %v4219_v20 = vpack.c.bf16 %v4209_v59, %v4208_v23 }
 0xe6f   : > { %v5075_v1 = vpop.permute.xlu1 %5074  ;;  %8092 = vmatprep.subr.bf16.mxu0 %v4219_v20 }
 0xe70   : > { %v4210_v36 = vpop.trf.xlu0  ;;  %8093 = vmatpush3.bf16.msra.mxu0 %v4219_v20 }
 0xe73   : > { %v10745_v49 = vpop.permute.xlu1 %4665  ;;  %8095 = vmatmul.mubr.msk.bf16.vlgmr.msra.gmra.mrb[112].mxu0 %vm1249_vm0, %v4781_v22 }
 0xe74   : > { %v4211_v15 = vpop.trf.xlu0  ;;  %8074 = vmatprep.subr.bf16.mxu1 %v10745_v49  ;;  %8098 = vmatprep.mubr.msk.bf16.mxu0 %vm1249_vm0, %v4783_v46 }
 0xe75   : > { %v4220_v39 = vpack.c.bf16 %v4211_v15, %v4210_v36 }
 0xe77   : > { %8118 = vmatprep.subr.bf16.mxu0 %v4220_v39 }
 0xe78   : > { %v4212_v62 = vpop.trf.xlu0  ;;  %8119 = vmatpush3.bf16.msra.mxu0 %v4220_v39 }
 0xe7b   : > { %8099 = vmatmul.mubr.msk.bf16.gmra.mrb[116].mxu0 %vm1249_vm0, %v4785_v38 }
 0xe7c   : > { %v4213_v42 = vpop.trf.xlu0  ;;  %8122 = vmatprep.mubr.msk.bf16.mxu0 %vm1249_vm0, %v5069_v56 }
 0xe7d   : > { %v4221_v60 = vpack.c.bf16 %v4213_v42, %v4212_v62 }
 0xe7f   : > { %8120 = vmatprep.subr.bf16.mxu0 %v4221_v60 }
 0xe80   : > { %8121 = vmatpush3.bf16.msra.mxu0 %v4221_v60 }
 0xe83   : > { %8123 = vmatmul.mubr.msk.bf16.vlgmr.msra.gmra.mrb[120].mxu0 %vm1249_vm0, %v5071_v35 }
 0xe84   : > { %8126 = vmatprep.mubr.msk.bf16.mxu0 %vm1249_vm0, %v5073_v54 }
 0xe8b   : > { %8127 = vmatmul.mubr.msk.bf16.gmra.mrb[124].mxu0 %vm1249_vm0, %v5075_v1 }
 0xf26   : > { %v10755_v31 = vpop.f32.mrb[96].mxu0 }
 0xf27   : > { %v10757_v4 = vpop.f32.mrb[97].mxu0  ;;  %v4309_v18 = vsel %vm1327_vm1, %v10755_v31, -inf }
 0xf28   : > { %v10761_v58 = vpop.f32.mrb[98].mxu0  ;;  %4310 = vmax.xlane.f32.xlu1 %v4309_v18  ;;  %v4303_v41 = vsel %vm1327_vm1, %v10757_v4, -inf }
 0xf29   : > { %v10763_v45 = vpop.f32.mrb[99].mxu0  ;;  %v4312_v8 = vsel %vm1327_vm1, %v10761_v58, -inf }
 0xf2a   : > { %v4306_v53 = vsel %vm1327_vm1, %v10763_v45, -inf }
 0xf2b   : > { %4307 = vmax.xlane.f32.xlu0 %v4306_v53 }
 0xf2c   : > { %4304 = vmax.xlane.f32.xlu1 %v4303_v41 }
 0xf2e   : > { %v10769_v40 = vpop.f32.mrb[100].mxu0 }
 0xf2f   : > { %v10771_v51 = vpop.f32.mrb[101].mxu0  ;;  %v4321_v21 = vsel %vm1327_vm1, %v10769_v40, -inf }
 0xf30   : > { %4313 = vmax.xlane.f32.xlu1 %v4312_v8  ;;  %v10775_v5 = vpop.f32.mrb[102].mxu0  ;;  %v4315_v61 = vsel %vm1327_vm1, %v10771_v51, -inf }
 0xf31   : > { %v10777_v7 = vpop.f32.mrb[103].mxu0  ;;  %v4324_v28 = vsel %vm1327_vm1, %v10775_v5, -inf }
 0xf32   : > { %v4318_v55 = vsel %vm1327_vm1, %v10777_v7, -inf }
 0xf34   : > { %4322 = vmax.xlane.f32.xlu1 %v4321_v21 }
 0xf36   : > { %v10781_v26 = vpop.f32.mrb[104].mxu0 }
 0xf37   : > { %v10783_v14 = vpop.f32.mrb[105].mxu0  ;;  %v4575_v22 = vsel %vm1327_vm1, %v10781_v26, -inf }
 0xf38   : > { %4316 = vmax.xlane.f32.xlu1 %v4315_v61  ;;  %v10787_v63 = vpop.f32.mrb[106].mxu0  ;;  %v4569_v32 = vsel %vm1327_vm1, %v10783_v14, -inf }
 0xf39   : > { %v10789_v2 = vpop.f32.mrb[107].mxu0  ;;  %v4578_v56 = vsel %vm1327_vm1, %v10787_v63, -inf }
 0xf3a   : > { %v4572_v23 = vsel %vm1327_vm1, %v10789_v2, -inf }
 0xf3c   : > { %4325 = vmax.xlane.f32.xlu1 %v4324_v28 }
 0xf3e   : > { %v10793_v52 = vpop.f32.mrb[108].mxu0 }
 0xf3f   : > { %v10795_v19 = vpop.f32.mrb[109].mxu0  ;;  %v4587_v1 = vsel %vm1327_vm1, %v10793_v52, -inf }
 0xf40   : > { %v10799_v43 = vpop.f32.mrb[110].mxu0  ;;  %4319 = vmax.xlane.f32.xlu1 %v4318_v55  ;;  %v4581_v62 = vsel %vm1327_vm1, %v10795_v19, -inf }
 0xf41   : > { %v10801_v30 = vpop.f32.mrb[111].mxu0  ;;  %v4590_v13 = vsel %vm1327_vm1, %v10799_v43, -inf }
 0xf42   : > { %4591 = vmax.xlane.f32.xlu0 %v4590_v13  ;;  %v4584_v53 = vsel %vm1327_vm1, %v10801_v30, -inf }
 0xf44   : > { %4576 = vmax.xlane.f32.xlu1 %v4575_v22 }
 0xf46   : > { %v10807_v16 = vpop.f32.mrb[112].mxu0 }
 0xf47   : > { %v10809_v46 = vpop.f32.mrb[113].mxu0  ;;  %v4869_v61 = vsel %vm1327_vm1, %v10807_v16, -inf }
 0xf48   : > { %v10813_v44 = vpop.f32.mrb[114].mxu0  ;;  %4570 = vmax.xlane.f32.xlu1 %v4569_v32  ;;  %v4863_v13 = vsel %vm1327_vm1, %v10809_v46, -inf }
 0xf49   : > { %v10815_v38 = vpop.f32.mrb[115].mxu0  ;;  %v4872_v12 = vsel %vm1327_vm1, %v10813_v44, -inf }
 0xf4a   : > { %4873 = vmax.xlane.f32.xlu0 %v4872_v12  ;;  %v4866_v9 = vsel %vm1327_vm1, %v10815_v38, -inf }
 0xf4c   : > { %4579 = vmax.xlane.f32.xlu1 %v4578_v56 }
 0xf4e   : > { %4867 = vmax.xlane.f32.xlu0 %v4866_v9  ;;  %v10823_v0 = vpop.f32.mrb[116].mxu0 }
 0xf4f   : > { %v10825_v35 = vpop.f32.mrb[117].mxu0  ;;  %v4881_v22 = vsel %vm1327_vm1, %v10823_v0, -inf }
 0xf50   : > { %v10829_v54 = vpop.f32.mrb[118].mxu0  ;;  %4573 = vmax.xlane.f32.xlu1 %v4572_v23  ;;  %v4875_v32 = vsel %vm1327_vm1, %v10825_v35, -inf }
 0xf51   : > { %v10831_v59 = vpop.f32.mrb[119].mxu0  ;;  %v4884_v20 = vsel %vm1327_vm1, %v10829_v54, -inf }
 0xf52   : > { %4885 = vmax.xlane.f32.xlu0 %v4884_v20  ;;  %v4878_v36 = vsel %vm1327_vm1, %v10831_v59, -inf  ;;  %v10883_v20 = vpop.permute.xlu1 %4667 }
 0xf54   : > { %4588 = vmax.xlane.f32.xlu1 %v4587_v1 }
 0xf56   : > { %v10839_v15 = vpop.f32.mrb[120].mxu0  ;;  %4879 = vmax.xlane.f32.xlu0 %v4878_v36  ;;  %v10887_v36 = vpop.permute.xlu0 %4669 }
 0xf57   : > { %v10841_v39 = vpop.f32.mrb[121].mxu0  ;;  %v5159_v12 = vsel %vm1327_vm1, %v10839_v15, -inf }
 0xf58   : > { %v10845_v42 = vpop.f32.mrb[122].mxu0  ;;  %4582 = vmax.xlane.f32.xlu1 %v4581_v62  ;;  %v5153_v56 = vsel %vm1327_vm1, %v10841_v39, -inf }
 0xf59   : > { %v10847_v60 = vpop.f32.mrb[123].mxu0  ;;  %v5162_v18 = vsel %vm1327_vm1, %v10845_v42, -inf }
 0xf5a   : > { %5163 = vmax.xlane.f32.xlu0 %v5162_v18  ;;  %v5156_v41 = vsel %vm1327_vm1, %v10847_v60, -inf  ;;  %v10893_v18 = vpop.permute.xlu0 %4955 }
 0xf5c   : > { %4585 = vmax.xlane.f32.xlu1 %v4584_v53 }
 0xf5e   : > { %v10855_v8 = vpop.f32.mrb[124].mxu0  ;;  %5157 = vmax.xlane.f32.xlu0 %v5156_v41  ;;  %v10897_v41 = vpop.permute.xlu0 %4957 }
 0xf5f   : > { %v10857_v21 = vpop.f32.mrb[125].mxu0  ;;  %v5171_v1 = vsel %vm1327_vm1, %v10855_v8, -inf }
 0xf60   : > { %v10861_v28 = vpop.f32.mrb[126].mxu0  ;;  %4870 = vmax.xlane.f32.xlu1 %v4869_v61  ;;  %v5165_v62 = vsel %vm1327_vm1, %v10857_v21, -inf }
 0xf61   : > { %v10863_v55 = vpop.f32.mrb[127].mxu0  ;;  %v5174_v9 = vsel %vm1327_vm1, %v10861_v28, -inf }
 0xf62   : > { %v5168_v23 = vsel %vm1327_vm1, %v10863_v55, -inf }
 0xf64   : > { %4864 = vmax.xlane.f32.xlu1 %v4863_v13 }
 0xf68   : > { %4882 = vmax.xlane.f32.xlu1 %v4881_v22 }
 0xf6c   : > { %4876 = vmax.xlane.f32.xlu1 %v4875_v32 }
 0xf70   : > { %5160 = vmax.xlane.f32.xlu1 %v5159_v12 }
 0xf74   : > { %5245 = vrot.lane.b32.xlu0 %v10676_v34, %s12103_s29  ;;  %5154 = vmax.xlane.f32.xlu1 %v5153_v56  ;;  %v10889_v34 = vpop.permute.xlu1 %4671 }
 0xf78   : > { %v10895_v53 = vpop.permute.xlu1 %4959 }
 0xf85   : > { %4961 = vrot.lane.b32.xlu1 %v10697_v33, %s12102_s20 }
 0xf93   : > { %5175 = vmax.xlane.f32.xlu0 %v5174_v9 }
 0xf97   : > { %5169 = vmax.xlane.f32.xlu0 %v5168_v23 }
 0xfa9   : > { %5172 = vmax.xlane.f32.xlu1 %v5171_v1 }
 0xfad   : > { %5166 = vmax.xlane.f32.xlu1 %v5165_v62 }
 0xfb5   : > { %v4311_v61 = vpop.xlane.xlu1 %4310 }
 0xfb6   : > { %v4329_v13 = vsub.f32 %v10755_v31, %v4311_v61 }
 0xfb8   : > { %v4339_v22 = vmul.f32 1.442695, %v4329_v13  ;;  %v4308_v32 = vpop.xlane.xlu0 %4307 }
 0xfb9   : > { %v4305_v12 = vpop.xlane.xlu1 %4304  ;;  %v4328_v9 = vsub.f32 %v10763_v45, %v4308_v32 }
 0xfba   : > { %8703 = vpow2.f32 %v4339_v22  ;;  %v4327_v56 = vsub.f32 %v10757_v4, %v4305_v12 }
 0xfbb   : > { %v4337_v10 = vmul.f32 1.442695, %v4328_v9 }
 0xfbc   : > { %v4335_v23 = vmul.f32 1.442695, %v4327_v56 }
 0xfbd   : > { %v4314_v1 = vpop.xlane.xlu1 %4313 }
 0xfbe   : > { %8705 = vpow2.f32 %v4335_v23  ;;  %v4330_v62 = vsub.f32 %v10761_v58, %v4314_v1 }
 0xfc0   : > { %v4341_v6 = vmul.f32 1.442695, %v4330_v62 }
 0xfc1   : > { %v4323_v48 = vpop.xlane.xlu1 %4322 }
 0xfc2   : > { %8707 = vpow2.f32 %v4341_v6  ;;  %v4333_v50 = vsub.f32 %v10769_v40, %v4323_v48 }
 0xfc3   : > { %8709 = vpow2.f32 %v4337_v10 }
 0xfc4   : > { %v10904_v31 = vpop.eup %8703  ;;  %v4347_v61 = vmul.f32 1.442695, %v4333_v50 }
 0xfc5   : > { %v4317_v13 = vpop.xlane.xlu1 %4316  ;;  %v4357_v4 = vsel %vm1327_vm1, %v10904_v31, 0.0 }
 0xfc6   : > { %8711 = vpow2.f32 %v4347_v61  ;;  %v4331_v45 = vsub.f32 %v10771_v51, %v4317_v13  ;;  %4358 = vadd.xlane.f32.xlu1 %v4357_v4 }
 0xfc8   : > { %v10909_v22 = vpop.eup %8705  ;;  %v4343_v58 = vmul.f32 1.442695, %v4331_v45 }
 0xfc9   : > { %v4326_v32 = vpop.xlane.xlu1 %4325  ;;  %v4351_v6 = vsel %vm1327_vm1, %v10909_v22, 0.0 }
 0xfca   : > { %8713 = vpow2.f32 %v4343_v58  ;;  %v4334_v48 = vsub.f32 %v10775_v5, %v4326_v32  ;;  %4352 = vadd.xlane.f32.xlu1 %v4351_v6 }
 0xfcc   : > { %v10914_v50 = vpop.eup %8707  ;;  %v4349_v10 = vmul.f32 1.442695, %v4334_v48 }
 0xfcd   : > { %v4320_v40 = vpop.xlane.xlu1 %4319  ;;  %v4360_v12 = vsel %vm1327_vm1, %v10914_v50, 0.0  ;;  %v10918_v51 = vpop.eup %8709 }
 0xfce   : > { %8715 = vpow2.f32 %v4349_v10  ;;  %v4332_v56 = vsub.f32 %v10777_v7, %v4320_v40  ;;  %4361 = vadd.xlane.f32.xlu0 %v4360_v12  ;;  %v4354_v5 = vsel %vm1327_vm1, %v10918_v51, 0.0 }
 0xfcf   : > { %v4592_v58 = vpop.xlane.xlu0 %4591 }
 0xfd0   : > { %v10921_v9 = vpop.eup %8711  ;;  %v4345_v23 = vmul.f32 1.442695, %v4332_v56 }
 0xfd1   : > { %v4577_v1 = vpop.xlane.xlu1 %4576  ;;  %v4369_v62 = vsel %vm1327_vm1, %v10921_v9, 0.0 }
 0xfd2   : > { %8717 = vpow2.f32 %v4345_v23  ;;  %v4595_v61 = vsub.f32 %v10781_v26, %v4577_v1  ;;  %4355 = vadd.xlane.f32.xlu0 %v4354_v5  ;;  %4370 = vadd.xlane.f32.xlu1 %v4369_v62  ;;  %v4600_v23 = vsub.f32 %v10799_v43, %v4592_v58 }
 0xfd4   : > { %v10928_v13 = vpop.eup %8713  ;;  %v4605_v4 = vmul.f32 1.442695, %v4595_v61 }
 0xfd5   : > { %v4571_v7 = vpop.xlane.xlu1 %4570  ;;  %v4363_v45 = vsel %vm1327_vm1, %v10928_v13, 0.0 }
 0xfd6   : > { %8719 = vpow2.f32 %v4605_v4  ;;  %v4593_v32 = vsub.f32 %v10783_v14, %v4571_v7  ;;  %4364 = vadd.xlane.f32.xlu1 %v4363_v45  ;;  %v4615_v4 = vmul.f32 1.442695, %v4600_v23 }
 0xfd7   : > { %v4874_v40 = vpop.xlane.xlu0 %4873 }
 0xfd8   : > { %v10933_v6 = vpop.eup %8715  ;;  %v4601_v48 = vmul.f32 1.442695, %v4593_v32 }
 0xfd9   : > { %v4580_v10 = vpop.xlane.xlu1 %4579  ;;  %v4372_v26 = vsel %vm1327_vm1, %v10933_v6, 0.0 }
 0xfda   : > { %8721 = vpow2.f32 %v4601_v48  ;;  %v4596_v12 = vsub.f32 %v10787_v63, %v4580_v10  ;;  %4373 = vadd.xlane.f32.xlu0 %v4372_v26 }
 0xfdb   : > { %v4868_v7 = vpop.xlane.xlu0 %4867 }
 0xfdc   : > { %v10938_v56 = vpop.eup %8717  ;;  %v4607_v1 = vmul.f32 1.442695, %v4596_v12 }
 0xfdd   : > { %v4574_v5 = vpop.xlane.xlu1 %4573  ;;  %v4366_v14 = vsel %vm1327_vm1, %v10938_v56, 0.0 }
 0xfde   : > { %8723 = vpow2.f32 %v4607_v1  ;;  %v4594_v62 = vsub.f32 %v10789_v2, %v4574_v5  ;;  %4367 = vadd.xlane.f32.xlu0 %v4366_v14 }
 0xfdf   : > { %v4886_v26 = vpop.xlane.xlu0 %4885 }
 0xfe0   : > { %v10944_v61 = vpop.eup %8719  ;;  %v4603_v45 = vmul.f32 1.442695, %v4594_v62 }
 0xfe1   : > { %v4589_v63 = vpop.xlane.xlu1 %4588  ;;  %v4623_v32 = vsel %vm1327_vm1, %v10944_v61, 0.0 }
 0xfe2   : > { %8725 = vpow2.f32 %v4603_v45  ;;  %v4599_v43 = vsub.f32 %v10793_v52, %v4589_v63  ;;  %4624 = vadd.xlane.f32.xlu1 %v4623_v32 }
 0xfe3   : > { %8727 = vpow2.f32 %v4615_v4  ;;  %v4880_v4 = vpop.xlane.xlu0 %4879 }
 0xfe4   : > { %v10949_v58 = vpop.eup %8721  ;;  %v4613_v48 = vmul.f32 1.442695, %v4599_v43 }
 0xfe5   : > { %v4583_v10 = vpop.xlane.xlu1 %4582  ;;  %v4617_v2 = vsel %vm1327_vm1, %v10949_v58, 0.0 }
 0xfe6   : > { %8729 = vpow2.f32 %v4613_v48  ;;  %v4597_v12 = vsub.f32 %v10795_v19, %v4583_v10  ;;  %4618 = vadd.xlane.f32.xlu1 %v4617_v2  ;;  %v4890_v10 = vsub.f32 %v10813_v44, %v4874_v40 }
 0xfe8   : > { %v10954_v23 = vpop.eup %8723  ;;  %v4609_v1 = vmul.f32 1.442695, %v4597_v12 }
 0xfe9   : > { %v4586_v5 = vpop.xlane.xlu1 %4585  ;;  %v4626_v52 = vsel %vm1327_vm1, %v10954_v23, 0.0 }
 0xfea   : > { %8731 = vpow2.f32 %v4609_v1  ;;  %v4598_v14 = vsub.f32 %v10801_v30, %v4586_v5  ;;  %4627 = vadd.xlane.f32.xlu0 %v4626_v52  ;;  %v5164_v5 = vpop.xlane.xlu0 %5163 }
 0xfec   : > { %v10959_v62 = vpop.eup %8725  ;;  %v4611_v45 = vmul.f32 1.442695, %v4598_v14  ;;  %v4901_v14 = vmul.f32 1.442695, %v4890_v10 }
 0xfed   : > { %v4871_v63 = vpop.xlane.xlu1 %4870  ;;  %v4620_v19 = vsel %vm1327_vm1, %v10959_v62, 0.0  ;;  %v10963_v32 = vpop.eup %8727 }
 0xfee   : > { %8733 = vpow2.f32 %v4611_v45  ;;  %v4889_v43 = vsub.f32 %v10807_v16, %v4871_v63  ;;  %4621 = vadd.xlane.f32.xlu0 %v4620_v19  ;;  %v4638_v12 = vsel %vm1327_vm1, %v10963_v32, 0.0  ;;  %v4888_v45 = vsub.f32 %v10815_v38, %v4868_v7  ;;  %v5158_v10 = vpop.xlane.xlu0 %5157 }
 0xff0   : > { %v10966_v48 = vpop.eup %8729  ;;  %v4899_v30 = vmul.f32 1.442695, %v4889_v43  ;;  %v4894_v43 = vsub.f32 %v10829_v54, %v4886_v26 }
 0xff1   : > { %v4865_v2 = vpop.xlane.xlu1 %4864  ;;  %v4635_v1 = vsel %vm1327_vm1, %v10966_v48, 0.0 }
 0xff2   : > { %8735 = vpow2.f32 %v4899_v30  ;;  %v4887_v52 = vsub.f32 %v10809_v46, %v4865_v2  ;;  %4639 = vadd.xlane.f32.xlu0 %v4638_v12  ;;  %4636 = vadd.xlane.f32.xlu1 %v4635_v1  ;;  %v4897_v46 = vmul.f32 1.442695, %v4888_v45  ;;  %v4892_v2 = vsub.f32 %v10831_v59, %v4880_v4 }
 0xff4   : > { %v10974_v16 = vpop.eup %8731  ;;  %v4895_v44 = vmul.f32 1.442695, %v4887_v52  ;;  %v5178_v52 = vsub.f32 %v10847_v60, %v5158_v10  ;;  %v4905_v26 = vmul.f32 1.442695, %v4892_v2 }
 0xff5   : > { %v4883_v40 = vpop.xlane.xlu1 %4882  ;;  %v4629_v63 = vsel %vm1327_vm1, %v10974_v16, 0.0 }
 0xff6   : > { %8737 = vpow2.f32 %v4895_v44  ;;  %v4893_v19 = vsub.f32 %v10823_v0, %v4883_v40  ;;  %4630 = vadd.xlane.f32.xlu1 %v4629_v63  ;;  %v4909_v0 = vmul.f32 1.442695, %v4894_v43  ;;  %v5187_v44 = vmul.f32 1.442695, %v5178_v52 }
 0xff7   : > { %8739 = vpow2.f32 %v4901_v14 }
 0xff8   : > { %v10981_v30 = vpop.eup %8733  ;;  %v4907_v12 = vmul.f32 1.442695, %v4893_v19 }
 0xff9   : > { %v4877_v38 = vpop.xlane.xlu1 %4876  ;;  %v4632_v7 = vsel %vm1327_vm1, %v10981_v30, 0.0 }
 0xffa   : > { %8741 = vpow2.f32 %v4907_v12  ;;  %v4891_v1 = vsub.f32 %v10825_v35, %v4877_v38  ;;  %4633 = vadd.xlane.f32.xlu0 %v4632_v7 }
 0xffb   : > { %8743 = vpow2.f32 %v4897_v46 }
 0xffc   : > { %v10988_v54 = vpop.eup %8735  ;;  %v4903_v14 = vmul.f32 1.442695, %v4891_v1 }
 0xffd   : > { %v5161_v45 = vpop.xlane.xlu1 %5160  ;;  %v4917_v59 = vsel %vm1327_vm1, %v10988_v54, 0.0 }
 0xffe   : > { %8745 = vpow2.f32 %v4903_v14  ;;  %v5179_v4 = vsub.f32 %v10839_v15, %v5161_v45  ;;  %4918 = vadd.xlane.f32.xlu0 %v4917_v59  ;;  %v5180_v15 = vsub.f32 %v10845_v42, %v5164_v5 }
 0xfff   : > { %8747 = vpow2.f32 %v4909_v0 }
0x1000   : > { %v10993_v35 = vpop.eup %8737  ;;  %8749 = vpow2.f32 %v4905_v26  ;;  %v5189_v40 = vmul.f32 1.442695, %v5179_v4 }
0x1001   : > { %v5155_v60 = vpop.xlane.xlu1 %5154  ;;  %v4911_v63 = vsel %vm1327_vm1, %v10993_v35, 0.0  ;;  %v10997_v19 = vpop.eup %8739  ;;  %8751 = vpow2.f32 %v5187_v44 }
0x1002   : > { %v5177_v43 = vsub.f32 %v10841_v39, %v5155_v60  ;;  %4912 = vadd.xlane.f32.xlu0 %v4911_v63  ;;  %8753 = vpow2.f32 %v5189_v40  ;;  %v4920_v10 = vsel %vm1327_vm1, %v10997_v19, 0.0  ;;  %v5191_v39 = vmul.f32 1.442695, %v5180_v15 }
0x1004   : > { %v11000_v46 = vpop.eup %8741  ;;  %v5185_v2 = vmul.f32 1.442695, %v5177_v43  ;;  %v11039_v43 = vpop.permute.xlu0 %5245 }
0x1005   : > { %v4929_v12 = vsel %vm1327_vm1, %v11000_v46, 0.0  ;;  %v11007_v38 = vpop.eup %8743 }
0x1006   : > { %4921 = vadd.xlane.f32.xlu0 %v4920_v10  ;;  %4930 = vadd.xlane.f32.xlu1 %v4929_v12  ;;  %8755 = vpow2.f32 %v5185_v2  ;;  %v4914_v42 = vsel %vm1327_vm1, %v11007_v38, 0.0  ;;  %v11041_v2 = vpop.permute.xlu1 %4961 }
0x1007   : > { %8757 = vpow2.f32 %v5191_v39 }
0x1008   : > { %v11009_v7 = vpop.eup %8745 }
0x1009   : > { %v11011_v1 = vpop.eup %8747  ;;  %v4923_v5 = vsel %vm1327_vm1, %v11009_v7, 0.0 }
0x100a   : > { %v11017_v0 = vpop.eup %8749  ;;  %4915 = vadd.xlane.f32.xlu0 %v4914_v42  ;;  %4924 = vadd.xlane.f32.xlu1 %v4923_v5  ;;  %v4932_v14 = vsel %vm1327_vm1, %v11011_v1, 0.0 }
0x100b   : > { %v11019_v52 = vpop.eup %8751  ;;  %v4926_v26 = vsel %vm1327_vm1, %v11017_v0, 0.0 }
0x100c   : > { %v11025_v45 = vpop.eup %8753  ;;  %v5204_v59 = vsel %vm1327_vm1, %v11019_v52, 0.0 }
0x100d   : > { %v5207_v4 = vsel %vm1327_vm1, %v11025_v45, 0.0 }
0x100e   : > { %4927 = vadd.xlane.f32.xlu0 %v4926_v26  ;;  %4933 = vadd.xlane.f32.xlu1 %v4932_v14 }
0x1010   : > { %v11031_v44 = vpop.eup %8755 }
0x1011   : > { %v5201_v40 = vsel %vm1327_vm1, %v11031_v44, 0.0  ;;  %v11035_v60 = vpop.eup %8757 }
0x1012   : > { %5205 = vadd.xlane.f32.xlu0 %v5204_v59  ;;  %5208 = vadd.xlane.f32.xlu1 %v5207_v4  ;;  %v5210_v63 = vsel %vm1327_vm1, %v11035_v60, 0.0 }
0x1016   : > { %5202 = vadd.xlane.f32.xlu1 %v5201_v40 }
0x101a   : > { %5211 = vadd.xlane.f32.xlu1 %v5210_v63 }
0x1020   : > { %v5176_v15 = vpop.xlane.xlu0 %5175 }
0x1021   : > { %v5184_v5 = vsub.f32 %v10861_v28, %v5176_v15 }
0x1023   : > { %v5199_v40 = vmul.f32 1.442695, %v5184_v5 }
0x1024   : > { %v5170_v10 = vpop.xlane.xlu0 %5169 }
0x1025   : > { %v5182_v12 = vsub.f32 %v10863_v55, %v5170_v10 }
0x1027   : > { %v5195_v26 = vmul.f32 1.442695, %v5182_v12 }
0x1036   : > { %v5173_v39 = vpop.xlane.xlu1 %5172 }
0x1037   : > { %v5183_v42 = vsub.f32 %v10855_v8, %v5173_v39 }
0x1039   : > { %v5197_v14 = vmul.f32 1.442695, %v5183_v42 }
0x103a   : > { %v5167_v59 = vpop.xlane.xlu1 %5166 }
0x103b   : > { %8759 = vpow2.f32 %v5197_v14  ;;  %v5181_v4 = vsub.f32 %v10857_v21, %v5167_v59 }
0x103c   : > { %8761 = vpow2.f32 %v5195_v26 }
0x103d   : > { %v5193_v63 = vmul.f32 1.442695, %v5181_v4 }
0x103f   : > { %8763 = vpow2.f32 %v5193_v63 }
0x1040   : > { %8765 = vpow2.f32 %v5199_v40 }
0x1045   : > { %v11047_v17 = vpop.eup %8759 }
0x1046   : > { %v5219_v55 = vsel %vm1327_vm1, %v11047_v17, 0.0  ;;  %v11051_v10 = vpop.eup %8761 }
0x1047   : > { %5220 = vadd.xlane.f32.xlu0 %v5219_v55  ;;  %v5216_v28 = vsel %vm1327_vm1, %v11051_v10, 0.0 }
0x1049   : > { %v11053_v8 = vpop.eup %8763 }
0x104a   : > { %v5213_v21 = vsel %vm1327_vm1, %v11053_v8, 0.0  ;;  %v11059_v15 = vpop.eup %8765 }
0x104b   : > { %5217 = vadd.xlane.f32.xlu0 %v5216_v28  ;;  %5214 = vadd.xlane.f32.xlu1 %v5213_v21  ;;  %v5222_v12 = vsel %vm1327_vm1, %v11059_v15, 0.0 }
0x104f   : > { %5223 = vadd.xlane.f32.xlu1 %v5222_v12 }
0x1053   : > { %v4359_v39 = vpop.xlane.xlu1 %4358 }
0x1057   : > { %v4353_v42 = vpop.xlane.xlu1 %4352 }
0x105b   : > { %v4362_v5 = vpop.xlane.xlu0 %4361 }
0x105c   : > { %8767 = vrcp.f32 %v4362_v5 }
0x105d   : > { %8769 = vrcp.f32 %v4353_v42 }
0x105e   : > { %8771 = vrcp.f32 %v4359_v39 }
0x105f   : > { %v4356_v26 = vpop.xlane.xlu0 %4355  ;;  %v4371_v14 = vpop.xlane.xlu1 %4370 }
0x1060   : > { %8773 = vrcp.f32 %v4356_v26  ;;  %5249 = vrot.lane.b32.xlu1 %v10700_v29, %s12103_s29 }
0x1061   : > { %5247 = vrot.lane.b32.xlu0 %v10673_v27, %s12103_s29 }
0x1063   : > { %v4365_v4 = vpop.xlane.xlu1 %4364 }
0x1064   : > { %5251 = vrot.lane.b32.xlu1 %v10697_v33, %s12103_s29 }
0x1066   : > { %v8768_v59 = vpop.eup %8767 }
0x1067   : > { %v4374_v40 = vpop.xlane.xlu0 %4373  ;;  %v8770_v63 = vpop.eup %8769  ;;  %v4386_v21 = vmul.f32 %v8768_v59, %v10914_v50 }
0x1068   : > { %v8772_v55 = vpop.eup %8771  ;;  %8775 = vrcp.f32 %v4374_v40  ;;  %v4383_v29 = vmul.f32 %v8770_v63, %v10909_v22 }
0x1069   : > { %8777 = vrcp.f32 %v4365_v4  ;;  %v4385_v27 = vmul.f32 %v8772_v55, %v10904_v31 }
0x106a   : > { %v8774_v28 = vpop.eup %8773  ;;  %8779 = vrcp.f32 %v4371_v14 }
0x106b   : > { %v4368_v12 = vpop.xlane.xlu0 %4367  ;;  %v4384_v39 = vmul.f32 %v8774_v28, %v10918_v51  ;;  %v4392_v42 = vpack.c.bf16 %v4386_v21, %v4385_v27 }
0x106c   : > { %8781 = vrcp.f32 %v4368_v12 }
0x106d   : > { %v4391_v33 = vpack.c.bf16 %v4384_v39, %v4383_v29 }
0x106f   : > { %8054 = vmatprep.mubr.msk.bf16.mxu1 %vm1327_vm1, %v4391_v33  ;;  %v4625_v5 = vpop.xlane.xlu1 %4624 }
0x1070   : > { %8055 = vmatmul.mubr.msk.bf16.vlgmr.msra.gmra.mrb[96].mxu1 %vm1327_vm1, %v4392_v42 }
0x1071   : > { %8075 = vmatpush3.bf16.msra.mxu1 %v10745_v49 }
0x1072   : > { %8076 = vmatprep.subr.bf16.mxu1 %v10883_v20  ;;  %v8776_v50 = vpop.eup %8775 }
0x1073   : > { %v8778_v26 = vpop.eup %8777  ;;  %v4390_v31 = vmul.f32 %v8776_v50, %v10933_v6  ;;  %v4619_v51 = vpop.xlane.xlu1 %4618 }
0x1074   : > { %v8780_v14 = vpop.eup %8779  ;;  %v4387_v4 = vmul.f32 %v8778_v26, %v10928_v13 }
0x1075   : > { %8077 = vmatpush3.bf16.msra.mxu1 %v10883_v20  ;;  %v4389_v49 = vmul.f32 %v8780_v14, %v10921_v9 }
0x1076   : > { %v8782_v22 = vpop.eup %8781  ;;  %8078 = vmatprep.subr.bf16.mxu1 %v10887_v36 }
0x1077   : > { %v4628_v59 = vpop.xlane.xlu0 %4627  ;;  %v4388_v40 = vmul.f32 %v8782_v22, %v10938_v56  ;;  %v4394_v20 = vpack.c.bf16 %v4390_v31, %v4389_v49 }
0x1078   : > { %8783 = vrcp.f32 %v4628_v59 }
0x1079   : > { %8079 = vmatpush3.bf16.msra.mxu1 %v10887_v36  ;;  %v4393_v63 = vpack.c.bf16 %v4388_v40, %v4387_v4  ;;  %8785 = vrcp.f32 %v4619_v51 }
0x107a   : > { %8080 = vmatprep.subr.bf16.mxu1 %v10889_v34  ;;  %8787 = vrcp.f32 %v4625_v5 }
0x107b   : > { %v4622_v55 = vpop.xlane.xlu0 %4621  ;;  %8058 = vmatprep.mubr.msk.bf16.mxu1 %vm1327_vm1, %v4393_v63 }
0x107c   : > { %8789 = vrcp.f32 %v4622_v55  ;;  %8059 = vmatmul.mubr.msk.bf16.gmra.mrb[100].mxu1 %vm1327_vm1, %v4394_v20 }
0x107d   : > { %8081 = vmatpush3.bf16.msra.mxu1 %v10889_v34 }
0x107e   : > { %8102 = vmatprep.subr.bf16.mxu1 %v10893_v18 }
0x107f   : > { %v4637_v9 = vpop.xlane.xlu1 %4636  ;;  %v4640_v13 = vpop.xlane.xlu0 %4639 }
0x1080   : > { %8791 = vrcp.f32 %v4640_v13 }
0x1081   : > { %8793 = vrcp.f32 %v4637_v9 }
0x1082   : > { %v8784_v6 = vpop.eup %8783 }
0x1083   : > { %v4631_v36 = vpop.xlane.xlu1 %4630  ;;  %v8786_v56 = vpop.eup %8785  ;;  %v4652_v12 = vmul.f32 %v8784_v6, %v10954_v23 }
0x1084   : > { %v8788_v28 = vpop.eup %8787  ;;  %8795 = vrcp.f32 %v4631_v36  ;;  %v4649_v39 = vmul.f32 %v8786_v56, %v10949_v58 }
0x1085   : > { %v4651_v34 = vmul.f32 %v8788_v28, %v10944_v61 }
0x1086   : > { %v8790_v21 = vpop.eup %8789 }
0x1087   : > { %v4634_v29 = vpop.xlane.xlu0 %4633  ;;  %v4650_v27 = vmul.f32 %v8790_v21, %v10959_v62  ;;  %v4658_v42 = vpack.c.bf16 %v4652_v12, %v4651_v34 }
0x1088   : > { %8797 = vrcp.f32 %v4634_v29 }
0x1089   : > { %v4657_v33 = vpack.c.bf16 %v4650_v27, %v4649_v39 }
0x108a   : > { %v8792_v50 = vpop.eup %8791 }
0x108b   : > { %v4919_v5 = vpop.xlane.xlu0 %4918  ;;  %8082 = vmatprep.mubr.msk.bf16.mxu1 %vm1327_vm1, %v4657_v33  ;;  %v8794_v23 = vpop.eup %8793  ;;  %v4656_v14 = vmul.f32 %v8792_v50, %v10963_v32 }
0x108c   : > { %8083 = vmatmul.mubr.msk.bf16.vlgmr.msra.gmra.mrb[104].mxu1 %vm1327_vm1, %v4658_v42  ;;  %v4655_v61 = vmul.f32 %v8794_v23, %v10966_v48 }
0x108d   : > { %8103 = vmatpush3.bf16.msra.mxu1 %v10893_v18 }
0x108e   : > { %8104 = vmatprep.subr.bf16.mxu1 %v10897_v41  ;;  %v8796_v58 = vpop.eup %8795 }
0x108f   : > { %v4913_v26 = vpop.xlane.xlu0 %4912  ;;  %v4653_v51 = vmul.f32 %v8796_v58, %v10974_v16 }
0x1091   : > { %8105 = vmatpush3.bf16.msra.mxu1 %v10897_v41  ;;  %v4660_v41 = vpack.c.bf16 %v4656_v14, %v4655_v61 }
0x1092   : > { %v8798_v62 = vpop.eup %8797  ;;  %8106 = vmatprep.subr.bf16.mxu1 %v10895_v53 }
0x1093   : > { %v4922_v22 = vpop.xlane.xlu0 %4921  ;;  %v4931_v31 = vpop.xlane.xlu1 %4930  ;;  %v4654_v18 = vmul.f32 %v8798_v62, %v10981_v30 }
0x1094   : > { %8799 = vrcp.f32 %v4922_v22 }
0x1095   : > { %8107 = vmatpush3.bf16.msra.mxu1 %v10895_v53  ;;  %v4659_v59 = vpack.c.bf16 %v4654_v18, %v4653_v51  ;;  %8801 = vrcp.f32 %v4913_v26 }
0x1096   : > { %8108 = vmatprep.subr.bf16.mxu1 %v11041_v2  ;;  %8803 = vrcp.f32 %v4919_v5 }
0x1097   : > { %v4916_v4 = vpop.xlane.xlu0 %4915  ;;  %8086 = vmatprep.mubr.msk.bf16.mxu1 %vm1327_vm1, %v4659_v59  ;;  %v4925_v48 = vpop.xlane.xlu1 %4924 }
0x1098   : > { %8805 = vrcp.f32 %v4916_v4  ;;  %8087 = vmatmul.mubr.msk.bf16.gmra.mrb[108].mxu1 %vm1327_vm1, %v4660_v41 }
0x1099   : > { %8109 = vmatpush3.bf16.msra.mxu1 %v11041_v2  ;;  %8807 = vrcp.f32 %v4925_v48 }
0x109a   : > { %8130 = vmatprep.subr.bf16.mxu1 %v11039_v43 }
0x109b   : > { %v4928_v32 = vpop.xlane.xlu0 %4927  ;;  %v4934_v53 = vpop.xlane.xlu1 %4933 }
0x109c   : > { %8809 = vrcp.f32 %v4928_v32 }
0x109d   : > { %8811 = vrcp.f32 %v4934_v53 }
0x109e   : > { %v8800_v16 = vpop.eup %8799  ;;  %8813 = vrcp.f32 %v4931_v31 }
0x109f   : > { %v5206_v30 = vpop.xlane.xlu0 %5205  ;;  %v5209_v40 = vpop.xlane.xlu1 %5208  ;;  %v4946_v55 = vmul.f32 %v8800_v16, %v10997_v19 }
0x10a0   : > { %v8802_v49 = vpop.eup %8801  ;;  %8815 = vrcp.f32 %v5206_v30 }
0x10a1   : > { %v8804_v63 = vpop.eup %8803  ;;  %v4943_v2 = vmul.f32 %v8802_v49, %v10993_v35 }
0x10a2   : > { %v8806_v20 = vpop.eup %8805  ;;  %v4945_v36 = vmul.f32 %v8804_v63, %v10988_v54 }
0x10a3   : > { %v5203_v9 = vpop.xlane.xlu1 %5202  ;;  %v4944_v13 = vmul.f32 %v8806_v20, %v11007_v38  ;;  %v8808_v6 = vpop.eup %8807 }
0x10a4   : > { %8817 = vrcp.f32 %v5203_v9  ;;  %v4952_v21 = vpack.c.bf16 %v4946_v55, %v4945_v36  ;;  %v4947_v29 = vmul.f32 %v8808_v6, %v11009_v7 }
0x10a5   : > { %v4951_v56 = vpack.c.bf16 %v4944_v13, %v4943_v2 }
0x10a6   : > { %v8810_v28 = vpop.eup %8809 }
0x10a7   : > { %v8812_v12 = vpop.eup %8811  ;;  %8110 = vmatprep.mubr.msk.bf16.mxu1 %vm1327_vm1, %v4951_v56  ;;  %v4948_v19 = vmul.f32 %v8810_v28, %v11017_v0 }
0x10a8   : > { %8111 = vmatmul.mubr.msk.bf16.vlgmr.msra.gmra.mrb[112].mxu1 %vm1327_vm1, %v4952_v21  ;;  %v8814_v39 = vpop.eup %8813  ;;  %v4950_v38 = vmul.f32 %v8812_v12, %v11011_v1 }
0x10a9   : > { %8131 = vmatpush3.bf16.msra.mxu1 %v11039_v43  ;;  %v4953_v35 = vpack.c.bf16 %v4948_v19, %v4947_v29  ;;  %v4949_v27 = vmul.f32 %v8814_v39, %v11000_v46  ;;  %v5212_v43 = vpop.xlane.xlu1 %5211  ;;  %v8367_v39 = vld [vmem:[%s11986_s7 + $0x40] sm:$0xff]  }
0x10aa   : > { %v8816_v54 = vpop.eup %8815  ;;  %8819 = vrcp.f32 %v5212_v43  ;;  %8146 = vmatprep.subr.bf16.mxu0 %v8367_v39  ;;  %v8371_v43 = vld [vmem:[%s11986_s7 + $0x60] sm:$0xff]  }
0x10ab   : > { %8114 = vmatprep.mubr.msk.bf16.mxu1 %vm1327_vm1, %v4953_v35  ;;  %v4954_v33 = vpack.c.bf16 %v4950_v38, %v4949_v27  ;;  %v5234_v7 = vmul.f32 %v8816_v54, %v11019_v52  ;;  %8821 = vrcp.f32 %v5209_v40  ;;  %v8368_v35 = vld [vmem:[%s11986_s7 + $0x48] sm:$0xff]   ;;  %8147 = vmatpush3.bf16.msra.mxu0 %v8367_v39  ;;  %v8369_v38 = vld [vmem:[%s11986_s7 + $0x50] sm:$0xff]  }
0x10ac   : > { %8148 = vmatprep.subr.bf16.mxu0 %v8368_v35 }
0x10ae   : > { %v8818_v34 = vpop.eup %8817 }
0x10af   : > { %v5233_v42 = vmul.f32 %v8818_v34, %v11031_v44  ;;  %8149 = vmatpush3.bf16.msra.mxu0 %v8368_v35  ;;  %v8370_v34 = vld [vmem:[%s11986_s7 + $0x58] sm:$0xff]  }
0x10b0   : > { %8115 = vmatmul.mubr.msk.bf16.gmra.mrb[116].mxu1 %vm1327_vm1, %v4954_v33  ;;  %8150 = vmatprep.subr.bf16.mxu0 %v8369_v38 }
0x10b1   : > { %v5241_v0 = vpack.c.bf16 %v5234_v7, %v5233_v42 }
0x10b3   : > { %8138 = vmatprep.mubr.msk.bf16.mxu1 %vm1327_vm1, %v5241_v0  ;;  %8151 = vmatpush3.bf16.msra.mxu0 %v8369_v38 }
0x10b4   : > { %v8820_v44 = vpop.eup %8819  ;;  %8152 = vmatprep.subr.bf16.mxu0 %v8370_v34 }
0x10b5   : > { %v8822_v26 = vpop.eup %8821  ;;  %v5236_v62 = vmul.f32 %v8820_v44, %v11035_v60 }
0x10b6   : > { %v5235_v31 = vmul.f32 %v8822_v26, %v11025_v45  ;;  %v8373_v26 = vld [vmem:[%s11986_s7 + $0x70] sm:$0xff]  }
0x10b7   : > { %8153 = vmatpush3.bf16.msra.mxu0 %v8370_v34 }
0x10b8   : > { %v5242_v18 = vpack.c.bf16 %v5236_v62, %v5235_v31  ;;  %8154 = vmatprep.subr.bf16.mxu0 %v8371_v43 }
0x10bb   : > { %8155 = vmatpush3.bf16.msra.mxu0 %v8371_v43 }
0x10d4   : > { %v5221_v5 = vpop.xlane.xlu0 %5220 }
0x10d8   : > { %v5218_v1 = vpop.xlane.xlu0 %5217  ;;  %v5215_v50 = vpop.xlane.xlu1 %5214 }
0x10d9   : > { %8823 = vrcp.f32 %v5218_v1 }
0x10da   : > { %8825 = vrcp.f32 %v5215_v50  ;;  %v8372_v50 = vld [vmem:[%s11986_s7 + $0x68] sm:$0xff]  }
0x10db   : > { %8156 = vmatprep.subr.bf16.mxu0 %v8372_v50 }
0x10dc   : > { %v5248_v46 = vpop.permute.xlu0 %5247  ;;  %v5224_v23 = vpop.xlane.xlu1 %5223  ;;  %8157 = vmatpush3.bf16.msra.mxu0 %v8372_v50  ;;  %v8377_v50 = vld [vmem:[%s11990_s11 + $0x104] ss:$16 sps:$4 sm:$0xff]  }
0x10dd   : > { %8132 = vmatprep.subr.bf16.mxu1 %v5248_v46  ;;  %8827 = vrcp.f32 %v5224_v23  ;;  %8158 = vmatprep.subr.bf16.mxu0 %v8373_v26 }
0x10de   : > { %8133 = vmatpush3.bf16.msra.mxu1 %v5248_v46  ;;  %8829 = vrcp.f32 %v5221_v5 }
0x10e0   : > { %v5250_v52 = vpop.permute.xlu1 %5249  ;;  %8159 = vmatpush3.bf16.msra.mxu0 %v8373_v26  ;;  %v8381_v26 = vld [vmem:[%s11990_s11 + $0x120] ss:$16 sps:$4 sm:$0xff]  }
0x10e1   : > { %8134 = vmatprep.subr.bf16.mxu1 %v5250_v52 }
0x10e2   : > { %8135 = vmatpush3.bf16.msra.mxu1 %v5250_v52 }
0x10e3   : > { %v8824_v58 = vpop.eup %8823 }
0x10e4   : > { %v8826_v61 = vpop.eup %8825  ;;  %v5252_v14 = vpop.permute.xlu1 %5251  ;;  %v5238_v22 = vmul.f32 %v8824_v58, %v11051_v10  ;;  %v8374_v58 = vld [vmem:[%s11986_s7 + $0x78] sm:$0xff]  }
0x10e5   : > { %8136 = vmatprep.subr.bf16.mxu1 %v5252_v14  ;;  %v5237_v51 = vmul.f32 %v8826_v61, %v11053_v8  ;;  %8160 = vmatprep.subr.bf16.mxu0 %v8374_v58 }
0x10e6   : > { %8137 = vmatpush3.bf16.msra.mxu1 %v5252_v14  ;;  %8161 = vmatpush3.bf16.msra.mxu0 %v8374_v58  ;;  %v8384_v58 = vld [vmem:[%s11990_s11 + $0x128] ss:$16 sps:$4 sm:$0xff]  }
0x10e7   : > { %v8828_v59 = vpop.eup %8827  ;;  %v5243_v41 = vpack.c.bf16 %v5238_v22, %v5237_v51  ;;  %5856 = vmatprep.subr.bf16.mxu1 %v8377_v50  ;;  %v8413_v50 = vld [vmem:[%s11990_s11 + $0x1c4] ss:$16 sps:$4 sm:$0xff]  }
0x10e8   : > { %v8830_v4 = vpop.eup %8829  ;;  %v5240_v60 = vmul.f32 %v8828_v59, %v11059_v15 }
0x10e9   : > { %8139 = vmatmul.mubr.msk.bf16.vlgmr.msra.gmra.mrb[120].mxu1 %vm1327_vm1, %v5242_v18  ;;  %v5239_v48 = vmul.f32 %v8830_v4, %v11047_v17 }
0x10ea   : > { %8142 = vmatprep.mubr.msk.bf16.mxu1 %vm1327_vm1, %v5243_v41 }
0x10eb   : > { %v5244_v32 = vpack.c.bf16 %v5240_v60, %v5239_v48 }
0x10f1   : > { %8143 = vmatmul.mubr.msk.bf16.gmra.mrb[124].mxu1 %vm1327_vm1, %v5244_v32 }
0x10f2   : > { %5888 = vmatprep.mubr.bf16.mxu1 %v12087_v25 }
0x1143   : > { %v8056_v45 = vpop.f32.mrb[96].mxu1 }
0x1144   : > { %v4441_v10 = vpop.f32.mrb[97].mxu1 }
0x1145   : > { %v8057_v8 = vpop.f32.mrb[98].mxu1 }
0x1146   : > { %v4473_v53 = vpack.c.bf16 %v8057_v8, %v8056_v45  ;;  %v4444_v16 = vpop.f32.mrb[99].mxu1 }
0x1147   : > { %v4472_v30 = vpack.c.bf16 %v4444_v16, %v4441_v10 }
0x1148   : > { %4477 = vst.msk [vmem:[#allocation2 + $0x8] sm:$0xff] %vm1249_vm0, %v4473_v53 }
0x1149   : > { %4476 = vst.msk [vmem:[#allocation2] sm:$0xff] %vm1249_vm0, %v4472_v30 }
0x114f   : > { %v8060_v40 = vpop.f32.mrb[100].mxu1 }
0x1150   : > { %v4457_v49 = vpop.f32.mrb[101].mxu1 }
0x1151   : > { %v8061_v15 = vpop.f32.mrb[102].mxu1 }
0x1152   : > { %v4475_v63 = vpack.c.bf16 %v8061_v15, %v8060_v40  ;;  %v4460_v17 = vpop.f32.mrb[103].mxu1 }
0x1153   : > { %v4474_v20 = vpack.c.bf16 %v4460_v17, %v4457_v49 }
0x1154   : > { %4479 = vst.msk [vmem:[#allocation2 + $0x18] sm:$0xff] %vm1249_vm0, %v4475_v63 }
0x1155   : > { %4478 = vst.msk [vmem:[#allocation2 + $0x10] sm:$0xff] %vm1249_vm0, %v4474_v20 }
0x115f   : > { %v8084_v55 = vpop.f32.mrb[104].mxu1 }
0x1160   : > { %v4723_v9 = vpop.f32.mrb[105].mxu1 }
0x1161   : > { %v8085_v2 = vpop.f32.mrb[106].mxu1 }
0x1162   : > { %v4755_v13 = vpack.c.bf16 %v8085_v2, %v8084_v55  ;;  %v4726_v6 = vpop.f32.mrb[107].mxu1 }
0x1163   : > { %v4754_v36 = vpack.c.bf16 %v4726_v6, %v4723_v9  ;;  %v7301_v6 = vld [vmem:[%s11987_s8 + $0x1] ss:$0 sm:$0xff] }
0x1164   : > { %4764 = vrot.lane.b32.xlu1 %v4755_v13, %s12103_s29 }
0x1165   : > { %4762 = vrot.lane.b32.xlu0 %v4754_v36, %s12103_s29 }
0x116b   : > { %v8088_v56 = vpop.f32.mrb[108].mxu1 }
0x116c   : > { %v4739_v28 = vpop.f32.mrb[109].mxu1 }
0x116d   : > { %v8089_v21 = vpop.f32.mrb[110].mxu1 }
0x116e   : > { %v4757_v12 = vpack.c.bf16 %v8089_v21, %v8088_v56  ;;  %v4742_v29 = vpop.f32.mrb[111].mxu1 }
0x116f   : > { %v4756_v19 = vpack.c.bf16 %v4742_v29, %v4739_v28 }
0x117b   : > { %v8112_v54 = vpop.f32.mrb[112].mxu1 }
0x117c   : > { %v5013_v27 = vpop.f32.mrb[113].mxu1 }
0x117d   : > { %v8113_v33 = vpop.f32.mrb[114].mxu1 }
0x117e   : > { %v5045_v42 = vpack.c.bf16 %v8113_v33, %v8112_v54  ;;  %v5016_v7 = vpop.f32.mrb[115].mxu1 }
0x117f   : > { %v5044_v0 = vpack.c.bf16 %v5016_v7, %v5013_v27  ;;  %v12109_v7 = vld [vmem:[#allocation15_spill] sm:$0xff] }
0x1180   : > { %5054 = vrot.lane.b32.xlu1 %v5045_v42, %s12102_s20 }
0x1181   : > { %5052 = vrot.lane.b32.xlu0 %v5044_v0, %s12102_s20  ;;  %v12110_v0 = vld [vmem:[#allocation17_spill] sm:$0xff] }
0x1183   : > { %v8116_v5 = vpop.f32.mrb[116].mxu1 }
0x1184   : > { %v5029_v1 = vpop.f32.mrb[117].mxu1 }
0x1185   : > { %v8117_v46 = vpop.f32.mrb[118].mxu1 }
0x1186   : > { %v5047_v23 = vpack.c.bf16 %v8117_v46, %v8116_v5  ;;  %v5032_v44 = vpop.f32.mrb[119].mxu1  ;;  %v8378_v46 = vld [vmem:[%s11990_s11 + $0x108] ss:$16 sps:$4 sm:$0xff]  }
0x1187   : > { %v5046_v52 = vpack.c.bf16 %v5032_v44, %v5029_v1  ;;  %v8383_v44 = vld [vmem:[%s11990_s11 + $0x124] ss:$16 sps:$4 sm:$0xff]  }
0x11bc   : > { %v8140_v62 = vpop.f32.mrb[120].mxu1 }
0x11bd   : > { %v5303_v61 = vpop.f32.mrb[121].mxu1 }
0x11be   : > { %v8141_v14 = vpop.f32.mrb[122].mxu1 }
0x11bf   : > { %v5335_v22 = vpack.c.bf16 %v8141_v14, %v8140_v62  ;;  %v5306_v31 = vpop.f32.mrb[123].mxu1 }
0x11c0   : > { %v5334_v51 = vpack.c.bf16 %v5306_v31, %v5303_v61 }
0x11c1   : > { %5344 = vrot.lane.b32.xlu1 %v5335_v22, %s12101_s30 }
0x11c2   : > { %5342 = vrot.lane.b32.xlu0 %v5334_v51, %s12101_s30 }
0x11c4   : > { %v8144_v18 = vpop.f32.mrb[124].mxu1 }
0x11c5   : > { %4768 = vrot.lane.b32.xlu1 %v4757_v12, %s12103_s29  ;;  %v5319_v59 = vpop.f32.mrb[125].mxu1 }
0x11c6   : > { %4766 = vrot.lane.b32.xlu0 %v4756_v19, %s12103_s29  ;;  %v8145_v41 = vpop.f32.mrb[126].mxu1 }
0x11c7   : > { %v5337_v4 = vpack.c.bf16 %v8145_v41, %v8144_v18  ;;  %v5322_v60 = vpop.f32.mrb[127].mxu1 }
0x11c8   : > { %v5336_v48 = vpack.c.bf16 %v5322_v60, %v5319_v59 }
0x11c9   : > { %5058 = vrot.lane.b32.xlu1 %v5047_v23, %s12102_s20  ;;  %v8380_v23 = vld [vmem:[%s11990_s11 + $0x10c] ss:$16 sps:$4 sm:$0xff]  }
0x11ca   : > { %5056 = vrot.lane.b32.xlu0 %v5046_v52, %s12102_s20  ;;  %v8386_v52 = vld [vmem:[%s11990_s11 + $0x12c] ss:$16 sps:$4 sm:$0xff]   ;;  %5929 = vmatprep.subr.bf16.mxu0 %v8380_v23  ;;  %v8411_v23 = vld [vmem:[%s11990_s11 + $0x1c0] ss:$16 sps:$4 sm:$0xff]  }
0x11cd   : > { %5348 = vrot.lane.b32.xlu1 %v5337_v4, %s12101_s30 }
0x11ce   : > { %5346 = vrot.lane.b32.xlu0 %v5336_v48, %s12101_s30 }
0x11d6   : > { %v4765_v32 = vpop.permute.xlu1 %4764 }
0x11d7   : > { %4775 = vst.msk [vmem:[#allocation2 + $0x8] sm:$0xff] %vm1799_vm2, %v4765_v32  ;;  %v4763_v45 = vpop.permute.xlu0 %4762 }
0x11d8   : > { %4774 = vst.msk [vmem:[#allocation2] sm:$0xff] %vm1799_vm2, %v4763_v45 }
0x11f2   : > { %v5055_v10 = vpop.permute.xlu1 %5054 }
0x11f3   : > { %5065 = vst.msk [vmem:[#allocation2 + $0x8] sm:$0xff] %vm2090_vm3, %v5055_v10  ;;  %v5053_v8 = vpop.permute.xlu0 %5052 }
0x11f4   : > { %5064 = vst.msk [vmem:[#allocation2] sm:$0xff] %vm2090_vm3, %v5053_v8 }
0x1233   : > { %v5345_v53 = vpop.permute.xlu1 %5344 }
0x1234   : > { %5355 = vst.msk [vmem:[#allocation2 + $0x8] sm:$0xff] %vm2381_vm4, %v5345_v53  ;;  %v5343_v16 = vpop.permute.xlu0 %5342 }
0x1235   : > { %5354 = vst.msk [vmem:[#allocation2] sm:$0xff] %vm2381_vm4, %v5343_v16 }
0x1237   : > { %v4769_v30 = vpop.permute.xlu1 %4768 }
0x1238   : > { %4777 = vst.msk [vmem:[#allocation2 + $0x18] sm:$0xff] %vm1799_vm2, %v4769_v30  ;;  %v4767_v40 = vpop.permute.xlu0 %4766 }
0x1239   : > { %4776 = vst.msk [vmem:[#allocation2 + $0x10] sm:$0xff] %vm1799_vm2, %v4767_v40 }
0x123b   : > { %v5059_v49 = vpop.permute.xlu1 %5058  ;;  %v5359_v17 = vld [vmem:[#allocation2 + $0x8] sm:$0xff] }
0x123c   : > { %5067 = vst.msk [vmem:[#allocation2 + $0x18] sm:$0xff] %vm2090_vm3, %v5059_v49  ;;  %v5057_v15 = vpop.permute.xlu0 %5056  ;;  %v5358_v63 = vld [vmem:[#allocation2] sm:$0xff] }
0x123d   : > { %5066 = vst.msk [vmem:[#allocation2 + $0x10] sm:$0xff] %vm2090_vm3, %v5057_v15  ;;  %8162 = vmatprep.mubr.bf16.mxu0 %v5358_v63 }
0x123e   : > { %8163 = vmatmul.mubr.bf16.vlgmr.msra.gmra.mrb[128].mxu0 %v5359_v17 }
0x123f   : > { %v5349_v20 = vpop.permute.xlu1 %5348  ;;  %5930 = vmatpush1.bf16.msra.mxu0 %v8378_v46  ;;  %v8416_v46 = vld [vmem:[%s11990_s11 + $0x1cc] ss:$16 sps:$4 sm:$0xff]  }
0x1240   : > { %5357 = vst.msk [vmem:[#allocation2 + $0x18] sm:$0xff] %vm2381_vm4, %v5349_v20  ;;  %v5347_v55 = vpop.permute.xlu0 %5346  ;;  %5931 = vmatprep.subr.bf16.mxu0 %v8386_v52  ;;  %v8417_v52 = vld [vmem:[%s11990_s11 + $0x1e0] ss:$16 sps:$4 sm:$0xff]  }
0x1241   : > { %5356 = vst.msk [vmem:[#allocation2 + $0x10] sm:$0xff] %vm2381_vm4, %v5347_v55 }
0x1243   : > { %5932 = vmatpush1.bf16.msra.mxu0 %v8384_v58  ;;  %v8420_v58 = vld [vmem:[%s11990_s11 + $0x1e8] ss:$16 sps:$4 sm:$0xff]  }
0x1247   : > { %v5361_v2 = vld [vmem:[#allocation2 + $0x18] sm:$0xff] }
0x1248   : > { %v5360_v9 = vld [vmem:[#allocation2 + $0x10] sm:$0xff] }
0x1249   : > { %8166 = vmatprep.mubr.bf16.mxu0 %v5360_v9 }
0x124a   : > { %8167 = vmatmul.mubr.bf16.gmra.mrb[132].mxu0 %v5361_v2 }
0x124b   : > { %5961 = vmatprep.mubr.bf16.mxu0 %v12087_v25 }
0x1311   : > { %v8164_v13 = vpop.f32.mrb[128].mxu0 }
0x1312   : > { %v5461_v36 = vpop.f32.mrb[129].mxu0  ;;  %v5494_v12 = vadd.f32 %v8164_v13, %v10494_v3 }
0x1313   : > { %v5492_v56 = vadd.f32 %v5461_v36, %v10484_v11  ;;  %v8165_v28 = vpop.f32.mrb[130].mxu0 }
0x1314   : > { %v5464_v21 = vpop.f32.mrb[131].mxu0  ;;  %v11199_v35 = vadd.f32 %v7301_v6, %v5494_v12  ;;  %v5495_v38 = vadd.f32 %v8165_v28, %v10499_v57  ;;  %v8389_v28 = vld [vmem:[%s11990_s11 + $0x144] ss:$16 sps:$4 sm:$0xff]   ;;  %v8387_v12 = vld [vmem:[%s11990_s11 + $0x140] ss:$16 sps:$4 sm:$0xff]  }
0x1315   : > { %v11193_v29 = vadd.f32 %v7301_v6, %v5492_v56  ;;  %v5493_v19 = vadd.f32 %v5464_v21, %v10489_v47  ;;  %v8392_v21 = vld [vmem:[%s11990_s11 + $0x14c] ss:$16 sps:$4 sm:$0xff]  }
0x1316   : > { %12106 = vst [vmem:[#allocation11_spill] sm:$0xff] %v11199_v35  ;;  %v11204_v11 = vadd.f32 %v7301_v6, %v5495_v38  ;;  %5933 = vmatprep.subr.bf16.mxu0 %v8392_v21  ;;  %v8395_v38 = vld [vmem:[%s11990_s11 + $0x164] ss:$16 sps:$4 sm:$0xff]  }
0x1317   : > { %12104 = vst [vmem:[#allocation16_spill] sm:$0xff] %v11193_v29  ;;  %v11196_v39 = vadd.f32 %v7301_v6, %v5493_v19  ;;  %5520 = vadd.xlane.f32.xlu0 %v11193_v29  ;;  %v8390_v19 = vld [vmem:[%s11990_s11 + $0x148] ss:$16 sps:$4 sm:$0xff]  }
0x1318   : > { %12107 = vst [vmem:[#allocation13_spill] sm:$0xff] %v11204_v11  ;;  %5934 = vmatpush1.bf16.msra.mxu0 %v8390_v19 }
0x1319   : > { %12105 = vst [vmem:[#allocation10_spill] sm:$0xff] %v11196_v39  ;;  %5522 = vadd.xlane.f32.xlu1 %v11196_v39 }
0x131b   : > { %5524 = vadd.xlane.f32.xlu0 %v11199_v35 }
0x131d   : > { %v8168_v54 = vpop.f32.mrb[132].mxu0 }
0x131e   : > { %v5477_v3 = vpop.f32.mrb[133].mxu0  ;;  %v5498_v33 = vadd.f32 %v8168_v54, %v10514_v24  ;;  %v8375_v24 = vld [vmem:[%s11990_s11 + $0x100] ss:$16 sps:$4 sm:$0xff]   ;;  %v8398_v54 = vld [vmem:[%s11990_s11 + $0x16c] ss:$16 sps:$4 sm:$0xff]  }
0x131f   : > { %v5496_v27 = vadd.f32 %v5477_v3, %v10504_v37  ;;  %5526 = vadd.xlane.f32.xlu0 %v11204_v11  ;;  %v8169_v47 = vpop.f32.mrb[134].mxu0  ;;  %5857 = vmatpush1.bf16.msra.mxu1 %v8375_v24  ;;  %v8393_v3 = vld [vmem:[%s11990_s11 + $0x160] ss:$16 sps:$4 sm:$0xff]   ;;  %v8408_v24 = vld [vmem:[%s11990_s11 + $0x1a8] ss:$16 sps:$4 sm:$0xff]  }
0x1320   : > { %v5480_v34 = vpop.f32.mrb[135].mxu0  ;;  %v5499_v43 = vadd.f32 %v8169_v47, %v12110_v0  ;;  %v11216_v1 = vadd.f32 %v7301_v6, %v5498_v33  ;;  %5858 = vmatprep.subr.bf16.mxu1 %v8383_v44  ;;  %5935 = vmatprep.subr.bf16.mxu0 %v8398_v54  ;;  %v8401_v47 = vld [vmem:[%s11990_s11 + $0x184] ss:$16 sps:$4 sm:$0xff]   ;;  %v8399_v33 = vld [vmem:[%s11990_s11 + $0x180] ss:$16 sps:$4 sm:$0xff]  }
0x1321   : > { %v11209_v42 = vadd.f32 %v7301_v6, %v5496_v27  ;;  %v5497_v57 = vadd.f32 %v5480_v34, %v12109_v7  ;;  %v8396_v27 = vld [vmem:[%s11990_s11 + $0x168] ss:$16 sps:$4 sm:$0xff]   ;;  %v8404_v34 = vld [vmem:[%s11990_s11 + $0x18c] ss:$16 sps:$4 sm:$0xff]  }
0x1322   : > { %12112 = vst [vmem:[#allocation4_spill] sm:$0xff] %v11216_v1  ;;  %v11219_v37 = vadd.f32 %v7301_v6, %v5499_v43  ;;  %5936 = vmatpush1.bf16.msra.mxu0 %v8396_v27  ;;  %v8402_v7 = vld [vmem:[%s11990_s11 + $0x188] ss:$16 sps:$4 sm:$0xff]   ;;  %v8410_v0 = vld [vmem:[%s11990_s11 + $0x1ac] ss:$16 sps:$4 sm:$0xff]  }
0x1323   : > { %12108 = vst [vmem:[#allocation12_spill] sm:$0xff] %v11209_v42  ;;  %v11213_v5 = vadd.f32 %v7301_v6, %v5497_v57  ;;  %5528 = vadd.xlane.f32.xlu1 %v11209_v42  ;;  %5859 = vmatpush1.bf16.msra.mxu1 %v8381_v26  ;;  %v8407_v57 = vld [vmem:[%s11990_s11 + $0x1a4] ss:$16 sps:$4 sm:$0xff]   ;;  %v8405_v43 = vld [vmem:[%s11990_s11 + $0x1a0] ss:$16 sps:$4 sm:$0xff]  }
0x1324   : > { %12113 = vst [vmem:[#allocation5_spill] sm:$0xff] %v11219_v37  ;;  %5860 = vmatprep.subr.bf16.mxu1 %v8389_v28  ;;  %5937 = vmatprep.subr.bf16.mxu0 %v8404_v34  ;;  %v8414_v44 = vld [vmem:[%s11990_s11 + $0x1c8] ss:$16 sps:$4 sm:$0xff]   ;;  %v8419_v26 = vld [vmem:[%s11990_s11 + $0x1e4] ss:$16 sps:$4 sm:$0xff]  }
0x1325   : > { %12111 = vst [vmem:[#allocation3_spill] sm:$0xff] %v11213_v5  ;;  %5530 = vadd.xlane.f32.xlu0 %v11213_v5 }
0x1326   : > { %5938 = vmatpush1.bf16.msra.mxu0 %v8402_v7 }
0x1327   : > { %5532 = vadd.xlane.f32.xlu1 %v11216_v1  ;;  %5861 = vmatpush1.bf16.msra.mxu1 %v8387_v12 }
0x1328   : > { %5862 = vmatprep.subr.bf16.mxu1 %v8395_v38  ;;  %5939 = vmatprep.subr.bf16.mxu0 %v8410_v0 }
0x1329   : > { %5534 = vadd.xlane.f32.xlu0 %v11219_v37 }
0x132a   : > { %5940 = vmatpush1.bf16.msra.mxu0 %v8408_v24 }
0x132b   : > { %5863 = vmatpush1.bf16.msra.mxu1 %v8393_v3  ;;  %5941 = vmatprep.subr.bf16.mxu0 %v8416_v46  ;;  %v7305_v3 = vld [vmem:[%s11989_s10 + $0x1] ss:$0 sm:$0xff] }
0x132c   : > { %5864 = vmatprep.subr.bf16.mxu1 %v8401_v47 }
0x132e   : > { %5942 = vmatpush1.bf16.msra.mxu0 %v8414_v44 }
0x132f   : > { %5865 = vmatpush1.bf16.msra.mxu1 %v8399_v33 }
0x1330   : > { %5866 = vmatprep.subr.bf16.mxu1 %v8407_v57 }
0x1333   : > { %5867 = vmatpush1.bf16.msra.mxu1 %v8405_v43 }
0x1334   : > { %5868 = vmatprep.subr.bf16.mxu1 %v8413_v50 }
0x1337   : > { %5869 = vmatpush1.bf16.msra.mxu1 %v8411_v23 }
0x1338   : > { %5870 = vmatprep.subr.bf16.mxu1 %v8419_v26 }
0x133b   : > { %5871 = vmatpush1.bf16.msra.mxu1 %v8417_v52 }
0x13a4   : > { %v5521_v62 = vpop.xlane.xlu0 %5520 }
0x13a5   : > { %v5536_v61 = vmul.f32 0.0078125, %v5521_v62  ;;  %v8422_v62 = vld [vmem:[%s11990_s11 + $0x1ec] ss:$16 sps:$4 sm:$0xff]  }
0x13a6   : > { %v5523_v14 = vpop.xlane.xlu1 %5522  ;;  %5943 = vmatprep.subr.bf16.mxu0 %v8422_v62 }
0x13a7   : > { %v11248_v22 = vsub.f32 %v11193_v29, %v5536_v61  ;;  %v5537_v31 = vmul.f32 0.0078125, %v5523_v14  ;;  %5944 = vmatpush1.bf16.msra.mxu0 %v8420_v58 }
0x13a8   : > { %v5525_v51 = vpop.xlane.xlu0 %5524 }
0x13a9   : > { %v11251_v18 = vsub.f32 %v11196_v39, %v5537_v31  ;;  %v5538_v59 = vmul.f32 0.0078125, %v5525_v51  ;;  %v5552_v41 = vmul.f32 %v11248_v22, %v11248_v22 }
0x13ab   : > { %v11256_v4 = vsub.f32 %v11199_v35, %v5538_v59  ;;  %5560 = vadd.xlane.f32.xlu1 %v5552_v41  ;;  %v5553_v60 = vmul.f32 %v11251_v18, %v11251_v18 }
0x13ac   : > { %v5527_v48 = vpop.xlane.xlu0 %5526 }
0x13ad   : > { %v5539_v32 = vmul.f32 0.0078125, %v5527_v48  ;;  %5562 = vadd.xlane.f32.xlu0 %v5553_v60  ;;  %v5554_v45 = vmul.f32 %v11256_v4, %v11256_v4 }
0x13af   : > { %v11263_v10 = vsub.f32 %v11204_v11, %v5539_v32  ;;  %5564 = vadd.xlane.f32.xlu1 %v5554_v45 }
0x13b0   : > { %v5529_v8 = vpop.xlane.xlu1 %5528 }
0x13b1   : > { %v5540_v53 = vmul.f32 0.0078125, %v5529_v8  ;;  %v5555_v16 = vmul.f32 %v11263_v10, %v11263_v10 }
0x13b2   : > { %v5531_v30 = vpop.xlane.xlu0 %5530 }
0x13b3   : > { %v11268_v40 = vsub.f32 %v11209_v42, %v5540_v53  ;;  %v5541_v49 = vmul.f32 0.0078125, %v5531_v30  ;;  %5566 = vadd.xlane.f32.xlu0 %v5555_v16 }
0x13b4   : > { %v5533_v15 = vpop.xlane.xlu1 %5532 }
0x13b5   : > { %v11271_v63 = vsub.f32 %v11213_v5, %v5541_v49  ;;  %v5542_v17 = vmul.f32 0.0078125, %v5533_v15  ;;  %v5556_v20 = vmul.f32 %v11268_v40, %v11268_v40 }
0x13b6   : > { %v5535_v55 = vpop.xlane.xlu0 %5534 }
0x13b7   : > { %v11276_v9 = vsub.f32 %v11216_v1, %v5542_v17  ;;  %v5543_v2 = vmul.f32 0.0078125, %v5535_v55  ;;  %5568 = vadd.xlane.f32.xlu1 %v5556_v20  ;;  %v5557_v13 = vmul.f32 %v11271_v63, %v11271_v63  ;;  %v7304_v17 = vld [vmem:[%s11988_s9 + $0x1] ss:$0 sm:$0xff] }
0x13b9   : > { %v11281_v6 = vsub.f32 %v11219_v37, %v5543_v2  ;;  %5570 = vadd.xlane.f32.xlu0 %v5557_v13  ;;  %v5558_v36 = vmul.f32 %v11276_v9, %v11276_v9 }
0x13bb   : > { %5572 = vadd.xlane.f32.xlu1 %v5558_v36  ;;  %v5559_v56 = vmul.f32 %v11281_v6, %v11281_v6 }
0x13bd   : > { %5574 = vadd.xlane.f32.xlu0 %v5559_v56 }
0x1438   : > { %v5561_v61 = vpop.xlane.xlu1 %5560 }
0x1439   : > { %v5576_v14 = vmul.f32 0.0078125, %v5561_v61 }
0x143a   : > { %v5563_v31 = vpop.xlane.xlu0 %5562 }
0x143b   : > { %v5584_v51 = vadd.f32 1e-06, %v5576_v14  ;;  %v5577_v59 = vmul.f32 0.0078125, %v5563_v31 }
0x143c   : > { %v5565_v41 = vpop.xlane.xlu1 %5564 }
0x143d   : > { %8831 = vrsqrt.f32 %v5584_v51  ;;  %v5585_v60 = vadd.f32 1e-06, %v5577_v59  ;;  %v5578_v48 = vmul.f32 0.0078125, %v5565_v41 }
0x143f   : > { %8833 = vrsqrt.f32 %v5585_v60  ;;  %v5586_v32 = vadd.f32 1e-06, %v5578_v48 }
0x1440   : > { %v5567_v45 = vpop.xlane.xlu0 %5566 }
0x1441   : > { %8835 = vrsqrt.f32 %v5586_v32  ;;  %v5579_v8 = vmul.f32 0.0078125, %v5567_v45  ;;  %v8425_v45 = vld [vmem:[%s11992_s13 + $0x100] sm:$0xff]  }
0x1443   : > { %v5587_v53 = vadd.f32 1e-06, %v5579_v8  ;;  %v8427_v8 = vld [vmem:[%s11992_s13 + $0x148] sm:$0xff]  }
0x1444   : > { %v5569_v16 = vpop.xlane.xlu1 %5568 }
0x1445   : > { %8837 = vrsqrt.f32 %v5587_v53  ;;  %v5580_v30 = vmul.f32 0.0078125, %v5569_v16  ;;  %v8428_v53 = vld [vmem:[%s11992_s13 + $0x1c8] sm:$0xff]  }
0x1446   : > { %v5571_v49 = vpop.xlane.xlu0 %5570  ;;  %v8429_v16 = vld [vmem:[%s11992_s13 + $0x108] sm:$0xff]  }
0x1447   : > { %v8832_v15 = vpop.eup %8831  ;;  %v5588_v20 = vadd.f32 1e-06, %v5580_v30  ;;  %v5581_v55 = vmul.f32 0.0078125, %v5571_v49  ;;  %v8430_v30 = vld [vmem:[%s11992_s13 + $0x188] sm:$0xff]   ;;  %v8431_v49 = vld [vmem:[%s11992_s13 + $0x150] sm:$0xff]  }
0x1448   : > { %v5600_v2 = vmul.f32 %v8832_v15, %v11248_v22  ;;  %v5573_v13 = vpop.xlane.xlu1 %5572  ;;  %v8432_v15 = vld [vmem:[%s11992_s13 + $0x1d0] sm:$0xff]  }
0x1449   : > { %v8834_v36 = vpop.eup %8833  ;;  %8839 = vrsqrt.f32 %v5588_v20  ;;  %v5589_v56 = vadd.f32 1e-06, %v5581_v55  ;;  %v5582_v28 = vmul.f32 0.0078125, %v5573_v13  ;;  %v8434_v20 = vld [vmem:[%s11992_s13 + $0x190] sm:$0xff]   ;;  %v8435_v55 = vld [vmem:[%s11992_s13 + $0x158] sm:$0xff]  }
0x144a   : > { %v5614_v21 = vmul.f32 %v7304_v17, %v5600_v2  ;;  %v5601_v12 = vmul.f32 %v8834_v36, %v11251_v18  ;;  %v5575_v19 = vpop.xlane.xlu0 %5574  ;;  %v8436_v2 = vld [vmem:[%s11992_s13 + $0x1d8] sm:$0xff]  }
0x144b   : > { %v8836_v38 = vpop.eup %8835  ;;  %8841 = vrsqrt.f32 %v5589_v56  ;;  %v5583_v54 = vmul.f32 0.0078125, %v5575_v19  ;;  %v5590_v47 = vadd.f32 1e-06, %v5582_v28  ;;  %v8437_v13 = vld [vmem:[%s11992_s13 + $0x118] sm:$0xff]   ;;  %v8439_v56 = vld [vmem:[%s11992_s13 + $0x160] sm:$0xff]   ;;  %v8443_v19 = vld [vmem:[%s11992_s13 + $0x168] sm:$0xff]  }
0x144c   : > { %v5615_v27 = vmul.f32 %v7304_v17, %v5601_v12  ;;  %v5628_v22 = vadd.f32 %v7305_v3, %v5614_v21  ;;  %v5602_v7 = vmul.f32 %v8836_v38, %v11256_v4  ;;  %v8438_v36 = vld [vmem:[%s11992_s13 + $0x198] sm:$0xff]   ;;  %v8440_v28 = vld [vmem:[%s11992_s13 + $0x1e0] sm:$0xff]   ;;  %v8444_v38 = vld [vmem:[%s11992_s13 + $0x1e8] sm:$0xff]  }
0x144d   : > { %v5591_v34 = vadd.f32 1e-06, %v5583_v54  ;;  %v8441_v21 = vld [vmem:[%s11992_s13 + $0x120] sm:$0xff]   ;;  %v8445_v54 = vld [vmem:[%s11992_s13 + $0x128] sm:$0xff]  }
0x144e   : > { %v5629_v33 = vadd.f32 %v7305_v3, %v5615_v27  ;;  %v5616_v43 = vmul.f32 %v7304_v17, %v5602_v7  ;;  %v8442_v12 = vld [vmem:[%s11992_s13 + $0x1a0] sm:$0xff]   ;;  %v8447_v27 = vld [vmem:[%s11992_s13 + $0x170] sm:$0xff]   ;;  %v8452_v7 = vld [vmem:[%s11992_s13 + $0x1f8] sm:$0xff]  }
0x144f   : > { %v8838_v57 = vpop.eup %8837  ;;  %8843 = vrsqrt.f32 %v5591_v34  ;;  %v8449_v34 = vld [vmem:[%s11992_s13 + $0x130] sm:$0xff]  }
0x1450   : > { %v5669_v0 = vpack.c.bf16 %v5629_v33, %v5628_v22  ;;  %v5603_v18 = vmul.f32 %v8838_v57, %v11263_v10  ;;  %8845 = vrsqrt.f32 %v5590_v47  ;;  %v5630_v44 = vadd.f32 %v7305_v3, %v5616_v43  ;;  %v8448_v47 = vld [vmem:[%s11992_s13 + $0x1f0] sm:$0xff]   ;;  %v8451_v33 = vld [vmem:[%s11992_s13 + $0x178] sm:$0xff]   ;;  %v12114_v43 = vld [vmem:[#allocation7_spill] sm:$0xff] }
0x1451   : > { %v8450_v22 = vld [vmem:[%s11992_s13 + $0x1b0] sm:$0xff]   ;;  %v8453_v57 = vld [vmem:[%s11992_s13 + $0x138] sm:$0xff]  }
0x1452   : > { %5889 = vmatmul.mubr.bf16.vlgmr.msra.gmra.mrb[128].mxu1 %v5669_v0  ;;  %5962 = vmatmul.mubr.bf16.vlgmr.msra.gmra.mrb[136].mxu0 %v5669_v0  ;;  %v5617_v24 = vmul.f32 %v7304_v17, %v5603_v18  ;;  %v8454_v0 = vld [vmem:[%s11992_s13 + $0x1b8] sm:$0xff]   ;;  %v7338_v18 = vld [vmem:[%s11991_s12 + $0x4] sm:$0xf] }
0x1453   : > { %v8840_v50 = vpop.eup %8839  ;;  %5898 = vmatprep.mubr.bf16.mxu1 %v12087_v25  ;;  %5971 = vmatprep.mubr.bf16.mxu0 %v12087_v25 }
0x1454   : > { %v5631_v46 = vadd.f32 %v7305_v3, %v5617_v24  ;;  %v5604_v4 = vmul.f32 %v8840_v50, %v11268_v40  ;;  %v11479_v24 = vrot.slane %v7338_v18, %v12114_v43  ;;  %v12115_v50 = vld [vmem:[#allocation9_spill] sm:$0xff] }
0x1455   : > { %v8842_v23 = vpop.eup %8841 }
0x1456   : > { %v5605_v52 = vmul.f32 %v8842_v23, %v11271_v63  ;;  %v5670_v26 = vpack.c.bf16 %v5631_v46, %v5630_v44  ;;  %v5618_v62 = vmul.f32 %v7304_v17, %v5604_v4  ;;  %v11482_v46 = vrot.slane %v7338_v18, %v12115_v50  ;;  %v12116_v23 = vld [vmem:[#allocation8_spill] sm:$0xff]  ;;  %v12117_v4 = vld [vmem:[#allocation6_spill] sm:$0xff] }
0x1457   : > { %v11485_v44 = vrot.slane %v7338_v18, %v12116_v23 }
0x1458   : > { %v5619_v58 = vmul.f32 %v7304_v17, %v5605_v52  ;;  %v5632_v51 = vadd.f32 %v7305_v3, %v5618_v62  ;;  %v12118_v52 = vsub.s32 3, %v12117_v4 }
0x1459   : > { %v8844_v10 = vpop.eup %8843 }
0x145a   : > { %5899 = vmatmul.mubr.bf16.gmra.mrb[132].mxu1 %v5670_v26  ;;  %5972 = vmatmul.mubr.bf16.gmra.mrb[140].mxu0 %v5670_v26  ;;  %v8846_v61 = vpop.eup %8845  ;;  %v5633_v14 = vadd.f32 %v7305_v3, %v5619_v58  ;;  %v5607_v31 = vmul.f32 %v8844_v10, %v11281_v6  ;;  %v8423_v6 = vld [vmem:[%s11992_s13 + $0x140] sm:$0xff]   ;;  %v11489_v26 = vrot.slane %v7338_v18, %v12118_v52 }
0x145b   : > { %5908 = vmatprep.mubr.bf16.mxu1 %v12087_v25  ;;  %5981 = vmatprep.mubr.bf16.mxu0 %v12087_v25  ;;  %v5606_v59 = vmul.f32 %v8846_v61, %v11276_v9  ;;  %v8424_v9 = vld [vmem:[%s11992_s13 + $0x1c0] sm:$0xff]  }
0x145c   : > { %v5671_v40 = vpack.c.bf16 %v5633_v14, %v5632_v51  ;;  %v5621_v41 = vmul.f32 %v7304_v17, %v5607_v31  ;;  %7734 = vmatprep.subr.bf16.mxu1 %v8423_v6  ;;  %7774 = vmatprep.subr.bf16.mxu0 %v8424_v9 }
0x145d   : > { %v5620_v63 = vmul.f32 %v7304_v17, %v5606_v59  ;;  %7735 = vmatpush3.bf16.msra.mxu1 %v8425_v45  ;;  %v8433_v17 = vld [vmem:[%s11992_s13 + $0x110] sm:$0xff]  }
0x145e   : > { %v5635_v60 = vadd.f32 %v7305_v3, %v5621_v41  ;;  %7736 = vmatprep.subr.bf16.mxu1 %v8427_v8 }
0x145f   : > { %v5634_v48 = vadd.f32 %v7305_v3, %v5620_v63  ;;  %v8446_v3 = vld [vmem:[%s11992_s13 + $0x1a8] sm:$0xff]  }
0x1461   : > { %v5672_v32 = vpack.c.bf16 %v5635_v60, %v5634_v48  ;;  %7737 = vmatpush3.bf16.msra.mxu1 %v8429_v16 }
0x1462   : > { %5909 = vmatmul.mubr.bf16.gmra.mrb[136].mxu1 %v5671_v40  ;;  %5982 = vmatmul.mubr.bf16.gmra.mrb[144].mxu0 %v5671_v40 }
0x1463   : > { %5918 = vmatprep.mubr.bf16.mxu1 %v12087_v25  ;;  %5991 = vmatprep.mubr.bf16.mxu0 %v12087_v25  ;;  %v8426_v25 = vld [vmem:[%s11992_s13 + $0x180] sm:$0xff]  }
0x1464   : > { %7775 = vmatpush3.bf16.msra.mxu0 %v8426_v25  ;;  %7738 = vmatprep.subr.bf16.mxu1 %v8431_v49 }
0x1465   : > { %7776 = vmatprep.subr.bf16.mxu0 %v8428_v53  ;;  %7739 = vmatpush3.bf16.msra.mxu1 %v8433_v17 }
0x1466   : > { %7740 = vmatprep.subr.bf16.mxu1 %v8435_v55 }
0x1468   : > { %7777 = vmatpush3.bf16.msra.mxu0 %v8430_v30 }
0x1469   : > { %7778 = vmatprep.subr.bf16.mxu0 %v8432_v15  ;;  %7741 = vmatpush3.bf16.msra.mxu1 %v8437_v13 }
0x146a   : > { %5919 = vmatmul.mubr.bf16.gmra.mrb[140].mxu1 %v5672_v32  ;;  %5992 = vmatmul.mubr.bf16.gmra.mrb[148].mxu0 %v5672_v32 }
0x146b   : > { %7742 = vmatprep.subr.bf16.mxu1 %v8439_v56 }
0x146c   : > { %7779 = vmatpush3.bf16.msra.mxu0 %v8434_v20 }
0x146d   : > { %7780 = vmatprep.subr.bf16.mxu0 %v8436_v2  ;;  %7743 = vmatpush3.bf16.msra.mxu1 %v8441_v21 }
0x146e   : > { %7744 = vmatprep.subr.bf16.mxu1 %v8443_v19 }
0x1470   : > { %7781 = vmatpush3.bf16.msra.mxu0 %v8438_v36 }
0x1471   : > { %7782 = vmatprep.subr.bf16.mxu0 %v8440_v28  ;;  %7745 = vmatpush3.bf16.msra.mxu1 %v8445_v54 }
0x1472   : > { %7746 = vmatprep.subr.bf16.mxu1 %v8447_v27 }
0x1474   : > { %7783 = vmatpush3.bf16.msra.mxu0 %v8442_v12 }
0x1475   : > { %7784 = vmatprep.subr.bf16.mxu0 %v8444_v38  ;;  %7747 = vmatpush3.bf16.msra.mxu1 %v8449_v34 }
0x1476   : > { %7748 = vmatprep.subr.bf16.mxu1 %v8451_v33 }
0x1478   : > { %7785 = vmatpush3.bf16.msra.mxu0 %v8446_v3 }
0x1479   : > { %7786 = vmatprep.subr.bf16.mxu0 %v8448_v47  ;;  %7749 = vmatpush3.bf16.msra.mxu1 %v8453_v57 }
0x147c   : > { %7787 = vmatpush3.bf16.msra.mxu0 %v8450_v22 }
0x147d   : > { %7788 = vmatprep.subr.bf16.mxu0 %v8452_v7 }
0x1480   : > { %7789 = vmatpush3.bf16.msra.mxu0 %v8454_v0 }
0x1525   : > { %v5890_v58 = vpop.f32.mrb[128].mxu1  ;;  %v5963_v10 = vpop.f32.mrb[136].mxu0 }
0x1526   : > { %v11492_v62 = vadd.f32 %v5890_v58, %v11479_v24  ;;  %v11495_v61 = vadd.f32 %v5963_v10, %v11482_v46  ;;  %v5892_v14 = vpop.f32.mrb[129].mxu1  ;;  %v5965_v31 = vpop.f32.mrb[137].mxu0 }
0x1527   : > { %v11498_v51 = vadd.f32 %v5892_v14, %v11485_v44  ;;  %v11501_v59 = vadd.f32 %v5965_v31, %v11489_v26  ;;  %v5894_v40 = vpop.f32.mrb[130].mxu1  ;;  %v5967_v41 = vpop.f32.mrb[138].mxu0 }
0x1528   : > { %v6002_v63 = vmul.f32 %v11492_v62, %v11492_v62  ;;  %v6004_v60 = vmul.f32 %v11495_v61, %v11495_v61  ;;  %v11508_v48 = vadd.f32 %v5894_v40, %v11479_v24  ;;  %v11511_v32 = vadd.f32 %v5967_v41, %v11482_v46  ;;  %v5896_v6 = vpop.f32.mrb[131].mxu1  ;;  %v5969_v9 = vpop.f32.mrb[139].mxu0 }
0x1529   : > { %v6003_v45 = vmul.f32 %v11498_v51, %v11498_v51  ;;  %v6005_v25 = vmul.f32 %v11501_v59, %v11501_v59  ;;  %v11518_v8 = vadd.f32 %v5896_v6, %v11485_v44  ;;  %v11521_v53 = vadd.f32 %v5969_v9, %v11489_v26 }
0x152a   : > { %v6034_v16 = vmul.f32 %v6002_v63, %v11492_v62  ;;  %v6036_v30 = vmul.f32 %v6004_v60, %v11495_v61  ;;  %v6006_v49 = vmul.f32 %v11508_v48, %v11508_v48  ;;  %v6008_v15 = vmul.f32 %v11511_v32, %v11511_v32 }
0x152b   : > { %v6035_v17 = vmul.f32 %v6003_v45, %v11498_v51  ;;  %v6037_v20 = vmul.f32 %v6005_v25, %v11501_v59  ;;  %v6007_v55 = vmul.f32 %v11518_v8, %v11518_v8  ;;  %v6009_v2 = vmul.f32 %v11521_v53, %v11521_v53 }
0x152c   : > { %v6066_v13 = vmul.f32 0.044715, %v6034_v16  ;;  %v6068_v36 = vmul.f32 0.044715, %v6036_v30  ;;  %v6038_v56 = vmul.f32 %v6006_v49, %v11508_v48  ;;  %v6040_v28 = vmul.f32 %v6008_v15, %v11511_v32 }
0x152d   : > { %v6067_v21 = vmul.f32 0.044715, %v6035_v17  ;;  %v6069_v12 = vmul.f32 0.044715, %v6037_v20  ;;  %v6039_v19 = vmul.f32 %v6007_v55, %v11518_v8  ;;  %v6041_v38 = vmul.f32 %v6009_v2, %v11521_v53  ;;  %v5900_v54 = vpop.f32.mrb[132].mxu1  ;;  %v5973_v3 = vpop.f32.mrb[140].mxu0 }
0x152e   : > { %v6098_v27 = vadd.f32 %v6066_v13, %v11492_v62  ;;  %v6100_v47 = vadd.f32 %v6068_v36, %v11495_v61  ;;  %v6070_v34 = vmul.f32 0.044715, %v6038_v56  ;;  %v6072_v22 = vmul.f32 0.044715, %v6040_v28  ;;  %v5902_v33 = vpop.f32.mrb[133].mxu1  ;;  %v5975_v7 = vpop.f32.mrb[141].mxu0 }
0x152f   : > { %v6099_v57 = vadd.f32 %v6067_v21, %v11498_v51  ;;  %v6101_v0 = vadd.f32 %v6069_v12, %v11501_v59  ;;  %v6071_v18 = vmul.f32 0.044715, %v6039_v19  ;;  %v6073_v43 = vmul.f32 0.044715, %v6041_v38  ;;  %v5904_v50 = vpop.f32.mrb[134].mxu1  ;;  %v5977_v23 = vpop.f32.mrb[142].mxu0 }
0x1530   : > { %v6130_v4 = vmul.f32 0.7978846, %v6098_v27  ;;  %v6132_v52 = vmul.f32 0.7978846, %v6100_v47  ;;  %v6102_v58 = vadd.f32 %v6070_v34, %v11508_v48  ;;  %v6104_v10 = vadd.f32 %v6072_v22, %v11511_v32  ;;  %v5906_v14 = vpop.f32.mrb[135].mxu1  ;;  %v5979_v31 = vpop.f32.mrb[143].mxu0 }
0x1531   : > { %v6131_v40 = vmul.f32 0.7978846, %v6099_v57  ;;  %v6133_v41 = vmul.f32 0.7978846, %v6101_v0  ;;  %v6103_v63 = vadd.f32 %v6071_v18, %v11518_v8  ;;  %v6105_v60 = vadd.f32 %v6073_v43, %v11521_v53 }
0x1532   : > { %8847 = vtanh.f32 %v6130_v4  ;;  %v6134_v6 = vmul.f32 0.7978846, %v6102_v58  ;;  %v6136_v9 = vmul.f32 0.7978846, %v6104_v10  ;;  %v11548_v45 = vadd.f32 %v5900_v54, %v11479_v24 }
0x1533   : > { %8849 = vtanh.f32 %v6132_v52  ;;  %v6135_v25 = vmul.f32 0.7978846, %v6103_v63  ;;  %v6137_v16 = vmul.f32 0.7978846, %v6105_v60  ;;  %v11551_v30 = vadd.f32 %v5973_v3, %v11482_v46 }
0x1534   : > { %8851 = vtanh.f32 %v6131_v40  ;;  %v6010_v49 = vmul.f32 %v11548_v45, %v11548_v45  ;;  %v11556_v15 = vadd.f32 %v5902_v33, %v11485_v44  ;;  %v11559_v17 = vadd.f32 %v5975_v7, %v11489_v26 }
0x1535   : > { %8853 = vtanh.f32 %v6133_v41  ;;  %v6012_v20 = vmul.f32 %v11551_v30, %v11551_v30  ;;  %v11564_v55 = vadd.f32 %v5904_v50, %v11479_v24  ;;  %v11567_v2 = vadd.f32 %v5977_v23, %v11482_v46  ;;  %v11569_v13 = vpop.f32.mrb[136].mxu1  ;;  %v11571_v36 = vpop.f32.mrb[144].mxu0 }
0x1536   : > { %8855 = vtanh.f32 %v6134_v6  ;;  %v6042_v56 = vmul.f32 %v6010_v49, %v11548_v45  ;;  %v6011_v28 = vmul.f32 %v11556_v15, %v11556_v15  ;;  %v6013_v21 = vmul.f32 %v11559_v17, %v11559_v17  ;;  %v11578_v12 = vpop.f32.mrb[137].mxu1  ;;  %v11580_v19 = vpop.f32.mrb[145].mxu0 }
0x1537   : > { %8857 = vtanh.f32 %v6136_v9  ;;  %v6044_v38 = vmul.f32 %v6012_v20, %v11551_v30  ;;  %v6014_v54 = vmul.f32 %v11564_v55, %v11564_v55  ;;  %v6016_v3 = vmul.f32 %v11567_v2, %v11567_v2  ;;  %v11587_v27 = vpop.f32.mrb[138].mxu1  ;;  %v11589_v47 = vpop.f32.mrb[146].mxu0 }
0x1538   : > { %8859 = vtanh.f32 %v6135_v25  ;;  %v6074_v34 = vmul.f32 0.044715, %v6042_v56  ;;  %v6043_v22 = vmul.f32 %v6011_v28, %v11556_v15  ;;  %v6045_v33 = vmul.f32 %v6013_v21, %v11559_v17  ;;  %v11593_v7 = vpop.f32.mrb[139].mxu1  ;;  %v11595_v57 = vpop.f32.mrb[147].mxu0 }
0x1539   : > { %8861 = vtanh.f32 %v6137_v16  ;;  %v6076_v0 = vmul.f32 0.044715, %v6044_v38  ;;  %v6046_v18 = vmul.f32 %v6014_v54, %v11564_v55  ;;  %v6048_v43 = vmul.f32 %v6016_v3, %v11567_v2 }
0x153a   : > { %v6106_v50 = vadd.f32 %v6074_v34, %v11548_v45  ;;  %v6075_v23 = vmul.f32 0.044715, %v6043_v22  ;;  %v6077_v4 = vmul.f32 0.044715, %v6045_v33  ;;  %v11601_v52 = vadd.f32 %v5906_v14, %v11485_v44 }
0x153b   : > { %v6108_v58 = vadd.f32 %v6076_v0, %v11551_v30  ;;  %v6078_v10 = vmul.f32 0.044715, %v6046_v18  ;;  %v6080_v40 = vmul.f32 0.044715, %v6048_v43  ;;  %v11605_v41 = vadd.f32 %v5979_v31, %v11489_v26 }
0x153c   : > { %v8848_v63 = vpop.eup %8847  ;;  %v6138_v60 = vmul.f32 0.7978846, %v6106_v50  ;;  %v6107_v6 = vadd.f32 %v6075_v23, %v11556_v15  ;;  %v6109_v9 = vadd.f32 %v6077_v4, %v11559_v17  ;;  %v6015_v25 = vmul.f32 %v11601_v52, %v11601_v52 }
0x153d   : > { %v8850_v16 = vpop.eup %8849  ;;  %v6194_v49 = vadd.f32 1.0, %v8848_v63  ;;  %v6140_v14 = vmul.f32 0.7978846, %v6108_v58  ;;  %v6110_v20 = vadd.f32 %v6078_v10, %v11564_v55  ;;  %v6112_v56 = vadd.f32 %v6080_v40, %v11567_v2  ;;  %v11613_v28 = vpop.f32.mrb[140].mxu1 }
0x153e   : > { %v11615_v31 = vpop.f32.mrb[148].mxu0  ;;  %v11617_v21 = vpop.eup %8851  ;;  %v6196_v38 = vadd.f32 1.0, %v8850_v16  ;;  %8863 = vtanh.f32 %v6138_v60  ;;  %v6139_v54 = vmul.f32 0.7978846, %v6107_v6  ;;  %v6141_v3 = vmul.f32 0.7978846, %v6109_v9 }
0x153f   : > { %v11619_v34 = vpop.f32.mrb[141].mxu1  ;;  %v11621_v22 = vpop.eup %8853  ;;  %v6226_v33 = vmul.f32 0.5, %v6194_v49  ;;  %8865 = vtanh.f32 %v6140_v14  ;;  %v6142_v0 = vmul.f32 0.7978846, %v6110_v20  ;;  %v6144_v18 = vmul.f32 0.7978846, %v6112_v56 }
0x1540   : > { %v11623_v43 = vpop.f32.mrb[149].mxu0  ;;  %v8856_v50 = vpop.eup %8855  ;;  %v6228_v23 = vmul.f32 0.5, %v6196_v38  ;;  %8867 = vtanh.f32 %v6139_v54  ;;  %v6047_v4 = vmul.f32 %v6015_v25, %v11601_v52  ;;  %v6017_v58 = vmul.f32 %v11605_v41, %v11605_v41 }
0x1541   : > { %v11628_v10 = vpop.f32.mrb[142].mxu1  ;;  %v11630_v40 = vpop.f32.mrb[150].mxu0  ;;  %v11633_v60 = vmul.f32 %v6226_v33, %v11492_v62  ;;  %v6198_v6 = vadd.f32 1.0, %v8856_v50  ;;  %8869 = vtanh.f32 %v6141_v3  ;;  %v11637_v9 = vadd.f32 %v11569_v13, %v11479_v24 }
0x1542   : > { %v8858_v63 = vpop.eup %8857  ;;  %v11639_v16 = vpop.f32.mrb[143].mxu1  ;;  %v11646_v14 = vmul.f32 %v6228_v23, %v11495_v61  ;;  %8871 = vtanh.f32 %v6142_v0  ;;  %v6079_v56 = vmul.f32 0.044715, %v6047_v4  ;;  %v6049_v54 = vmul.f32 %v6017_v58, %v11605_v41 }
0x1543   : > { %v11641_v25 = vpop.f32.mrb[151].mxu0  ;;  %v11643_v49 = vpop.eup %8859  ;;  %v6200_v20 = vadd.f32 1.0, %v8858_v63  ;;  %v6230_v38 = vmul.f32 0.5, %v6198_v6  ;;  %8873 = vtanh.f32 %v6144_v18  ;;  %v6018_v13 = vmul.f32 %v11637_v9, %v11637_v9 }
0x1544   : > { %v11648_v62 = vpop.eup %8861  ;;  %v6111_v33 = vadd.f32 %v6079_v56, %v11601_v52  ;;  %v11656_v50 = vadd.f32 %v11571_v36, %v11482_v46  ;;  %v11660_v61 = vadd.f32 %v11578_v12, %v11485_v44  ;;  %v6081_v18 = vmul.f32 0.044715, %v6049_v54 }
0x1545   : > { %v6232_v3 = vmul.f32 0.5, %v6200_v20  ;;  %v11663_v0 = vmul.f32 %v6230_v38, %v11508_v48  ;;  %v6050_v23 = vmul.f32 %v6018_v13, %v11637_v9  ;;  %v11668_v4 = vadd.f32 %v11580_v19, %v11489_v26 }
0x1546   : > { %v6143_v63 = vmul.f32 0.7978846, %v6111_v33  ;;  %v6020_v36 = vmul.f32 %v11656_v50, %v11656_v50  ;;  %v6019_v12 = vmul.f32 %v11660_v61, %v11660_v61  ;;  %v6113_v6 = vadd.f32 %v6081_v18, %v11605_v41 }
0x1547   : > { %v11671_v58 = vmul.f32 %v6232_v3, %v11511_v32  ;;  %v6082_v20 = vmul.f32 0.044715, %v6050_v23  ;;  %v6021_v19 = vmul.f32 %v11668_v4, %v11668_v4  ;;  %v11694_v23 = vadd.f32 %v11587_v27, %v11479_v24 }
0x1548   : > { %v11682_v56 = vpop.eup %8863  ;;  %8875 = vtanh.f32 %v6143_v63  ;;  %v6052_v38 = vmul.f32 %v6020_v36, %v11656_v50  ;;  %v6051_v54 = vmul.f32 %v6019_v12, %v11660_v61  ;;  %v6145_v3 = vmul.f32 0.7978846, %v6113_v6 }
0x1549   : > { %v11688_v13 = vpop.eup %8865  ;;  %v6114_v33 = vadd.f32 %v6082_v20, %v11637_v9  ;;  %v6053_v18 = vmul.f32 %v6021_v19, %v11668_v4  ;;  %v11700_v63 = vadd.f32 %v11589_v47, %v11482_v46  ;;  %v11704_v36 = vadd.f32 %v11593_v7, %v11485_v44 }
0x154a   : > { %v11696_v48 = vpop.eup %8867  ;;  %v6084_v37 = vmul.f32 0.044715, %v6052_v38  ;;  %v6083_v32 = vmul.f32 0.044715, %v6051_v54  ;;  %8877 = vtanh.f32 %v6145_v3  ;;  %v6022_v27 = vmul.f32 %v11694_v23, %v11694_v23 }
0x154b   : > { %v11706_v12 = vpop.eup %8869  ;;  %v6146_v6 = vmul.f32 0.7978846, %v6114_v33  ;;  %v6085_v20 = vmul.f32 0.044715, %v6053_v18  ;;  %v6024_v47 = vmul.f32 %v11700_v63, %v11700_v63  ;;  %v6023_v7 = vmul.f32 %v11704_v36, %v11704_v36 }
0x154c   : > { %v11710_v19 = vpop.eup %8871  ;;  %v6116_v38 = vadd.f32 %v6084_v37, %v11656_v50  ;;  %v6115_v54 = vadd.f32 %v6083_v32, %v11660_v61  ;;  %v6054_v33 = vmul.f32 %v6022_v27, %v11694_v23  ;;  %v11724_v18 = vadd.f32 %v11595_v57, %v11489_v26 }
0x154d   : > { %v11718_v1 = vpop.eup %8873  ;;  %8879 = vtanh.f32 %v6146_v6  ;;  %v6117_v3 = vadd.f32 %v6085_v20, %v11668_v4  ;;  %v6056_v32 = vmul.f32 %v6024_v47, %v11700_v63  ;;  %v6055_v42 = vmul.f32 %v6023_v7, %v11704_v36 }
0x154e   : > { %v6148_v37 = vmul.f32 0.7978846, %v6116_v38  ;;  %v6147_v5 = vmul.f32 0.7978846, %v6115_v54  ;;  %v6086_v35 = vmul.f32 0.044715, %v6054_v33  ;;  %v6025_v39 = vmul.f32 %v11724_v18, %v11724_v18 }
0x154f   : > { %v6149_v11 = vmul.f32 0.7978846, %v6117_v3  ;;  %v11732_v6 = vadd.f32 %v11613_v28, %v11479_v24  ;;  %v6088_v20 = vmul.f32 0.044715, %v6056_v32  ;;  %v6087_v27 = vmul.f32 0.044715, %v6055_v42 }
0x1550   : > { %8881 = vtanh.f32 %v6148_v37  ;;  %v11736_v57 = vadd.f32 %v11615_v31, %v11482_v46  ;;  %v6118_v38 = vadd.f32 %v6086_v35, %v11694_v23  ;;  %v6057_v54 = vmul.f32 %v6025_v39, %v11724_v18 }
0x1551   : > { %12119 = vst [vmem:[#allocation14_spill] sm:$0xff] %v11732_v6  ;;  %8883 = vtanh.f32 %v6147_v5  ;;  %v6026_v47 = vmul.f32 %v11732_v6, %v11732_v6  ;;  %v6120_v28 = vadd.f32 %v6088_v20, %v11700_v63  ;;  %v6119_v3 = vadd.f32 %v6087_v27, %v11704_v36 }
0x1552   : > { %12120 = vst [vmem:[#allocation15_spill] sm:$0xff] %v11736_v57  ;;  %v11742_v7 = vpop.eup %8875  ;;  %8885 = vtanh.f32 %v6149_v11  ;;  %v6028_v42 = vmul.f32 %v11736_v57, %v11736_v57  ;;  %v6150_v31 = vmul.f32 0.7978846, %v6118_v38  ;;  %v6089_v33 = vmul.f32 0.044715, %v6057_v54 }
0x1553   : > { %v6058_v5 = vmul.f32 %v6026_v47, %v11732_v6  ;;  %v11751_v39 = vadd.f32 %v11619_v34, %v11485_v44  ;;  %v6152_v35 = vmul.f32 0.7978846, %v6120_v28  ;;  %v6151_v37 = vmul.f32 0.7978846, %v6119_v3 }
0x1554   : > { %v6060_v32 = vmul.f32 %v6028_v42, %v11736_v57  ;;  %v11756_v11 = vadd.f32 %v11623_v43, %v11489_v26  ;;  %v11758_v20 = vpop.eup %8877  ;;  %8887 = vtanh.f32 %v6150_v31  ;;  %v6121_v27 = vadd.f32 %v6089_v33, %v11724_v18 }
0x1555   : > { %v6090_v38 = vmul.f32 0.044715, %v6058_v5  ;;  %v6027_v54 = vmul.f32 %v11751_v39, %v11751_v39  ;;  %8889 = vtanh.f32 %v6152_v35  ;;  %v11767_v28 = vadd.f32 %v11628_v10, %v11479_v24 }
0x1556   : > { %v6092_v34 = vmul.f32 0.044715, %v6060_v32  ;;  %v6029_v47 = vmul.f32 %v11756_v11, %v11756_v11  ;;  %8891 = vtanh.f32 %v6151_v37  ;;  %v6153_v3 = vmul.f32 0.7978846, %v6121_v27 }
0x1557   : > { %12121 = vst [vmem:[#allocation17_spill] sm:$0xff] %v11767_v28  ;;  %v11769_v43 = vpop.eup %8879  ;;  %v6122_v42 = vadd.f32 %v6090_v38, %v11732_v6  ;;  %v6059_v31 = vmul.f32 %v6027_v54, %v11751_v39  ;;  %v6030_v35 = vmul.f32 %v11767_v28, %v11767_v28  ;;  %v11779_v32 = vadd.f32 %v11630_v40, %v11482_v46 }
0x1558   : > { %v6124_v33 = vadd.f32 %v6092_v34, %v11736_v57  ;;  %v6061_v5 = vmul.f32 %v6029_v47, %v11756_v11  ;;  %8893 = vtanh.f32 %v6153_v3  ;;  %v11783_v37 = vadd.f32 %v11639_v16, %v11485_v44 }
0x1559   : > { %v6154_v24 = vmul.f32 0.7978846, %v6122_v42  ;;  %v6091_v10 = vmul.f32 0.044715, %v6059_v31  ;;  %v6062_v34 = vmul.f32 %v6030_v35, %v11767_v28  ;;  %v6032_v47 = vmul.f32 %v11779_v32, %v11779_v32 }
0x155a   : > { %v11785_v27 = vpop.eup %8881  ;;  %v6156_v38 = vmul.f32 0.7978846, %v6124_v33  ;;  %v6093_v54 = vmul.f32 0.044715, %v6061_v5  ;;  %v6031_v40 = vmul.f32 %v11783_v37, %v11783_v37  ;;  %v11797_v44 = vadd.f32 %v11641_v25, %v11489_v26 }
0x155b   : > { %v11790_v29 = vpop.eup %8883  ;;  %8895 = vtanh.f32 %v6154_v24  ;;  %v6123_v46 = vadd.f32 %v6091_v10, %v11751_v39  ;;  %v6094_v42 = vmul.f32 0.044715, %v6062_v34  ;;  %v6064_v31 = vmul.f32 %v6032_v47, %v11779_v32 }
0x155c   : > { %v11799_v16 = vpop.eup %8885  ;;  %8897 = vtanh.f32 %v6156_v38  ;;  %v6125_v3 = vadd.f32 %v6093_v54, %v11756_v11  ;;  %v6063_v5 = vmul.f32 %v6031_v40, %v11783_v37  ;;  %v6033_v35 = vmul.f32 %v11797_v44, %v11797_v44 }
0x155d   : > { %v6155_v33 = vmul.f32 0.7978846, %v6123_v46  ;;  %v6195_v24 = vadd.f32 1.0, %v11617_v21  ;;  %v6126_v26 = vadd.f32 %v6094_v42, %v11767_v28  ;;  %v6096_v25 = vmul.f32 0.044715, %v6064_v31 }
0x155e   : > { %v6157_v10 = vmul.f32 0.7978846, %v6125_v3  ;;  %v6199_v57 = vadd.f32 1.0, %v11643_v49  ;;  %v11809_v38 = vpop.eup %8887  ;;  %v6095_v54 = vmul.f32 0.044715, %v6063_v5  ;;  %v6065_v34 = vmul.f32 %v6033_v35, %v11797_v44 }
0x155f   : > { %8899 = vtanh.f32 %v6155_v33  ;;  %v6227_v47 = vmul.f32 0.5, %v6195_v24  ;;  %v11812_v46 = vpop.eup %8889  ;;  %v6158_v40 = vmul.f32 0.7978846, %v6126_v26  ;;  %v6128_v6 = vadd.f32 %v6096_v25, %v11779_v32 }
0x1560   : > { %8901 = vtanh.f32 %v6157_v10  ;;  %v6231_v21 = vmul.f32 0.5, %v6199_v57  ;;  %v8892_v3 = vpop.eup %8891  ;;  %v6127_v42 = vadd.f32 %v6095_v54, %v11783_v37  ;;  %v6097_v31 = vmul.f32 0.044715, %v6065_v34 }
0x1561   : > { %v6259_v49 = vmul.f32 %v6227_v47, %v11498_v51  ;;  %v6197_v28 = vadd.f32 1.0, %v11621_v22  ;;  %8903 = vtanh.f32 %v6158_v40  ;;  %v6160_v33 = vmul.f32 0.7978846, %v6128_v6 }
0x1562   : > { %v6263_v5 = vmul.f32 %v6231_v21, %v11518_v8  ;;  %v6201_v35 = vadd.f32 1.0, %v11648_v62  ;;  %v8894_v24 = vpop.eup %8893  ;;  %v6159_v10 = vmul.f32 0.7978846, %v6127_v42  ;;  %v6129_v26 = vadd.f32 %v6097_v31, %v11797_v44 }
0x1563   : > { %v6229_v25 = vmul.f32 0.5, %v6197_v28  ;;  %v6203_v57 = vadd.f32 1.0, %v11696_v48  ;;  %8905 = vtanh.f32 %v6160_v33  ;;  %v6207_v51 = vadd.f32 1.0, %v11742_v7 }
0x1564   : > { %v6356_v54 = vpack.c.bf16 %v6263_v5, %v6259_v49  ;;  %v6233_v34 = vmul.f32 0.5, %v6201_v35  ;;  %8907 = vtanh.f32 %v6159_v10  ;;  %v6161_v22 = vmul.f32 0.7978846, %v6129_v26 }
0x1565   : > { %v11823_v47 = vpop.eup %8895  ;;  %v6261_v8 = vmul.f32 %v6229_v25, %v11501_v59  ;;  %v6235_v6 = vmul.f32 0.5, %v6203_v57  ;;  %v6239_v28 = vmul.f32 0.5, %v6207_v51  ;;  %v6205_v48 = vadd.f32 1.0, %v11706_v12 }
0x1566   : > { %v11826_v62 = vpop.eup %8897  ;;  %6603 = vmatprep.mubr.bf16.mxu1 %v6356_v54  ;;  %v6265_v40 = vmul.f32 %v6233_v34, %v11521_v53  ;;  %v6209_v21 = vadd.f32 1.0, %v11758_v20  ;;  %8909 = vtanh.f32 %v6161_v22  ;;  %v12122_v7 = vpack.c.bf16 %v11663_v0, %v11633_v60 }
0x1567   : > { %v6267_v42 = vmul.f32 %v6235_v6, %v11556_v15  ;;  %v6202_v59 = vadd.f32 1.0, %v11682_v56  ;;  %v6206_v31 = vadd.f32 1.0, %v11710_v19  ;;  %v6271_v33 = vmul.f32 %v6239_v28, %v11601_v52 }
0x1568   : > { %6604 = vmatmul.mubr.bf16.vlgmr.msra.gmra.mrb[144].mxu1 %v12122_v7  ;;  %v6358_v49 = vpack.c.bf16 %v6265_v40, %v6261_v8  ;;  %v6237_v53 = vmul.f32 0.5, %v6205_v48  ;;  %v6241_v5 = vmul.f32 0.5, %v6209_v21  ;;  %v6204_v20 = vadd.f32 1.0, %v11688_v13 }
0x1569   : > { %v8900_v35 = vpop.eup %8899  ;;  %v6234_v12 = vmul.f32 0.5, %v6202_v59  ;;  %v6238_v10 = vmul.f32 0.5, %v6206_v31  ;;  %v6208_v26 = vadd.f32 1.0, %v11718_v1  ;;  %v6360_v0 = vpack.c.bf16 %v6271_v33, %v6267_v42 }
0x156a   : > { %v8902_v60 = vpop.eup %8901  ;;  %6668 = vmatprep.mubr.bf16.mxu0 %v6358_v49  ;;  %v6269_v15 = vmul.f32 %v6237_v53, %v11559_v17  ;;  %v6273_v56 = vmul.f32 %v6241_v5, %v11605_v41  ;;  %v6211_v19 = vadd.f32 1.0, %v11790_v29  ;;  %v12123_v52 = vpack.c.bf16 %v11671_v58, %v11646_v14 }
0x156b   : > { %v6266_v25 = vmul.f32 %v6234_v12, %v11548_v45  ;;  %v6270_v57 = vmul.f32 %v6238_v10, %v11564_v55  ;;  %v6236_v13 = vmul.f32 0.5, %v6204_v20  ;;  %v6240_v54 = vmul.f32 0.5, %v6208_v26  ;;  %v8904_v1 = vpop.eup %8903  ;;  %6611 = vmatprep.mubr.bf16.mxu1 %v6360_v0 }
0x156c   : > { %6669 = vmatmul.mubr.bf16.vlgmr.msra.gmra.mrb[152].mxu0 %v12123_v52  ;;  %v6362_v34 = vpack.c.bf16 %v6273_v56, %v6269_v15  ;;  %v6215_v51 = vadd.f32 1.0, %v8892_v3  ;;  %v6243_v22 = vmul.f32 0.5, %v6211_v19  ;;  %v6213_v17 = vadd.f32 1.0, %v11799_v16 }
0x156d   : > { %v6359_v41 = vpack.c.bf16 %v6270_v57, %v6266_v25  ;;  %v6268_v29 = vmul.f32 %v6236_v13, %v11551_v30  ;;  %v6272_v8 = vmul.f32 %v6240_v54, %v11567_v2  ;;  %v6217_v14 = vadd.f32 1.0, %v8894_v24  ;;  %v8906_v58 = vpop.eup %8905 }
0x156e   : > { %6676 = vmatprep.mubr.bf16.mxu0 %v6362_v34  ;;  %v6247_v45 = vmul.f32 0.5, %v6215_v51  ;;  %v6275_v55 = vmul.f32 %v6243_v22, %v11660_v61  ;;  %v6245_v6 = vmul.f32 0.5, %v6213_v17  ;;  %v6210_v40 = vadd.f32 1.0, %v11769_v43  ;;  %v8908_v28 = vpop.eup %8907  ;;  %v12126_v22 = vld [vmem:[#allocation15_spill] sm:$0xff] }
0x156f   : > { %v6361_v3 = vpack.c.bf16 %v6272_v8, %v6268_v29  ;;  %v6249_v48 = vmul.f32 0.5, %v6217_v14  ;;  %v6214_v16 = vadd.f32 1.0, %v11809_v38  ;;  %v6212_v21 = vadd.f32 1.0, %v11785_v27 }
0x1570   : > { %6612 = vmatmul.mubr.bf16.gmra.mrb[148].mxu1 %v6359_v41  ;;  %v6279_v30 = vmul.f32 %v6247_v45, %v11704_v36  ;;  %v6277_v2 = vmul.f32 %v6245_v6, %v11668_v4  ;;  %v6242_v24 = vmul.f32 0.5, %v6210_v40  ;;  %v6216_v7 = vadd.f32 1.0, %v11812_v46  ;;  %v8910_v42 = vpop.eup %8909 }
0x1571   : > { %v6281_v61 = vmul.f32 %v6249_v48, %v11724_v18  ;;  %v6246_v59 = vmul.f32 0.5, %v6214_v16  ;;  %v6244_v43 = vmul.f32 0.5, %v6212_v21  ;;  %v6219_v31 = vadd.f32 1.0, %v8900_v35 }
0x1572   : > { %v6364_v49 = vpack.c.bf16 %v6279_v30, %v6275_v55  ;;  %v6274_v33 = vmul.f32 %v6242_v24, %v11637_v9  ;;  %v6248_v53 = vmul.f32 0.5, %v6216_v7  ;;  %v6223_v38 = vadd.f32 1.0, %v8908_v28 }
0x1573   : > { %v6366_v27 = vpack.c.bf16 %v6281_v61, %v6277_v2  ;;  %v6278_v36 = vmul.f32 %v6246_v59, %v11694_v23  ;;  %v6276_v4 = vmul.f32 %v6244_v43, %v11656_v50  ;;  %v6251_v5 = vmul.f32 0.5, %v6219_v31  ;;  %v12127_v61 = vld [vmem:[#allocation16_spill] sm:$0xff] }
0x1574   : > { %6677 = vmatmul.mubr.bf16.gmra.mrb[156].mxu0 %v6361_v3  ;;  %6619 = vmatprep.mubr.bf16.mxu1 %v6364_v49  ;;  %v6280_v46 = vmul.f32 %v6248_v53, %v11700_v63  ;;  %v6255_v12 = vmul.f32 0.5, %v6223_v38  ;;  %v6221_v18 = vadd.f32 1.0, %v8902_v60  ;;  %v6225_v10 = vadd.f32 1.0, %v8910_v42  ;;  %v12128_v53 = vld [vmem:[#allocation10_spill] sm:$0xff] }
0x1575   : > { %6684 = vmatprep.mubr.bf16.mxu0 %v6366_v27  ;;  %v6363_v35 = vpack.c.bf16 %v6278_v36, %v6274_v33  ;;  %v6283_v20 = vmul.f32 %v6251_v5, %v11751_v39  ;;  %v6218_v9 = vadd.f32 1.0, %v11823_v47  ;;  %v6222_v26 = vadd.f32 1.0, %v8904_v1  ;;  %v12124_v39 = vld [vmem:[#allocation14_spill] sm:$0xff]  ;;  %v12125_v47 = vld [vmem:[#allocation17_spill] sm:$0xff] }
0x1576   : > { %v6365_v0 = vpack.c.bf16 %v6280_v46, %v6276_v4  ;;  %v6287_v15 = vmul.f32 %v6255_v12, %v11783_v37  ;;  %v6253_v23 = vmul.f32 0.5, %v6221_v18  ;;  %v6257_v56 = vmul.f32 0.5, %v6225_v10 }
0x1577   : > { %v6250_v50 = vmul.f32 0.5, %v6218_v9  ;;  %v6254_v19 = vmul.f32 0.5, %v6222_v26  ;;  %v6220_v63 = vadd.f32 1.0, %v11826_v62  ;;  %v6224_v52 = vadd.f32 1.0, %v8906_v58 }
0x1578   : > { %6620 = vmatmul.mubr.bf16.gmra.mrb[152].mxu1 %v6363_v35  ;;  %v6368_v60 = vpack.c.bf16 %v6287_v15, %v6283_v20  ;;  %v6285_v25 = vmul.f32 %v6253_v23, %v11756_v11  ;;  %v6289_v57 = vmul.f32 %v6257_v56, %v11797_v44  ;;  %v11876_v44 = vld [vmem:[%s11993_s14 + $0x1] ss:$0 sm:$0xff] }
0x1579   : > { %v6282_v13 = vmul.f32 %v6250_v50, %v12124_v39  ;;  %v6286_v54 = vmul.f32 %v6254_v19, %v12125_v47  ;;  %v6252_v1 = vmul.f32 0.5, %v6220_v63  ;;  %v6256_v34 = vmul.f32 0.5, %v6224_v52  ;;  %v12130_v63 = vld [vmem:[#allocation13_spill] sm:$0xff] }
0x157a   : > { %6627 = vmatprep.mubr.bf16.mxu1 %v6368_v60  ;;  %v6370_v37 = vpack.c.bf16 %v6289_v57, %v6285_v25 }
0x157b   : > { %v6367_v51 = vpack.c.bf16 %v6286_v54, %v6282_v13  ;;  %v6284_v17 = vmul.f32 %v6252_v1, %v12126_v22  ;;  %v6288_v62 = vmul.f32 %v6256_v34, %v11779_v32  ;;  %v12131_v22 = vld [vmem:[#allocation12_spill] sm:$0xff] }
0x157c   : > { %6685 = vmatmul.mubr.bf16.gmra.mrb[160].mxu0 %v6365_v0  ;;  %v12129_v0 = vld [vmem:[#allocation11_spill] sm:$0xff] }
0x157d   : > { %6692 = vmatprep.mubr.bf16.mxu0 %v6370_v37  ;;  %v6369_v41 = vpack.c.bf16 %v6288_v62, %v6284_v17 }
0x1580   : > { %6628 = vmatmul.mubr.bf16.gmra.mrb[156].mxu1 %v6367_v51 }
0x1584   : > { %6693 = vmatmul.mubr.bf16.gmra.mrb[164].mxu0 %v6369_v41 }
0x163b   : > { %v7750_v11 = vpop.f32.mrb[144].mxu1 }
0x163c   : > { %v7751_v29 = vpop.f32.mrb[145].mxu1 }
0x163d   : > { %v7752_v8 = vadd.f32 %v7751_v29, %v7750_v11  ;;  %v7753_v14 = vpop.f32.mrb[146].mxu1 }
0x163e   : > { %v7754_v58 = vpop.f32.mrb[147].mxu1 }
0x163f   : > { %v7790_v45 = vpop.f32.mrb[152].mxu0  ;;  %v6606_v55 = vadd.f32 %v7752_v8, %v11876_v44  ;;  %v7755_v6 = vadd.f32 %v7754_v58, %v7753_v14  ;;  %v12132_v14 = vld [vmem:[#allocation3_spill] sm:$0xff] }
0x1640   : > { %v7791_v40 = vpop.f32.mrb[153].mxu0 }
0x1641   : > { %v7792_v32 = vadd.f32 %v7791_v40, %v7790_v45  ;;  %v7793_v28 = vpop.f32.mrb[154].mxu0  ;;  %v6609_v3 = vadd.f32 %v7755_v6, %v11876_v44 }
0x1642   : > { %v7794_v48 = vpop.f32.mrb[155].mxu0 }
0x1643   : > { %v6671_v16 = vadd.f32 %v7792_v32, %v6606_v55  ;;  %v7795_v21 = vadd.f32 %v7794_v48, %v7793_v28  ;;  %v7756_v30 = vpop.f32.mrb[148].mxu1 }
0x1644   : > { %v7757_v2 = vpop.f32.mrb[149].mxu1 }
0x1645   : > { %v6674_v24 = vadd.f32 %v7795_v21, %v6609_v3  ;;  %v7758_v7 = vadd.f32 %v7757_v2, %v7756_v30  ;;  %v7759_v42 = vpop.f32.mrb[150].mxu1  ;;  %v11881_v59 = vadd.f32 %v6671_v16, %v12127_v61  ;;  %v12133_v16 = vld [vmem:[#allocation4_spill] sm:$0xff]  ;;  %v12134_v30 = vld [vmem:[#allocation5_spill] sm:$0xff] }
0x1646   : > { %v7760_v43 = vpop.f32.mrb[151].mxu1 }
0x1647   : > { %v7796_v31 = vpop.f32.mrb[156].mxu0  ;;  %v6614_v49 = vadd.f32 %v7758_v7, %v11876_v44  ;;  %6711 = vadd.xlane.f32.xlu1 %v11881_v59  ;;  %v7761_v33 = vadd.f32 %v7760_v43, %v7759_v42  ;;  %v6702_v38 = vadd.f32 %v6674_v24, %v12128_v53 }
0x1648   : > { %v7797_v27 = vpop.f32.mrb[157].mxu0 }
0x1649   : > { %v7798_v36 = vadd.f32 %v7797_v27, %v7796_v31  ;;  %v7799_v4 = vpop.f32.mrb[158].mxu0  ;;  %v6617_v5 = vadd.f32 %v7761_v33, %v11876_v44  ;;  %6713 = vadd.xlane.f32.xlu0 %v6702_v38 }
0x164a   : > { %v7800_v46 = vpop.f32.mrb[159].mxu0 }
0x164b   : > { %v6679_v12 = vadd.f32 %v7798_v36, %v6614_v49  ;;  %v7801_v18 = vadd.f32 %v7800_v46, %v7799_v4  ;;  %v7762_v10 = vpop.f32.mrb[152].mxu1 }
0x164c   : > { %v7763_v35 = vpop.f32.mrb[153].mxu1 }
0x164d   : > { %v6682_v20 = vadd.f32 %v7801_v18, %v6617_v5  ;;  %v7764_v9 = vadd.f32 %v7763_v35, %v7762_v10  ;;  %v7765_v26 = vpop.f32.mrb[154].mxu1  ;;  %v6703_v15 = vadd.f32 %v6679_v12, %v12129_v0 }
0x164e   : > { %v7766_v23 = vpop.f32.mrb[155].mxu1 }
0x164f   : > { %v7802_v56 = vpop.f32.mrb[160].mxu0  ;;  %v6622_v50 = vadd.f32 %v7764_v9, %v11876_v44  ;;  %6715 = vadd.xlane.f32.xlu1 %v6703_v15  ;;  %v7767_v19 = vadd.f32 %v7766_v23, %v7765_v26  ;;  %v6704_v52 = vadd.f32 %v6682_v20, %v12130_v63  ;;  %v8456_v63 = vld [vmem:[%s11996_s17 + $0x8] sm:$0xff]  }
0x1650   : > { %v7803_v60 = vpop.f32.mrb[161].mxu0 }
0x1651   : > { %v7804_v25 = vadd.f32 %v7803_v60, %v7802_v56  ;;  %v7805_v57 = vpop.f32.mrb[162].mxu0  ;;  %v6625_v39 = vadd.f32 %v7767_v19, %v11876_v44  ;;  %6717 = vadd.xlane.f32.xlu0 %v6704_v52 }
0x1652   : > { %v7806_v13 = vpop.f32.mrb[163].mxu0 }
0x1653   : > { %v6687_v47 = vadd.f32 %v7804_v25, %v6622_v50  ;;  %v7807_v54 = vadd.f32 %v7806_v13, %v7805_v57  ;;  %v7768_v1 = vpop.f32.mrb[156].mxu1  ;;  %v8457_v57 = vld [vmem:[%s11996_s17 + $0x10] sm:$0xff]   ;;  %v8459_v13 = vld [vmem:[%s11996_s17 + $0x20] sm:$0xff]  }
0x1654   : > { %v7769_v34 = vpop.f32.mrb[157].mxu1 }
0x1655   : > { %v6690_v37 = vadd.f32 %v7807_v54, %v6625_v39  ;;  %v7770_v51 = vadd.f32 %v7769_v34, %v7768_v1  ;;  %v6705_v17 = vadd.f32 %v6687_v47, %v12131_v22  ;;  %v7771_v62 = vpop.f32.mrb[158].mxu1  ;;  %v8458_v39 = vld [vmem:[%s11996_s17 + $0x18] sm:$0xff]   ;;  %v8460_v47 = vld [vmem:[%s11996_s17 + $0x28] sm:$0xff]   ;;  %v8461_v54 = vld [vmem:[%s11996_s17 + $0x30] sm:$0xff]  }
0x1656   : > { %v7772_v41 = vpop.f32.mrb[159].mxu1  ;;  %v8462_v1 = vld [vmem:[%s11996_s17 + $0x38] sm:$0xff]  }
0x1657   : > { %v7808_v11 = vpop.f32.mrb[164].mxu0  ;;  %v6630_v29 = vadd.f32 %v7770_v51, %v11876_v44  ;;  %6719 = vadd.xlane.f32.xlu1 %v6705_v17  ;;  %v7773_v8 = vadd.f32 %v7772_v41, %v7771_v62  ;;  %v6706_v58 = vadd.f32 %v6690_v37, %v12132_v14 }
0x1658   : > { %v7809_v45 = vpop.f32.mrb[165].mxu0 }
0x1659   : > { %v7810_v55 = vadd.f32 %v7809_v45, %v7808_v11  ;;  %v7811_v6 = vpop.f32.mrb[166].mxu0  ;;  %v6633_v40 = vadd.f32 %v7773_v8, %v11876_v44  ;;  %6721 = vadd.xlane.f32.xlu0 %v6706_v58 }
0x165a   : > { %v7812_v32 = vpop.f32.mrb[167].mxu0 }
0x165b   : > { %v6695_v28 = vadd.f32 %v7810_v55, %v6630_v29  ;;  %v7813_v3 = vadd.f32 %v7812_v32, %v7811_v6  ;;  %v7469_v55 = vld [vmem:[%s11994_s15] ss:$0 sm:$0xff] }
0x165d   : > { %v6698_v48 = vadd.f32 %v7813_v3, %v6633_v40  ;;  %v6707_v21 = vadd.f32 %v6695_v28, %v12133_v16 }
0x165f   : > { %6723 = vadd.xlane.f32.xlu1 %v6707_v21  ;;  %v6708_v2 = vadd.f32 %v6698_v48, %v12134_v30 }
0x1661   : > { %6725 = vadd.xlane.f32.xlu0 %v6708_v2 }
0x16d4   : > { %v6712_v24 = vpop.xlane.xlu1 %6711 }
0x16d5   : > { %v6727_v7 = vmul.f32 0.0078125, %v6712_v24 }
0x16d6   : > { %v6714_v42 = vpop.xlane.xlu0 %6713 }
0x16d7   : > { %v11898_v61 = vsub.f32 %v11881_v59, %v6727_v7  ;;  %v6728_v43 = vmul.f32 0.0078125, %v6714_v42 }
0x16d9   : > { %v11900_v31 = vsub.f32 %v6702_v38, %v6728_v43  ;;  %v6743_v44 = vmul.f32 %v11898_v61, %v11898_v61 }
0x16db   : > { %6751 = vadd.xlane.f32.xlu1 %v6743_v44  ;;  %v6744_v49 = vmul.f32 %v11900_v31, %v11900_v31 }
0x16dc   : > { %v6716_v33 = vpop.xlane.xlu1 %6715 }
0x16dd   : > { %v6729_v53 = vmul.f32 0.0078125, %v6716_v33  ;;  %6753 = vadd.xlane.f32.xlu0 %v6744_v49 }
0x16de   : > { %v6718_v27 = vpop.xlane.xlu0 %6717 }
0x16df   : > { %v11906_v36 = vsub.f32 %v6703_v15, %v6729_v53  ;;  %v6730_v4 = vmul.f32 0.0078125, %v6718_v27  ;;  %v8455_v15 = vld [vmem:[%s11996_s17] sm:$0xff]  }
0x16e0   : > { %8170 = vmatprep.subr.bf16.mxu1 %v8455_v15 }
0x16e1   : > { %v11908_v5 = vsub.f32 %v6704_v52, %v6730_v4  ;;  %v6745_v59 = vmul.f32 %v11906_v36, %v11906_v36  ;;  %8171 = vmatpush3.bf16.msra.mxu1 %v8455_v15 }
0x16e2   : > { %8172 = vmatprep.subr.bf16.mxu1 %v8456_v63 }
0x16e3   : > { %6755 = vadd.xlane.f32.xlu1 %v6745_v59  ;;  %v6746_v38 = vmul.f32 %v11908_v5, %v11908_v5 }
0x16e4   : > { %v6720_v46 = vpop.xlane.xlu1 %6719 }
0x16e5   : > { %v6731_v12 = vmul.f32 0.0078125, %v6720_v46  ;;  %6757 = vadd.xlane.f32.xlu0 %v6746_v38  ;;  %8173 = vmatpush3.bf16.msra.mxu1 %v8456_v63 }
0x16e6   : > { %v6722_v18 = vpop.xlane.xlu0 %6721  ;;  %8174 = vmatprep.subr.bf16.mxu1 %v8457_v57 }
0x16e7   : > { %v11914_v10 = vsub.f32 %v6705_v17, %v6731_v12  ;;  %v6732_v35 = vmul.f32 0.0078125, %v6722_v18 }
0x16e9   : > { %v11916_v20 = vsub.f32 %v6706_v58, %v6732_v35  ;;  %v6747_v9 = vmul.f32 %v11914_v10, %v11914_v10  ;;  %8175 = vmatpush3.bf16.msra.mxu1 %v8457_v57 }
0x16ea   : > { %8176 = vmatprep.subr.bf16.mxu1 %v8458_v39 }
0x16eb   : > { %6759 = vadd.xlane.f32.xlu1 %v6747_v9  ;;  %v6748_v26 = vmul.f32 %v11916_v20, %v11916_v20 }
0x16ec   : > { %v6724_v0 = vpop.xlane.xlu1 %6723 }
0x16ed   : > { %v6733_v23 = vmul.f32 0.0078125, %v6724_v0  ;;  %6761 = vadd.xlane.f32.xlu0 %v6748_v26  ;;  %8177 = vmatpush3.bf16.msra.mxu1 %v8458_v39 }
0x16ee   : > { %v6726_v56 = vpop.xlane.xlu0 %6725  ;;  %8178 = vmatprep.subr.bf16.mxu1 %v8459_v13 }
0x16ef   : > { %v11925_v50 = vsub.f32 %v6707_v21, %v6733_v23  ;;  %v6734_v19 = vmul.f32 0.0078125, %v6726_v56 }
0x16f1   : > { %v11930_v52 = vsub.f32 %v6708_v2, %v6734_v19  ;;  %v6749_v60 = vmul.f32 %v11925_v50, %v11925_v50  ;;  %8179 = vmatpush3.bf16.msra.mxu1 %v8459_v13  ;;  %v7470_v2 = vld [vmem:[%s11995_s16] ss:$0 sm:$0xff] }
0x16f2   : > { %8180 = vmatprep.subr.bf16.mxu1 %v8460_v47 }
0x16f3   : > { %6763 = vadd.xlane.f32.xlu1 %v6749_v60  ;;  %v6750_v25 = vmul.f32 %v11930_v52, %v11930_v52 }
0x16f5   : > { %6765 = vadd.xlane.f32.xlu0 %v6750_v25  ;;  %8181 = vmatpush3.bf16.msra.mxu1 %v8460_v47 }
0x16f6   : > { %8182 = vmatprep.subr.bf16.mxu1 %v8461_v54 }
0x16f9   : > { %8183 = vmatpush3.bf16.msra.mxu1 %v8461_v54 }
0x16fa   : > { %8184 = vmatprep.subr.bf16.mxu1 %v8462_v1 }
0x16fd   : > { %8185 = vmatpush3.bf16.msra.mxu1 %v8462_v1 }
0x1768   : > { %v6752_v34 = vpop.xlane.xlu1 %6751 }
0x1769   : > { %v6767_v37 = vmul.f32 0.0078125, %v6752_v34 }
0x176a   : > { %v6754_v51 = vpop.xlane.xlu0 %6753 }
0x176b   : > { %v6775_v22 = vadd.f32 1e-06, %v6767_v37  ;;  %v6768_v17 = vmul.f32 0.0078125, %v6754_v51 }
0x176d   : > { %8911 = vrsqrt.f32 %v6775_v22  ;;  %v6776_v62 = vadd.f32 1e-06, %v6768_v17 }
0x176f   : > { %8913 = vrsqrt.f32 %v6776_v62 }
0x1770   : > { %v6756_v41 = vpop.xlane.xlu1 %6755 }
0x1771   : > { %v6769_v11 = vmul.f32 0.0078125, %v6756_v41 }
0x1772   : > { %v6758_v29 = vpop.xlane.xlu0 %6757 }
0x1773   : > { %v6777_v8 = vadd.f32 1e-06, %v6769_v11  ;;  %v6770_v14 = vmul.f32 0.0078125, %v6758_v29 }
0x1775   : > { %8915 = vrsqrt.f32 %v6777_v8  ;;  %v6778_v58 = vadd.f32 1e-06, %v6770_v14 }
0x1777   : > { %v8912_v45 = vpop.eup %8911  ;;  %8917 = vrsqrt.f32 %v6778_v58 }
0x1778   : > { %v6760_v6 = vpop.xlane.xlu1 %6759  ;;  %v6791_v40 = vmul.f32 %v8912_v45, %v11898_v61 }
0x1779   : > { %v8914_v32 = vpop.eup %8913  ;;  %v6771_v28 = vmul.f32 0.0078125, %v6760_v6 }
0x177a   : > { %v6762_v3 = vpop.xlane.xlu0 %6761  ;;  %v6792_v48 = vmul.f32 %v8914_v32, %v11900_v31  ;;  %v6805_v16 = vmul.f32 %v7469_v55, %v6791_v40 }
0x177b   : > { %v6779_v21 = vadd.f32 1e-06, %v6771_v28  ;;  %v6772_v30 = vmul.f32 0.0078125, %v6762_v3 }
0x177c   : > { %v6806_v24 = vmul.f32 %v7469_v55, %v6792_v48  ;;  %v6819_v42 = vadd.f32 %v7470_v2, %v6805_v16 }
0x177d   : > { %8919 = vrsqrt.f32 %v6779_v21  ;;  %v6780_v7 = vadd.f32 1e-06, %v6772_v30 }
0x177e   : > { %v6820_v43 = vadd.f32 %v7470_v2, %v6806_v24 }
0x177f   : > { %v8916_v44 = vpop.eup %8915  ;;  %8921 = vrsqrt.f32 %v6780_v7 }
0x1780   : > { %v6793_v61 = vmul.f32 %v8916_v44, %v11906_v36  ;;  %v6764_v49 = vpop.xlane.xlu1 %6763  ;;  %v6843_v33 = vpack.c.bf16 %v6820_v43, %v6819_v42 }
0x1781   : > { %v8918_v53 = vpop.eup %8917  ;;  %v6773_v31 = vmul.f32 0.0078125, %v6764_v49 }
0x1782   : > { %v6807_v27 = vmul.f32 %v7469_v55, %v6793_v61  ;;  %v6794_v4 = vmul.f32 %v8918_v53, %v11908_v5  ;;  %v6766_v59 = vpop.xlane.xlu0 %6765  ;;  %8186 = vmatprep.mubr.bf16.mxu1 %v6843_v33 }
0x1783   : > { %v6781_v38 = vadd.f32 1e-06, %v6773_v31  ;;  %v6774_v46 = vmul.f32 0.0078125, %v6766_v59 }
0x1784   : > { %v6808_v12 = vmul.f32 %v7469_v55, %v6794_v4  ;;  %v6821_v35 = vadd.f32 %v7470_v2, %v6807_v27 }
0x1785   : > { %8923 = vrsqrt.f32 %v6781_v38  ;;  %v6782_v18 = vadd.f32 1e-06, %v6774_v46 }
0x1786   : > { %v6822_v9 = vadd.f32 %v7470_v2, %v6808_v12 }
0x1787   : > { %v8920_v26 = vpop.eup %8919  ;;  %8925 = vrsqrt.f32 %v6782_v18 }
0x1788   : > { %v6844_v0 = vpack.c.bf16 %v6822_v9, %v6821_v35  ;;  %v6795_v36 = vmul.f32 %v8920_v26, %v11914_v10 }
0x1789   : > { %v8922_v15 = vpop.eup %8921 }
0x178a   : > { %8187 = vmatmul.mubr.bf16.vlgmr.msra.gmra.mrb[160].mxu1 %v6844_v0  ;;  %v6796_v23 = vmul.f32 %v8922_v15, %v11916_v20  ;;  %v6809_v56 = vmul.f32 %v7469_v55, %v6795_v36  ;;  %v7471_v20 = vld [vmem:[%s11997_s18] ss:$0 sm:$0xff] }
0x178c   : > { %v6810_v5 = vmul.f32 %v7469_v55, %v6796_v23  ;;  %v6823_v19 = vadd.f32 %v7470_v2, %v6809_v56 }
0x178e   : > { %v6824_v63 = vadd.f32 %v7470_v2, %v6810_v5 }
0x178f   : > { %v8924_v60 = vpop.eup %8923 }
0x1790   : > { %v6845_v25 = vpack.c.bf16 %v6824_v63, %v6823_v19  ;;  %v6797_v57 = vmul.f32 %v8924_v60, %v11925_v50 }
0x1791   : > { %v8926_v39 = vpop.eup %8925 }
0x1792   : > { %8190 = vmatprep.mubr.bf16.mxu1 %v6845_v25  ;;  %v6798_v13 = vmul.f32 %v8926_v39, %v11930_v52  ;;  %v6811_v47 = vmul.f32 %v7469_v55, %v6797_v57 }
0x1794   : > { %v6812_v54 = vmul.f32 %v7469_v55, %v6798_v13  ;;  %v6825_v10 = vadd.f32 %v7470_v2, %v6811_v47 }
0x1796   : > { %v6826_v1 = vadd.f32 %v7470_v2, %v6812_v54 }
0x1798   : > { %v6846_v34 = vpack.c.bf16 %v6826_v1, %v6825_v10 }
0x179a   : > { %8191 = vmatmul.mubr.bf16.gmra.mrb[164].mxu1 %v6846_v34 }
0x185d   : > { %v8188_v50 = vpop.f32.mrb[160].mxu1 }
0x185e   : > { %v6945_v37 = vadd.f32 %v8188_v50, %v7471_v20  ;;  %v6936_v51 = vpop.f32.mrb[161].mxu1 }
0x185f   : > { %v6937_v22 = vadd.f32 %v7471_v20, %v6936_v51  ;;  %v8189_v52 = vpop.f32.mrb[162].mxu1 }
0x1860   : > { %6969 = vst [vmem:[%s604_s26 + $0x10] sm:$0xff] %v6945_v37  ;;  %v6948_v17 = vadd.f32 %v8189_v52, %v7471_v20  ;;  %v6939_v62 = vpop.f32.mrb[163].mxu1 }
0x1861   : > { %6967 = vst [vmem:[%s604_s26] sm:$0xff] %v6937_v22  ;;  %v6940_v41 = vadd.f32 %v7471_v20, %v6939_v62 }
0x1862   : > { %6970 = vst [vmem:[%s604_s26 + $0x18] sm:$0xff] %v6948_v17 }
0x1863   : > { %6968 = vst [vmem:[%s604_s26 + $0x8] sm:$0xff] %v6940_v41 }
0x186d   : > { %v8192_v11 = vpop.f32.mrb[164].mxu1 }
0x186e   : > { %v6961_v29 = vadd.f32 %v8192_v11, %v7471_v20  ;;  %v6952_v8 = vpop.f32.mrb[165].mxu1 }
0x186f   : > { %v6953_v14 = vadd.f32 %v7471_v20, %v6952_v8  ;;  %v8193_v58 = vpop.f32.mrb[166].mxu1 }
0x1870   : > { %6973 = vst [vmem:[%s604_s26 + $0x30] sm:$0xff] %v6961_v29  ;;  %v6964_v45 = vadd.f32 %v8193_v58, %v7471_v20  ;;  %v6955_v55 = vpop.f32.mrb[167].mxu1 }
0x1871   : > { %6971 = vst [vmem:[%s604_s26 + $0x20] sm:$0xff] %v6953_v14  ;;  %v6956_v6 = vadd.f32 %v7471_v20, %v6955_v55 }
0x1872   : > { %6974 = vst [vmem:[%s604_s26 + $0x38] sm:$0xff] %v6964_v45 }
0x1873   : > { %6972 = vst [vmem:[%s604_s26 + $0x28] sm:$0xff] %v6956_v6 }
0x1874 PF: > { %s29_s0 = sadd.s32 1, %s8933_s0  }
0x1875   : > { %p26_p4 = scmp.ge.s32.totalorder %s29_s0, 4  }
0x1877   :  { %28 = sbr.rel (!%p26_p4) target bundleno = 5 (0x5), region = 138 }

</bundles_post_ra>
